<compile_context>
chip_gen: v6e
topology: v6e:2x2x1
jax: 0.10.0
libtpu: 0.0.40
codegen_flags: <defaults>
</compile_context>

<pallas_src>
import functools

import jax
import jax.numpy as jnp
from jax import lax
from jax.experimental import pallas as pl
from jax.experimental.pallas import tpu as pltpu

_TOL = 1e-6          # relative tolerance (scaled by edge-norm products in-kernel)
_SUBLANE = 8
_LANE = 128
_TILE_P = 8          # sublane (smaller-set) tile == chunk height -> 1-vreg pair temps
_CHUNK_G = 128       # lane chunk width processed per inner-loop iteration
_MAX_TILE_G = 512    # lane BlockSpec tile, strip-mined in-kernel in _CHUNK_G chunks


# ----------------------------- kernel helpers ------------------------------
def _min4(v):
    return jnp.minimum(jnp.minimum(v[0], v[1]), jnp.minimum(v[2], v[3]))


def _max4(v):
    return jnp.maximum(jnp.maximum(v[0], v[1]), jnp.maximum(v[2], v[3]))


def _signed_area(xs, ys):
    s = jnp.float32(0.0)
    for k in range(4):
        k2 = (k + 1) % 4
        s = s + (xs[k] * ys[k2] - xs[k2] * ys[k])
    return 0.5 * s


def _edges(xs, ys):
    """Edge vectors and L1 norms of a quad given as 4 x-coord / 4 y-coord arrays."""
    dx = [xs[(k + 1) % 4] - xs[k] for k in range(4)]
    dy = [ys[(k + 1) % 4] - ys[k] for k in range(4)]
    nrm = [jnp.abs(dx[k]) + jnp.abs(dy[k]) for k in range(4)]
    return dx, dy, nrm


def _clip_dir_contrib(vx, vy, dxs, dys, dnrm,
                      cxs, cys, edxs, edys, etol,
                      csign, sgn_ab, dedupe_shared):
    """Sum over the 4 subject-quad edges of their shoelace contribution
    (x0*y1 - x1*y0) after clipping each edge against the convex clip quad.

    vx/vy: subject vertices; dxs/dys/dnrm: subject edge vectors / L1 norms.
    cxs/cys: clip vertices; edxs/edys: clip edge vectors;
    etol[l] = _TOL * |clip edge l|_1 (per clip line).
    csign: orientation sign of the clip quad; sgn_ab = sign(A)*sign(B).
    dedupe_shared: drop segments lying exactly on a clip edge with both quads
    on the same side, so a shared boundary is counted only once."""
    # CSE: signed distance (times csign and |clip edge|) of every subject
    # vertex to every clip line; f1 of subject edge k == f0 of edge k+1.
    F = [[csign * (edxs[l] * (vy[v] - cys[l]) - edys[l] * (vx[v] - cxs[l]))
          for l in range(4)] for v in range(4)]

    total = jnp.float32(0.0)
    for k in range(4):
        k2 = (k + 1) % 4
        t_lo = jnp.float32(0.0)          # 0-d scalars: no pair-shaped splats
        t_hi = jnp.float32(1.0)
        empty = jnp.zeros((), jnp.bool_)
        for l in range(4):
            f0 = F[k][l]
            f1 = F[k2][l]
            denom = f1 - f0
            tol = etol[l] * dnrm[k]                      # scale-aware tolerance
            is_par = jnp.abs(denom) <= tol
            t_c = (-f0) * pl.reciprocal(jnp.where(is_par, 1.0, denom),
                                        approx=True)     # EUP approx reciprocal
            t_lo = jnp.where((~is_par) & (denom > 0.0),
                             jnp.maximum(t_lo, t_c), t_lo)
            t_hi = jnp.where((~is_par) & (denom < 0.0),
                             jnp.minimum(t_hi, t_c), t_hi)
            empty = empty | (is_par & (f0 < -tol))
            if dedupe_shared:
                on_line = is_par & (jnp.abs(f0) <= tol)
                same_side = (edxs[l] * dxs[k] + edys[l] * dys[k]) * sgn_ab > 0.0
                empty = empty | (on_line & same_side)
        x0 = vx[k] + t_lo * dxs[k]
        y0 = vy[k] + t_lo * dys[k]
        x1 = vx[k] + t_hi * dxs[k]
        y1 = vy[k] + t_hi * dys[k]
        keep = (~empty) & (t_hi > t_lo)
        total = total + jnp.where(keep, x0 * y1 - x1 * y0, 0.0)
    return total


# --------------------------------- kernel -----------------------------------
def _skew_iou_kernel(sub_ref, lane_ref, out_ref, acc_ref, *, ns, nl, eps):
    # sub_ref:  (TILE_P, 8)       sublane-set polygons (x1,y1,...,x4,y4) in lanes
    # lane_ref: (8, tile_g)       lane-set polygons, coords in sublanes
    # out_ref:  (1, 1, 1)         per-(i, j) partial loss (both axes parallel)
    # acc_ref:  (TILE_P, CHUNK_G) elementwise VMEM accumulator (scratch)
    tile_p = sub_ref.shape[0]
    tile_g = lane_ref.shape[1]
    n_chunks = tile_g // _CHUNK_G

    acc_ref[...] = jnp.zeros_like(acc_ref)

    # ---- sublane-set geometry: chunk-invariant, hoisted out of the loop ----
    sub = sub_ref[...]                                     # (TILE_P, 8)
    px = [sub[:, 2 * k:2 * k + 1] for k in range(4)]       # (TILE_P, 1) each
    py = [sub[:, 2 * k + 1:2 * k + 2] for k in range(4)]
    pxmin, pxmax = _min4(px), _max4(px)
    pymin, pymax = _min4(py), _max4(py)
    sA = _signed_area(px, py)
    area_a = jnp.abs(sA)
    sgn_a = jnp.where(sA >= 0.0, 1.0, -1.0)
    pdx, pdy, pnrm = _edges(px, py)
    ptol = [_TOL * n for n in pnrm]
    row_ok = (jax.lax.broadcasted_iota(jnp.int32, (tile_p, 1), 0)
              + pl.program_id(0) * tile_p) < ns
    col_base = pl.program_id(1) * tile_g

    def chunk_body(c, carry):
        g0 = pl.multiple_of(c * _CHUNK_G, _CHUNK_G)
        lane = lane_ref[:, pl.ds(g0, _CHUNK_G)]            # (8, CHUNK_G)
        qx = [lane[2 * k:2 * k + 1, :] for k in range(4)]  # (1, CHUNK_G) each
        qy = [lane[2 * k + 1:2 * k + 2, :] for k in range(4)]

        col_ok = (jax.lax.broadcasted_iota(jnp.int32, (1, _CHUNK_G), 1)
                  + (col_base + g0)) < nl

        # mmdet-v1 bbox_overlaps gating ("+1" convention) on the HBBs.
        # h_iou > 0 <=> h_overlap > 0, so the HBB-IoU divide is dropped.
        qxmin, qxmax = _min4(qx), _max4(qx)
        qymin, qymax = _min4(qy), _max4(qy)
        iw = jnp.maximum(jnp.minimum(pxmax, qxmax)
                         - jnp.maximum(pxmin, qxmin) + 1.0, 0.0)
        ih = jnp.maximum(jnp.minimum(pymax, qymax)
                         - jnp.maximum(pymin, qymin) + 1.0, 0.0)
        pair_on = row_ok & col_ok & ((iw * ih) > 0.0)

        @pl.when(jnp.any(pair_on))     # early-out: skip clipper for dead chunks
        def _heavy():
            sB = _signed_area(qx, qy)
            area_b = jnp.abs(sB)
            sgn_b = jnp.where(sB >= 0.0, 1.0, -1.0)
            sgn_ab = sgn_a * sgn_b                          # pair-shaped, once
            qdx, qdy, qnrm = _edges(qx, qy)
            qtol = [_TOL * n for n in qnrm]

            # exact rotated-quad intersection (line-integral of both boundaries)
            acc_ab = _clip_dir_contrib(px, py, pdx, pdy, pnrm,
                                       qx, qy, qdx, qdy, qtol,
                                       sgn_b, sgn_ab, False)
            acc_ba = _clip_dir_contrib(qx, qy, qdx, qdy, qnrm,
                                       px, py, pdx, pdy, ptol,
                                       sgn_a, sgn_ab, True)
            inter = jnp.maximum(0.5 * (sgn_a * acc_ab + sgn_b * acc_ba), 0.0)
            # a zero-area (degenerate) quad cannot contribute intersection area
            inter = jnp.where((area_a > 0.0) & (area_b > 0.0), inter, 0.0)

            union = area_a + area_b - inter
            union_safe = jnp.where(union == 0.0, 1.0, union)
            poly_iou = jnp.where(union == 0.0, 1.0,
                                 inter * pl.reciprocal(union_safe, approx=False))
            overlap = jnp.maximum(poly_iou, eps)            # clamp like reference
            acc_ref[...] += jnp.where(pair_on, -jnp.log(overlap), 0.0)

        return carry

    lax.fori_loop(0, n_chunks, chunk_body, 0)
    out_ref[...] = jnp.reshape(jnp.sum(acc_ref[...]), out_ref.shape)


# ------------------------------ JAX glue ------------------------------------
def _rotbox2polys(boxes):
    """(N,5) (x_ctr,y_ctr,w,h,angle) -> (N,8) corner polygon (AerialDetection)."""
    boxes = boxes.astype(jnp.float32)
    cs = jnp.cos(boxes[:, 4])
    ss = jnp.sin(boxes[:, 4])
    w = boxes[:, 2] - 1.0
    h = boxes[:, 3] - 1.0
    xc = boxes[:, 0]
    yc = boxes[:, 1]
    x1 = xc + cs * (w / 2.0) - ss * (-h / 2.0)
    x2 = xc + cs * (w / 2.0) - ss * (h / 2.0)
    x3 = xc + cs * (-w / 2.0) - ss * (h / 2.0)
    x4 = xc + cs * (-w / 2.0) - ss * (-h / 2.0)
    y1 = yc + ss * (w / 2.0) + cs * (-h / 2.0)
    y2 = yc + ss * (w / 2.0) + cs * (h / 2.0)
    y3 = yc + ss * (-w / 2.0) + cs * (h / 2.0)
    y4 = yc + ss * (-w / 2.0) + cs * (-h / 2.0)
    return jnp.stack([x1, y1, x2, y2, x3, y3, x4, y4], axis=1)


def _round_up(x, m):
    return (x + m - 1) // m * m


def skew_iou_loss_pallas(pred, target, eps=1e-6):
    pred_poly = _rotbox2polys(pred)      # (NP, 8)
    gt_poly = _rotbox2polys(target)      # (NG, 8)

    # The summed pair loss is symmetric in (pred, gt); put the larger set on
    # the lane axis so lane padding to 128 is not wasted on a small set.
    if pred_poly.shape[0] >= gt_poly.shape[0]:
        lane_poly, sub_poly = pred_poly, gt_poly
    else:
        lane_poly, sub_poly = gt_poly, pred_poly

    ns, nl = sub_poly.shape[0], lane_poly.shape[0]
    tile_p = _TILE_P
    tile_g = min(_round_up(max(nl, 1), _CHUNK_G), _MAX_TILE_G)
    ns_pad = _round_up(max(ns, 1), tile_p)
    nl_pad = _round_up(max(nl, 1), tile_g)

    sub_p = jnp.zeros((ns_pad, 8), jnp.float32).at[:ns].set(sub_poly)
    lane_p = jnp.zeros((nl_pad, 8), jnp.float32).at[:nl].set(lane_poly)
    lane_t = lane_p.T                                         # (8, NL_pad)

    gi = ns_pad // tile_p
    gj = nl_pad // tile_g

    partials = pl.pallas_call(
        functools.partial(_skew_iou_kernel, ns=ns, nl=nl, eps=float(eps)),
        out_shape=jax.ShapeDtypeStruct((gi * gj, 1, 1), jnp.float32),
        grid=(gi, gj),
        in_specs=[
            pl.BlockSpec((tile_p, 8), lambda i, j: (i, 0)),
            pl.BlockSpec((8, tile_g), lambda i, j: (0, j)),
        ],
        out_specs=pl.BlockSpec((1, 1, 1), lambda i, j: (i * gj + j, 0, 0)),
        scratch_shapes=[pltpu.VMEM((tile_p, _CHUNK_G), jnp.float32)],
        compiler_params=pltpu.CompilerParams(
            dimension_semantics=("parallel", "parallel")),
    )(sub_p, lane_t)
    return jnp.sum(partials)


class SkewIoULoss:
    """JAX/Pallas equivalent of the PyTorch skew_IoULoss module (no params)."""

    def __init__(self, eps=1e-6, reduction="mean", loss_weight=1.0):
        self.eps = eps
        self.reduction = reduction
        self.loss_weight = loss_weight

    def __call__(self, pred, target, weight=None, avg_factor=None,
                 reduction_override=None):
        assert reduction_override in (None, "none", "mean", "sum")
        # The reference collapses to a 0-d scalar before reduction, so
        # mean / sum / none all return the same value (weight is None here).
        # TODO(synk): non-None `weight` / `avg_factor` are not supported.
        loss = self.loss_weight * skew_iou_loss_pallas(pred, target, eps=self.eps)
        return loss


if __name__ == "__main__":
    key = jax.random.PRNGKey(0)
    k_ctr, k_wh, k_ang, k_nc, k_nw, k_na = jax.random.split(key, 6)

    n = 8  # boxes per set
    ctr = jax.random.uniform(k_ctr, (n, 2), minval=20.0, maxval=80.0)
    wh = jax.random.uniform(k_wh, (n, 2), minval=8.0, maxval=24.0)
    ang = jax.random.uniform(k_ang, (n, 1), minval=-0.6, maxval=0.6)
    target = jnp.concatenate([ctr, wh, ang], axis=1).astype(jnp.float32)

    # predictions = perturbed targets, so many pairs genuinely overlap
    d_ctr = jax.random.uniform(k_nc, (n, 2), minval=-4.0, maxval=4.0)
    d_wh = jax.random.uniform(k_nw, (n, 2), minval=-2.0, maxval=2.0)
    d_ang = jax.random.uniform(k_na, (n, 1), minval=-0.2, maxval=0.2)
    pred = (target + jnp.concatenate([d_ctr, d_wh, d_ang], axis=1)).astype(jnp.float32)

    loss_mod = SkewIoULoss(eps=1e-6, reduction="mean", loss_weight=1.0)
    loss = loss_mod(pred, target)
    jax.block_until_ready(loss)
    print("KERNEL_OK")
</pallas_src>

<mosaic_0001>
module attributes {stable_mosaic.version = 11 : i64} {
  func.func @_skew_iou_kernel(%arg0: i32, %arg1: i32, %arg2: memref<8x8xf32, #tpu.memory_space<vmem>>, %arg3: memref<8x128xf32, #tpu.memory_space<vmem>>, %arg4: memref<1x1x1xf32, #tpu.memory_space<vmem>>, %arg5: memref<8x128xf32, #tpu.memory_space<vmem>>) attributes {dimension_semantics = [#tpu.dimension_semantics<parallel>, #tpu.dimension_semantics<parallel>], iteration_bounds = array<i64: 1, 1>, scalar_prefetch = 0 : i64, scratch_operands = 1 : i64, tpu.core_type = #tpu.core_type<tc>, window_params = [{transform_indices = @transform_0, window_bounds = array<i64: 8, 8>}, {transform_indices = @transform_1, window_bounds = array<i64: 8, 128>}, {transform_indices = @transform_2, window_bounds = array<i64: 1, 1, 1>}]} {
    %cst = arith.constant 0.000000e+00 : f32
    %0 = vector.broadcast %cst : f32 to vector<8x128xf32>
    %c0 = arith.constant 0 : index
    %c0_0 = arith.constant 0 : index
    %1 = vector.load %arg5[%c0, %c0_0] : memref<8x128xf32, #tpu.memory_space<vmem>>, vector<8x128xf32>
    tpu.vector_store %arg5[%c0, %c0_0], %0 {strides = array<i32>} : memref<8x128xf32, #tpu.memory_space<vmem>>, vector<8x128xf32>,
    %c0_1 = arith.constant 0 : index
    %c0_2 = arith.constant 0 : index
    %2 = vector.load %arg2[%c0_1, %c0_2] : memref<8x8xf32, #tpu.memory_space<vmem>>, vector<8x8xf32>
    %3 = vector.extract_strided_slice %2 {offsets = [0, 0], sizes = [8, 1], strides = [1, 1]} : vector<8x8xf32> to vector<8x1xf32>
    %4 = vector.extract_strided_slice %2 {offsets = [0, 2], sizes = [8, 1], strides = [1, 1]} : vector<8x8xf32> to vector<8x1xf32>
    %5 = vector.extract_strided_slice %2 {offsets = [0, 4], sizes = [8, 1], strides = [1, 1]} : vector<8x8xf32> to vector<8x1xf32>
    %6 = vector.extract_strided_slice %2 {offsets = [0, 6], sizes = [8, 1], strides = [1, 1]} : vector<8x8xf32> to vector<8x1xf32>
    %7 = vector.extract_strided_slice %2 {offsets = [0, 1], sizes = [8, 1], strides = [1, 1]} : vector<8x8xf32> to vector<8x1xf32>
    %8 = vector.extract_strided_slice %2 {offsets = [0, 3], sizes = [8, 1], strides = [1, 1]} : vector<8x8xf32> to vector<8x1xf32>
    %9 = vector.extract_strided_slice %2 {offsets = [0, 5], sizes = [8, 1], strides = [1, 1]} : vector<8x8xf32> to vector<8x1xf32>
    %10 = vector.extract_strided_slice %2 {offsets = [0, 7], sizes = [8, 1], strides = [1, 1]} : vector<8x8xf32> to vector<8x1xf32>
    %11 = arith.minimumf %3, %4 : vector<8x1xf32>
    %12 = arith.minimumf %5, %6 : vector<8x1xf32>
    %13 = arith.minimumf %11, %12 : vector<8x1xf32>
    %14 = arith.maximumf %3, %4 : vector<8x1xf32>
    %15 = arith.maximumf %5, %6 : vector<8x1xf32>
    %16 = arith.maximumf %14, %15 : vector<8x1xf32>
    %17 = arith.minimumf %7, %8 : vector<8x1xf32>
    %18 = arith.minimumf %9, %10 : vector<8x1xf32>
    %19 = arith.minimumf %17, %18 : vector<8x1xf32>
    %20 = arith.maximumf %7, %8 : vector<8x1xf32>
    %21 = arith.maximumf %9, %10 : vector<8x1xf32>
    %22 = arith.maximumf %20, %21 : vector<8x1xf32>
    %23 = arith.mulf %3, %8 : vector<8x1xf32>
    %24 = arith.mulf %4, %7 : vector<8x1xf32>
    %25 = arith.subf %23, %24 : vector<8x1xf32>
    %cst_3 = arith.constant 0.000000e+00 : f32
    %26 = vector.broadcast %cst_3 : f32 to vector<8x1xf32>
    %27 = arith.addf %26, %25 : vector<8x1xf32>
    %28 = arith.mulf %4, %9 : vector<8x1xf32>
    %29 = arith.mulf %5, %8 : vector<8x1xf32>
    %30 = arith.subf %28, %29 : vector<8x1xf32>
    %31 = arith.addf %27, %30 : vector<8x1xf32>
    %32 = arith.mulf %5, %10 : vector<8x1xf32>
    %33 = arith.mulf %6, %9 : vector<8x1xf32>
    %34 = arith.subf %32, %33 : vector<8x1xf32>
    %35 = arith.addf %31, %34 : vector<8x1xf32>
    %36 = arith.mulf %6, %7 : vector<8x1xf32>
    %37 = arith.mulf %3, %10 : vector<8x1xf32>
    %38 = arith.subf %36, %37 : vector<8x1xf32>
    %39 = arith.addf %35, %38 : vector<8x1xf32>
    %cst_4 = arith.constant 5.000000e-01 : f32
    %40 = vector.broadcast %cst_4 : f32 to vector<8x1xf32>
    %41 = arith.mulf %40, %39 : vector<8x1xf32>
    %42 = math.absf %41 : vector<8x1xf32>
    %cst_5 = arith.constant 0.000000e+00 : f32
    %43 = vector.broadcast %cst_5 : f32 to vector<8x1xf32>
    %44 = arith.cmpf oge, %41, %43 : vector<8x1xf32>
    %cst_6 = arith.constant 1.000000e+00 : f32
    %cst_7 = arith.constant -1.000000e+00 : f32
    %45 = vector.broadcast %cst_6 : f32 to vector<8x1xf32>
    %46 = vector.broadcast %cst_7 : f32 to vector<8x1xf32>
    %47 = arith.select %44, %45, %46 : vector<8x1xi1>, vector<8x1xf32>
    %48 = arith.subf %4, %3 : vector<8x1xf32>
    %49 = arith.subf %5, %4 : vector<8x1xf32>
    %50 = arith.subf %6, %5 : vector<8x1xf32>
    %51 = arith.subf %3, %6 : vector<8x1xf32>
    %52 = arith.subf %8, %7 : vector<8x1xf32>
    %53 = arith.subf %9, %8 : vector<8x1xf32>
    %54 = arith.subf %10, %9 : vector<8x1xf32>
    %55 = arith.subf %7, %10 : vector<8x1xf32>
    %56 = math.absf %48 : vector<8x1xf32>
    %57 = math.absf %52 : vector<8x1xf32>
    %58 = arith.addf %56, %57 : vector<8x1xf32>
    %59 = math.absf %49 : vector<8x1xf32>
    %60 = math.absf %53 : vector<8x1xf32>
    %61 = arith.addf %59, %60 : vector<8x1xf32>
    %62 = math.absf %50 : vector<8x1xf32>
    %63 = math.absf %54 : vector<8x1xf32>
    %64 = arith.addf %62, %63 : vector<8x1xf32>
    %65 = math.absf %51 : vector<8x1xf32>
    %66 = math.absf %55 : vector<8x1xf32>
    %67 = arith.addf %65, %66 : vector<8x1xf32>
    %cst_8 = arith.constant 9.99999997E-7 : f32
    %68 = vector.broadcast %cst_8 : f32 to vector<8x1xf32>
    %69 = arith.mulf %68, %58 : vector<8x1xf32>
    %cst_9 = arith.constant 9.99999997E-7 : f32
    %70 = vector.broadcast %cst_9 : f32 to vector<8x1xf32>
    %71 = arith.mulf %70, %61 : vector<8x1xf32>
    %cst_10 = arith.constant 9.99999997E-7 : f32
    %72 = vector.broadcast %cst_10 : f32 to vector<8x1xf32>
    %73 = arith.mulf %72, %64 : vector<8x1xf32>
    %cst_11 = arith.constant 9.99999997E-7 : f32
    %74 = vector.broadcast %cst_11 : f32 to vector<8x1xf32>
    %75 = arith.mulf %74, %67 : vector<8x1xf32>
    %76 = tpu.iota {dimensions = array<i32: 0>} : vector<8x1xi32>
    %c8_i32 = arith.constant 8 : i32
    %77 = arith.muli %arg0, %c8_i32 : i32
    %78 = vector.broadcast %77 : i32 to vector<8x1xi32>
    %79 = arith.addi %76, %78 : vector<8x1xi32>
    %c8_i32_12 = arith.constant 8 : i32
    %80 = vector.broadcast %c8_i32_12 : i32 to vector<8x1xi32>
    %81 = arith.cmpi slt, %79, %80 : vector<8x1xi32>
    %c128_i32 = arith.constant 128 : i32
    %82 = arith.muli %arg1, %c128_i32 : i32
    %c0_i32 = arith.constant 0 : i32
    %c128_i32_13 = arith.constant 128 : i32
    %83 = arith.muli %c0_i32, %c128_i32_13 : i32
    %84 = tpu.assume_multiple %83, 128 : i32
    %c0_14 = arith.constant 0 : index
    %85 = arith.index_cast %84 : i32 to index
    %86 = vector.load %arg3[%c0_14, %85] : memref<8x128xf32, #tpu.memory_space<vmem>>, vector<8x128xf32>
    %87 = vector.extract_strided_slice %86 {offsets = [0, 0], sizes = [1, 128], strides = [1, 1]} : vector<8x128xf32> to vector<1x128xf32>
    %88 = vector.extract_strided_slice %86 {offsets = [2, 0], sizes = [1, 128], strides = [1, 1]} : vector<8x128xf32> to vector<1x128xf32>
    %89 = vector.extract_strided_slice %86 {offsets = [4, 0], sizes = [1, 128], strides = [1, 1]} : vector<8x128xf32> to vector<1x128xf32>
    %90 = vector.extract_strided_slice %86 {offsets = [6, 0], sizes = [1, 128], strides = [1, 1]} : vector<8x128xf32> to vector<1x128xf32>
    %91 = vector.extract_strided_slice %86 {offsets = [1, 0], sizes = [1, 128], strides = [1, 1]} : vector<8x128xf32> to vector<1x128xf32>
    %92 = vector.extract_strided_slice %86 {offsets = [3, 0], sizes = [1, 128], strides = [1, 1]} : vector<8x128xf32> to vector<1x128xf32>
    %93 = vector.extract_strided_slice %86 {offsets = [5, 0], sizes = [1, 128], strides = [1, 1]} : vector<8x128xf32> to vector<1x128xf32>
    %94 = vector.extract_strided_slice %86 {offsets = [7, 0], sizes = [1, 128], strides = [1, 1]} : vector<8x128xf32> to vector<1x128xf32>
    %95 = tpu.iota {dimensions = array<i32: 1>} : vector<1x128xi32>
    %96 = arith.addi %82, %84 : i32
    %97 = vector.broadcast %96 : i32 to vector<1x128xi32>
    %98 = arith.addi %95, %97 : vector<1x128xi32>
    %c8_i32_15 = arith.constant 8 : i32
    %99 = vector.broadcast %c8_i32_15 : i32 to vector<1x128xi32>
    %100 = arith.cmpi slt, %98, %99 : vector<1x128xi32>
    %101 = arith.minimumf %87, %88 : vector<1x128xf32>
    %102 = arith.minimumf %89, %90 : vector<1x128xf32>
    %103 = arith.minimumf %101, %102 : vector<1x128xf32>
    %104 = arith.maximumf %87, %88 : vector<1x128xf32>
    %105 = arith.maximumf %89, %90 : vector<1x128xf32>
    %106 = arith.maximumf %104, %105 : vector<1x128xf32>
    %107 = arith.minimumf %91, %92 : vector<1x128xf32>
    %108 = arith.minimumf %93, %94 : vector<1x128xf32>
    %109 = arith.minimumf %107, %108 : vector<1x128xf32>
    %110 = arith.maximumf %91, %92 : vector<1x128xf32>
    %111 = arith.maximumf %93, %94 : vector<1x128xf32>
    %112 = arith.maximumf %110, %111 : vector<1x128xf32>
    %113 = vector.broadcast %16 : vector<8x1xf32> to vector<8x128xf32>
    %114 = vector.broadcast %106 : vector<1x128xf32> to vector<8x128xf32>
    %115 = arith.minimumf %113, %114 : vector<8x128xf32>
    %116 = vector.broadcast %13 : vector<8x1xf32> to vector<8x128xf32>
    %117 = vector.broadcast %103 : vector<1x128xf32> to vector<8x128xf32>
    %118 = arith.maximumf %116, %117 : vector<8x128xf32>
    %119 = arith.subf %115, %118 : vector<8x128xf32>
    %cst_16 = arith.constant 1.000000e+00 : f32
    %120 = vector.broadcast %cst_16 : f32 to vector<8x128xf32>
    %121 = arith.addf %119, %120 : vector<8x128xf32>
    %cst_17 = arith.constant 0.000000e+00 : f32
    %122 = vector.broadcast %cst_17 : f32 to vector<8x128xf32>
    %123 = arith.maximumf %121, %122 : vector<8x128xf32>
    %124 = vector.broadcast %22 : vector<8x1xf32> to vector<8x128xf32>
    %125 = vector.broadcast %112 : vector<1x128xf32> to vector<8x128xf32>
    %126 = arith.minimumf %124, %125 : vector<8x128xf32>
    %127 = vector.broadcast %19 : vector<8x1xf32> to vector<8x128xf32>
    %128 = vector.broadcast %109 : vector<1x128xf32> to vector<8x128xf32>
    %129 = arith.maximumf %127, %128 : vector<8x128xf32>
    %130 = arith.subf %126, %129 : vector<8x128xf32>
    %cst_18 = arith.constant 1.000000e+00 : f32
    %131 = vector.broadcast %cst_18 : f32 to vector<8x128xf32>
    %132 = arith.addf %130, %131 : vector<8x128xf32>
    %cst_19 = arith.constant 0.000000e+00 : f32
    %133 = vector.broadcast %cst_19 : f32 to vector<8x128xf32>
    %134 = arith.maximumf %132, %133 : vector<8x128xf32>
    %135 = vector.broadcast %81 : vector<8x1xi1> to vector<8x128xi1>
    %136 = vector.broadcast %100 : vector<1x128xi1> to vector<8x128xi1>
    %137 = arith.andi %135, %136 : vector<8x128xi1>
    %138 = arith.mulf %123, %134 : vector<8x128xf32>
    %cst_20 = arith.constant 0.000000e+00 : f32
    %139 = vector.broadcast %cst_20 : f32 to vector<8x128xf32>
    %140 = arith.cmpf ogt, %138, %139 : vector<8x128xf32>
    %141 = arith.andi %137, %140 : vector<8x128xi1>
    %cst_21 = arith.constant 1.000000e+00 : f32
    %cst_22 = arith.constant 0.000000e+00 : f32
    %142 = vector.broadcast %cst_21 : f32 to vector<8x128xf32>
    %143 = vector.broadcast %cst_22 : f32 to vector<8x128xf32>
    %144 = arith.select %141, %142, %143 : vector<8x128xi1>, vector<8x128xf32>
    %145 = vector.shape_cast %144 : vector<8x128xf32> to vector<1x8x128xf32>
    %cst_23 = arith.constant dense<0xFF800000> : vector<1xf32>
    %146 = vector.multi_reduction <maximumf>, %145, %cst_23 [1, 2] : vector<1x8x128xf32> to vector<1xf32>
    %147 = vector.shape_cast %146 : vector<1xf32> to vector<1x1x1xf32>
    %148 = vector.extract %147[0, 0, 0] : f32 from vector<1x1x1xf32>
    %cst_24 = arith.constant 0.000000e+00 : f32
    %149 = arith.cmpf ogt, %148, %cst_24 : f32
    %150 = arith.extui %149 : i1 to i32
    %c0_i32_25 = arith.constant 0 : i32
    %151 = arith.cmpi ne, %150, %c0_i32_25 : i32
    scf.if %151 {
      %159 = arith.mulf %87, %92 : vector<1x128xf32>
      %160 = arith.mulf %88, %91 : vector<1x128xf32>
      %161 = arith.subf %159, %160 : vector<1x128xf32>
      %cst_32 = arith.constant 0.000000e+00 : f32
      %162 = vector.broadcast %cst_32 : f32 to vector<1x128xf32>
      %163 = arith.addf %162, %161 : vector<1x128xf32>
      %164 = arith.mulf %88, %93 : vector<1x128xf32>
      %165 = arith.mulf %89, %92 : vector<1x128xf32>
      %166 = arith.subf %164, %165 : vector<1x128xf32>
      %167 = arith.addf %163, %166 : vector<1x128xf32>
      %168 = arith.mulf %89, %94 : vector<1x128xf32>
      %169 = arith.mulf %90, %93 : vector<1x128xf32>
      %170 = arith.subf %168, %169 : vector<1x128xf32>
      %171 = arith.addf %167, %170 : vector<1x128xf32>
      %172 = arith.mulf %90, %91 : vector<1x128xf32>
      %173 = arith.mulf %87, %94 : vector<1x128xf32>
      %174 = arith.subf %172, %173 : vector<1x128xf32>
      %175 = arith.addf %171, %174 : vector<1x128xf32>
      %cst_33 = arith.constant 5.000000e-01 : f32
      %176 = vector.broadcast %cst_33 : f32 to vector<1x128xf32>
      %177 = arith.mulf %176, %175 : vector<1x128xf32>
      %178 = math.absf %177 : vector<1x128xf32>
      %cst_34 = arith.constant 0.000000e+00 : f32
      %179 = vector.broadcast %cst_34 : f32 to vector<1x128xf32>
      %180 = arith.cmpf oge, %177, %179 : vector<1x128xf32>
      %cst_35 = arith.constant 1.000000e+00 : f32
      %cst_36 = arith.constant -1.000000e+00 : f32
      %181 = vector.broadcast %cst_35 : f32 to vector<1x128xf32>
      %182 = vector.broadcast %cst_36 : f32 to vector<1x128xf32>
      %183 = arith.select %180, %181, %182 : vector<1x128xi1>, vector<1x128xf32>
      %184 = vector.broadcast %47 : vector<8x1xf32> to vector<8x128xf32>
      %185 = vector.broadcast %183 : vector<1x128xf32> to vector<8x128xf32>
      %186 = arith.mulf %184, %185 : vector<8x128xf32>
      %187 = arith.subf %88, %87 : vector<1x128xf32>
      %188 = arith.subf %89, %88 : vector<1x128xf32>
      %189 = arith.subf %90, %89 : vector<1x128xf32>
      %190 = arith.subf %87, %90 : vector<1x128xf32>
      %191 = arith.subf %92, %91 : vector<1x128xf32>
      %192 = arith.subf %93, %92 : vector<1x128xf32>
      %193 = arith.subf %94, %93 : vector<1x128xf32>
      %194 = arith.subf %91, %94 : vector<1x128xf32>
      %195 = math.absf %187 : vector<1x128xf32>
      %196 = math.absf %191 : vector<1x128xf32>
      %197 = arith.addf %195, %196 : vector<1x128xf32>
      %198 = math.absf %188 : vector<1x128xf32>
      %199 = math.absf %192 : vector<1x128xf32>
      %200 = arith.addf %198, %199 : vector<1x128xf32>
      %201 = math.absf %189 : vector<1x128xf32>
      %202 = math.absf %193 : vector<1x128xf32>
      %203 = arith.addf %201, %202 : vector<1x128xf32>
      %204 = math.absf %190 : vector<1x128xf32>
      %205 = math.absf %194 : vector<1x128xf32>
      %206 = arith.addf %204, %205 : vector<1x128xf32>
      %cst_37 = arith.constant 9.99999997E-7 : f32
      %207 = vector.broadcast %cst_37 : f32 to vector<1x128xf32>
      %208 = arith.mulf %207, %197 : vector<1x128xf32>
      %cst_38 = arith.constant 9.99999997E-7 : f32
      %209 = vector.broadcast %cst_38 : f32 to vector<1x128xf32>
      %210 = arith.mulf %209, %200 : vector<1x128xf32>
      %cst_39 = arith.constant 9.99999997E-7 : f32
      %211 = vector.broadcast %cst_39 : f32 to vector<1x128xf32>
      %212 = arith.mulf %211, %203 : vector<1x128xf32>
      %cst_40 = arith.constant 9.99999997E-7 : f32
      %213 = vector.broadcast %cst_40 : f32 to vector<1x128xf32>
      %214 = arith.mulf %213, %206 : vector<1x128xf32>
      %215 = vector.broadcast %7 : vector<8x1xf32> to vector<8x128xf32>
      %216 = vector.broadcast %91 : vector<1x128xf32> to vector<8x128xf32>
      %217 = arith.subf %215, %216 : vector<8x128xf32>
      %218 = vector.broadcast %187 : vector<1x128xf32> to vector<8x128xf32>
      %219 = arith.mulf %218, %217 : vector<8x128xf32>
      %220 = vector.broadcast %3 : vector<8x1xf32> to vector<8x128xf32>
      %221 = vector.broadcast %87 : vector<1x128xf32> to vector<8x128xf32>
      %222 = arith.subf %220, %221 : vector<8x128xf32>
      %223 = vector.broadcast %191 : vector<1x128xf32> to vector<8x128xf32>
      %224 = arith.mulf %223, %222 : vector<8x128xf32>
      %225 = arith.subf %219, %224 : vector<8x128xf32>
      %226 = vector.broadcast %183 : vector<1x128xf32> to vector<8x128xf32>
      %227 = arith.mulf %226, %225 : vector<8x128xf32>
      %228 = vector.broadcast %7 : vector<8x1xf32> to vector<8x128xf32>
      %229 = vector.broadcast %92 : vector<1x128xf32> to vector<8x128xf32>
      %230 = arith.subf %228, %229 : vector<8x128xf32>
      %231 = vector.broadcast %188 : vector<1x128xf32> to vector<8x128xf32>
      %232 = arith.mulf %231, %230 : vector<8x128xf32>
      %233 = vector.broadcast %3 : vector<8x1xf32> to vector<8x128xf32>
      %234 = vector.broadcast %88 : vector<1x128xf32> to vector<8x128xf32>
      %235 = arith.subf %233, %234 : vector<8x128xf32>
      %236 = vector.broadcast %192 : vector<1x128xf32> to vector<8x128xf32>
      %237 = arith.mulf %236, %235 : vector<8x128xf32>
      %238 = arith.subf %232, %237 : vector<8x128xf32>
      %239 = vector.broadcast %183 : vector<1x128xf32> to vector<8x128xf32>
      %240 = arith.mulf %239, %238 : vector<8x128xf32>
      %241 = vector.broadcast %7 : vector<8x1xf32> to vector<8x128xf32>
      %242 = vector.broadcast %93 : vector<1x128xf32> to vector<8x128xf32>
      %243 = arith.subf %241, %242 : vector<8x128xf32>
      %244 = vector.broadcast %189 : vector<1x128xf32> to vector<8x128xf32>
      %245 = arith.mulf %244, %243 : vector<8x128xf32>
      %246 = vector.broadcast %3 : vector<8x1xf32> to vector<8x128xf32>
      %247 = vector.broadcast %89 : vector<1x128xf32> to vector<8x128xf32>
      %248 = arith.subf %246, %247 : vector<8x128xf32>
      %249 = vector.broadcast %193 : vector<1x128xf32> to vector<8x128xf32>
      %250 = arith.mulf %249, %248 : vector<8x128xf32>
      %251 = arith.subf %245, %250 : vector<8x128xf32>
      %252 = vector.broadcast %183 : vector<1x128xf32> to vector<8x128xf32>
      %253 = arith.mulf %252, %251 : vector<8x128xf32>
      %254 = vector.broadcast %7 : vector<8x1xf32> to vector<8x128xf32>
      %255 = vector.broadcast %94 : vector<1x128xf32> to vector<8x128xf32>
      %256 = arith.subf %254, %255 : vector<8x128xf32>
      %257 = vector.broadcast %190 : vector<1x128xf32> to vector<8x128xf32>
      %258 = arith.mulf %257, %256 : vector<8x128xf32>
      %259 = vector.broadcast %3 : vector<8x1xf32> to vector<8x128xf32>
      %260 = vector.broadcast %90 : vector<1x128xf32> to vector<8x128xf32>
      %261 = arith.subf %259, %260 : vector<8x128xf32>
      %262 = vector.broadcast %194 : vector<1x128xf32> to vector<8x128xf32>
      %263 = arith.mulf %262, %261 : vector<8x128xf32>
      %264 = arith.subf %258, %263 : vector<8x128xf32>
      %265 = vector.broadcast %183 : vector<1x128xf32> to vector<8x128xf32>
      %266 = arith.mulf %265, %264 : vector<8x128xf32>
      %267 = vector.broadcast %8 : vector<8x1xf32> to vector<8x128xf32>
      %268 = vector.broadcast %91 : vector<1x128xf32> to vector<8x128xf32>
      %269 = arith.subf %267, %268 : vector<8x128xf32>
      %270 = vector.broadcast %187 : vector<1x128xf32> to vector<8x128xf32>
      %271 = arith.mulf %270, %269 : vector<8x128xf32>
      %272 = vector.broadcast %4 : vector<8x1xf32> to vector<8x128xf32>
      %273 = vector.broadcast %87 : vector<1x128xf32> to vector<8x128xf32>
      %274 = arith.subf %272, %273 : vector<8x128xf32>
      %275 = vector.broadcast %191 : vector<1x128xf32> to vector<8x128xf32>
      %276 = arith.mulf %275, %274 : vector<8x128xf32>
      %277 = arith.subf %271, %276 : vector<8x128xf32>
      %278 = vector.broadcast %183 : vector<1x128xf32> to vector<8x128xf32>
      %279 = arith.mulf %278, %277 : vector<8x128xf32>
      %280 = vector.broadcast %8 : vector<8x1xf32> to vector<8x128xf32>
      %281 = vector.broadcast %92 : vector<1x128xf32> to vector<8x128xf32>
      %282 = arith.subf %280, %281 : vector<8x128xf32>
      %283 = vector.broadcast %188 : vector<1x128xf32> to vector<8x128xf32>
      %284 = arith.mulf %283, %282 : vector<8x128xf32>
      %285 = vector.broadcast %4 : vector<8x1xf32> to vector<8x128xf32>
      %286 = vector.broadcast %88 : vector<1x128xf32> to vector<8x128xf32>
      %287 = arith.subf %285, %286 : vector<8x128xf32>
      %288 = vector.broadcast %192 : vector<1x128xf32> to vector<8x128xf32>
      %289 = arith.mulf %288, %287 : vector<8x128xf32>
      %290 = arith.subf %284, %289 : vector<8x128xf32>
      %291 = vector.broadcast %183 : vector<1x128xf32> to vector<8x128xf32>
      %292 = arith.mulf %291, %290 : vector<8x128xf32>
      %293 = vector.broadcast %8 : vector<8x1xf32> to vector<8x128xf32>
      %294 = vector.broadcast %93 : vector<1x128xf32> to vector<8x128xf32>
      %295 = arith.subf %293, %294 : vector<8x128xf32>
      %296 = vector.broadcast %189 : vector<1x128xf32> to vector<8x128xf32>
      %297 = arith.mulf %296, %295 : vector<8x128xf32>
      %298 = vector.broadcast %4 : vector<8x1xf32> to vector<8x128xf32>
      %299 = vector.broadcast %89 : vector<1x128xf32> to vector<8x128xf32>
      %300 = arith.subf %298, %299 : vector<8x128xf32>
      %301 = vector.broadcast %193 : vector<1x128xf32> to vector<8x128xf32>
      %302 = arith.mulf %301, %300 : vector<8x128xf32>
      %303 = arith.subf %297, %302 : vector<8x128xf32>
      %304 = vector.broadcast %183 : vector<1x128xf32> to vector<8x128xf32>
      %305 = arith.mulf %304, %303 : vector<8x128xf32>
      %306 = vector.broadcast %8 : vector<8x1xf32> to vector<8x128xf32>
      %307 = vector.broadcast %94 : vector<1x128xf32> to vector<8x128xf32>
      %308 = arith.subf %306, %307 : vector<8x128xf32>
      %309 = vector.broadcast %190 : vector<1x128xf32> to vector<8x128xf32>
      %310 = arith.mulf %309, %308 : vector<8x128xf32>
      %311 = vector.broadcast %4 : vector<8x1xf32> to vector<8x128xf32>
      %312 = vector.broadcast %90 : vector<1x128xf32> to vector<8x128xf32>
      %313 = arith.subf %311, %312 : vector<8x128xf32>
      %314 = vector.broadcast %194 : vector<1x128xf32> to vector<8x128xf32>
      %315 = arith.mulf %314, %313 : vector<8x128xf32>
      %316 = arith.subf %310, %315 : vector<8x128xf32>
      %317 = vector.broadcast %183 : vector<1x128xf32> to vector<8x128xf32>
      %318 = arith.mulf %317, %316 : vector<8x128xf32>
      %319 = vector.broadcast %9 : vector<8x1xf32> to vector<8x128xf32>
      %320 = vector.broadcast %91 : vector<1x128xf32> to vector<8x128xf32>
      %321 = arith.subf %319, %320 : vector<8x128xf32>
      %322 = vector.broadcast %187 : vector<1x128xf32> to vector<8x128xf32>
      %323 = arith.mulf %322, %321 : vector<8x128xf32>
      %324 = vector.broadcast %5 : vector<8x1xf32> to vector<8x128xf32>
      %325 = vector.broadcast %87 : vector<1x128xf32> to vector<8x128xf32>
      %326 = arith.subf %324, %325 : vector<8x128xf32>
      %327 = vector.broadcast %191 : vector<1x128xf32> to vector<8x128xf32>
      %328 = arith.mulf %327, %326 : vector<8x128xf32>
      %329 = arith.subf %323, %328 : vector<8x128xf32>
      %330 = vector.broadcast %183 : vector<1x128xf32> to vector<8x128xf32>
      %331 = arith.mulf %330, %329 : vector<8x128xf32>
      %332 = vector.broadcast %9 : vector<8x1xf32> to vector<8x128xf32>
      %333 = vector.broadcast %92 : vector<1x128xf32> to vector<8x128xf32>
      %334 = arith.subf %332, %333 : vector<8x128xf32>
      %335 = vector.broadcast %188 : vector<1x128xf32> to vector<8x128xf32>
      %336 = arith.mulf %335, %334 : vector<8x128xf32>
      %337 = vector.broadcast %5 : vector<8x1xf32> to vector<8x128xf32>
      %338 = vector.broadcast %88 : vector<1x128xf32> to vector<8x128xf32>
      %339 = arith.subf %337, %338 : vector<8x128xf32>
      %340 = vector.broadcast %192 : vector<1x128xf32> to vector<8x128xf32>
      %341 = arith.mulf %340, %339 : vector<8x128xf32>
      %342 = arith.subf %336, %341 : vector<8x128xf32>
      %343 = vector.broadcast %183 : vector<1x128xf32> to vector<8x128xf32>
      %344 = arith.mulf %343, %342 : vector<8x128xf32>
      %345 = vector.broadcast %9 : vector<8x1xf32> to vector<8x128xf32>
      %346 = vector.broadcast %93 : vector<1x128xf32> to vector<8x128xf32>
      %347 = arith.subf %345, %346 : vector<8x128xf32>
      %348 = vector.broadcast %189 : vector<1x128xf32> to vector<8x128xf32>
      %349 = arith.mulf %348, %347 : vector<8x128xf32>
      %350 = vector.broadcast %5 : vector<8x1xf32> to vector<8x128xf32>
      %351 = vector.broadcast %89 : vector<1x128xf32> to vector<8x128xf32>
      %352 = arith.subf %350, %351 : vector<8x128xf32>
      %353 = vector.broadcast %193 : vector<1x128xf32> to vector<8x128xf32>
      %354 = arith.mulf %353, %352 : vector<8x128xf32>
      %355 = arith.subf %349, %354 : vector<8x128xf32>
      %356 = vector.broadcast %183 : vector<1x128xf32> to vector<8x128xf32>
      %357 = arith.mulf %356, %355 : vector<8x128xf32>
      %358 = vector.broadcast %9 : vector<8x1xf32> to vector<8x128xf32>
      %359 = vector.broadcast %94 : vector<1x128xf32> to vector<8x128xf32>
      %360 = arith.subf %358, %359 : vector<8x128xf32>
      %361 = vector.broadcast %190 : vector<1x128xf32> to vector<8x128xf32>
      %362 = arith.mulf %361, %360 : vector<8x128xf32>
      %363 = vector.broadcast %5 : vector<8x1xf32> to vector<8x128xf32>
      %364 = vector.broadcast %90 : vector<1x128xf32> to vector<8x128xf32>
      %365 = arith.subf %363, %364 : vector<8x128xf32>
      %366 = vector.broadcast %194 : vector<1x128xf32> to vector<8x128xf32>
      %367 = arith.mulf %366, %365 : vector<8x128xf32>
      %368 = arith.subf %362, %367 : vector<8x128xf32>
      %369 = vector.broadcast %183 : vector<1x128xf32> to vector<8x128xf32>
      %370 = arith.mulf %369, %368 : vector<8x128xf32>
      %371 = vector.broadcast %10 : vector<8x1xf32> to vector<8x128xf32>
      %372 = vector.broadcast %91 : vector<1x128xf32> to vector<8x128xf32>
      %373 = arith.subf %371, %372 : vector<8x128xf32>
      %374 = vector.broadcast %187 : vector<1x128xf32> to vector<8x128xf32>
      %375 = arith.mulf %374, %373 : vector<8x128xf32>
      %376 = vector.broadcast %6 : vector<8x1xf32> to vector<8x128xf32>
      %377 = vector.broadcast %87 : vector<1x128xf32> to vector<8x128xf32>
      %378 = arith.subf %376, %377 : vector<8x128xf32>
      %379 = vector.broadcast %191 : vector<1x128xf32> to vector<8x128xf32>
      %380 = arith.mulf %379, %378 : vector<8x128xf32>
      %381 = arith.subf %375, %380 : vector<8x128xf32>
      %382 = vector.broadcast %183 : vector<1x128xf32> to vector<8x128xf32>
      %383 = arith.mulf %382, %381 : vector<8x128xf32>
      %384 = vector.broadcast %10 : vector<8x1xf32> to vector<8x128xf32>
      %385 = vector.broadcast %92 : vector<1x128xf32> to vector<8x128xf32>
      %386 = arith.subf %384, %385 : vector<8x128xf32>
      %387 = vector.broadcast %188 : vector<1x128xf32> to vector<8x128xf32>
      %388 = arith.mulf %387, %386 : vector<8x128xf32>
      %389 = vector.broadcast %6 : vector<8x1xf32> to vector<8x128xf32>
      %390 = vector.broadcast %88 : vector<1x128xf32> to vector<8x128xf32>
      %391 = arith.subf %389, %390 : vector<8x128xf32>
      %392 = vector.broadcast %192 : vector<1x128xf32> to vector<8x128xf32>
      %393 = arith.mulf %392, %391 : vector<8x128xf32>
      %394 = arith.subf %388, %393 : vector<8x128xf32>
      %395 = vector.broadcast %183 : vector<1x128xf32> to vector<8x128xf32>
      %396 = arith.mulf %395, %394 : vector<8x128xf32>
      %397 = vector.broadcast %10 : vector<8x1xf32> to vector<8x128xf32>
      %398 = vector.broadcast %93 : vector<1x128xf32> to vector<8x128xf32>
      %399 = arith.subf %397, %398 : vector<8x128xf32>
      %400 = vector.broadcast %189 : vector<1x128xf32> to vector<8x128xf32>
      %401 = arith.mulf %400, %399 : vector<8x128xf32>
      %402 = vector.broadcast %6 : vector<8x1xf32> to vector<8x128xf32>
      %403 = vector.broadcast %89 : vector<1x128xf32> to vector<8x128xf32>
      %404 = arith.subf %402, %403 : vector<8x128xf32>
      %405 = vector.broadcast %193 : vector<1x128xf32> to vector<8x128xf32>
      %406 = arith.mulf %405, %404 : vector<8x128xf32>
      %407 = arith.subf %401, %406 : vector<8x128xf32>
      %408 = vector.broadcast %183 : vector<1x128xf32> to vector<8x128xf32>
      %409 = arith.mulf %408, %407 : vector<8x128xf32>
      %410 = vector.broadcast %10 : vector<8x1xf32> to vector<8x128xf32>
      %411 = vector.broadcast %94 : vector<1x128xf32> to vector<8x128xf32>
      %412 = arith.subf %410, %411 : vector<8x128xf32>
      %413 = vector.broadcast %190 : vector<1x128xf32> to vector<8x128xf32>
      %414 = arith.mulf %413, %412 : vector<8x128xf32>
      %415 = vector.broadcast %6 : vector<8x1xf32> to vector<8x128xf32>
      %416 = vector.broadcast %90 : vector<1x128xf32> to vector<8x128xf32>
      %417 = arith.subf %415, %416 : vector<8x128xf32>
      %418 = vector.broadcast %194 : vector<1x128xf32> to vector<8x128xf32>
      %419 = arith.mulf %418, %417 : vector<8x128xf32>
      %420 = arith.subf %414, %419 : vector<8x128xf32>
      %421 = vector.broadcast %183 : vector<1x128xf32> to vector<8x128xf32>
      %422 = arith.mulf %421, %420 : vector<8x128xf32>
      %423 = arith.subf %279, %227 : vector<8x128xf32>
      %424 = vector.broadcast %208 : vector<1x128xf32> to vector<8x128xf32>
      %425 = vector.broadcast %58 : vector<8x1xf32> to vector<8x128xf32>
      %426 = arith.mulf %424, %425 : vector<8x128xf32>
      %427 = math.absf %423 : vector<8x128xf32>
      %428 = arith.cmpf ole, %427, %426 : vector<8x128xf32>
      %cst_41 = arith.constant 0.000000e+00 : f32
      %429 = vector.broadcast %cst_41 : f32 to vector<8x128xf32>
      %430 = arith.subf %429, %227 : vector<8x128xf32>
      %cst_42 = arith.constant 1.000000e+00 : f32
      %431 = vector.broadcast %cst_42 : f32 to vector<8x128xf32>
      %432 = arith.select %428, %431, %423 : vector<8x128xi1>, vector<8x128xf32>
      %433 = tpu.reciprocal %432 {approx = true} : vector<8x128xf32> -> vector<8x128xf32>
      %434 = arith.mulf %430, %433 : vector<8x128xf32>
      %cst_43 = arith.constant dense<true> : vector<8x128xi1>
      %435 = arith.xori %428, %cst_43 : vector<8x128xi1>
      %cst_44 = arith.constant 0.000000e+00 : f32
      %436 = vector.broadcast %cst_44 : f32 to vector<8x128xf32>
      %437 = arith.cmpf ogt, %423, %436 : vector<8x128xf32>
      %438 = arith.andi %435, %437 : vector<8x128xi1>
      %cst_45 = arith.constant 0.000000e+00 : f32
      %439 = vector.broadcast %cst_45 : f32 to vector<8x128xf32>
      %440 = arith.maximumf %439, %434 : vector<8x128xf32>
      %cst_46 = arith.constant 0.000000e+00 : f32
      %441 = vector.broadcast %cst_46 : f32 to vector<8x128xf32>
      %442 = arith.select %438, %440, %441 : vector<8x128xi1>, vector<8x128xf32>
      %cst_47 = arith.constant dense<true> : vector<8x128xi1>
      %443 = arith.xori %428, %cst_47 : vector<8x128xi1>
      %cst_48 = arith.constant 0.000000e+00 : f32
      %444 = vector.broadcast %cst_48 : f32 to vector<8x128xf32>
      %445 = arith.cmpf olt, %423, %444 : vector<8x128xf32>
      %446 = arith.andi %443, %445 : vector<8x128xi1>
      %cst_49 = arith.constant 1.000000e+00 : f32
      %447 = vector.broadcast %cst_49 : f32 to vector<8x128xf32>
      %448 = arith.minimumf %447, %434 : vector<8x128xf32>
      %cst_50 = arith.constant 1.000000e+00 : f32
      %449 = vector.broadcast %cst_50 : f32 to vector<8x128xf32>
      %450 = arith.select %446, %448, %449 : vector<8x128xi1>, vector<8x128xf32>
      %cst_51 = arith.constant 0.000000e+00 : f32
      %451 = vector.broadcast %cst_51 : f32 to vector<8x128xf32>
      %452 = arith.subf %451, %426 : vector<8x128xf32>
      %453 = arith.cmpf olt, %227, %452 : vector<8x128xf32>
      %454 = arith.andi %428, %453 : vector<8x128xi1>
      %false = arith.constant false
      %455 = vector.broadcast %false : i1 to vector<8x128xi1>
      %456 = arith.ori %455, %454 : vector<8x128xi1>
      %457 = arith.subf %292, %240 : vector<8x128xf32>
      %458 = vector.broadcast %210 : vector<1x128xf32> to vector<8x128xf32>
      %459 = vector.broadcast %58 : vector<8x1xf32> to vector<8x128xf32>
      %460 = arith.mulf %458, %459 : vector<8x128xf32>
      %461 = math.absf %457 : vector<8x128xf32>
      %462 = arith.cmpf ole, %461, %460 : vector<8x128xf32>
      %cst_52 = arith.constant 0.000000e+00 : f32
      %463 = vector.broadcast %cst_52 : f32 to vector<8x128xf32>
      %464 = arith.subf %463, %240 : vector<8x128xf32>
      %cst_53 = arith.constant 1.000000e+00 : f32
      %465 = vector.broadcast %cst_53 : f32 to vector<8x128xf32>
      %466 = arith.select %462, %465, %457 : vector<8x128xi1>, vector<8x128xf32>
      %467 = tpu.reciprocal %466 {approx = true} : vector<8x128xf32> -> vector<8x128xf32>
      %468 = arith.mulf %464, %467 : vector<8x128xf32>
      %cst_54 = arith.constant dense<true> : vector<8x128xi1>
      %469 = arith.xori %462, %cst_54 : vector<8x128xi1>
      %cst_55 = arith.constant 0.000000e+00 : f32
      %470 = vector.broadcast %cst_55 : f32 to vector<8x128xf32>
      %471 = arith.cmpf ogt, %457, %470 : vector<8x128xf32>
      %472 = arith.andi %469, %471 : vector<8x128xi1>
      %473 = arith.maximumf %442, %468 : vector<8x128xf32>
      %474 = arith.select %472, %473, %442 : vector<8x128xi1>, vector<8x128xf32>
      %cst_56 = arith.constant dense<true> : vector<8x128xi1>
      %475 = arith.xori %462, %cst_56 : vector<8x128xi1>
      %cst_57 = arith.constant 0.000000e+00 : f32
      %476 = vector.broadcast %cst_57 : f32 to vector<8x128xf32>
      %477 = arith.cmpf olt, %457, %476 : vector<8x128xf32>
      %478 = arith.andi %475, %477 : vector<8x128xi1>
      %479 = arith.minimumf %450, %468 : vector<8x128xf32>
      %480 = arith.select %478, %479, %450 : vector<8x128xi1>, vector<8x128xf32>
      %cst_58 = arith.constant 0.000000e+00 : f32
      %481 = vector.broadcast %cst_58 : f32 to vector<8x128xf32>
      %482 = arith.subf %481, %460 : vector<8x128xf32>
      %483 = arith.cmpf olt, %240, %482 : vector<8x128xf32>
      %484 = arith.andi %462, %483 : vector<8x128xi1>
      %485 = arith.ori %456, %484 : vector<8x128xi1>
      %486 = arith.subf %305, %253 : vector<8x128xf32>
      %487 = vector.broadcast %212 : vector<1x128xf32> to vector<8x128xf32>
      %488 = vector.broadcast %58 : vector<8x1xf32> to vector<8x128xf32>
      %489 = arith.mulf %487, %488 : vector<8x128xf32>
      %490 = math.absf %486 : vector<8x128xf32>
      %491 = arith.cmpf ole, %490, %489 : vector<8x128xf32>
      %cst_59 = arith.constant 0.000000e+00 : f32
      %492 = vector.broadcast %cst_59 : f32 to vector<8x128xf32>
      %493 = arith.subf %492, %253 : vector<8x128xf32>
      %cst_60 = arith.constant 1.000000e+00 : f32
      %494 = vector.broadcast %cst_60 : f32 to vector<8x128xf32>
      %495 = arith.select %491, %494, %486 : vector<8x128xi1>, vector<8x128xf32>
      %496 = tpu.reciprocal %495 {approx = true} : vector<8x128xf32> -> vector<8x128xf32>
      %497 = arith.mulf %493, %496 : vector<8x128xf32>
      %cst_61 = arith.constant dense<true> : vector<8x128xi1>
      %498 = arith.xori %491, %cst_61 : vector<8x128xi1>
      %cst_62 = arith.constant 0.000000e+00 : f32
      %499 = vector.broadcast %cst_62 : f32 to vector<8x128xf32>
      %500 = arith.cmpf ogt, %486, %499 : vector<8x128xf32>
      %501 = arith.andi %498, %500 : vector<8x128xi1>
      %502 = arith.maximumf %474, %497 : vector<8x128xf32>
      %503 = arith.select %501, %502, %474 : vector<8x128xi1>, vector<8x128xf32>
      %cst_63 = arith.constant dense<true> : vector<8x128xi1>
      %504 = arith.xori %491, %cst_63 : vector<8x128xi1>
      %cst_64 = arith.constant 0.000000e+00 : f32
      %505 = vector.broadcast %cst_64 : f32 to vector<8x128xf32>
      %506 = arith.cmpf olt, %486, %505 : vector<8x128xf32>
      %507 = arith.andi %504, %506 : vector<8x128xi1>
      %508 = arith.minimumf %480, %497 : vector<8x128xf32>
      %509 = arith.select %507, %508, %480 : vector<8x128xi1>, vector<8x128xf32>
      %cst_65 = arith.constant 0.000000e+00 : f32
      %510 = vector.broadcast %cst_65 : f32 to vector<8x128xf32>
      %511 = arith.subf %510, %489 : vector<8x128xf32>
      %512 = arith.cmpf olt, %253, %511 : vector<8x128xf32>
      %513 = arith.andi %491, %512 : vector<8x128xi1>
      %514 = arith.ori %485, %513 : vector<8x128xi1>
      %515 = arith.subf %318, %266 : vector<8x128xf32>
      %516 = vector.broadcast %214 : vector<1x128xf32> to vector<8x128xf32>
      %517 = vector.broadcast %58 : vector<8x1xf32> to vector<8x128xf32>
      %518 = arith.mulf %516, %517 : vector<8x128xf32>
      %519 = math.absf %515 : vector<8x128xf32>
      %520 = arith.cmpf ole, %519, %518 : vector<8x128xf32>
      %cst_66 = arith.constant 0.000000e+00 : f32
      %521 = vector.broadcast %cst_66 : f32 to vector<8x128xf32>
      %522 = arith.subf %521, %266 : vector<8x128xf32>
      %cst_67 = arith.constant 1.000000e+00 : f32
      %523 = vector.broadcast %cst_67 : f32 to vector<8x128xf32>
      %524 = arith.select %520, %523, %515 : vector<8x128xi1>, vector<8x128xf32>
      %525 = tpu.reciprocal %524 {approx = true} : vector<8x128xf32> -> vector<8x128xf32>
      %526 = arith.mulf %522, %525 : vector<8x128xf32>
      %cst_68 = arith.constant dense<true> : vector<8x128xi1>
      %527 = arith.xori %520, %cst_68 : vector<8x128xi1>
      %cst_69 = arith.constant 0.000000e+00 : f32
      %528 = vector.broadcast %cst_69 : f32 to vector<8x128xf32>
      %529 = arith.cmpf ogt, %515, %528 : vector<8x128xf32>
      %530 = arith.andi %527, %529 : vector<8x128xi1>
      %531 = arith.maximumf %503, %526 : vector<8x128xf32>
      %532 = arith.select %530, %531, %503 : vector<8x128xi1>, vector<8x128xf32>
      %cst_70 = arith.constant dense<true> : vector<8x128xi1>
      %533 = arith.xori %520, %cst_70 : vector<8x128xi1>
      %cst_71 = arith.constant 0.000000e+00 : f32
      %534 = vector.broadcast %cst_71 : f32 to vector<8x128xf32>
      %535 = arith.cmpf olt, %515, %534 : vector<8x128xf32>
      %536 = arith.andi %533, %535 : vector<8x128xi1>
      %537 = arith.minimumf %509, %526 : vector<8x128xf32>
      %538 = arith.select %536, %537, %509 : vector<8x128xi1>, vector<8x128xf32>
      %cst_72 = arith.constant 0.000000e+00 : f32
      %539 = vector.broadcast %cst_72 : f32 to vector<8x128xf32>
      %540 = arith.subf %539, %518 : vector<8x128xf32>
      %541 = arith.cmpf olt, %266, %540 : vector<8x128xf32>
      %542 = arith.andi %520, %541 : vector<8x128xi1>
      %543 = arith.ori %514, %542 : vector<8x128xi1>
      %544 = vector.broadcast %48 : vector<8x1xf32> to vector<8x128xf32>
      %545 = arith.mulf %532, %544 : vector<8x128xf32>
      %546 = vector.broadcast %3 : vector<8x1xf32> to vector<8x128xf32>
      %547 = arith.addf %546, %545 : vector<8x128xf32>
      %548 = vector.broadcast %52 : vector<8x1xf32> to vector<8x128xf32>
      %549 = arith.mulf %532, %548 : vector<8x128xf32>
      %550 = vector.broadcast %7 : vector<8x1xf32> to vector<8x128xf32>
      %551 = arith.addf %550, %549 : vector<8x128xf32>
      %552 = vector.broadcast %48 : vector<8x1xf32> to vector<8x128xf32>
      %553 = arith.mulf %538, %552 : vector<8x128xf32>
      %554 = vector.broadcast %3 : vector<8x1xf32> to vector<8x128xf32>
      %555 = arith.addf %554, %553 : vector<8x128xf32>
      %556 = vector.broadcast %52 : vector<8x1xf32> to vector<8x128xf32>
      %557 = arith.mulf %538, %556 : vector<8x128xf32>
      %558 = vector.broadcast %7 : vector<8x1xf32> to vector<8x128xf32>
      %559 = arith.addf %558, %557 : vector<8x128xf32>
      %cst_73 = arith.constant dense<true> : vector<8x128xi1>
      %560 = arith.xori %543, %cst_73 : vector<8x128xi1>
      %561 = arith.cmpf ogt, %538, %532 : vector<8x128xf32>
      %562 = arith.andi %560, %561 : vector<8x128xi1>
      %563 = arith.mulf %547, %559 : vector<8x128xf32>
      %564 = arith.mulf %555, %551 : vector<8x128xf32>
      %565 = arith.subf %563, %564 : vector<8x128xf32>
      %cst_74 = arith.constant 0.000000e+00 : f32
      %566 = vector.broadcast %cst_74 : f32 to vector<8x128xf32>
      %567 = arith.select %562, %565, %566 : vector<8x128xi1>, vector<8x128xf32>
      %cst_75 = arith.constant 0.000000e+00 : f32
      %568 = vector.broadcast %cst_75 : f32 to vector<8x128xf32>
      %569 = arith.addf %568, %567 : vector<8x128xf32>
      %570 = arith.subf %331, %279 : vector<8x128xf32>
      %571 = vector.broadcast %208 : vector<1x128xf32> to vector<8x128xf32>
      %572 = vector.broadcast %61 : vector<8x1xf32> to vector<8x128xf32>
      %573 = arith.mulf %571, %572 : vector<8x128xf32>
      %574 = math.absf %570 : vector<8x128xf32>
      %575 = arith.cmpf ole, %574, %573 : vector<8x128xf32>
      %cst_76 = arith.constant 0.000000e+00 : f32
      %576 = vector.broadcast %cst_76 : f32 to vector<8x128xf32>
      %577 = arith.subf %576, %279 : vector<8x128xf32>
      %cst_77 = arith.constant 1.000000e+00 : f32
      %578 = vector.broadcast %cst_77 : f32 to vector<8x128xf32>
      %579 = arith.select %575, %578, %570 : vector<8x128xi1>, vector<8x128xf32>
      %580 = tpu.reciprocal %579 {approx = true} : vector<8x128xf32> -> vector<8x128xf32>
      %581 = arith.mulf %577, %580 : vector<8x128xf32>
      %cst_78 = arith.constant dense<true> : vector<8x128xi1>
      %582 = arith.xori %575, %cst_78 : vector<8x128xi1>
      %cst_79 = arith.constant 0.000000e+00 : f32
      %583 = vector.broadcast %cst_79 : f32 to vector<8x128xf32>
      %584 = arith.cmpf ogt, %570, %583 : vector<8x128xf32>
      %585 = arith.andi %582, %584 : vector<8x128xi1>
      %cst_80 = arith.constant 0.000000e+00 : f32
      %586 = vector.broadcast %cst_80 : f32 to vector<8x128xf32>
      %587 = arith.maximumf %586, %581 : vector<8x128xf32>
      %cst_81 = arith.constant 0.000000e+00 : f32
      %588 = vector.broadcast %cst_81 : f32 to vector<8x128xf32>
      %589 = arith.select %585, %587, %588 : vector<8x128xi1>, vector<8x128xf32>
      %cst_82 = arith.constant dense<true> : vector<8x128xi1>
      %590 = arith.xori %575, %cst_82 : vector<8x128xi1>
      %cst_83 = arith.constant 0.000000e+00 : f32
      %591 = vector.broadcast %cst_83 : f32 to vector<8x128xf32>
      %592 = arith.cmpf olt, %570, %591 : vector<8x128xf32>
      %593 = arith.andi %590, %592 : vector<8x128xi1>
      %cst_84 = arith.constant 1.000000e+00 : f32
      %594 = vector.broadcast %cst_84 : f32 to vector<8x128xf32>
      %595 = arith.minimumf %594, %581 : vector<8x128xf32>
      %cst_85 = arith.constant 1.000000e+00 : f32
      %596 = vector.broadcast %cst_85 : f32 to vector<8x128xf32>
      %597 = arith.select %593, %595, %596 : vector<8x128xi1>, vector<8x128xf32>
      %cst_86 = arith.constant 0.000000e+00 : f32
      %598 = vector.broadcast %cst_86 : f32 to vector<8x128xf32>
      %599 = arith.subf %598, %573 : vector<8x128xf32>
      %600 = arith.cmpf olt, %279, %599 : vector<8x128xf32>
      %601 = arith.andi %575, %600 : vector<8x128xi1>
      %false_87 = arith.constant false
      %602 = vector.broadcast %false_87 : i1 to vector<8x128xi1>
      %603 = arith.ori %602, %601 : vector<8x128xi1>
      %604 = arith.subf %344, %292 : vector<8x128xf32>
      %605 = vector.broadcast %210 : vector<1x128xf32> to vector<8x128xf32>
      %606 = vector.broadcast %61 : vector<8x1xf32> to vector<8x128xf32>
      %607 = arith.mulf %605, %606 : vector<8x128xf32>
      %608 = math.absf %604 : vector<8x128xf32>
      %609 = arith.cmpf ole, %608, %607 : vector<8x128xf32>
      %cst_88 = arith.constant 0.000000e+00 : f32
      %610 = vector.broadcast %cst_88 : f32 to vector<8x128xf32>
      %611 = arith.subf %610, %292 : vector<8x128xf32>
      %cst_89 = arith.constant 1.000000e+00 : f32
      %612 = vector.broadcast %cst_89 : f32 to vector<8x128xf32>
      %613 = arith.select %609, %612, %604 : vector<8x128xi1>, vector<8x128xf32>
      %614 = tpu.reciprocal %613 {approx = true} : vector<8x128xf32> -> vector<8x128xf32>
      %615 = arith.mulf %611, %614 : vector<8x128xf32>
      %cst_90 = arith.constant dense<true> : vector<8x128xi1>
      %616 = arith.xori %609, %cst_90 : vector<8x128xi1>
      %cst_91 = arith.constant 0.000000e+00 : f32
      %617 = vector.broadcast %cst_91 : f32 to vector<8x128xf32>
      %618 = arith.cmpf ogt, %604, %617 : vector<8x128xf32>
      %619 = arith.andi %616, %618 : vector<8x128xi1>
      %620 = arith.maximumf %589, %615 : vector<8x128xf32>
      %621 = arith.select %619, %620, %589 : vector<8x128xi1>, vector<8x128xf32>
      %cst_92 = arith.constant dense<true> : vector<8x128xi1>
      %622 = arith.xori %609, %cst_92 : vector<8x128xi1>
      %cst_93 = arith.constant 0.000000e+00 : f32
      %623 = vector.broadcast %cst_93 : f32 to vector<8x128xf32>
      %624 = arith.cmpf olt, %604, %623 : vector<8x128xf32>
      %625 = arith.andi %622, %624 : vector<8x128xi1>
      %626 = arith.minimumf %597, %615 : vector<8x128xf32>
      %627 = arith.select %625, %626, %597 : vector<8x128xi1>, vector<8x128xf32>
      %cst_94 = arith.constant 0.000000e+00 : f32
      %628 = vector.broadcast %cst_94 : f32 to vector<8x128xf32>
      %629 = arith.subf %628, %607 : vector<8x128xf32>
      %630 = arith.cmpf olt, %292, %629 : vector<8x128xf32>
      %631 = arith.andi %609, %630 : vector<8x128xi1>
      %632 = arith.ori %603, %631 : vector<8x128xi1>
      %633 = arith.subf %357, %305 : vector<8x128xf32>
      %634 = vector.broadcast %212 : vector<1x128xf32> to vector<8x128xf32>
      %635 = vector.broadcast %61 : vector<8x1xf32> to vector<8x128xf32>
      %636 = arith.mulf %634, %635 : vector<8x128xf32>
      %637 = math.absf %633 : vector<8x128xf32>
      %638 = arith.cmpf ole, %637, %636 : vector<8x128xf32>
      %cst_95 = arith.constant 0.000000e+00 : f32
      %639 = vector.broadcast %cst_95 : f32 to vector<8x128xf32>
      %640 = arith.subf %639, %305 : vector<8x128xf32>
      %cst_96 = arith.constant 1.000000e+00 : f32
      %641 = vector.broadcast %cst_96 : f32 to vector<8x128xf32>
      %642 = arith.select %638, %641, %633 : vector<8x128xi1>, vector<8x128xf32>
      %643 = tpu.reciprocal %642 {approx = true} : vector<8x128xf32> -> vector<8x128xf32>
      %644 = arith.mulf %640, %643 : vector<8x128xf32>
      %cst_97 = arith.constant dense<true> : vector<8x128xi1>
      %645 = arith.xori %638, %cst_97 : vector<8x128xi1>
      %cst_98 = arith.constant 0.000000e+00 : f32
      %646 = vector.broadcast %cst_98 : f32 to vector<8x128xf32>
      %647 = arith.cmpf ogt, %633, %646 : vector<8x128xf32>
      %648 = arith.andi %645, %647 : vector<8x128xi1>
      %649 = arith.maximumf %621, %644 : vector<8x128xf32>
      %650 = arith.select %648, %649, %621 : vector<8x128xi1>, vector<8x128xf32>
      %cst_99 = arith.constant dense<true> : vector<8x128xi1>
      %651 = arith.xori %638, %cst_99 : vector<8x128xi1>
      %cst_100 = arith.constant 0.000000e+00 : f32
      %652 = vector.broadcast %cst_100 : f32 to vector<8x128xf32>
      %653 = arith.cmpf olt, %633, %652 : vector<8x128xf32>
      %654 = arith.andi %651, %653 : vector<8x128xi1>
      %655 = arith.minimumf %627, %644 : vector<8x128xf32>
      %656 = arith.select %654, %655, %627 : vector<8x128xi1>, vector<8x128xf32>
      %cst_101 = arith.constant 0.000000e+00 : f32
      %657 = vector.broadcast %cst_101 : f32 to vector<8x128xf32>
      %658 = arith.subf %657, %636 : vector<8x128xf32>
      %659 = arith.cmpf olt, %305, %658 : vector<8x128xf32>
      %660 = arith.andi %638, %659 : vector<8x128xi1>
      %661 = arith.ori %632, %660 : vector<8x128xi1>
      %662 = arith.subf %370, %318 : vector<8x128xf32>
      %663 = vector.broadcast %214 : vector<1x128xf32> to vector<8x128xf32>
      %664 = vector.broadcast %61 : vector<8x1xf32> to vector<8x128xf32>
      %665 = arith.mulf %663, %664 : vector<8x128xf32>
      %666 = math.absf %662 : vector<8x128xf32>
      %667 = arith.cmpf ole, %666, %665 : vector<8x128xf32>
      %cst_102 = arith.constant 0.000000e+00 : f32
      %668 = vector.broadcast %cst_102 : f32 to vector<8x128xf32>
      %669 = arith.subf %668, %318 : vector<8x128xf32>
      %cst_103 = arith.constant 1.000000e+00 : f32
      %670 = vector.broadcast %cst_103 : f32 to vector<8x128xf32>
      %671 = arith.select %667, %670, %662 : vector<8x128xi1>, vector<8x128xf32>
      %672 = tpu.reciprocal %671 {approx = true} : vector<8x128xf32> -> vector<8x128xf32>
      %673 = arith.mulf %669, %672 : vector<8x128xf32>
      %cst_104 = arith.constant dense<true> : vector<8x128xi1>
      %674 = arith.xori %667, %cst_104 : vector<8x128xi1>
      %cst_105 = arith.constant 0.000000e+00 : f32
      %675 = vector.broadcast %cst_105 : f32 to vector<8x128xf32>
      %676 = arith.cmpf ogt, %662, %675 : vector<8x128xf32>
      %677 = arith.andi %674, %676 : vector<8x128xi1>
      %678 = arith.maximumf %650, %673 : vector<8x128xf32>
      %679 = arith.select %677, %678, %650 : vector<8x128xi1>, vector<8x128xf32>
      %cst_106 = arith.constant dense<true> : vector<8x128xi1>
      %680 = arith.xori %667, %cst_106 : vector<8x128xi1>
      %cst_107 = arith.constant 0.000000e+00 : f32
      %681 = vector.broadcast %cst_107 : f32 to vector<8x128xf32>
      %682 = arith.cmpf olt, %662, %681 : vector<8x128xf32>
      %683 = arith.andi %680, %682 : vector<8x128xi1>
      %684 = arith.minimumf %656, %673 : vector<8x128xf32>
      %685 = arith.select %683, %684, %656 : vector<8x128xi1>, vector<8x128xf32>
      %cst_108 = arith.constant 0.000000e+00 : f32
      %686 = vector.broadcast %cst_108 : f32 to vector<8x128xf32>
      %687 = arith.subf %686, %665 : vector<8x128xf32>
      %688 = arith.cmpf olt, %318, %687 : vector<8x128xf32>
      %689 = arith.andi %667, %688 : vector<8x128xi1>
      %690 = arith.ori %661, %689 : vector<8x128xi1>
      %691 = vector.broadcast %49 : vector<8x1xf32> to vector<8x128xf32>
      %692 = arith.mulf %679, %691 : vector<8x128xf32>
      %693 = vector.broadcast %4 : vector<8x1xf32> to vector<8x128xf32>
      %694 = arith.addf %693, %692 : vector<8x128xf32>
      %695 = vector.broadcast %53 : vector<8x1xf32> to vector<8x128xf32>
      %696 = arith.mulf %679, %695 : vector<8x128xf32>
      %697 = vector.broadcast %8 : vector<8x1xf32> to vector<8x128xf32>
      %698 = arith.addf %697, %696 : vector<8x128xf32>
      %699 = vector.broadcast %49 : vector<8x1xf32> to vector<8x128xf32>
      %700 = arith.mulf %685, %699 : vector<8x128xf32>
      %701 = vector.broadcast %4 : vector<8x1xf32> to vector<8x128xf32>
      %702 = arith.addf %701, %700 : vector<8x128xf32>
      %703 = vector.broadcast %53 : vector<8x1xf32> to vector<8x128xf32>
      %704 = arith.mulf %685, %703 : vector<8x128xf32>
      %705 = vector.broadcast %8 : vector<8x1xf32> to vector<8x128xf32>
      %706 = arith.addf %705, %704 : vector<8x128xf32>
      %cst_109 = arith.constant dense<true> : vector<8x128xi1>
      %707 = arith.xori %690, %cst_109 : vector<8x128xi1>
      %708 = arith.cmpf ogt, %685, %679 : vector<8x128xf32>
      %709 = arith.andi %707, %708 : vector<8x128xi1>
      %710 = arith.mulf %694, %706 : vector<8x128xf32>
      %711 = arith.mulf %702, %698 : vector<8x128xf32>
      %712 = arith.subf %710, %711 : vector<8x128xf32>
      %cst_110 = arith.constant 0.000000e+00 : f32
      %713 = vector.broadcast %cst_110 : f32 to vector<8x128xf32>
      %714 = arith.select %709, %712, %713 : vector<8x128xi1>, vector<8x128xf32>
      %715 = arith.addf %569, %714 : vector<8x128xf32>
      %716 = arith.subf %383, %331 : vector<8x128xf32>
      %717 = vector.broadcast %208 : vector<1x128xf32> to vector<8x128xf32>
      %718 = vector.broadcast %64 : vector<8x1xf32> to vector<8x128xf32>
      %719 = arith.mulf %717, %718 : vector<8x128xf32>
      %720 = math.absf %716 : vector<8x128xf32>
      %721 = arith.cmpf ole, %720, %719 : vector<8x128xf32>
      %cst_111 = arith.constant 0.000000e+00 : f32
      %722 = vector.broadcast %cst_111 : f32 to vector<8x128xf32>
      %723 = arith.subf %722, %331 : vector<8x128xf32>
      %cst_112 = arith.constant 1.000000e+00 : f32
      %724 = vector.broadcast %cst_112 : f32 to vector<8x128xf32>
      %725 = arith.select %721, %724, %716 : vector<8x128xi1>, vector<8x128xf32>
      %726 = tpu.reciprocal %725 {approx = true} : vector<8x128xf32> -> vector<8x128xf32>
      %727 = arith.mulf %723, %726 : vector<8x128xf32>
      %cst_113 = arith.constant dense<true> : vector<8x128xi1>
      %728 = arith.xori %721, %cst_113 : vector<8x128xi1>
      %cst_114 = arith.constant 0.000000e+00 : f32
      %729 = vector.broadcast %cst_114 : f32 to vector<8x128xf32>
      %730 = arith.cmpf ogt, %716, %729 : vector<8x128xf32>
      %731 = arith.andi %728, %730 : vector<8x128xi1>
      %cst_115 = arith.constant 0.000000e+00 : f32
      %732 = vector.broadcast %cst_115 : f32 to vector<8x128xf32>
      %733 = arith.maximumf %732, %727 : vector<8x128xf32>
      %cst_116 = arith.constant 0.000000e+00 : f32
      %734 = vector.broadcast %cst_116 : f32 to vector<8x128xf32>
      %735 = arith.select %731, %733, %734 : vector<8x128xi1>, vector<8x128xf32>
      %cst_117 = arith.constant dense<true> : vector<8x128xi1>
      %736 = arith.xori %721, %cst_117 : vector<8x128xi1>
      %cst_118 = arith.constant 0.000000e+00 : f32
      %737 = vector.broadcast %cst_118 : f32 to vector<8x128xf32>
      %738 = arith.cmpf olt, %716, %737 : vector<8x128xf32>
      %739 = arith.andi %736, %738 : vector<8x128xi1>
      %cst_119 = arith.constant 1.000000e+00 : f32
      %740 = vector.broadcast %cst_119 : f32 to vector<8x128xf32>
      %741 = arith.minimumf %740, %727 : vector<8x128xf32>
      %cst_120 = arith.constant 1.000000e+00 : f32
      %742 = vector.broadcast %cst_120 : f32 to vector<8x128xf32>
      %743 = arith.select %739, %741, %742 : vector<8x128xi1>, vector<8x128xf32>
      %cst_121 = arith.constant 0.000000e+00 : f32
      %744 = vector.broadcast %cst_121 : f32 to vector<8x128xf32>
      %745 = arith.subf %744, %719 : vector<8x128xf32>
      %746 = arith.cmpf olt, %331, %745 : vector<8x128xf32>
      %747 = arith.andi %721, %746 : vector<8x128xi1>
      %false_122 = arith.constant false
      %748 = vector.broadcast %false_122 : i1 to vector<8x128xi1>
      %749 = arith.ori %748, %747 : vector<8x128xi1>
      %750 = arith.subf %396, %344 : vector<8x128xf32>
      %751 = vector.broadcast %210 : vector<1x128xf32> to vector<8x128xf32>
      %752 = vector.broadcast %64 : vector<8x1xf32> to vector<8x128xf32>
      %753 = arith.mulf %751, %752 : vector<8x128xf32>
      %754 = math.absf %750 : vector<8x128xf32>
      %755 = arith.cmpf ole, %754, %753 : vector<8x128xf32>
      %cst_123 = arith.constant 0.000000e+00 : f32
      %756 = vector.broadcast %cst_123 : f32 to vector<8x128xf32>
      %757 = arith.subf %756, %344 : vector<8x128xf32>
      %cst_124 = arith.constant 1.000000e+00 : f32
      %758 = vector.broadcast %cst_124 : f32 to vector<8x128xf32>
      %759 = arith.select %755, %758, %750 : vector<8x128xi1>, vector<8x128xf32>
      %760 = tpu.reciprocal %759 {approx = true} : vector<8x128xf32> -> vector<8x128xf32>
      %761 = arith.mulf %757, %760 : vector<8x128xf32>
      %cst_125 = arith.constant dense<true> : vector<8x128xi1>
      %762 = arith.xori %755, %cst_125 : vector<8x128xi1>
      %cst_126 = arith.constant 0.000000e+00 : f32
      %763 = vector.broadcast %cst_126 : f32 to vector<8x128xf32>
      %764 = arith.cmpf ogt, %750, %763 : vector<8x128xf32>
      %765 = arith.andi %762, %764 : vector<8x128xi1>
      %766 = arith.maximumf %735, %761 : vector<8x128xf32>
      %767 = arith.select %765, %766, %735 : vector<8x128xi1>, vector<8x128xf32>
      %cst_127 = arith.constant dense<true> : vector<8x128xi1>
      %768 = arith.xori %755, %cst_127 : vector<8x128xi1>
      %cst_128 = arith.constant 0.000000e+00 : f32
      %769 = vector.broadcast %cst_128 : f32 to vector<8x128xf32>
      %770 = arith.cmpf olt, %750, %769 : vector<8x128xf32>
      %771 = arith.andi %768, %770 : vector<8x128xi1>
      %772 = arith.minimumf %743, %761 : vector<8x128xf32>
      %773 = arith.select %771, %772, %743 : vector<8x128xi1>, vector<8x128xf32>
      %cst_129 = arith.constant 0.000000e+00 : f32
      %774 = vector.broadcast %cst_129 : f32 to vector<8x128xf32>
      %775 = arith.subf %774, %753 : vector<8x128xf32>
      %776 = arith.cmpf olt, %344, %775 : vector<8x128xf32>
      %777 = arith.andi %755, %776 : vector<8x128xi1>
      %778 = arith.ori %749, %777 : vector<8x128xi1>
      %779 = arith.subf %409, %357 : vector<8x128xf32>
      %780 = vector.broadcast %212 : vector<1x128xf32> to vector<8x128xf32>
      %781 = vector.broadcast %64 : vector<8x1xf32> to vector<8x128xf32>
      %782 = arith.mulf %780, %781 : vector<8x128xf32>
      %783 = math.absf %779 : vector<8x128xf32>
      %784 = arith.cmpf ole, %783, %782 : vector<8x128xf32>
      %cst_130 = arith.constant 0.000000e+00 : f32
      %785 = vector.broadcast %cst_130 : f32 to vector<8x128xf32>
      %786 = arith.subf %785, %357 : vector<8x128xf32>
      %cst_131 = arith.constant 1.000000e+00 : f32
      %787 = vector.broadcast %cst_131 : f32 to vector<8x128xf32>
      %788 = arith.select %784, %787, %779 : vector<8x128xi1>, vector<8x128xf32>
      %789 = tpu.reciprocal %788 {approx = true} : vector<8x128xf32> -> vector<8x128xf32>
      %790 = arith.mulf %786, %789 : vector<8x128xf32>
      %cst_132 = arith.constant dense<true> : vector<8x128xi1>
      %791 = arith.xori %784, %cst_132 : vector<8x128xi1>
      %cst_133 = arith.constant 0.000000e+00 : f32
      %792 = vector.broadcast %cst_133 : f32 to vector<8x128xf32>
      %793 = arith.cmpf ogt, %779, %792 : vector<8x128xf32>
      %794 = arith.andi %791, %793 : vector<8x128xi1>
      %795 = arith.maximumf %767, %790 : vector<8x128xf32>
      %796 = arith.select %794, %795, %767 : vector<8x128xi1>, vector<8x128xf32>
      %cst_134 = arith.constant dense<true> : vector<8x128xi1>
      %797 = arith.xori %784, %cst_134 : vector<8x128xi1>
      %cst_135 = arith.constant 0.000000e+00 : f32
      %798 = vector.broadcast %cst_135 : f32 to vector<8x128xf32>
      %799 = arith.cmpf olt, %779, %798 : vector<8x128xf32>
      %800 = arith.andi %797, %799 : vector<8x128xi1>
      %801 = arith.minimumf %773, %790 : vector<8x128xf32>
      %802 = arith.select %800, %801, %773 : vector<8x128xi1>, vector<8x128xf32>
      %cst_136 = arith.constant 0.000000e+00 : f32
      %803 = vector.broadcast %cst_136 : f32 to vector<8x128xf32>
      %804 = arith.subf %803, %782 : vector<8x128xf32>
      %805 = arith.cmpf olt, %357, %804 : vector<8x128xf32>
      %806 = arith.andi %784, %805 : vector<8x128xi1>
      %807 = arith.ori %778, %806 : vector<8x128xi1>
      %808 = arith.subf %422, %370 : vector<8x128xf32>
      %809 = vector.broadcast %214 : vector<1x128xf32> to vector<8x128xf32>
      %810 = vector.broadcast %64 : vector<8x1xf32> to vector<8x128xf32>
      %811 = arith.mulf %809, %810 : vector<8x128xf32>
      %812 = math.absf %808 : vector<8x128xf32>
      %813 = arith.cmpf ole, %812, %811 : vector<8x128xf32>
      %cst_137 = arith.constant 0.000000e+00 : f32
      %814 = vector.broadcast %cst_137 : f32 to vector<8x128xf32>
      %815 = arith.subf %814, %370 : vector<8x128xf32>
      %cst_138 = arith.constant 1.000000e+00 : f32
      %816 = vector.broadcast %cst_138 : f32 to vector<8x128xf32>
      %817 = arith.select %813, %816, %808 : vector<8x128xi1>, vector<8x128xf32>
      %818 = tpu.reciprocal %817 {approx = true} : vector<8x128xf32> -> vector<8x128xf32>
      %819 = arith.mulf %815, %818 : vector<8x128xf32>
      %cst_139 = arith.constant dense<true> : vector<8x128xi1>
      %820 = arith.xori %813, %cst_139 : vector<8x128xi1>
      %cst_140 = arith.constant 0.000000e+00 : f32
      %821 = vector.broadcast %cst_140 : f32 to vector<8x128xf32>
      %822 = arith.cmpf ogt, %808, %821 : vector<8x128xf32>
      %823 = arith.andi %820, %822 : vector<8x128xi1>
      %824 = arith.maximumf %796, %819 : vector<8x128xf32>
      %825 = arith.select %823, %824, %796 : vector<8x128xi1>, vector<8x128xf32>
      %cst_141 = arith.constant dense<true> : vector<8x128xi1>
      %826 = arith.xori %813, %cst_141 : vector<8x128xi1>
      %cst_142 = arith.constant 0.000000e+00 : f32
      %827 = vector.broadcast %cst_142 : f32 to vector<8x128xf32>
      %828 = arith.cmpf olt, %808, %827 : vector<8x128xf32>
      %829 = arith.andi %826, %828 : vector<8x128xi1>
      %830 = arith.minimumf %802, %819 : vector<8x128xf32>
      %831 = arith.select %829, %830, %802 : vector<8x128xi1>, vector<8x128xf32>
      %cst_143 = arith.constant 0.000000e+00 : f32
      %832 = vector.broadcast %cst_143 : f32 to vector<8x128xf32>
      %833 = arith.subf %832, %811 : vector<8x128xf32>
      %834 = arith.cmpf olt, %370, %833 : vector<8x128xf32>
      %835 = arith.andi %813, %834 : vector<8x128xi1>
      %836 = arith.ori %807, %835 : vector<8x128xi1>
      %837 = vector.broadcast %50 : vector<8x1xf32> to vector<8x128xf32>
      %838 = arith.mulf %825, %837 : vector<8x128xf32>
      %839 = vector.broadcast %5 : vector<8x1xf32> to vector<8x128xf32>
      %840 = arith.addf %839, %838 : vector<8x128xf32>
      %841 = vector.broadcast %54 : vector<8x1xf32> to vector<8x128xf32>
      %842 = arith.mulf %825, %841 : vector<8x128xf32>
      %843 = vector.broadcast %9 : vector<8x1xf32> to vector<8x128xf32>
      %844 = arith.addf %843, %842 : vector<8x128xf32>
      %845 = vector.broadcast %50 : vector<8x1xf32> to vector<8x128xf32>
      %846 = arith.mulf %831, %845 : vector<8x128xf32>
      %847 = vector.broadcast %5 : vector<8x1xf32> to vector<8x128xf32>
      %848 = arith.addf %847, %846 : vector<8x128xf32>
      %849 = vector.broadcast %54 : vector<8x1xf32> to vector<8x128xf32>
      %850 = arith.mulf %831, %849 : vector<8x128xf32>
      %851 = vector.broadcast %9 : vector<8x1xf32> to vector<8x128xf32>
      %852 = arith.addf %851, %850 : vector<8x128xf32>
      %cst_144 = arith.constant dense<true> : vector<8x128xi1>
      %853 = arith.xori %836, %cst_144 : vector<8x128xi1>
      %854 = arith.cmpf ogt, %831, %825 : vector<8x128xf32>
      %855 = arith.andi %853, %854 : vector<8x128xi1>
      %856 = arith.mulf %840, %852 : vector<8x128xf32>
      %857 = arith.mulf %848, %844 : vector<8x128xf32>
      %858 = arith.subf %856, %857 : vector<8x128xf32>
      %cst_145 = arith.constant 0.000000e+00 : f32
      %859 = vector.broadcast %cst_145 : f32 to vector<8x128xf32>
      %860 = arith.select %855, %858, %859 : vector<8x128xi1>, vector<8x128xf32>
      %861 = arith.addf %715, %860 : vector<8x128xf32>
      %862 = arith.subf %227, %383 : vector<8x128xf32>
      %863 = vector.broadcast %208 : vector<1x128xf32> to vector<8x128xf32>
      %864 = vector.broadcast %67 : vector<8x1xf32> to vector<8x128xf32>
      %865 = arith.mulf %863, %864 : vector<8x128xf32>
      %866 = math.absf %862 : vector<8x128xf32>
      %867 = arith.cmpf ole, %866, %865 : vector<8x128xf32>
      %cst_146 = arith.constant 0.000000e+00 : f32
      %868 = vector.broadcast %cst_146 : f32 to vector<8x128xf32>
      %869 = arith.subf %868, %383 : vector<8x128xf32>
      %cst_147 = arith.constant 1.000000e+00 : f32
      %870 = vector.broadcast %cst_147 : f32 to vector<8x128xf32>
      %871 = arith.select %867, %870, %862 : vector<8x128xi1>, vector<8x128xf32>
      %872 = tpu.reciprocal %871 {approx = true} : vector<8x128xf32> -> vector<8x128xf32>
      %873 = arith.mulf %869, %872 : vector<8x128xf32>
      %cst_148 = arith.constant dense<true> : vector<8x128xi1>
      %874 = arith.xori %867, %cst_148 : vector<8x128xi1>
      %cst_149 = arith.constant 0.000000e+00 : f32
      %875 = vector.broadcast %cst_149 : f32 to vector<8x128xf32>
      %876 = arith.cmpf ogt, %862, %875 : vector<8x128xf32>
      %877 = arith.andi %874, %876 : vector<8x128xi1>
      %cst_150 = arith.constant 0.000000e+00 : f32
      %878 = vector.broadcast %cst_150 : f32 to vector<8x128xf32>
      %879 = arith.maximumf %878, %873 : vector<8x128xf32>
      %cst_151 = arith.constant 0.000000e+00 : f32
      %880 = vector.broadcast %cst_151 : f32 to vector<8x128xf32>
      %881 = arith.select %877, %879, %880 : vector<8x128xi1>, vector<8x128xf32>
      %cst_152 = arith.constant dense<true> : vector<8x128xi1>
      %882 = arith.xori %867, %cst_152 : vector<8x128xi1>
      %cst_153 = arith.constant 0.000000e+00 : f32
      %883 = vector.broadcast %cst_153 : f32 to vector<8x128xf32>
      %884 = arith.cmpf olt, %862, %883 : vector<8x128xf32>
      %885 = arith.andi %882, %884 : vector<8x128xi1>
      %cst_154 = arith.constant 1.000000e+00 : f32
      %886 = vector.broadcast %cst_154 : f32 to vector<8x128xf32>
      %887 = arith.minimumf %886, %873 : vector<8x128xf32>
      %cst_155 = arith.constant 1.000000e+00 : f32
      %888 = vector.broadcast %cst_155 : f32 to vector<8x128xf32>
      %889 = arith.select %885, %887, %888 : vector<8x128xi1>, vector<8x128xf32>
      %cst_156 = arith.constant 0.000000e+00 : f32
      %890 = vector.broadcast %cst_156 : f32 to vector<8x128xf32>
      %891 = arith.subf %890, %865 : vector<8x128xf32>
      %892 = arith.cmpf olt, %383, %891 : vector<8x128xf32>
      %893 = arith.andi %867, %892 : vector<8x128xi1>
      %false_157 = arith.constant false
      %894 = vector.broadcast %false_157 : i1 to vector<8x128xi1>
      %895 = arith.ori %894, %893 : vector<8x128xi1>
      %896 = arith.subf %240, %396 : vector<8x128xf32>
      %897 = vector.broadcast %210 : vector<1x128xf32> to vector<8x128xf32>
      %898 = vector.broadcast %67 : vector<8x1xf32> to vector<8x128xf32>
      %899 = arith.mulf %897, %898 : vector<8x128xf32>
      %900 = math.absf %896 : vector<8x128xf32>
      %901 = arith.cmpf ole, %900, %899 : vector<8x128xf32>
      %cst_158 = arith.constant 0.000000e+00 : f32
      %902 = vector.broadcast %cst_158 : f32 to vector<8x128xf32>
      %903 = arith.subf %902, %396 : vector<8x128xf32>
      %cst_159 = arith.constant 1.000000e+00 : f32
      %904 = vector.broadcast %cst_159 : f32 to vector<8x128xf32>
      %905 = arith.select %901, %904, %896 : vector<8x128xi1>, vector<8x128xf32>
      %906 = tpu.reciprocal %905 {approx = true} : vector<8x128xf32> -> vector<8x128xf32>
      %907 = arith.mulf %903, %906 : vector<8x128xf32>
      %cst_160 = arith.constant dense<true> : vector<8x128xi1>
      %908 = arith.xori %901, %cst_160 : vector<8x128xi1>
      %cst_161 = arith.constant 0.000000e+00 : f32
      %909 = vector.broadcast %cst_161 : f32 to vector<8x128xf32>
      %910 = arith.cmpf ogt, %896, %909 : vector<8x128xf32>
      %911 = arith.andi %908, %910 : vector<8x128xi1>
      %912 = arith.maximumf %881, %907 : vector<8x128xf32>
      %913 = arith.select %911, %912, %881 : vector<8x128xi1>, vector<8x128xf32>
      %cst_162 = arith.constant dense<true> : vector<8x128xi1>
      %914 = arith.xori %901, %cst_162 : vector<8x128xi1>
      %cst_163 = arith.constant 0.000000e+00 : f32
      %915 = vector.broadcast %cst_163 : f32 to vector<8x128xf32>
      %916 = arith.cmpf olt, %896, %915 : vector<8x128xf32>
      %917 = arith.andi %914, %916 : vector<8x128xi1>
      %918 = arith.minimumf %889, %907 : vector<8x128xf32>
      %919 = arith.select %917, %918, %889 : vector<8x128xi1>, vector<8x128xf32>
      %cst_164 = arith.constant 0.000000e+00 : f32
      %920 = vector.broadcast %cst_164 : f32 to vector<8x128xf32>
      %921 = arith.subf %920, %899 : vector<8x128xf32>
      %922 = arith.cmpf olt, %396, %921 : vector<8x128xf32>
      %923 = arith.andi %901, %922 : vector<8x128xi1>
      %924 = arith.ori %895, %923 : vector<8x128xi1>
      %925 = arith.subf %253, %409 : vector<8x128xf32>
      %926 = vector.broadcast %212 : vector<1x128xf32> to vector<8x128xf32>
      %927 = vector.broadcast %67 : vector<8x1xf32> to vector<8x128xf32>
      %928 = arith.mulf %926, %927 : vector<8x128xf32>
      %929 = math.absf %925 : vector<8x128xf32>
      %930 = arith.cmpf ole, %929, %928 : vector<8x128xf32>
      %cst_165 = arith.constant 0.000000e+00 : f32
      %931 = vector.broadcast %cst_165 : f32 to vector<8x128xf32>
      %932 = arith.subf %931, %409 : vector<8x128xf32>
      %cst_166 = arith.constant 1.000000e+00 : f32
      %933 = vector.broadcast %cst_166 : f32 to vector<8x128xf32>
      %934 = arith.select %930, %933, %925 : vector<8x128xi1>, vector<8x128xf32>
      %935 = tpu.reciprocal %934 {approx = true} : vector<8x128xf32> -> vector<8x128xf32>
      %936 = arith.mulf %932, %935 : vector<8x128xf32>
      %cst_167 = arith.constant dense<true> : vector<8x128xi1>
      %937 = arith.xori %930, %cst_167 : vector<8x128xi1>
      %cst_168 = arith.constant 0.000000e+00 : f32
      %938 = vector.broadcast %cst_168 : f32 to vector<8x128xf32>
      %939 = arith.cmpf ogt, %925, %938 : vector<8x128xf32>
      %940 = arith.andi %937, %939 : vector<8x128xi1>
      %941 = arith.maximumf %913, %936 : vector<8x128xf32>
      %942 = arith.select %940, %941, %913 : vector<8x128xi1>, vector<8x128xf32>
      %cst_169 = arith.constant dense<true> : vector<8x128xi1>
      %943 = arith.xori %930, %cst_169 : vector<8x128xi1>
      %cst_170 = arith.constant 0.000000e+00 : f32
      %944 = vector.broadcast %cst_170 : f32 to vector<8x128xf32>
      %945 = arith.cmpf olt, %925, %944 : vector<8x128xf32>
      %946 = arith.andi %943, %945 : vector<8x128xi1>
      %947 = arith.minimumf %919, %936 : vector<8x128xf32>
      %948 = arith.select %946, %947, %919 : vector<8x128xi1>, vector<8x128xf32>
      %cst_171 = arith.constant 0.000000e+00 : f32
      %949 = vector.broadcast %cst_171 : f32 to vector<8x128xf32>
      %950 = arith.subf %949, %928 : vector<8x128xf32>
      %951 = arith.cmpf olt, %409, %950 : vector<8x128xf32>
      %952 = arith.andi %930, %951 : vector<8x128xi1>
      %953 = arith.ori %924, %952 : vector<8x128xi1>
      %954 = arith.subf %266, %422 : vector<8x128xf32>
      %955 = vector.broadcast %214 : vector<1x128xf32> to vector<8x128xf32>
      %956 = vector.broadcast %67 : vector<8x1xf32> to vector<8x128xf32>
      %957 = arith.mulf %955, %956 : vector<8x128xf32>
      %958 = math.absf %954 : vector<8x128xf32>
      %959 = arith.cmpf ole, %958, %957 : vector<8x128xf32>
      %cst_172 = arith.constant 0.000000e+00 : f32
      %960 = vector.broadcast %cst_172 : f32 to vector<8x128xf32>
      %961 = arith.subf %960, %422 : vector<8x128xf32>
      %cst_173 = arith.constant 1.000000e+00 : f32
      %962 = vector.broadcast %cst_173 : f32 to vector<8x128xf32>
      %963 = arith.select %959, %962, %954 : vector<8x128xi1>, vector<8x128xf32>
      %964 = tpu.reciprocal %963 {approx = true} : vector<8x128xf32> -> vector<8x128xf32>
      %965 = arith.mulf %961, %964 : vector<8x128xf32>
      %cst_174 = arith.constant dense<true> : vector<8x128xi1>
      %966 = arith.xori %959, %cst_174 : vector<8x128xi1>
      %cst_175 = arith.constant 0.000000e+00 : f32
      %967 = vector.broadcast %cst_175 : f32 to vector<8x128xf32>
      %968 = arith.cmpf ogt, %954, %967 : vector<8x128xf32>
      %969 = arith.andi %966, %968 : vector<8x128xi1>
      %970 = arith.maximumf %942, %965 : vector<8x128xf32>
      %971 = arith.select %969, %970, %942 : vector<8x128xi1>, vector<8x128xf32>
      %cst_176 = arith.constant dense<true> : vector<8x128xi1>
      %972 = arith.xori %959, %cst_176 : vector<8x128xi1>
      %cst_177 = arith.constant 0.000000e+00 : f32
      %973 = vector.broadcast %cst_177 : f32 to vector<8x128xf32>
      %974 = arith.cmpf olt, %954, %973 : vector<8x128xf32>
      %975 = arith.andi %972, %974 : vector<8x128xi1>
      %976 = arith.minimumf %948, %965 : vector<8x128xf32>
      %977 = arith.select %975, %976, %948 : vector<8x128xi1>, vector<8x128xf32>
      %cst_178 = arith.constant 0.000000e+00 : f32
      %978 = vector.broadcast %cst_178 : f32 to vector<8x128xf32>
      %979 = arith.subf %978, %957 : vector<8x128xf32>
      %980 = arith.cmpf olt, %422, %979 : vector<8x128xf32>
      %981 = arith.andi %959, %980 : vector<8x128xi1>
      %982 = arith.ori %953, %981 : vector<8x128xi1>
      %983 = vector.broadcast %51 : vector<8x1xf32> to vector<8x128xf32>
      %984 = arith.mulf %971, %983 : vector<8x128xf32>
      %985 = vector.broadcast %6 : vector<8x1xf32> to vector<8x128xf32>
      %986 = arith.addf %985, %984 : vector<8x128xf32>
      %987 = vector.broadcast %55 : vector<8x1xf32> to vector<8x128xf32>
      %988 = arith.mulf %971, %987 : vector<8x128xf32>
      %989 = vector.broadcast %10 : vector<8x1xf32> to vector<8x128xf32>
      %990 = arith.addf %989, %988 : vector<8x128xf32>
      %991 = vector.broadcast %51 : vector<8x1xf32> to vector<8x128xf32>
      %992 = arith.mulf %977, %991 : vector<8x128xf32>
      %993 = vector.broadcast %6 : vector<8x1xf32> to vector<8x128xf32>
      %994 = arith.addf %993, %992 : vector<8x128xf32>
      %995 = vector.broadcast %55 : vector<8x1xf32> to vector<8x128xf32>
      %996 = arith.mulf %977, %995 : vector<8x128xf32>
      %997 = vector.broadcast %10 : vector<8x1xf32> to vector<8x128xf32>
      %998 = arith.addf %997, %996 : vector<8x128xf32>
      %cst_179 = arith.constant dense<true> : vector<8x128xi1>
      %999 = arith.xori %982, %cst_179 : vector<8x128xi1>
      %1000 = arith.cmpf ogt, %977, %971 : vector<8x128xf32>
      %1001 = arith.andi %999, %1000 : vector<8x128xi1>
      %1002 = arith.mulf %986, %998 : vector<8x128xf32>
      %1003 = arith.mulf %994, %990 : vector<8x128xf32>
      %1004 = arith.subf %1002, %1003 : vector<8x128xf32>
      %cst_180 = arith.constant 0.000000e+00 : f32
      %1005 = vector.broadcast %cst_180 : f32 to vector<8x128xf32>
      %1006 = arith.select %1001, %1004, %1005 : vector<8x128xi1>, vector<8x128xf32>
      %1007 = arith.addf %861, %1006 : vector<8x128xf32>
      %1008 = vector.broadcast %91 : vector<1x128xf32> to vector<8x128xf32>
      %1009 = vector.broadcast %7 : vector<8x1xf32> to vector<8x128xf32>
      %1010 = arith.subf %1008, %1009 : vector<8x128xf32>
      %1011 = vector.broadcast %48 : vector<8x1xf32> to vector<8x128xf32>
      %1012 = arith.mulf %1011, %1010 : vector<8x128xf32>
      %1013 = vector.broadcast %87 : vector<1x128xf32> to vector<8x128xf32>
      %1014 = vector.broadcast %3 : vector<8x1xf32> to vector<8x128xf32>
      %1015 = arith.subf %1013, %1014 : vector<8x128xf32>
      %1016 = vector.broadcast %52 : vector<8x1xf32> to vector<8x128xf32>
      %1017 = arith.mulf %1016, %1015 : vector<8x128xf32>
      %1018 = arith.subf %1012, %1017 : vector<8x128xf32>
      %1019 = vector.broadcast %47 : vector<8x1xf32> to vector<8x128xf32>
      %1020 = arith.mulf %1019, %1018 : vector<8x128xf32>
      %1021 = vector.broadcast %91 : vector<1x128xf32> to vector<8x128xf32>
      %1022 = vector.broadcast %8 : vector<8x1xf32> to vector<8x128xf32>
      %1023 = arith.subf %1021, %1022 : vector<8x128xf32>
      %1024 = vector.broadcast %49 : vector<8x1xf32> to vector<8x128xf32>
      %1025 = arith.mulf %1024, %1023 : vector<8x128xf32>
      %1026 = vector.broadcast %87 : vector<1x128xf32> to vector<8x128xf32>
      %1027 = vector.broadcast %4 : vector<8x1xf32> to vector<8x128xf32>
      %1028 = arith.subf %1026, %1027 : vector<8x128xf32>
      %1029 = vector.broadcast %53 : vector<8x1xf32> to vector<8x128xf32>
      %1030 = arith.mulf %1029, %1028 : vector<8x128xf32>
      %1031 = arith.subf %1025, %1030 : vector<8x128xf32>
      %1032 = vector.broadcast %47 : vector<8x1xf32> to vector<8x128xf32>
      %1033 = arith.mulf %1032, %1031 : vector<8x128xf32>
      %1034 = vector.broadcast %91 : vector<1x128xf32> to vector<8x128xf32>
      %1035 = vector.broadcast %9 : vector<8x1xf32> to vector<8x128xf32>
      %1036 = arith.subf %1034, %1035 : vector<8x128xf32>
      %1037 = vector.broadcast %50 : vector<8x1xf32> to vector<8x128xf32>
      %1038 = arith.mulf %1037, %1036 : vector<8x128xf32>
      %1039 = vector.broadcast %87 : vector<1x128xf32> to vector<8x128xf32>
      %1040 = vector.broadcast %5 : vector<8x1xf32> to vector<8x128xf32>
      %1041 = arith.subf %1039, %1040 : vector<8x128xf32>
      %1042 = vector.broadcast %54 : vector<8x1xf32> to vector<8x128xf32>
      %1043 = arith.mulf %1042, %1041 : vector<8x128xf32>
      %1044 = arith.subf %1038, %1043 : vector<8x128xf32>
      %1045 = vector.broadcast %47 : vector<8x1xf32> to vector<8x128xf32>
      %1046 = arith.mulf %1045, %1044 : vector<8x128xf32>
      %1047 = vector.broadcast %91 : vector<1x128xf32> to vector<8x128xf32>
      %1048 = vector.broadcast %10 : vector<8x1xf32> to vector<8x128xf32>
      %1049 = arith.subf %1047, %1048 : vector<8x128xf32>
      %1050 = vector.broadcast %51 : vector<8x1xf32> to vector<8x128xf32>
      %1051 = arith.mulf %1050, %1049 : vector<8x128xf32>
      %1052 = vector.broadcast %87 : vector<1x128xf32> to vector<8x128xf32>
      %1053 = vector.broadcast %6 : vector<8x1xf32> to vector<8x128xf32>
      %1054 = arith.subf %1052, %1053 : vector<8x128xf32>
      %1055 = vector.broadcast %55 : vector<8x1xf32> to vector<8x128xf32>
      %1056 = arith.mulf %1055, %1054 : vector<8x128xf32>
      %1057 = arith.subf %1051, %1056 : vector<8x128xf32>
      %1058 = vector.broadcast %47 : vector<8x1xf32> to vector<8x128xf32>
      %1059 = arith.mulf %1058, %1057 : vector<8x128xf32>
      %1060 = vector.broadcast %92 : vector<1x128xf32> to vector<8x128xf32>
      %1061 = vector.broadcast %7 : vector<8x1xf32> to vector<8x128xf32>
      %1062 = arith.subf %1060, %1061 : vector<8x128xf32>
      %1063 = vector.broadcast %48 : vector<8x1xf32> to vector<8x128xf32>
      %1064 = arith.mulf %1063, %1062 : vector<8x128xf32>
      %1065 = vector.broadcast %88 : vector<1x128xf32> to vector<8x128xf32>
      %1066 = vector.broadcast %3 : vector<8x1xf32> to vector<8x128xf32>
      %1067 = arith.subf %1065, %1066 : vector<8x128xf32>
      %1068 = vector.broadcast %52 : vector<8x1xf32> to vector<8x128xf32>
      %1069 = arith.mulf %1068, %1067 : vector<8x128xf32>
      %1070 = arith.subf %1064, %1069 : vector<8x128xf32>
      %1071 = vector.broadcast %47 : vector<8x1xf32> to vector<8x128xf32>
      %1072 = arith.mulf %1071, %1070 : vector<8x128xf32>
      %1073 = vector.broadcast %92 : vector<1x128xf32> to vector<8x128xf32>
      %1074 = vector.broadcast %8 : vector<8x1xf32> to vector<8x128xf32>
      %1075 = arith.subf %1073, %1074 : vector<8x128xf32>
      %1076 = vector.broadcast %49 : vector<8x1xf32> to vector<8x128xf32>
      %1077 = arith.mulf %1076, %1075 : vector<8x128xf32>
      %1078 = vector.broadcast %88 : vector<1x128xf32> to vector<8x128xf32>
      %1079 = vector.broadcast %4 : vector<8x1xf32> to vector<8x128xf32>
      %1080 = arith.subf %1078, %1079 : vector<8x128xf32>
      %1081 = vector.broadcast %53 : vector<8x1xf32> to vector<8x128xf32>
      %1082 = arith.mulf %1081, %1080 : vector<8x128xf32>
      %1083 = arith.subf %1077, %1082 : vector<8x128xf32>
      %1084 = vector.broadcast %47 : vector<8x1xf32> to vector<8x128xf32>
      %1085 = arith.mulf %1084, %1083 : vector<8x128xf32>
      %1086 = vector.broadcast %92 : vector<1x128xf32> to vector<8x128xf32>
      %1087 = vector.broadcast %9 : vector<8x1xf32> to vector<8x128xf32>
      %1088 = arith.subf %1086, %1087 : vector<8x128xf32>
      %1089 = vector.broadcast %50 : vector<8x1xf32> to vector<8x128xf32>
      %1090 = arith.mulf %1089, %1088 : vector<8x128xf32>
      %1091 = vector.broadcast %88 : vector<1x128xf32> to vector<8x128xf32>
      %1092 = vector.broadcast %5 : vector<8x1xf32> to vector<8x128xf32>
      %1093 = arith.subf %1091, %1092 : vector<8x128xf32>
      %1094 = vector.broadcast %54 : vector<8x1xf32> to vector<8x128xf32>
      %1095 = arith.mulf %1094, %1093 : vector<8x128xf32>
      %1096 = arith.subf %1090, %1095 : vector<8x128xf32>
      %1097 = vector.broadcast %47 : vector<8x1xf32> to vector<8x128xf32>
      %1098 = arith.mulf %1097, %1096 : vector<8x128xf32>
      %1099 = vector.broadcast %92 : vector<1x128xf32> to vector<8x128xf32>
      %1100 = vector.broadcast %10 : vector<8x1xf32> to vector<8x128xf32>
      %1101 = arith.subf %1099, %1100 : vector<8x128xf32>
      %1102 = vector.broadcast %51 : vector<8x1xf32> to vector<8x128xf32>
      %1103 = arith.mulf %1102, %1101 : vector<8x128xf32>
      %1104 = vector.broadcast %88 : vector<1x128xf32> to vector<8x128xf32>
      %1105 = vector.broadcast %6 : vector<8x1xf32> to vector<8x128xf32>
      %1106 = arith.subf %1104, %1105 : vector<8x128xf32>
      %1107 = vector.broadcast %55 : vector<8x1xf32> to vector<8x128xf32>
      %1108 = arith.mulf %1107, %1106 : vector<8x128xf32>
      %1109 = arith.subf %1103, %1108 : vector<8x128xf32>
      %1110 = vector.broadcast %47 : vector<8x1xf32> to vector<8x128xf32>
      %1111 = arith.mulf %1110, %1109 : vector<8x128xf32>
      %1112 = vector.broadcast %93 : vector<1x128xf32> to vector<8x128xf32>
      %1113 = vector.broadcast %7 : vector<8x1xf32> to vector<8x128xf32>
      %1114 = arith.subf %1112, %1113 : vector<8x128xf32>
      %1115 = vector.broadcast %48 : vector<8x1xf32> to vector<8x128xf32>
      %1116 = arith.mulf %1115, %1114 : vector<8x128xf32>
      %1117 = vector.broadcast %89 : vector<1x128xf32> to vector<8x128xf32>
      %1118 = vector.broadcast %3 : vector<8x1xf32> to vector<8x128xf32>
      %1119 = arith.subf %1117, %1118 : vector<8x128xf32>
      %1120 = vector.broadcast %52 : vector<8x1xf32> to vector<8x128xf32>
      %1121 = arith.mulf %1120, %1119 : vector<8x128xf32>
      %1122 = arith.subf %1116, %1121 : vector<8x128xf32>
      %1123 = vector.broadcast %47 : vector<8x1xf32> to vector<8x128xf32>
      %1124 = arith.mulf %1123, %1122 : vector<8x128xf32>
      %1125 = vector.broadcast %93 : vector<1x128xf32> to vector<8x128xf32>
      %1126 = vector.broadcast %8 : vector<8x1xf32> to vector<8x128xf32>
      %1127 = arith.subf %1125, %1126 : vector<8x128xf32>
      %1128 = vector.broadcast %49 : vector<8x1xf32> to vector<8x128xf32>
      %1129 = arith.mulf %1128, %1127 : vector<8x128xf32>
      %1130 = vector.broadcast %89 : vector<1x128xf32> to vector<8x128xf32>
      %1131 = vector.broadcast %4 : vector<8x1xf32> to vector<8x128xf32>
      %1132 = arith.subf %1130, %1131 : vector<8x128xf32>
      %1133 = vector.broadcast %53 : vector<8x1xf32> to vector<8x128xf32>
      %1134 = arith.mulf %1133, %1132 : vector<8x128xf32>
      %1135 = arith.subf %1129, %1134 : vector<8x128xf32>
      %1136 = vector.broadcast %47 : vector<8x1xf32> to vector<8x128xf32>
      %1137 = arith.mulf %1136, %1135 : vector<8x128xf32>
      %1138 = vector.broadcast %93 : vector<1x128xf32> to vector<8x128xf32>
      %1139 = vector.broadcast %9 : vector<8x1xf32> to vector<8x128xf32>
      %1140 = arith.subf %1138, %1139 : vector<8x128xf32>
      %1141 = vector.broadcast %50 : vector<8x1xf32> to vector<8x128xf32>
      %1142 = arith.mulf %1141, %1140 : vector<8x128xf32>
      %1143 = vector.broadcast %89 : vector<1x128xf32> to vector<8x128xf32>
      %1144 = vector.broadcast %5 : vector<8x1xf32> to vector<8x128xf32>
      %1145 = arith.subf %1143, %1144 : vector<8x128xf32>
      %1146 = vector.broadcast %54 : vector<8x1xf32> to vector<8x128xf32>
      %1147 = arith.mulf %1146, %1145 : vector<8x128xf32>
      %1148 = arith.subf %1142, %1147 : vector<8x128xf32>
      %1149 = vector.broadcast %47 : vector<8x1xf32> to vector<8x128xf32>
      %1150 = arith.mulf %1149, %1148 : vector<8x128xf32>
      %1151 = vector.broadcast %93 : vector<1x128xf32> to vector<8x128xf32>
      %1152 = vector.broadcast %10 : vector<8x1xf32> to vector<8x128xf32>
      %1153 = arith.subf %1151, %1152 : vector<8x128xf32>
      %1154 = vector.broadcast %51 : vector<8x1xf32> to vector<8x128xf32>
      %1155 = arith.mulf %1154, %1153 : vector<8x128xf32>
      %1156 = vector.broadcast %89 : vector<1x128xf32> to vector<8x128xf32>
      %1157 = vector.broadcast %6 : vector<8x1xf32> to vector<8x128xf32>
      %1158 = arith.subf %1156, %1157 : vector<8x128xf32>
      %1159 = vector.broadcast %55 : vector<8x1xf32> to vector<8x128xf32>
      %1160 = arith.mulf %1159, %1158 : vector<8x128xf32>
      %1161 = arith.subf %1155, %1160 : vector<8x128xf32>
      %1162 = vector.broadcast %47 : vector<8x1xf32> to vector<8x128xf32>
      %1163 = arith.mulf %1162, %1161 : vector<8x128xf32>
      %1164 = vector.broadcast %94 : vector<1x128xf32> to vector<8x128xf32>
      %1165 = vector.broadcast %7 : vector<8x1xf32> to vector<8x128xf32>
      %1166 = arith.subf %1164, %1165 : vector<8x128xf32>
      %1167 = vector.broadcast %48 : vector<8x1xf32> to vector<8x128xf32>
      %1168 = arith.mulf %1167, %1166 : vector<8x128xf32>
      %1169 = vector.broadcast %90 : vector<1x128xf32> to vector<8x128xf32>
      %1170 = vector.broadcast %3 : vector<8x1xf32> to vector<8x128xf32>
      %1171 = arith.subf %1169, %1170 : vector<8x128xf32>
      %1172 = vector.broadcast %52 : vector<8x1xf32> to vector<8x128xf32>
      %1173 = arith.mulf %1172, %1171 : vector<8x128xf32>
      %1174 = arith.subf %1168, %1173 : vector<8x128xf32>
      %1175 = vector.broadcast %47 : vector<8x1xf32> to vector<8x128xf32>
      %1176 = arith.mulf %1175, %1174 : vector<8x128xf32>
      %1177 = vector.broadcast %94 : vector<1x128xf32> to vector<8x128xf32>
      %1178 = vector.broadcast %8 : vector<8x1xf32> to vector<8x128xf32>
      %1179 = arith.subf %1177, %1178 : vector<8x128xf32>
      %1180 = vector.broadcast %49 : vector<8x1xf32> to vector<8x128xf32>
      %1181 = arith.mulf %1180, %1179 : vector<8x128xf32>
      %1182 = vector.broadcast %90 : vector<1x128xf32> to vector<8x128xf32>
      %1183 = vector.broadcast %4 : vector<8x1xf32> to vector<8x128xf32>
      %1184 = arith.subf %1182, %1183 : vector<8x128xf32>
      %1185 = vector.broadcast %53 : vector<8x1xf32> to vector<8x128xf32>
      %1186 = arith.mulf %1185, %1184 : vector<8x128xf32>
      %1187 = arith.subf %1181, %1186 : vector<8x128xf32>
      %1188 = vector.broadcast %47 : vector<8x1xf32> to vector<8x128xf32>
      %1189 = arith.mulf %1188, %1187 : vector<8x128xf32>
      %1190 = vector.broadcast %94 : vector<1x128xf32> to vector<8x128xf32>
      %1191 = vector.broadcast %9 : vector<8x1xf32> to vector<8x128xf32>
      %1192 = arith.subf %1190, %1191 : vector<8x128xf32>
      %1193 = vector.broadcast %50 : vector<8x1xf32> to vector<8x128xf32>
      %1194 = arith.mulf %1193, %1192 : vector<8x128xf32>
      %1195 = vector.broadcast %90 : vector<1x128xf32> to vector<8x128xf32>
      %1196 = vector.broadcast %5 : vector<8x1xf32> to vector<8x128xf32>
      %1197 = arith.subf %1195, %1196 : vector<8x128xf32>
      %1198 = vector.broadcast %54 : vector<8x1xf32> to vector<8x128xf32>
      %1199 = arith.mulf %1198, %1197 : vector<8x128xf32>
      %1200 = arith.subf %1194, %1199 : vector<8x128xf32>
      %1201 = vector.broadcast %47 : vector<8x1xf32> to vector<8x128xf32>
      %1202 = arith.mulf %1201, %1200 : vector<8x128xf32>
      %1203 = vector.broadcast %94 : vector<1x128xf32> to vector<8x128xf32>
      %1204 = vector.broadcast %10 : vector<8x1xf32> to vector<8x128xf32>
      %1205 = arith.subf %1203, %1204 : vector<8x128xf32>
      %1206 = vector.broadcast %51 : vector<8x1xf32> to vector<8x128xf32>
      %1207 = arith.mulf %1206, %1205 : vector<8x128xf32>
      %1208 = vector.broadcast %90 : vector<1x128xf32> to vector<8x128xf32>
      %1209 = vector.broadcast %6 : vector<8x1xf32> to vector<8x128xf32>
      %1210 = arith.subf %1208, %1209 : vector<8x128xf32>
      %1211 = vector.broadcast %55 : vector<8x1xf32> to vector<8x128xf32>
      %1212 = arith.mulf %1211, %1210 : vector<8x128xf32>
      %1213 = arith.subf %1207, %1212 : vector<8x128xf32>
      %1214 = vector.broadcast %47 : vector<8x1xf32> to vector<8x128xf32>
      %1215 = arith.mulf %1214, %1213 : vector<8x128xf32>
      %1216 = arith.subf %1072, %1020 : vector<8x128xf32>
      %1217 = vector.broadcast %69 : vector<8x1xf32> to vector<8x128xf32>
      %1218 = vector.broadcast %197 : vector<1x128xf32> to vector<8x128xf32>
      %1219 = arith.mulf %1217, %1218 : vector<8x128xf32>
      %1220 = math.absf %1216 : vector<8x128xf32>
      %1221 = arith.cmpf ole, %1220, %1219 : vector<8x128xf32>
      %cst_181 = arith.constant 0.000000e+00 : f32
      %1222 = vector.broadcast %cst_181 : f32 to vector<8x128xf32>
      %1223 = arith.subf %1222, %1020 : vector<8x128xf32>
      %cst_182 = arith.constant 1.000000e+00 : f32
      %1224 = vector.broadcast %cst_182 : f32 to vector<8x128xf32>
      %1225 = arith.select %1221, %1224, %1216 : vector<8x128xi1>, vector<8x128xf32>
      %1226 = tpu.reciprocal %1225 {approx = true} : vector<8x128xf32> -> vector<8x128xf32>
      %1227 = arith.mulf %1223, %1226 : vector<8x128xf32>
      %cst_183 = arith.constant dense<true> : vector<8x128xi1>
      %1228 = arith.xori %1221, %cst_183 : vector<8x128xi1>
      %cst_184 = arith.constant 0.000000e+00 : f32
      %1229 = vector.broadcast %cst_184 : f32 to vector<8x128xf32>
      %1230 = arith.cmpf ogt, %1216, %1229 : vector<8x128xf32>
      %1231 = arith.andi %1228, %1230 : vector<8x128xi1>
      %cst_185 = arith.constant 0.000000e+00 : f32
      %1232 = vector.broadcast %cst_185 : f32 to vector<8x128xf32>
      %1233 = arith.maximumf %1232, %1227 : vector<8x128xf32>
      %cst_186 = arith.constant 0.000000e+00 : f32
      %1234 = vector.broadcast %cst_186 : f32 to vector<8x128xf32>
      %1235 = arith.select %1231, %1233, %1234 : vector<8x128xi1>, vector<8x128xf32>
      %cst_187 = arith.constant dense<true> : vector<8x128xi1>
      %1236 = arith.xori %1221, %cst_187 : vector<8x128xi1>
      %cst_188 = arith.constant 0.000000e+00 : f32
      %1237 = vector.broadcast %cst_188 : f32 to vector<8x128xf32>
      %1238 = arith.cmpf olt, %1216, %1237 : vector<8x128xf32>
      %1239 = arith.andi %1236, %1238 : vector<8x128xi1>
      %cst_189 = arith.constant 1.000000e+00 : f32
      %1240 = vector.broadcast %cst_189 : f32 to vector<8x128xf32>
      %1241 = arith.minimumf %1240, %1227 : vector<8x128xf32>
      %cst_190 = arith.constant 1.000000e+00 : f32
      %1242 = vector.broadcast %cst_190 : f32 to vector<8x128xf32>
      %1243 = arith.select %1239, %1241, %1242 : vector<8x128xi1>, vector<8x128xf32>
      %cst_191 = arith.constant 0.000000e+00 : f32
      %1244 = vector.broadcast %cst_191 : f32 to vector<8x128xf32>
      %1245 = arith.subf %1244, %1219 : vector<8x128xf32>
      %1246 = arith.cmpf olt, %1020, %1245 : vector<8x128xf32>
      %1247 = arith.andi %1221, %1246 : vector<8x128xi1>
      %false_192 = arith.constant false
      %1248 = vector.broadcast %false_192 : i1 to vector<8x128xi1>
      %1249 = arith.ori %1248, %1247 : vector<8x128xi1>
      %1250 = math.absf %1020 : vector<8x128xf32>
      %1251 = arith.cmpf ole, %1250, %1219 : vector<8x128xf32>
      %1252 = arith.andi %1221, %1251 : vector<8x128xi1>
      %1253 = vector.broadcast %48 : vector<8x1xf32> to vector<8x128xf32>
      %1254 = vector.broadcast %187 : vector<1x128xf32> to vector<8x128xf32>
      %1255 = arith.mulf %1253, %1254 : vector<8x128xf32>
      %1256 = vector.broadcast %52 : vector<8x1xf32> to vector<8x128xf32>
      %1257 = vector.broadcast %191 : vector<1x128xf32> to vector<8x128xf32>
      %1258 = arith.mulf %1256, %1257 : vector<8x128xf32>
      %1259 = arith.addf %1255, %1258 : vector<8x128xf32>
      %1260 = arith.mulf %1259, %186 : vector<8x128xf32>
      %cst_193 = arith.constant 0.000000e+00 : f32
      %1261 = vector.broadcast %cst_193 : f32 to vector<8x128xf32>
      %1262 = arith.cmpf ogt, %1260, %1261 : vector<8x128xf32>
      %1263 = arith.andi %1252, %1262 : vector<8x128xi1>
      %1264 = arith.ori %1249, %1263 : vector<8x128xi1>
      %1265 = arith.subf %1085, %1033 : vector<8x128xf32>
      %1266 = vector.broadcast %71 : vector<8x1xf32> to vector<8x128xf32>
      %1267 = vector.broadcast %197 : vector<1x128xf32> to vector<8x128xf32>
      %1268 = arith.mulf %1266, %1267 : vector<8x128xf32>
      %1269 = math.absf %1265 : vector<8x128xf32>
      %1270 = arith.cmpf ole, %1269, %1268 : vector<8x128xf32>
      %cst_194 = arith.constant 0.000000e+00 : f32
      %1271 = vector.broadcast %cst_194 : f32 to vector<8x128xf32>
      %1272 = arith.subf %1271, %1033 : vector<8x128xf32>
      %cst_195 = arith.constant 1.000000e+00 : f32
      %1273 = vector.broadcast %cst_195 : f32 to vector<8x128xf32>
      %1274 = arith.select %1270, %1273, %1265 : vector<8x128xi1>, vector<8x128xf32>
      %1275 = tpu.reciprocal %1274 {approx = true} : vector<8x128xf32> -> vector<8x128xf32>
      %1276 = arith.mulf %1272, %1275 : vector<8x128xf32>
      %cst_196 = arith.constant dense<true> : vector<8x128xi1>
      %1277 = arith.xori %1270, %cst_196 : vector<8x128xi1>
      %cst_197 = arith.constant 0.000000e+00 : f32
      %1278 = vector.broadcast %cst_197 : f32 to vector<8x128xf32>
      %1279 = arith.cmpf ogt, %1265, %1278 : vector<8x128xf32>
      %1280 = arith.andi %1277, %1279 : vector<8x128xi1>
      %1281 = arith.maximumf %1235, %1276 : vector<8x128xf32>
      %1282 = arith.select %1280, %1281, %1235 : vector<8x128xi1>, vector<8x128xf32>
      %cst_198 = arith.constant dense<true> : vector<8x128xi1>
      %1283 = arith.xori %1270, %cst_198 : vector<8x128xi1>
      %cst_199 = arith.constant 0.000000e+00 : f32
      %1284 = vector.broadcast %cst_199 : f32 to vector<8x128xf32>
      %1285 = arith.cmpf olt, %1265, %1284 : vector<8x128xf32>
      %1286 = arith.andi %1283, %1285 : vector<8x128xi1>
      %1287 = arith.minimumf %1243, %1276 : vector<8x128xf32>
      %1288 = arith.select %1286, %1287, %1243 : vector<8x128xi1>, vector<8x128xf32>
      %cst_200 = arith.constant 0.000000e+00 : f32
      %1289 = vector.broadcast %cst_200 : f32 to vector<8x128xf32>
      %1290 = arith.subf %1289, %1268 : vector<8x128xf32>
      %1291 = arith.cmpf olt, %1033, %1290 : vector<8x128xf32>
      %1292 = arith.andi %1270, %1291 : vector<8x128xi1>
      %1293 = arith.ori %1264, %1292 : vector<8x128xi1>
      %1294 = math.absf %1033 : vector<8x128xf32>
      %1295 = arith.cmpf ole, %1294, %1268 : vector<8x128xf32>
      %1296 = arith.andi %1270, %1295 : vector<8x128xi1>
      %1297 = vector.broadcast %49 : vector<8x1xf32> to vector<8x128xf32>
      %1298 = vector.broadcast %187 : vector<1x128xf32> to vector<8x128xf32>
      %1299 = arith.mulf %1297, %1298 : vector<8x128xf32>
      %1300 = vector.broadcast %53 : vector<8x1xf32> to vector<8x128xf32>
      %1301 = vector.broadcast %191 : vector<1x128xf32> to vector<8x128xf32>
      %1302 = arith.mulf %1300, %1301 : vector<8x128xf32>
      %1303 = arith.addf %1299, %1302 : vector<8x128xf32>
      %1304 = arith.mulf %1303, %186 : vector<8x128xf32>
      %cst_201 = arith.constant 0.000000e+00 : f32
      %1305 = vector.broadcast %cst_201 : f32 to vector<8x128xf32>
      %1306 = arith.cmpf ogt, %1304, %1305 : vector<8x128xf32>
      %1307 = arith.andi %1296, %1306 : vector<8x128xi1>
      %1308 = arith.ori %1293, %1307 : vector<8x128xi1>
      %1309 = arith.subf %1098, %1046 : vector<8x128xf32>
      %1310 = vector.broadcast %73 : vector<8x1xf32> to vector<8x128xf32>
      %1311 = vector.broadcast %197 : vector<1x128xf32> to vector<8x128xf32>
      %1312 = arith.mulf %1310, %1311 : vector<8x128xf32>
      %1313 = math.absf %1309 : vector<8x128xf32>
      %1314 = arith.cmpf ole, %1313, %1312 : vector<8x128xf32>
      %cst_202 = arith.constant 0.000000e+00 : f32
      %1315 = vector.broadcast %cst_202 : f32 to vector<8x128xf32>
      %1316 = arith.subf %1315, %1046 : vector<8x128xf32>
      %cst_203 = arith.constant 1.000000e+00 : f32
      %1317 = vector.broadcast %cst_203 : f32 to vector<8x128xf32>
      %1318 = arith.select %1314, %1317, %1309 : vector<8x128xi1>, vector<8x128xf32>
      %1319 = tpu.reciprocal %1318 {approx = true} : vector<8x128xf32> -> vector<8x128xf32>
      %1320 = arith.mulf %1316, %1319 : vector<8x128xf32>
      %cst_204 = arith.constant dense<true> : vector<8x128xi1>
      %1321 = arith.xori %1314, %cst_204 : vector<8x128xi1>
      %cst_205 = arith.constant 0.000000e+00 : f32
      %1322 = vector.broadcast %cst_205 : f32 to vector<8x128xf32>
      %1323 = arith.cmpf ogt, %1309, %1322 : vector<8x128xf32>
      %1324 = arith.andi %1321, %1323 : vector<8x128xi1>
      %1325 = arith.maximumf %1282, %1320 : vector<8x128xf32>
      %1326 = arith.select %1324, %1325, %1282 : vector<8x128xi1>, vector<8x128xf32>
      %cst_206 = arith.constant dense<true> : vector<8x128xi1>
      %1327 = arith.xori %1314, %cst_206 : vector<8x128xi1>
      %cst_207 = arith.constant 0.000000e+00 : f32
      %1328 = vector.broadcast %cst_207 : f32 to vector<8x128xf32>
      %1329 = arith.cmpf olt, %1309, %1328 : vector<8x128xf32>
      %1330 = arith.andi %1327, %1329 : vector<8x128xi1>
      %1331 = arith.minimumf %1288, %1320 : vector<8x128xf32>
      %1332 = arith.select %1330, %1331, %1288 : vector<8x128xi1>, vector<8x128xf32>
      %cst_208 = arith.constant 0.000000e+00 : f32
      %1333 = vector.broadcast %cst_208 : f32 to vector<8x128xf32>
      %1334 = arith.subf %1333, %1312 : vector<8x128xf32>
      %1335 = arith.cmpf olt, %1046, %1334 : vector<8x128xf32>
      %1336 = arith.andi %1314, %1335 : vector<8x128xi1>
      %1337 = arith.ori %1308, %1336 : vector<8x128xi1>
      %1338 = math.absf %1046 : vector<8x128xf32>
      %1339 = arith.cmpf ole, %1338, %1312 : vector<8x128xf32>
      %1340 = arith.andi %1314, %1339 : vector<8x128xi1>
      %1341 = vector.broadcast %50 : vector<8x1xf32> to vector<8x128xf32>
      %1342 = vector.broadcast %187 : vector<1x128xf32> to vector<8x128xf32>
      %1343 = arith.mulf %1341, %1342 : vector<8x128xf32>
      %1344 = vector.broadcast %54 : vector<8x1xf32> to vector<8x128xf32>
      %1345 = vector.broadcast %191 : vector<1x128xf32> to vector<8x128xf32>
      %1346 = arith.mulf %1344, %1345 : vector<8x128xf32>
      %1347 = arith.addf %1343, %1346 : vector<8x128xf32>
      %1348 = arith.mulf %1347, %186 : vector<8x128xf32>
      %cst_209 = arith.constant 0.000000e+00 : f32
      %1349 = vector.broadcast %cst_209 : f32 to vector<8x128xf32>
      %1350 = arith.cmpf ogt, %1348, %1349 : vector<8x128xf32>
      %1351 = arith.andi %1340, %1350 : vector<8x128xi1>
      %1352 = arith.ori %1337, %1351 : vector<8x128xi1>
      %1353 = arith.subf %1111, %1059 : vector<8x128xf32>
      %1354 = vector.broadcast %75 : vector<8x1xf32> to vector<8x128xf32>
      %1355 = vector.broadcast %197 : vector<1x128xf32> to vector<8x128xf32>
      %1356 = arith.mulf %1354, %1355 : vector<8x128xf32>
      %1357 = math.absf %1353 : vector<8x128xf32>
      %1358 = arith.cmpf ole, %1357, %1356 : vector<8x128xf32>
      %cst_210 = arith.constant 0.000000e+00 : f32
      %1359 = vector.broadcast %cst_210 : f32 to vector<8x128xf32>
      %1360 = arith.subf %1359, %1059 : vector<8x128xf32>
      %cst_211 = arith.constant 1.000000e+00 : f32
      %1361 = vector.broadcast %cst_211 : f32 to vector<8x128xf32>
      %1362 = arith.select %1358, %1361, %1353 : vector<8x128xi1>, vector<8x128xf32>
      %1363 = tpu.reciprocal %1362 {approx = true} : vector<8x128xf32> -> vector<8x128xf32>
      %1364 = arith.mulf %1360, %1363 : vector<8x128xf32>
      %cst_212 = arith.constant dense<true> : vector<8x128xi1>
      %1365 = arith.xori %1358, %cst_212 : vector<8x128xi1>
      %cst_213 = arith.constant 0.000000e+00 : f32
      %1366 = vector.broadcast %cst_213 : f32 to vector<8x128xf32>
      %1367 = arith.cmpf ogt, %1353, %1366 : vector<8x128xf32>
      %1368 = arith.andi %1365, %1367 : vector<8x128xi1>
      %1369 = arith.maximumf %1326, %1364 : vector<8x128xf32>
      %1370 = arith.select %1368, %1369, %1326 : vector<8x128xi1>, vector<8x128xf32>
      %cst_214 = arith.constant dense<true> : vector<8x128xi1>
      %1371 = arith.xori %1358, %cst_214 : vector<8x128xi1>
      %cst_215 = arith.constant 0.000000e+00 : f32
      %1372 = vector.broadcast %cst_215 : f32 to vector<8x128xf32>
      %1373 = arith.cmpf olt, %1353, %1372 : vector<8x128xf32>
      %1374 = arith.andi %1371, %1373 : vector<8x128xi1>
      %1375 = arith.minimumf %1332, %1364 : vector<8x128xf32>
      %1376 = arith.select %1374, %1375, %1332 : vector<8x128xi1>, vector<8x128xf32>
      %cst_216 = arith.constant 0.000000e+00 : f32
      %1377 = vector.broadcast %cst_216 : f32 to vector<8x128xf32>
      %1378 = arith.subf %1377, %1356 : vector<8x128xf32>
      %1379 = arith.cmpf olt, %1059, %1378 : vector<8x128xf32>
      %1380 = arith.andi %1358, %1379 : vector<8x128xi1>
      %1381 = arith.ori %1352, %1380 : vector<8x128xi1>
      %1382 = math.absf %1059 : vector<8x128xf32>
      %1383 = arith.cmpf ole, %1382, %1356 : vector<8x128xf32>
      %1384 = arith.andi %1358, %1383 : vector<8x128xi1>
      %1385 = vector.broadcast %51 : vector<8x1xf32> to vector<8x128xf32>
      %1386 = vector.broadcast %187 : vector<1x128xf32> to vector<8x128xf32>
      %1387 = arith.mulf %1385, %1386 : vector<8x128xf32>
      %1388 = vector.broadcast %55 : vector<8x1xf32> to vector<8x128xf32>
      %1389 = vector.broadcast %191 : vector<1x128xf32> to vector<8x128xf32>
      %1390 = arith.mulf %1388, %1389 : vector<8x128xf32>
      %1391 = arith.addf %1387, %1390 : vector<8x128xf32>
      %1392 = arith.mulf %1391, %186 : vector<8x128xf32>
      %cst_217 = arith.constant 0.000000e+00 : f32
      %1393 = vector.broadcast %cst_217 : f32 to vector<8x128xf32>
      %1394 = arith.cmpf ogt, %1392, %1393 : vector<8x128xf32>
      %1395 = arith.andi %1384, %1394 : vector<8x128xi1>
      %1396 = arith.ori %1381, %1395 : vector<8x128xi1>
      %1397 = vector.broadcast %187 : vector<1x128xf32> to vector<8x128xf32>
      %1398 = arith.mulf %1370, %1397 : vector<8x128xf32>
      %1399 = vector.broadcast %87 : vector<1x128xf32> to vector<8x128xf32>
      %1400 = arith.addf %1399, %1398 : vector<8x128xf32>
      %1401 = vector.broadcast %191 : vector<1x128xf32> to vector<8x128xf32>
      %1402 = arith.mulf %1370, %1401 : vector<8x128xf32>
      %1403 = vector.broadcast %91 : vector<1x128xf32> to vector<8x128xf32>
      %1404 = arith.addf %1403, %1402 : vector<8x128xf32>
      %1405 = vector.broadcast %187 : vector<1x128xf32> to vector<8x128xf32>
      %1406 = arith.mulf %1376, %1405 : vector<8x128xf32>
      %1407 = vector.broadcast %87 : vector<1x128xf32> to vector<8x128xf32>
      %1408 = arith.addf %1407, %1406 : vector<8x128xf32>
      %1409 = vector.broadcast %191 : vector<1x128xf32> to vector<8x128xf32>
      %1410 = arith.mulf %1376, %1409 : vector<8x128xf32>
      %1411 = vector.broadcast %91 : vector<1x128xf32> to vector<8x128xf32>
      %1412 = arith.addf %1411, %1410 : vector<8x128xf32>
      %cst_218 = arith.constant dense<true> : vector<8x128xi1>
      %1413 = arith.xori %1396, %cst_218 : vector<8x128xi1>
      %1414 = arith.cmpf ogt, %1376, %1370 : vector<8x128xf32>
      %1415 = arith.andi %1413, %1414 : vector<8x128xi1>
      %1416 = arith.mulf %1400, %1412 : vector<8x128xf32>
      %1417 = arith.mulf %1408, %1404 : vector<8x128xf32>
      %1418 = arith.subf %1416, %1417 : vector<8x128xf32>
      %cst_219 = arith.constant 0.000000e+00 : f32
      %1419 = vector.broadcast %cst_219 : f32 to vector<8x128xf32>
      %1420 = arith.select %1415, %1418, %1419 : vector<8x128xi1>, vector<8x128xf32>
      %cst_220 = arith.constant 0.000000e+00 : f32
      %1421 = vector.broadcast %cst_220 : f32 to vector<8x128xf32>
      %1422 = arith.addf %1421, %1420 : vector<8x128xf32>
      %1423 = arith.subf %1124, %1072 : vector<8x128xf32>
      %1424 = vector.broadcast %69 : vector<8x1xf32> to vector<8x128xf32>
      %1425 = vector.broadcast %200 : vector<1x128xf32> to vector<8x128xf32>
      %1426 = arith.mulf %1424, %1425 : vector<8x128xf32>
      %1427 = math.absf %1423 : vector<8x128xf32>
      %1428 = arith.cmpf ole, %1427, %1426 : vector<8x128xf32>
      %cst_221 = arith.constant 0.000000e+00 : f32
      %1429 = vector.broadcast %cst_221 : f32 to vector<8x128xf32>
      %1430 = arith.subf %1429, %1072 : vector<8x128xf32>
      %cst_222 = arith.constant 1.000000e+00 : f32
      %1431 = vector.broadcast %cst_222 : f32 to vector<8x128xf32>
      %1432 = arith.select %1428, %1431, %1423 : vector<8x128xi1>, vector<8x128xf32>
      %1433 = tpu.reciprocal %1432 {approx = true} : vector<8x128xf32> -> vector<8x128xf32>
      %1434 = arith.mulf %1430, %1433 : vector<8x128xf32>
      %cst_223 = arith.constant dense<true> : vector<8x128xi1>
      %1435 = arith.xori %1428, %cst_223 : vector<8x128xi1>
      %cst_224 = arith.constant 0.000000e+00 : f32
      %1436 = vector.broadcast %cst_224 : f32 to vector<8x128xf32>
      %1437 = arith.cmpf ogt, %1423, %1436 : vector<8x128xf32>
      %1438 = arith.andi %1435, %1437 : vector<8x128xi1>
      %cst_225 = arith.constant 0.000000e+00 : f32
      %1439 = vector.broadcast %cst_225 : f32 to vector<8x128xf32>
      %1440 = arith.maximumf %1439, %1434 : vector<8x128xf32>
      %cst_226 = arith.constant 0.000000e+00 : f32
      %1441 = vector.broadcast %cst_226 : f32 to vector<8x128xf32>
      %1442 = arith.select %1438, %1440, %1441 : vector<8x128xi1>, vector<8x128xf32>
      %cst_227 = arith.constant dense<true> : vector<8x128xi1>
      %1443 = arith.xori %1428, %cst_227 : vector<8x128xi1>
      %cst_228 = arith.constant 0.000000e+00 : f32
      %1444 = vector.broadcast %cst_228 : f32 to vector<8x128xf32>
      %1445 = arith.cmpf olt, %1423, %1444 : vector<8x128xf32>
      %1446 = arith.andi %1443, %1445 : vector<8x128xi1>
      %cst_229 = arith.constant 1.000000e+00 : f32
      %1447 = vector.broadcast %cst_229 : f32 to vector<8x128xf32>
      %1448 = arith.minimumf %1447, %1434 : vector<8x128xf32>
      %cst_230 = arith.constant 1.000000e+00 : f32
      %1449 = vector.broadcast %cst_230 : f32 to vector<8x128xf32>
      %1450 = arith.select %1446, %1448, %1449 : vector<8x128xi1>, vector<8x128xf32>
      %cst_231 = arith.constant 0.000000e+00 : f32
      %1451 = vector.broadcast %cst_231 : f32 to vector<8x128xf32>
      %1452 = arith.subf %1451, %1426 : vector<8x128xf32>
      %1453 = arith.cmpf olt, %1072, %1452 : vector<8x128xf32>
      %1454 = arith.andi %1428, %1453 : vector<8x128xi1>
      %false_232 = arith.constant false
      %1455 = vector.broadcast %false_232 : i1 to vector<8x128xi1>
      %1456 = arith.ori %1455, %1454 : vector<8x128xi1>
      %1457 = math.absf %1072 : vector<8x128xf32>
      %1458 = arith.cmpf ole, %1457, %1426 : vector<8x128xf32>
      %1459 = arith.andi %1428, %1458 : vector<8x128xi1>
      %1460 = vector.broadcast %48 : vector<8x1xf32> to vector<8x128xf32>
      %1461 = vector.broadcast %188 : vector<1x128xf32> to vector<8x128xf32>
      %1462 = arith.mulf %1460, %1461 : vector<8x128xf32>
      %1463 = vector.broadcast %52 : vector<8x1xf32> to vector<8x128xf32>
      %1464 = vector.broadcast %192 : vector<1x128xf32> to vector<8x128xf32>
      %1465 = arith.mulf %1463, %1464 : vector<8x128xf32>
      %1466 = arith.addf %1462, %1465 : vector<8x128xf32>
      %1467 = arith.mulf %1466, %186 : vector<8x128xf32>
      %cst_233 = arith.constant 0.000000e+00 : f32
      %1468 = vector.broadcast %cst_233 : f32 to vector<8x128xf32>
      %1469 = arith.cmpf ogt, %1467, %1468 : vector<8x128xf32>
      %1470 = arith.andi %1459, %1469 : vector<8x128xi1>
      %1471 = arith.ori %1456, %1470 : vector<8x128xi1>
      %1472 = arith.subf %1137, %1085 : vector<8x128xf32>
      %1473 = vector.broadcast %71 : vector<8x1xf32> to vector<8x128xf32>
      %1474 = vector.broadcast %200 : vector<1x128xf32> to vector<8x128xf32>
      %1475 = arith.mulf %1473, %1474 : vector<8x128xf32>
      %1476 = math.absf %1472 : vector<8x128xf32>
      %1477 = arith.cmpf ole, %1476, %1475 : vector<8x128xf32>
      %cst_234 = arith.constant 0.000000e+00 : f32
      %1478 = vector.broadcast %cst_234 : f32 to vector<8x128xf32>
      %1479 = arith.subf %1478, %1085 : vector<8x128xf32>
      %cst_235 = arith.constant 1.000000e+00 : f32
      %1480 = vector.broadcast %cst_235 : f32 to vector<8x128xf32>
      %1481 = arith.select %1477, %1480, %1472 : vector<8x128xi1>, vector<8x128xf32>
      %1482 = tpu.reciprocal %1481 {approx = true} : vector<8x128xf32> -> vector<8x128xf32>
      %1483 = arith.mulf %1479, %1482 : vector<8x128xf32>
      %cst_236 = arith.constant dense<true> : vector<8x128xi1>
      %1484 = arith.xori %1477, %cst_236 : vector<8x128xi1>
      %cst_237 = arith.constant 0.000000e+00 : f32
      %1485 = vector.broadcast %cst_237 : f32 to vector<8x128xf32>
      %1486 = arith.cmpf ogt, %1472, %1485 : vector<8x128xf32>
      %1487 = arith.andi %1484, %1486 : vector<8x128xi1>
      %1488 = arith.maximumf %1442, %1483 : vector<8x128xf32>
      %1489 = arith.select %1487, %1488, %1442 : vector<8x128xi1>, vector<8x128xf32>
      %cst_238 = arith.constant dense<true> : vector<8x128xi1>
      %1490 = arith.xori %1477, %cst_238 : vector<8x128xi1>
      %cst_239 = arith.constant 0.000000e+00 : f32
      %1491 = vector.broadcast %cst_239 : f32 to vector<8x128xf32>
      %1492 = arith.cmpf olt, %1472, %1491 : vector<8x128xf32>
      %1493 = arith.andi %1490, %1492 : vector<8x128xi1>
      %1494 = arith.minimumf %1450, %1483 : vector<8x128xf32>
      %1495 = arith.select %1493, %1494, %1450 : vector<8x128xi1>, vector<8x128xf32>
      %cst_240 = arith.constant 0.000000e+00 : f32
      %1496 = vector.broadcast %cst_240 : f32 to vector<8x128xf32>
      %1497 = arith.subf %1496, %1475 : vector<8x128xf32>
      %1498 = arith.cmpf olt, %1085, %1497 : vector<8x128xf32>
      %1499 = arith.andi %1477, %1498 : vector<8x128xi1>
      %1500 = arith.ori %1471, %1499 : vector<8x128xi1>
      %1501 = math.absf %1085 : vector<8x128xf32>
      %1502 = arith.cmpf ole, %1501, %1475 : vector<8x128xf32>
      %1503 = arith.andi %1477, %1502 : vector<8x128xi1>
      %1504 = vector.broadcast %49 : vector<8x1xf32> to vector<8x128xf32>
      %1505 = vector.broadcast %188 : vector<1x128xf32> to vector<8x128xf32>
      %1506 = arith.mulf %1504, %1505 : vector<8x128xf32>
      %1507 = vector.broadcast %53 : vector<8x1xf32> to vector<8x128xf32>
      %1508 = vector.broadcast %192 : vector<1x128xf32> to vector<8x128xf32>
      %1509 = arith.mulf %1507, %1508 : vector<8x128xf32>
      %1510 = arith.addf %1506, %1509 : vector<8x128xf32>
      %1511 = arith.mulf %1510, %186 : vector<8x128xf32>
      %cst_241 = arith.constant 0.000000e+00 : f32
      %1512 = vector.broadcast %cst_241 : f32 to vector<8x128xf32>
      %1513 = arith.cmpf ogt, %1511, %1512 : vector<8x128xf32>
      %1514 = arith.andi %1503, %1513 : vector<8x128xi1>
      %1515 = arith.ori %1500, %1514 : vector<8x128xi1>
      %1516 = arith.subf %1150, %1098 : vector<8x128xf32>
      %1517 = vector.broadcast %73 : vector<8x1xf32> to vector<8x128xf32>
      %1518 = vector.broadcast %200 : vector<1x128xf32> to vector<8x128xf32>
      %1519 = arith.mulf %1517, %1518 : vector<8x128xf32>
      %1520 = math.absf %1516 : vector<8x128xf32>
      %1521 = arith.cmpf ole, %1520, %1519 : vector<8x128xf32>
      %cst_242 = arith.constant 0.000000e+00 : f32
      %1522 = vector.broadcast %cst_242 : f32 to vector<8x128xf32>
      %1523 = arith.subf %1522, %1098 : vector<8x128xf32>
      %cst_243 = arith.constant 1.000000e+00 : f32
      %1524 = vector.broadcast %cst_243 : f32 to vector<8x128xf32>
      %1525 = arith.select %1521, %1524, %1516 : vector<8x128xi1>, vector<8x128xf32>
      %1526 = tpu.reciprocal %1525 {approx = true} : vector<8x128xf32> -> vector<8x128xf32>
      %1527 = arith.mulf %1523, %1526 : vector<8x128xf32>
      %cst_244 = arith.constant dense<true> : vector<8x128xi1>
      %1528 = arith.xori %1521, %cst_244 : vector<8x128xi1>
      %cst_245 = arith.constant 0.000000e+00 : f32
      %1529 = vector.broadcast %cst_245 : f32 to vector<8x128xf32>
      %1530 = arith.cmpf ogt, %1516, %1529 : vector<8x128xf32>
      %1531 = arith.andi %1528, %1530 : vector<8x128xi1>
      %1532 = arith.maximumf %1489, %1527 : vector<8x128xf32>
      %1533 = arith.select %1531, %1532, %1489 : vector<8x128xi1>, vector<8x128xf32>
      %cst_246 = arith.constant dense<true> : vector<8x128xi1>
      %1534 = arith.xori %1521, %cst_246 : vector<8x128xi1>
      %cst_247 = arith.constant 0.000000e+00 : f32
      %1535 = vector.broadcast %cst_247 : f32 to vector<8x128xf32>
      %1536 = arith.cmpf olt, %1516, %1535 : vector<8x128xf32>
      %1537 = arith.andi %1534, %1536 : vector<8x128xi1>
      %1538 = arith.minimumf %1495, %1527 : vector<8x128xf32>
      %1539 = arith.select %1537, %1538, %1495 : vector<8x128xi1>, vector<8x128xf32>
      %cst_248 = arith.constant 0.000000e+00 : f32
      %1540 = vector.broadcast %cst_248 : f32 to vector<8x128xf32>
      %1541 = arith.subf %1540, %1519 : vector<8x128xf32>
      %1542 = arith.cmpf olt, %1098, %1541 : vector<8x128xf32>
      %1543 = arith.andi %1521, %1542 : vector<8x128xi1>
      %1544 = arith.ori %1515, %1543 : vector<8x128xi1>
      %1545 = math.absf %1098 : vector<8x128xf32>
      %1546 = arith.cmpf ole, %1545, %1519 : vector<8x128xf32>
      %1547 = arith.andi %1521, %1546 : vector<8x128xi1>
      %1548 = vector.broadcast %50 : vector<8x1xf32> to vector<8x128xf32>
      %1549 = vector.broadcast %188 : vector<1x128xf32> to vector<8x128xf32>
      %1550 = arith.mulf %1548, %1549 : vector<8x128xf32>
      %1551 = vector.broadcast %54 : vector<8x1xf32> to vector<8x128xf32>
      %1552 = vector.broadcast %192 : vector<1x128xf32> to vector<8x128xf32>
      %1553 = arith.mulf %1551, %1552 : vector<8x128xf32>
      %1554 = arith.addf %1550, %1553 : vector<8x128xf32>
      %1555 = arith.mulf %1554, %186 : vector<8x128xf32>
      %cst_249 = arith.constant 0.000000e+00 : f32
      %1556 = vector.broadcast %cst_249 : f32 to vector<8x128xf32>
      %1557 = arith.cmpf ogt, %1555, %1556 : vector<8x128xf32>
      %1558 = arith.andi %1547, %1557 : vector<8x128xi1>
      %1559 = arith.ori %1544, %1558 : vector<8x128xi1>
      %1560 = arith.subf %1163, %1111 : vector<8x128xf32>
      %1561 = vector.broadcast %75 : vector<8x1xf32> to vector<8x128xf32>
      %1562 = vector.broadcast %200 : vector<1x128xf32> to vector<8x128xf32>
      %1563 = arith.mulf %1561, %1562 : vector<8x128xf32>
      %1564 = math.absf %1560 : vector<8x128xf32>
      %1565 = arith.cmpf ole, %1564, %1563 : vector<8x128xf32>
      %cst_250 = arith.constant 0.000000e+00 : f32
      %1566 = vector.broadcast %cst_250 : f32 to vector<8x128xf32>
      %1567 = arith.subf %1566, %1111 : vector<8x128xf32>
      %cst_251 = arith.constant 1.000000e+00 : f32
      %1568 = vector.broadcast %cst_251 : f32 to vector<8x128xf32>
      %1569 = arith.select %1565, %1568, %1560 : vector<8x128xi1>, vector<8x128xf32>
      %1570 = tpu.reciprocal %1569 {approx = true} : vector<8x128xf32> -> vector<8x128xf32>
      %1571 = arith.mulf %1567, %1570 : vector<8x128xf32>
      %cst_252 = arith.constant dense<true> : vector<8x128xi1>
      %1572 = arith.xori %1565, %cst_252 : vector<8x128xi1>
      %cst_253 = arith.constant 0.000000e+00 : f32
      %1573 = vector.broadcast %cst_253 : f32 to vector<8x128xf32>
      %1574 = arith.cmpf ogt, %1560, %1573 : vector<8x128xf32>
      %1575 = arith.andi %1572, %1574 : vector<8x128xi1>
      %1576 = arith.maximumf %1533, %1571 : vector<8x128xf32>
      %1577 = arith.select %1575, %1576, %1533 : vector<8x128xi1>, vector<8x128xf32>
      %cst_254 = arith.constant dense<true> : vector<8x128xi1>
      %1578 = arith.xori %1565, %cst_254 : vector<8x128xi1>
      %cst_255 = arith.constant 0.000000e+00 : f32
      %1579 = vector.broadcast %cst_255 : f32 to vector<8x128xf32>
      %1580 = arith.cmpf olt, %1560, %1579 : vector<8x128xf32>
      %1581 = arith.andi %1578, %1580 : vector<8x128xi1>
      %1582 = arith.minimumf %1539, %1571 : vector<8x128xf32>
      %1583 = arith.select %1581, %1582, %1539 : vector<8x128xi1>, vector<8x128xf32>
      %cst_256 = arith.constant 0.000000e+00 : f32
      %1584 = vector.broadcast %cst_256 : f32 to vector<8x128xf32>
      %1585 = arith.subf %1584, %1563 : vector<8x128xf32>
      %1586 = arith.cmpf olt, %1111, %1585 : vector<8x128xf32>
      %1587 = arith.andi %1565, %1586 : vector<8x128xi1>
      %1588 = arith.ori %1559, %1587 : vector<8x128xi1>
      %1589 = math.absf %1111 : vector<8x128xf32>
      %1590 = arith.cmpf ole, %1589, %1563 : vector<8x128xf32>
      %1591 = arith.andi %1565, %1590 : vector<8x128xi1>
      %1592 = vector.broadcast %51 : vector<8x1xf32> to vector<8x128xf32>
      %1593 = vector.broadcast %188 : vector<1x128xf32> to vector<8x128xf32>
      %1594 = arith.mulf %1592, %1593 : vector<8x128xf32>
      %1595 = vector.broadcast %55 : vector<8x1xf32> to vector<8x128xf32>
      %1596 = vector.broadcast %192 : vector<1x128xf32> to vector<8x128xf32>
      %1597 = arith.mulf %1595, %1596 : vector<8x128xf32>
      %1598 = arith.addf %1594, %1597 : vector<8x128xf32>
      %1599 = arith.mulf %1598, %186 : vector<8x128xf32>
      %cst_257 = arith.constant 0.000000e+00 : f32
      %1600 = vector.broadcast %cst_257 : f32 to vector<8x128xf32>
      %1601 = arith.cmpf ogt, %1599, %1600 : vector<8x128xf32>
      %1602 = arith.andi %1591, %1601 : vector<8x128xi1>
      %1603 = arith.ori %1588, %1602 : vector<8x128xi1>
      %1604 = vector.broadcast %188 : vector<1x128xf32> to vector<8x128xf32>
      %1605 = arith.mulf %1577, %1604 : vector<8x128xf32>
      %1606 = vector.broadcast %88 : vector<1x128xf32> to vector<8x128xf32>
      %1607 = arith.addf %1606, %1605 : vector<8x128xf32>
      %1608 = vector.broadcast %192 : vector<1x128xf32> to vector<8x128xf32>
      %1609 = arith.mulf %1577, %1608 : vector<8x128xf32>
      %1610 = vector.broadcast %92 : vector<1x128xf32> to vector<8x128xf32>
      %1611 = arith.addf %1610, %1609 : vector<8x128xf32>
      %1612 = vector.broadcast %188 : vector<1x128xf32> to vector<8x128xf32>
      %1613 = arith.mulf %1583, %1612 : vector<8x128xf32>
      %1614 = vector.broadcast %88 : vector<1x128xf32> to vector<8x128xf32>
      %1615 = arith.addf %1614, %1613 : vector<8x128xf32>
      %1616 = vector.broadcast %192 : vector<1x128xf32> to vector<8x128xf32>
      %1617 = arith.mulf %1583, %1616 : vector<8x128xf32>
      %1618 = vector.broadcast %92 : vector<1x128xf32> to vector<8x128xf32>
      %1619 = arith.addf %1618, %1617 : vector<8x128xf32>
      %cst_258 = arith.constant dense<true> : vector<8x128xi1>
      %1620 = arith.xori %1603, %cst_258 : vector<8x128xi1>
      %1621 = arith.cmpf ogt, %1583, %1577 : vector<8x128xf32>
      %1622 = arith.andi %1620, %1621 : vector<8x128xi1>
      %1623 = arith.mulf %1607, %1619 : vector<8x128xf32>
      %1624 = arith.mulf %1615, %1611 : vector<8x128xf32>
      %1625 = arith.subf %1623, %1624 : vector<8x128xf32>
      %cst_259 = arith.constant 0.000000e+00 : f32
      %1626 = vector.broadcast %cst_259 : f32 to vector<8x128xf32>
      %1627 = arith.select %1622, %1625, %1626 : vector<8x128xi1>, vector<8x128xf32>
      %1628 = arith.addf %1422, %1627 : vector<8x128xf32>
      %1629 = arith.subf %1176, %1124 : vector<8x128xf32>
      %1630 = vector.broadcast %69 : vector<8x1xf32> to vector<8x128xf32>
      %1631 = vector.broadcast %203 : vector<1x128xf32> to vector<8x128xf32>
      %1632 = arith.mulf %1630, %1631 : vector<8x128xf32>
      %1633 = math.absf %1629 : vector<8x128xf32>
      %1634 = arith.cmpf ole, %1633, %1632 : vector<8x128xf32>
      %cst_260 = arith.constant 0.000000e+00 : f32
      %1635 = vector.broadcast %cst_260 : f32 to vector<8x128xf32>
      %1636 = arith.subf %1635, %1124 : vector<8x128xf32>
      %cst_261 = arith.constant 1.000000e+00 : f32
      %1637 = vector.broadcast %cst_261 : f32 to vector<8x128xf32>
      %1638 = arith.select %1634, %1637, %1629 : vector<8x128xi1>, vector<8x128xf32>
      %1639 = tpu.reciprocal %1638 {approx = true} : vector<8x128xf32> -> vector<8x128xf32>
      %1640 = arith.mulf %1636, %1639 : vector<8x128xf32>
      %cst_262 = arith.constant dense<true> : vector<8x128xi1>
      %1641 = arith.xori %1634, %cst_262 : vector<8x128xi1>
      %cst_263 = arith.constant 0.000000e+00 : f32
      %1642 = vector.broadcast %cst_263 : f32 to vector<8x128xf32>
      %1643 = arith.cmpf ogt, %1629, %1642 : vector<8x128xf32>
      %1644 = arith.andi %1641, %1643 : vector<8x128xi1>
      %cst_264 = arith.constant 0.000000e+00 : f32
      %1645 = vector.broadcast %cst_264 : f32 to vector<8x128xf32>
      %1646 = arith.maximumf %1645, %1640 : vector<8x128xf32>
      %cst_265 = arith.constant 0.000000e+00 : f32
      %1647 = vector.broadcast %cst_265 : f32 to vector<8x128xf32>
      %1648 = arith.select %1644, %1646, %1647 : vector<8x128xi1>, vector<8x128xf32>
      %cst_266 = arith.constant dense<true> : vector<8x128xi1>
      %1649 = arith.xori %1634, %cst_266 : vector<8x128xi1>
      %cst_267 = arith.constant 0.000000e+00 : f32
      %1650 = vector.broadcast %cst_267 : f32 to vector<8x128xf32>
      %1651 = arith.cmpf olt, %1629, %1650 : vector<8x128xf32>
      %1652 = arith.andi %1649, %1651 : vector<8x128xi1>
      %cst_268 = arith.constant 1.000000e+00 : f32
      %1653 = vector.broadcast %cst_268 : f32 to vector<8x128xf32>
      %1654 = arith.minimumf %1653, %1640 : vector<8x128xf32>
      %cst_269 = arith.constant 1.000000e+00 : f32
      %1655 = vector.broadcast %cst_269 : f32 to vector<8x128xf32>
      %1656 = arith.select %1652, %1654, %1655 : vector<8x128xi1>, vector<8x128xf32>
      %cst_270 = arith.constant 0.000000e+00 : f32
      %1657 = vector.broadcast %cst_270 : f32 to vector<8x128xf32>
      %1658 = arith.subf %1657, %1632 : vector<8x128xf32>
      %1659 = arith.cmpf olt, %1124, %1658 : vector<8x128xf32>
      %1660 = arith.andi %1634, %1659 : vector<8x128xi1>
      %false_271 = arith.constant false
      %1661 = vector.broadcast %false_271 : i1 to vector<8x128xi1>
      %1662 = arith.ori %1661, %1660 : vector<8x128xi1>
      %1663 = math.absf %1124 : vector<8x128xf32>
      %1664 = arith.cmpf ole, %1663, %1632 : vector<8x128xf32>
      %1665 = arith.andi %1634, %1664 : vector<8x128xi1>
      %1666 = vector.broadcast %48 : vector<8x1xf32> to vector<8x128xf32>
      %1667 = vector.broadcast %189 : vector<1x128xf32> to vector<8x128xf32>
      %1668 = arith.mulf %1666, %1667 : vector<8x128xf32>
      %1669 = vector.broadcast %52 : vector<8x1xf32> to vector<8x128xf32>
      %1670 = vector.broadcast %193 : vector<1x128xf32> to vector<8x128xf32>
      %1671 = arith.mulf %1669, %1670 : vector<8x128xf32>
      %1672 = arith.addf %1668, %1671 : vector<8x128xf32>
      %1673 = arith.mulf %1672, %186 : vector<8x128xf32>
      %cst_272 = arith.constant 0.000000e+00 : f32
      %1674 = vector.broadcast %cst_272 : f32 to vector<8x128xf32>
      %1675 = arith.cmpf ogt, %1673, %1674 : vector<8x128xf32>
      %1676 = arith.andi %1665, %1675 : vector<8x128xi1>
      %1677 = arith.ori %1662, %1676 : vector<8x128xi1>
      %1678 = arith.subf %1189, %1137 : vector<8x128xf32>
      %1679 = vector.broadcast %71 : vector<8x1xf32> to vector<8x128xf32>
      %1680 = vector.broadcast %203 : vector<1x128xf32> to vector<8x128xf32>
      %1681 = arith.mulf %1679, %1680 : vector<8x128xf32>
      %1682 = math.absf %1678 : vector<8x128xf32>
      %1683 = arith.cmpf ole, %1682, %1681 : vector<8x128xf32>
      %cst_273 = arith.constant 0.000000e+00 : f32
      %1684 = vector.broadcast %cst_273 : f32 to vector<8x128xf32>
      %1685 = arith.subf %1684, %1137 : vector<8x128xf32>
      %cst_274 = arith.constant 1.000000e+00 : f32
      %1686 = vector.broadcast %cst_274 : f32 to vector<8x128xf32>
      %1687 = arith.select %1683, %1686, %1678 : vector<8x128xi1>, vector<8x128xf32>
      %1688 = tpu.reciprocal %1687 {approx = true} : vector<8x128xf32> -> vector<8x128xf32>
      %1689 = arith.mulf %1685, %1688 : vector<8x128xf32>
      %cst_275 = arith.constant dense<true> : vector<8x128xi1>
      %1690 = arith.xori %1683, %cst_275 : vector<8x128xi1>
      %cst_276 = arith.constant 0.000000e+00 : f32
      %1691 = vector.broadcast %cst_276 : f32 to vector<8x128xf32>
      %1692 = arith.cmpf ogt, %1678, %1691 : vector<8x128xf32>
      %1693 = arith.andi %1690, %1692 : vector<8x128xi1>
      %1694 = arith.maximumf %1648, %1689 : vector<8x128xf32>
      %1695 = arith.select %1693, %1694, %1648 : vector<8x128xi1>, vector<8x128xf32>
      %cst_277 = arith.constant dense<true> : vector<8x128xi1>
      %1696 = arith.xori %1683, %cst_277 : vector<8x128xi1>
      %cst_278 = arith.constant 0.000000e+00 : f32
      %1697 = vector.broadcast %cst_278 : f32 to vector<8x128xf32>
      %1698 = arith.cmpf olt, %1678, %1697 : vector<8x128xf32>
      %1699 = arith.andi %1696, %1698 : vector<8x128xi1>
      %1700 = arith.minimumf %1656, %1689 : vector<8x128xf32>
      %1701 = arith.select %1699, %1700, %1656 : vector<8x128xi1>, vector<8x128xf32>
      %cst_279 = arith.constant 0.000000e+00 : f32
      %1702 = vector.broadcast %cst_279 : f32 to vector<8x128xf32>
      %1703 = arith.subf %1702, %1681 : vector<8x128xf32>
      %1704 = arith.cmpf olt, %1137, %1703 : vector<8x128xf32>
      %1705 = arith.andi %1683, %1704 : vector<8x128xi1>
      %1706 = arith.ori %1677, %1705 : vector<8x128xi1>
      %1707 = math.absf %1137 : vector<8x128xf32>
      %1708 = arith.cmpf ole, %1707, %1681 : vector<8x128xf32>
      %1709 = arith.andi %1683, %1708 : vector<8x128xi1>
      %1710 = vector.broadcast %49 : vector<8x1xf32> to vector<8x128xf32>
      %1711 = vector.broadcast %189 : vector<1x128xf32> to vector<8x128xf32>
      %1712 = arith.mulf %1710, %1711 : vector<8x128xf32>
      %1713 = vector.broadcast %53 : vector<8x1xf32> to vector<8x128xf32>
      %1714 = vector.broadcast %193 : vector<1x128xf32> to vector<8x128xf32>
      %1715 = arith.mulf %1713, %1714 : vector<8x128xf32>
      %1716 = arith.addf %1712, %1715 : vector<8x128xf32>
      %1717 = arith.mulf %1716, %186 : vector<8x128xf32>
      %cst_280 = arith.constant 0.000000e+00 : f32
      %1718 = vector.broadcast %cst_280 : f32 to vector<8x128xf32>
      %1719 = arith.cmpf ogt, %1717, %1718 : vector<8x128xf32>
      %1720 = arith.andi %1709, %1719 : vector<8x128xi1>
      %1721 = arith.ori %1706, %1720 : vector<8x128xi1>
      %1722 = arith.subf %1202, %1150 : vector<8x128xf32>
      %1723 = vector.broadcast %73 : vector<8x1xf32> to vector<8x128xf32>
      %1724 = vector.broadcast %203 : vector<1x128xf32> to vector<8x128xf32>
      %1725 = arith.mulf %1723, %1724 : vector<8x128xf32>
      %1726 = math.absf %1722 : vector<8x128xf32>
      %1727 = arith.cmpf ole, %1726, %1725 : vector<8x128xf32>
      %cst_281 = arith.constant 0.000000e+00 : f32
      %1728 = vector.broadcast %cst_281 : f32 to vector<8x128xf32>
      %1729 = arith.subf %1728, %1150 : vector<8x128xf32>
      %cst_282 = arith.constant 1.000000e+00 : f32
      %1730 = vector.broadcast %cst_282 : f32 to vector<8x128xf32>
      %1731 = arith.select %1727, %1730, %1722 : vector<8x128xi1>, vector<8x128xf32>
      %1732 = tpu.reciprocal %1731 {approx = true} : vector<8x128xf32> -> vector<8x128xf32>
      %1733 = arith.mulf %1729, %1732 : vector<8x128xf32>
      %cst_283 = arith.constant dense<true> : vector<8x128xi1>
      %1734 = arith.xori %1727, %cst_283 : vector<8x128xi1>
      %cst_284 = arith.constant 0.000000e+00 : f32
      %1735 = vector.broadcast %cst_284 : f32 to vector<8x128xf32>
      %1736 = arith.cmpf ogt, %1722, %1735 : vector<8x128xf32>
      %1737 = arith.andi %1734, %1736 : vector<8x128xi1>
      %1738 = arith.maximumf %1695, %1733 : vector<8x128xf32>
      %1739 = arith.select %1737, %1738, %1695 : vector<8x128xi1>, vector<8x128xf32>
      %cst_285 = arith.constant dense<true> : vector<8x128xi1>
      %1740 = arith.xori %1727, %cst_285 : vector<8x128xi1>
      %cst_286 = arith.constant 0.000000e+00 : f32
      %1741 = vector.broadcast %cst_286 : f32 to vector<8x128xf32>
      %1742 = arith.cmpf olt, %1722, %1741 : vector<8x128xf32>
      %1743 = arith.andi %1740, %1742 : vector<8x128xi1>
      %1744 = arith.minimumf %1701, %1733 : vector<8x128xf32>
      %1745 = arith.select %1743, %1744, %1701 : vector<8x128xi1>, vector<8x128xf32>
      %cst_287 = arith.constant 0.000000e+00 : f32
      %1746 = vector.broadcast %cst_287 : f32 to vector<8x128xf32>
      %1747 = arith.subf %1746, %1725 : vector<8x128xf32>
      %1748 = arith.cmpf olt, %1150, %1747 : vector<8x128xf32>
      %1749 = arith.andi %1727, %1748 : vector<8x128xi1>
      %1750 = arith.ori %1721, %1749 : vector<8x128xi1>
      %1751 = math.absf %1150 : vector<8x128xf32>
      %1752 = arith.cmpf ole, %1751, %1725 : vector<8x128xf32>
      %1753 = arith.andi %1727, %1752 : vector<8x128xi1>
      %1754 = vector.broadcast %50 : vector<8x1xf32> to vector<8x128xf32>
      %1755 = vector.broadcast %189 : vector<1x128xf32> to vector<8x128xf32>
      %1756 = arith.mulf %1754, %1755 : vector<8x128xf32>
      %1757 = vector.broadcast %54 : vector<8x1xf32> to vector<8x128xf32>
      %1758 = vector.broadcast %193 : vector<1x128xf32> to vector<8x128xf32>
      %1759 = arith.mulf %1757, %1758 : vector<8x128xf32>
      %1760 = arith.addf %1756, %1759 : vector<8x128xf32>
      %1761 = arith.mulf %1760, %186 : vector<8x128xf32>
      %cst_288 = arith.constant 0.000000e+00 : f32
      %1762 = vector.broadcast %cst_288 : f32 to vector<8x128xf32>
      %1763 = arith.cmpf ogt, %1761, %1762 : vector<8x128xf32>
      %1764 = arith.andi %1753, %1763 : vector<8x128xi1>
      %1765 = arith.ori %1750, %1764 : vector<8x128xi1>
      %1766 = arith.subf %1215, %1163 : vector<8x128xf32>
      %1767 = vector.broadcast %75 : vector<8x1xf32> to vector<8x128xf32>
      %1768 = vector.broadcast %203 : vector<1x128xf32> to vector<8x128xf32>
      %1769 = arith.mulf %1767, %1768 : vector<8x128xf32>
      %1770 = math.absf %1766 : vector<8x128xf32>
      %1771 = arith.cmpf ole, %1770, %1769 : vector<8x128xf32>
      %cst_289 = arith.constant 0.000000e+00 : f32
      %1772 = vector.broadcast %cst_289 : f32 to vector<8x128xf32>
      %1773 = arith.subf %1772, %1163 : vector<8x128xf32>
      %cst_290 = arith.constant 1.000000e+00 : f32
      %1774 = vector.broadcast %cst_290 : f32 to vector<8x128xf32>
      %1775 = arith.select %1771, %1774, %1766 : vector<8x128xi1>, vector<8x128xf32>
      %1776 = tpu.reciprocal %1775 {approx = true} : vector<8x128xf32> -> vector<8x128xf32>
      %1777 = arith.mulf %1773, %1776 : vector<8x128xf32>
      %cst_291 = arith.constant dense<true> : vector<8x128xi1>
      %1778 = arith.xori %1771, %cst_291 : vector<8x128xi1>
      %cst_292 = arith.constant 0.000000e+00 : f32
      %1779 = vector.broadcast %cst_292 : f32 to vector<8x128xf32>
      %1780 = arith.cmpf ogt, %1766, %1779 : vector<8x128xf32>
      %1781 = arith.andi %1778, %1780 : vector<8x128xi1>
      %1782 = arith.maximumf %1739, %1777 : vector<8x128xf32>
      %1783 = arith.select %1781, %1782, %1739 : vector<8x128xi1>, vector<8x128xf32>
      %cst_293 = arith.constant dense<true> : vector<8x128xi1>
      %1784 = arith.xori %1771, %cst_293 : vector<8x128xi1>
      %cst_294 = arith.constant 0.000000e+00 : f32
      %1785 = vector.broadcast %cst_294 : f32 to vector<8x128xf32>
      %1786 = arith.cmpf olt, %1766, %1785 : vector<8x128xf32>
      %1787 = arith.andi %1784, %1786 : vector<8x128xi1>
      %1788 = arith.minimumf %1745, %1777 : vector<8x128xf32>
      %1789 = arith.select %1787, %1788, %1745 : vector<8x128xi1>, vector<8x128xf32>
      %cst_295 = arith.constant 0.000000e+00 : f32
      %1790 = vector.broadcast %cst_295 : f32 to vector<8x128xf32>
      %1791 = arith.subf %1790, %1769 : vector<8x128xf32>
      %1792 = arith.cmpf olt, %1163, %1791 : vector<8x128xf32>
      %1793 = arith.andi %1771, %1792 : vector<8x128xi1>
      %1794 = arith.ori %1765, %1793 : vector<8x128xi1>
      %1795 = math.absf %1163 : vector<8x128xf32>
      %1796 = arith.cmpf ole, %1795, %1769 : vector<8x128xf32>
      %1797 = arith.andi %1771, %1796 : vector<8x128xi1>
      %1798 = vector.broadcast %51 : vector<8x1xf32> to vector<8x128xf32>
      %1799 = vector.broadcast %189 : vector<1x128xf32> to vector<8x128xf32>
      %1800 = arith.mulf %1798, %1799 : vector<8x128xf32>
      %1801 = vector.broadcast %55 : vector<8x1xf32> to vector<8x128xf32>
      %1802 = vector.broadcast %193 : vector<1x128xf32> to vector<8x128xf32>
      %1803 = arith.mulf %1801, %1802 : vector<8x128xf32>
      %1804 = arith.addf %1800, %1803 : vector<8x128xf32>
      %1805 = arith.mulf %1804, %186 : vector<8x128xf32>
      %cst_296 = arith.constant 0.000000e+00 : f32
      %1806 = vector.broadcast %cst_296 : f32 to vector<8x128xf32>
      %1807 = arith.cmpf ogt, %1805, %1806 : vector<8x128xf32>
      %1808 = arith.andi %1797, %1807 : vector<8x128xi1>
      %1809 = arith.ori %1794, %1808 : vector<8x128xi1>
      %1810 = vector.broadcast %189 : vector<1x128xf32> to vector<8x128xf32>
      %1811 = arith.mulf %1783, %1810 : vector<8x128xf32>
      %1812 = vector.broadcast %89 : vector<1x128xf32> to vector<8x128xf32>
      %1813 = arith.addf %1812, %1811 : vector<8x128xf32>
      %1814 = vector.broadcast %193 : vector<1x128xf32> to vector<8x128xf32>
      %1815 = arith.mulf %1783, %1814 : vector<8x128xf32>
      %1816 = vector.broadcast %93 : vector<1x128xf32> to vector<8x128xf32>
      %1817 = arith.addf %1816, %1815 : vector<8x128xf32>
      %1818 = vector.broadcast %189 : vector<1x128xf32> to vector<8x128xf32>
      %1819 = arith.mulf %1789, %1818 : vector<8x128xf32>
      %1820 = vector.broadcast %89 : vector<1x128xf32> to vector<8x128xf32>
      %1821 = arith.addf %1820, %1819 : vector<8x128xf32>
      %1822 = vector.broadcast %193 : vector<1x128xf32> to vector<8x128xf32>
      %1823 = arith.mulf %1789, %1822 : vector<8x128xf32>
      %1824 = vector.broadcast %93 : vector<1x128xf32> to vector<8x128xf32>
      %1825 = arith.addf %1824, %1823 : vector<8x128xf32>
      %cst_297 = arith.constant dense<true> : vector<8x128xi1>
      %1826 = arith.xori %1809, %cst_297 : vector<8x128xi1>
      %1827 = arith.cmpf ogt, %1789, %1783 : vector<8x128xf32>
      %1828 = arith.andi %1826, %1827 : vector<8x128xi1>
      %1829 = arith.mulf %1813, %1825 : vector<8x128xf32>
      %1830 = arith.mulf %1821, %1817 : vector<8x128xf32>
      %1831 = arith.subf %1829, %1830 : vector<8x128xf32>
      %cst_298 = arith.constant 0.000000e+00 : f32
      %1832 = vector.broadcast %cst_298 : f32 to vector<8x128xf32>
      %1833 = arith.select %1828, %1831, %1832 : vector<8x128xi1>, vector<8x128xf32>
      %1834 = arith.addf %1628, %1833 : vector<8x128xf32>
      %1835 = arith.subf %1020, %1176 : vector<8x128xf32>
      %1836 = vector.broadcast %69 : vector<8x1xf32> to vector<8x128xf32>
      %1837 = vector.broadcast %206 : vector<1x128xf32> to vector<8x128xf32>
      %1838 = arith.mulf %1836, %1837 : vector<8x128xf32>
      %1839 = math.absf %1835 : vector<8x128xf32>
      %1840 = arith.cmpf ole, %1839, %1838 : vector<8x128xf32>
      %cst_299 = arith.constant 0.000000e+00 : f32
      %1841 = vector.broadcast %cst_299 : f32 to vector<8x128xf32>
      %1842 = arith.subf %1841, %1176 : vector<8x128xf32>
      %cst_300 = arith.constant 1.000000e+00 : f32
      %1843 = vector.broadcast %cst_300 : f32 to vector<8x128xf32>
      %1844 = arith.select %1840, %1843, %1835 : vector<8x128xi1>, vector<8x128xf32>
      %1845 = tpu.reciprocal %1844 {approx = true} : vector<8x128xf32> -> vector<8x128xf32>
      %1846 = arith.mulf %1842, %1845 : vector<8x128xf32>
      %cst_301 = arith.constant dense<true> : vector<8x128xi1>
      %1847 = arith.xori %1840, %cst_301 : vector<8x128xi1>
      %cst_302 = arith.constant 0.000000e+00 : f32
      %1848 = vector.broadcast %cst_302 : f32 to vector<8x128xf32>
      %1849 = arith.cmpf ogt, %1835, %1848 : vector<8x128xf32>
      %1850 = arith.andi %1847, %1849 : vector<8x128xi1>
      %cst_303 = arith.constant 0.000000e+00 : f32
      %1851 = vector.broadcast %cst_303 : f32 to vector<8x128xf32>
      %1852 = arith.maximumf %1851, %1846 : vector<8x128xf32>
      %cst_304 = arith.constant 0.000000e+00 : f32
      %1853 = vector.broadcast %cst_304 : f32 to vector<8x128xf32>
      %1854 = arith.select %1850, %1852, %1853 : vector<8x128xi1>, vector<8x128xf32>
      %cst_305 = arith.constant dense<true> : vector<8x128xi1>
      %1855 = arith.xori %1840, %cst_305 : vector<8x128xi1>
      %cst_306 = arith.constant 0.000000e+00 : f32
      %1856 = vector.broadcast %cst_306 : f32 to vector<8x128xf32>
      %1857 = arith.cmpf olt, %1835, %1856 : vector<8x128xf32>
      %1858 = arith.andi %1855, %1857 : vector<8x128xi1>
      %cst_307 = arith.constant 1.000000e+00 : f32
      %1859 = vector.broadcast %cst_307 : f32 to vector<8x128xf32>
      %1860 = arith.minimumf %1859, %1846 : vector<8x128xf32>
      %cst_308 = arith.constant 1.000000e+00 : f32
      %1861 = vector.broadcast %cst_308 : f32 to vector<8x128xf32>
      %1862 = arith.select %1858, %1860, %1861 : vector<8x128xi1>, vector<8x128xf32>
      %cst_309 = arith.constant 0.000000e+00 : f32
      %1863 = vector.broadcast %cst_309 : f32 to vector<8x128xf32>
      %1864 = arith.subf %1863, %1838 : vector<8x128xf32>
      %1865 = arith.cmpf olt, %1176, %1864 : vector<8x128xf32>
      %1866 = arith.andi %1840, %1865 : vector<8x128xi1>
      %false_310 = arith.constant false
      %1867 = vector.broadcast %false_310 : i1 to vector<8x128xi1>
      %1868 = arith.ori %1867, %1866 : vector<8x128xi1>
      %1869 = math.absf %1176 : vector<8x128xf32>
      %1870 = arith.cmpf ole, %1869, %1838 : vector<8x128xf32>
      %1871 = arith.andi %1840, %1870 : vector<8x128xi1>
      %1872 = vector.broadcast %48 : vector<8x1xf32> to vector<8x128xf32>
      %1873 = vector.broadcast %190 : vector<1x128xf32> to vector<8x128xf32>
      %1874 = arith.mulf %1872, %1873 : vector<8x128xf32>
      %1875 = vector.broadcast %52 : vector<8x1xf32> to vector<8x128xf32>
      %1876 = vector.broadcast %194 : vector<1x128xf32> to vector<8x128xf32>
      %1877 = arith.mulf %1875, %1876 : vector<8x128xf32>
      %1878 = arith.addf %1874, %1877 : vector<8x128xf32>
      %1879 = arith.mulf %1878, %186 : vector<8x128xf32>
      %cst_311 = arith.constant 0.000000e+00 : f32
      %1880 = vector.broadcast %cst_311 : f32 to vector<8x128xf32>
      %1881 = arith.cmpf ogt, %1879, %1880 : vector<8x128xf32>
      %1882 = arith.andi %1871, %1881 : vector<8x128xi1>
      %1883 = arith.ori %1868, %1882 : vector<8x128xi1>
      %1884 = arith.subf %1033, %1189 : vector<8x128xf32>
      %1885 = vector.broadcast %71 : vector<8x1xf32> to vector<8x128xf32>
      %1886 = vector.broadcast %206 : vector<1x128xf32> to vector<8x128xf32>
      %1887 = arith.mulf %1885, %1886 : vector<8x128xf32>
      %1888 = math.absf %1884 : vector<8x128xf32>
      %1889 = arith.cmpf ole, %1888, %1887 : vector<8x128xf32>
      %cst_312 = arith.constant 0.000000e+00 : f32
      %1890 = vector.broadcast %cst_312 : f32 to vector<8x128xf32>
      %1891 = arith.subf %1890, %1189 : vector<8x128xf32>
      %cst_313 = arith.constant 1.000000e+00 : f32
      %1892 = vector.broadcast %cst_313 : f32 to vector<8x128xf32>
      %1893 = arith.select %1889, %1892, %1884 : vector<8x128xi1>, vector<8x128xf32>
      %1894 = tpu.reciprocal %1893 {approx = true} : vector<8x128xf32> -> vector<8x128xf32>
      %1895 = arith.mulf %1891, %1894 : vector<8x128xf32>
      %cst_314 = arith.constant dense<true> : vector<8x128xi1>
      %1896 = arith.xori %1889, %cst_314 : vector<8x128xi1>
      %cst_315 = arith.constant 0.000000e+00 : f32
      %1897 = vector.broadcast %cst_315 : f32 to vector<8x128xf32>
      %1898 = arith.cmpf ogt, %1884, %1897 : vector<8x128xf32>
      %1899 = arith.andi %1896, %1898 : vector<8x128xi1>
      %1900 = arith.maximumf %1854, %1895 : vector<8x128xf32>
      %1901 = arith.select %1899, %1900, %1854 : vector<8x128xi1>, vector<8x128xf32>
      %cst_316 = arith.constant dense<true> : vector<8x128xi1>
      %1902 = arith.xori %1889, %cst_316 : vector<8x128xi1>
      %cst_317 = arith.constant 0.000000e+00 : f32
      %1903 = vector.broadcast %cst_317 : f32 to vector<8x128xf32>
      %1904 = arith.cmpf olt, %1884, %1903 : vector<8x128xf32>
      %1905 = arith.andi %1902, %1904 : vector<8x128xi1>
      %1906 = arith.minimumf %1862, %1895 : vector<8x128xf32>
      %1907 = arith.select %1905, %1906, %1862 : vector<8x128xi1>, vector<8x128xf32>
      %cst_318 = arith.constant 0.000000e+00 : f32
      %1908 = vector.broadcast %cst_318 : f32 to vector<8x128xf32>
      %1909 = arith.subf %1908, %1887 : vector<8x128xf32>
      %1910 = arith.cmpf olt, %1189, %1909 : vector<8x128xf32>
      %1911 = arith.andi %1889, %1910 : vector<8x128xi1>
      %1912 = arith.ori %1883, %1911 : vector<8x128xi1>
      %1913 = math.absf %1189 : vector<8x128xf32>
      %1914 = arith.cmpf ole, %1913, %1887 : vector<8x128xf32>
      %1915 = arith.andi %1889, %1914 : vector<8x128xi1>
      %1916 = vector.broadcast %49 : vector<8x1xf32> to vector<8x128xf32>
      %1917 = vector.broadcast %190 : vector<1x128xf32> to vector<8x128xf32>
      %1918 = arith.mulf %1916, %1917 : vector<8x128xf32>
      %1919 = vector.broadcast %53 : vector<8x1xf32> to vector<8x128xf32>
      %1920 = vector.broadcast %194 : vector<1x128xf32> to vector<8x128xf32>
      %1921 = arith.mulf %1919, %1920 : vector<8x128xf32>
      %1922 = arith.addf %1918, %1921 : vector<8x128xf32>
      %1923 = arith.mulf %1922, %186 : vector<8x128xf32>
      %cst_319 = arith.constant 0.000000e+00 : f32
      %1924 = vector.broadcast %cst_319 : f32 to vector<8x128xf32>
      %1925 = arith.cmpf ogt, %1923, %1924 : vector<8x128xf32>
      %1926 = arith.andi %1915, %1925 : vector<8x128xi1>
      %1927 = arith.ori %1912, %1926 : vector<8x128xi1>
      %1928 = arith.subf %1046, %1202 : vector<8x128xf32>
      %1929 = vector.broadcast %73 : vector<8x1xf32> to vector<8x128xf32>
      %1930 = vector.broadcast %206 : vector<1x128xf32> to vector<8x128xf32>
      %1931 = arith.mulf %1929, %1930 : vector<8x128xf32>
      %1932 = math.absf %1928 : vector<8x128xf32>
      %1933 = arith.cmpf ole, %1932, %1931 : vector<8x128xf32>
      %cst_320 = arith.constant 0.000000e+00 : f32
      %1934 = vector.broadcast %cst_320 : f32 to vector<8x128xf32>
      %1935 = arith.subf %1934, %1202 : vector<8x128xf32>
      %cst_321 = arith.constant 1.000000e+00 : f32
      %1936 = vector.broadcast %cst_321 : f32 to vector<8x128xf32>
      %1937 = arith.select %1933, %1936, %1928 : vector<8x128xi1>, vector<8x128xf32>
      %1938 = tpu.reciprocal %1937 {approx = true} : vector<8x128xf32> -> vector<8x128xf32>
      %1939 = arith.mulf %1935, %1938 : vector<8x128xf32>
      %cst_322 = arith.constant dense<true> : vector<8x128xi1>
      %1940 = arith.xori %1933, %cst_322 : vector<8x128xi1>
      %cst_323 = arith.constant 0.000000e+00 : f32
      %1941 = vector.broadcast %cst_323 : f32 to vector<8x128xf32>
      %1942 = arith.cmpf ogt, %1928, %1941 : vector<8x128xf32>
      %1943 = arith.andi %1940, %1942 : vector<8x128xi1>
      %1944 = arith.maximumf %1901, %1939 : vector<8x128xf32>
      %1945 = arith.select %1943, %1944, %1901 : vector<8x128xi1>, vector<8x128xf32>
      %cst_324 = arith.constant dense<true> : vector<8x128xi1>
      %1946 = arith.xori %1933, %cst_324 : vector<8x128xi1>
      %cst_325 = arith.constant 0.000000e+00 : f32
      %1947 = vector.broadcast %cst_325 : f32 to vector<8x128xf32>
      %1948 = arith.cmpf olt, %1928, %1947 : vector<8x128xf32>
      %1949 = arith.andi %1946, %1948 : vector<8x128xi1>
      %1950 = arith.minimumf %1907, %1939 : vector<8x128xf32>
      %1951 = arith.select %1949, %1950, %1907 : vector<8x128xi1>, vector<8x128xf32>
      %cst_326 = arith.constant 0.000000e+00 : f32
      %1952 = vector.broadcast %cst_326 : f32 to vector<8x128xf32>
      %1953 = arith.subf %1952, %1931 : vector<8x128xf32>
      %1954 = arith.cmpf olt, %1202, %1953 : vector<8x128xf32>
      %1955 = arith.andi %1933, %1954 : vector<8x128xi1>
      %1956 = arith.ori %1927, %1955 : vector<8x128xi1>
      %1957 = math.absf %1202 : vector<8x128xf32>
      %1958 = arith.cmpf ole, %1957, %1931 : vector<8x128xf32>
      %1959 = arith.andi %1933, %1958 : vector<8x128xi1>
      %1960 = vector.broadcast %50 : vector<8x1xf32> to vector<8x128xf32>
      %1961 = vector.broadcast %190 : vector<1x128xf32> to vector<8x128xf32>
      %1962 = arith.mulf %1960, %1961 : vector<8x128xf32>
      %1963 = vector.broadcast %54 : vector<8x1xf32> to vector<8x128xf32>
      %1964 = vector.broadcast %194 : vector<1x128xf32> to vector<8x128xf32>
      %1965 = arith.mulf %1963, %1964 : vector<8x128xf32>
      %1966 = arith.addf %1962, %1965 : vector<8x128xf32>
      %1967 = arith.mulf %1966, %186 : vector<8x128xf32>
      %cst_327 = arith.constant 0.000000e+00 : f32
      %1968 = vector.broadcast %cst_327 : f32 to vector<8x128xf32>
      %1969 = arith.cmpf ogt, %1967, %1968 : vector<8x128xf32>
      %1970 = arith.andi %1959, %1969 : vector<8x128xi1>
      %1971 = arith.ori %1956, %1970 : vector<8x128xi1>
      %1972 = arith.subf %1059, %1215 : vector<8x128xf32>
      %1973 = vector.broadcast %75 : vector<8x1xf32> to vector<8x128xf32>
      %1974 = vector.broadcast %206 : vector<1x128xf32> to vector<8x128xf32>
      %1975 = arith.mulf %1973, %1974 : vector<8x128xf32>
      %1976 = math.absf %1972 : vector<8x128xf32>
      %1977 = arith.cmpf ole, %1976, %1975 : vector<8x128xf32>
      %cst_328 = arith.constant 0.000000e+00 : f32
      %1978 = vector.broadcast %cst_328 : f32 to vector<8x128xf32>
      %1979 = arith.subf %1978, %1215 : vector<8x128xf32>
      %cst_329 = arith.constant 1.000000e+00 : f32
      %1980 = vector.broadcast %cst_329 : f32 to vector<8x128xf32>
      %1981 = arith.select %1977, %1980, %1972 : vector<8x128xi1>, vector<8x128xf32>
      %1982 = tpu.reciprocal %1981 {approx = true} : vector<8x128xf32> -> vector<8x128xf32>
      %1983 = arith.mulf %1979, %1982 : vector<8x128xf32>
      %cst_330 = arith.constant dense<true> : vector<8x128xi1>
      %1984 = arith.xori %1977, %cst_330 : vector<8x128xi1>
      %cst_331 = arith.constant 0.000000e+00 : f32
      %1985 = vector.broadcast %cst_331 : f32 to vector<8x128xf32>
      %1986 = arith.cmpf ogt, %1972, %1985 : vector<8x128xf32>
      %1987 = arith.andi %1984, %1986 : vector<8x128xi1>
      %1988 = arith.maximumf %1945, %1983 : vector<8x128xf32>
      %1989 = arith.select %1987, %1988, %1945 : vector<8x128xi1>, vector<8x128xf32>
      %cst_332 = arith.constant dense<true> : vector<8x128xi1>
      %1990 = arith.xori %1977, %cst_332 : vector<8x128xi1>
      %cst_333 = arith.constant 0.000000e+00 : f32
      %1991 = vector.broadcast %cst_333 : f32 to vector<8x128xf32>
      %1992 = arith.cmpf olt, %1972, %1991 : vector<8x128xf32>
      %1993 = arith.andi %1990, %1992 : vector<8x128xi1>
      %1994 = arith.minimumf %1951, %1983 : vector<8x128xf32>
      %1995 = arith.select %1993, %1994, %1951 : vector<8x128xi1>, vector<8x128xf32>
      %cst_334 = arith.constant 0.000000e+00 : f32
      %1996 = vector.broadcast %cst_334 : f32 to vector<8x128xf32>
      %1997 = arith.subf %1996, %1975 : vector<8x128xf32>
      %1998 = arith.cmpf olt, %1215, %1997 : vector<8x128xf32>
      %1999 = arith.andi %1977, %1998 : vector<8x128xi1>
      %2000 = arith.ori %1971, %1999 : vector<8x128xi1>
      %2001 = math.absf %1215 : vector<8x128xf32>
      %2002 = arith.cmpf ole, %2001, %1975 : vector<8x128xf32>
      %2003 = arith.andi %1977, %2002 : vector<8x128xi1>
      %2004 = vector.broadcast %51 : vector<8x1xf32> to vector<8x128xf32>
      %2005 = vector.broadcast %190 : vector<1x128xf32> to vector<8x128xf32>
      %2006 = arith.mulf %2004, %2005 : vector<8x128xf32>
      %2007 = vector.broadcast %55 : vector<8x1xf32> to vector<8x128xf32>
      %2008 = vector.broadcast %194 : vector<1x128xf32> to vector<8x128xf32>
      %2009 = arith.mulf %2007, %2008 : vector<8x128xf32>
      %2010 = arith.addf %2006, %2009 : vector<8x128xf32>
      %2011 = arith.mulf %2010, %186 : vector<8x128xf32>
      %cst_335 = arith.constant 0.000000e+00 : f32
      %2012 = vector.broadcast %cst_335 : f32 to vector<8x128xf32>
      %2013 = arith.cmpf ogt, %2011, %2012 : vector<8x128xf32>
      %2014 = arith.andi %2003, %2013 : vector<8x128xi1>
      %2015 = arith.ori %2000, %2014 : vector<8x128xi1>
      %2016 = vector.broadcast %190 : vector<1x128xf32> to vector<8x128xf32>
      %2017 = arith.mulf %1989, %2016 : vector<8x128xf32>
      %2018 = vector.broadcast %90 : vector<1x128xf32> to vector<8x128xf32>
      %2019 = arith.addf %2018, %2017 : vector<8x128xf32>
      %2020 = vector.broadcast %194 : vector<1x128xf32> to vector<8x128xf32>
      %2021 = arith.mulf %1989, %2020 : vector<8x128xf32>
      %2022 = vector.broadcast %94 : vector<1x128xf32> to vector<8x128xf32>
      %2023 = arith.addf %2022, %2021 : vector<8x128xf32>
      %2024 = vector.broadcast %190 : vector<1x128xf32> to vector<8x128xf32>
      %2025 = arith.mulf %1995, %2024 : vector<8x128xf32>
      %2026 = vector.broadcast %90 : vector<1x128xf32> to vector<8x128xf32>
      %2027 = arith.addf %2026, %2025 : vector<8x128xf32>
      %2028 = vector.broadcast %194 : vector<1x128xf32> to vector<8x128xf32>
      %2029 = arith.mulf %1995, %2028 : vector<8x128xf32>
      %2030 = vector.broadcast %94 : vector<1x128xf32> to vector<8x128xf32>
      %2031 = arith.addf %2030, %2029 : vector<8x128xf32>
      %cst_336 = arith.constant dense<true> : vector<8x128xi1>
      %2032 = arith.xori %2015, %cst_336 : vector<8x128xi1>
      %2033 = arith.cmpf ogt, %1995, %1989 : vector<8x128xf32>
      %2034 = arith.andi %2032, %2033 : vector<8x128xi1>
      %2035 = arith.mulf %2019, %2031 : vector<8x128xf32>
      %2036 = arith.mulf %2027, %2023 : vector<8x128xf32>
      %2037 = arith.subf %2035, %2036 : vector<8x128xf32>
      %cst_337 = arith.constant 0.000000e+00 : f32
      %2038 = vector.broadcast %cst_337 : f32 to vector<8x128xf32>
      %2039 = arith.select %2034, %2037, %2038 : vector<8x128xi1>, vector<8x128xf32>
      %2040 = arith.addf %1834, %2039 : vector<8x128xf32>
      %2041 = vector.broadcast %47 : vector<8x1xf32> to vector<8x128xf32>
      %2042 = arith.mulf %2041, %1007 : vector<8x128xf32>
      %2043 = vector.broadcast %183 : vector<1x128xf32> to vector<8x128xf32>
      %2044 = arith.mulf %2043, %2040 : vector<8x128xf32>
      %2045 = arith.addf %2042, %2044 : vector<8x128xf32>
      %cst_338 = arith.constant 5.000000e-01 : f32
      %2046 = vector.broadcast %cst_338 : f32 to vector<8x128xf32>
      %2047 = arith.mulf %2046, %2045 : vector<8x128xf32>
      %cst_339 = arith.constant 0.000000e+00 : f32
      %2048 = vector.broadcast %cst_339 : f32 to vector<8x128xf32>
      %2049 = arith.maximumf %2047, %2048 : vector<8x128xf32>
      %cst_340 = arith.constant 0.000000e+00 : f32
      %2050 = vector.broadcast %cst_340 : f32 to vector<8x1xf32>
      %2051 = arith.cmpf ogt, %42, %2050 : vector<8x1xf32>
      %cst_341 = arith.constant 0.000000e+00 : f32
      %2052 = vector.broadcast %cst_341 : f32 to vector<1x128xf32>
      %2053 = arith.cmpf ogt, %178, %2052 : vector<1x128xf32>
      %2054 = vector.broadcast %2051 : vector<8x1xi1> to vector<8x128xi1>
      %2055 = vector.broadcast %2053 : vector<1x128xi1> to vector<8x128xi1>
      %2056 = arith.andi %2054, %2055 : vector<8x128xi1>
      %cst_342 = arith.constant 0.000000e+00 : f32
      %2057 = vector.broadcast %cst_342 : f32 to vector<8x128xf32>
      %2058 = arith.select %2056, %2049, %2057 : vector<8x128xi1>, vector<8x128xf32>
      %2059 = vector.broadcast %42 : vector<8x1xf32> to vector<8x128xf32>
      %2060 = vector.broadcast %178 : vector<1x128xf32> to vector<8x128xf32>
      %2061 = arith.addf %2059, %2060 : vector<8x128xf32>
      %2062 = arith.subf %2061, %2058 : vector<8x128xf32>
      %cst_343 = arith.constant 0.000000e+00 : f32
      %2063 = vector.broadcast %cst_343 : f32 to vector<8x128xf32>
      %2064 = arith.cmpf oeq, %2062, %2063 : vector<8x128xf32>
      %cst_344 = arith.constant 1.000000e+00 : f32
      %2065 = vector.broadcast %cst_344 : f32 to vector<8x128xf32>
      %2066 = arith.select %2064, %2065, %2062 : vector<8x128xi1>, vector<8x128xf32>
      %cst_345 = arith.constant 0.000000e+00 : f32
      %2067 = vector.broadcast %cst_345 : f32 to vector<8x128xf32>
      %2068 = arith.cmpf oeq, %2062, %2067 : vector<8x128xf32>
      %2069 = tpu.reciprocal %2066 : vector<8x128xf32> -> vector<8x128xf32>
      %2070 = arith.mulf %2058, %2069 : vector<8x128xf32>
      %cst_346 = arith.constant 1.000000e+00 : f32
      %2071 = vector.broadcast %cst_346 : f32 to vector<8x128xf32>
      %2072 = arith.select %2068, %2071, %2070 : vector<8x128xi1>, vector<8x128xf32>
      %cst_347 = arith.constant 9.99999997E-7 : f32
      %2073 = vector.broadcast %cst_347 : f32 to vector<8x128xf32>
      %2074 = arith.maximumf %2072, %2073 : vector<8x128xf32>
      %c0_348 = arith.constant 0 : index
      %c0_349 = arith.constant 0 : index
      %2075 = vector.load %arg5[%c0_348, %c0_349] : memref<8x128xf32, #tpu.memory_space<vmem>>, vector<8x128xf32>
      %2076 = math.log %2074 : vector<8x128xf32>
      %cst_350 = arith.constant 0.000000e+00 : f32
      %2077 = vector.broadcast %cst_350 : f32 to vector<8x128xf32>
      %2078 = arith.subf %2077, %2076 : vector<8x128xf32>
      %cst_351 = arith.constant 0.000000e+00 : f32
      %2079 = vector.broadcast %cst_351 : f32 to vector<8x128xf32>
      %2080 = arith.select %141, %2078, %2079 : vector<8x128xi1>, vector<8x128xf32>
      %2081 = arith.addf %2075, %2080 : vector<8x128xf32>
      %c0_352 = arith.constant 0 : index
      %c0_353 = arith.constant 0 : index
      %2082 = vector.load %arg5[%c0_352, %c0_353] : memref<8x128xf32, #tpu.memory_space<vmem>>, vector<8x128xf32>
      tpu.vector_store %arg5[%c0_352, %c0_353], %2081 {strides = array<i32>} : memref<8x128xf32, #tpu.memory_space<vmem>>, vector<8x128xf32>,
    } else {
    }
    %c1_i32 = arith.constant 1 : i32
    %c0_26 = arith.constant 0 : index
    %c0_27 = arith.constant 0 : index
    %152 = vector.load %arg5[%c0_26, %c0_27] : memref<8x128xf32, #tpu.memory_space<vmem>>, vector<8x128xf32>
    %153 = vector.shape_cast %152 : vector<8x128xf32> to vector<1x8x128xf32>
    %cst_28 = arith.constant dense<0.000000e+00> : vector<1xf32>
    %154 = vector.multi_reduction <add>, %153, %cst_28 [1, 2] : vector<1x8x128xf32> to vector<1xf32>
    %155 = vector.shape_cast %154 : vector<1xf32> to vector<1x1x1xf32>
    %156 = vector.extract %155[0, 0, 0] : f32 from vector<1x1x1xf32>
    %157 = vector.broadcast %156 : f32 to vector<1x1x1xf32>
    %c0_29 = arith.constant 0 : index
    %c0_30 = arith.constant 0 : index
    %c0_31 = arith.constant 0 : index
    %158 = vector.load %arg4[%c0_29, %c0_30, %c0_31] : memref<1x1x1xf32, #tpu.memory_space<vmem>>, vector<1x1x1xf32>
    tpu.vector_store %arg4[%c0_29, %c0_30, %c0_31], %157 {strides = array<i32>} : memref<1x1x1xf32, #tpu.memory_space<vmem>>, vector<1x1x1xf32>,
    return
  }
  func.func @transform_0(%arg0: i32, %arg1: i32) -> (i32, i32) {
    %c0_i32 = arith.constant 0 : i32
    %c0_i32_0 = arith.constant 0 : i32
    return %arg0, %c0_i32 : i32, i32
  }
  func.func @transform_1(%arg0: i32, %arg1: i32) -> (i32, i32) {
    %c0_i32 = arith.constant 0 : i32
    %c0_i32_0 = arith.constant 0 : i32
    return %c0_i32, %arg1 : i32, i32
  }
  func.func @transform_2(%arg0: i32, %arg1: i32) -> (i32, i32, i32) {
    %c1_i32 = arith.constant 1 : i32
    %0 = arith.muli %arg0, %c1_i32 : i32
    %1 = arith.addi %0, %arg1 : i32
    %c0_i32 = arith.constant 0 : i32
    %c0_i32_0 = arith.constant 0 : i32
    %c0_i32_1 = arith.constant 0 : i32
    return %1, %c0_i32, %c0_i32_0 : i32, i32, i32
  }
}

</mosaic_0001>

<bundles_post_ra>
// kernel: tpu_custom_call.1
= control target key start
LH: loop header
LB: loop body
LE: loop exit
PB: predicated region body
PF: predicated region fallthrough
CT: control target
= control target key end

     0   :  { %7 = vsyncpa [#allocation4], 0  ;;  %s5595_s0 = inlined_call_operand.hbm [shape: f32[8,8], index: 0, kind: input, shape index: {}]   ;;  %s5596_s1 = inlined_call_operand.hbm [shape: f32[8,128], index: 1, kind: input, shape index: {}]   ;;  %s5597_s2 = inlined_call_operand.hbm [shape: f32[1,1,1], index: 2, kind: output, shape index: {}]  }
   0x1   :  { %8 = vsyncpa [#allocation7], 0 }
   0x2   :  { %9 = vsyncpa [#allocation5], 0  ;;  %s1869_s9 = smov [#allocation3]   ;;  %s1870_s11 = smov [#allocation6]  }
   0x3   :  { %s16_s10 = sshll.u32 %s1869_s9, 4  ;;  %s26_s12 = sshll.u32 %s1870_s11, 4  ;;  %s17_s10 = int_to_ptr.vmem [resolvable:$true] %s16_s10  ;;  %s27_s12 = int_to_ptr.vmem [resolvable:$true] %s26_s12 }
   0x4   :  { %s1811_s13 = scalar_lea.vmem %s17_s10, 128  ;;  %p1816_p1 = scmp.lt.s32.totalorder %s17_s10, %s17_s10 }
   0x5   :  { %p1812_p0 = scmp.ne.s32.totalorder %s17_s10, %s1811_s13  ;;  %p1817_p2 = scmp.lt.s32.totalorder %s1811_s13, %s1811_s13 }
   0x7   :  { %p1818_p3 = por %p1817_p2, %p1816_p1 }
   0x9   :  { %p1819_p4 = pnand %p1818_p3, %p1812_p0 }
   0xb   :  { %1822 = shalt.err (!%p1819_p4)
}
   0xc   :  { %19 = dma.hbm_to_vmem [thread:$0]  %s5595_s0, 128, %s17_s10, [#allocation4]  }
   0xd   :  { %s1831_s16 = scalar_lea.vmem %s27_s12, 128  ;;  %p1836_p6 = scmp.lt.s32.totalorder %s27_s12, %s27_s12 }
   0xe   :  { %p1832_p5 = scmp.ne.s32.totalorder %s27_s12, %s1831_s16  ;;  %p1837_p7 = scmp.lt.s32.totalorder %s1831_s16, %s1831_s16 }
  0x10   :  { %p1838_p8 = por %p1837_p7, %p1836_p6 }
  0x12   :  { %p1839_p9 = pnand %p1838_p8, %p1832_p5 }
  0x14   :  { %1842 = shalt.err (!%p1839_p9)
}
  0x15   :  { %29 = dma.hbm_to_vmem [thread:$0]  %s5596_s1, 128, %s27_s12, [#allocation7]  }
  0x16   :  { %1863 = dma.done.wait [#allocation4], 128  }
  0x17   :  { %1864 = vsyncadd [#allocation4], 4294967168 }
  0x18   :  { %1865 = dma.done.wait [#allocation7], 128  }
  0x19   :  { %1866 = vsyncadd [#allocation7], 4294967168  ;;  %v1917_v0 = vld [vmem:[#allocation3] sm:$0xff]  ;;  %s1871_s19 = smov 126   ;;  %v1872_v1 = vmov 0   ;;  %s1873_s0 = smov 124   ;;  %v130_v13 = vlaneseq }
  0x1a   :  { %40 = vrot.lane.b32.xlu0 %v1917_v0, %s1871_s19  ;;  %1708 = vset.pattern.permute.xlu1 %v1872_v1  ;;  %v1874_v9 = vmov 1   ;;  %s1875_s1 = smov 1   ;;  %s1876_s20 = smov 121   ;;  %v1877_v10 = vmov 0.0   ;;  %v1928_v11 = vld [vmem:[#allocation6] sm:$0xff]  ;;  %v6094_v47 = vmov 0 }
  0x1b   :  { %1709 = vset.pattern.permute.xlu0 %v1872_v1  ;;  %37 = vst [vmem:[#allocation2] sm:$0xff] %v1877_v10  ;;  %s1878_s21 = smov 125   ;;  %v137_v12 = vrot.slane %v1928_v11, 2  ;;  %v1933_v17 = vshrl.u32 %v130_v13, 7  ;;  %s1879_s22 = smov 5   ;;  %v131_v43 = vand.u32 127, %v130_v13 }
  0x1c   :  { %s1880_s23 = smov 6   ;;  %s1881_s24 = smov 2  }
  0x1d   :  { %v144_v14 = vmax.f32 %v1928_v11, %v137_v12  ;;  %v139_v15 = vmin.f32 %v1928_v11, %v137_v12  ;;  %v1936_v20 = vsub.s32 0, %v1933_v17  ;;  %v1941_v26 = vsub.s32 1, %v1933_v17  ;;  %s1882_s25 = smov 122   ;;  %s1883_s26 = smov 127  }
  0x1e   :  { %vm135_vm0 = vcmp.lt.s32.totalorder %v131_v43, 8 }
  0x1f   :  { %v146_v16 = vrot.slane %v144_v14, 4  ;;  %v141_v18 = vrot.slane %v139_v15, 4  ;;  %6093 = vst [vmem:[#allocation12_spill] sm:$0xff] %v1936_v20 }
  0x21   :  { %v148_v19 = vmax.f32 %v144_v14, %v146_v16  ;;  %v143_v21 = vmin.f32 %v139_v15, %v141_v18  ;;  %v1884_v16 = vmov -1.0  }
  0x23   :  { %v157_v22 = vrot.slane %v148_v19, %v1936_v20  ;;  %v167_v24 = vrot.slane %v143_v21, %v1936_v20  ;;  %v179_v32 = vrot.slane %v148_v19, %v1941_v26  ;;  %v188_v33 = vrot.slane %v143_v21, %v1941_v26 }
  0x8c   :  { %v41_v2 = vpop.permute.xlu0 %40 }
  0x8d   :  { %v43_v3 = vmin.f32 %v1917_v0, %v41_v2  ;;  %v49_v4 = vmax.f32 %v1917_v0, %v41_v2 }
  0x8f   :  { %51 = vrot.lane.b32.xlu1 %v49_v4, %s1873_s0  ;;  %45 = vrot.lane.b32.xlu0 %v43_v3, %s1873_s0 }
 0x101   :  { %v52_v5 = vpop.permute.xlu1 %51  ;;  %v46_v6 = vpop.permute.xlu0 %45 }
 0x102   :  { %v54_v7 = vmax.f32 %v49_v4, %v52_v5  ;;  %v48_v8 = vmin.f32 %v43_v3, %v46_v6 }
 0x104   :  { %151 = vperm.xlu1 %1708, %v54_v7   ;;  %161 = vperm.xlu0 %1709, %v48_v8  }
 0x108   :  { %1710 = vset.pattern.permute.xlu1 %v1874_v9  ;;  %59 = vrot.lane.b32.xlu0 %v1917_v0, %s1875_s1 }
 0x109   :  { %173 = vperm.xlu1 %1710, %v54_v7   ;;  %1711 = vset.pattern.permute.xlu0 %v1874_v9 }
 0x10d   :  { %182 = vperm.xlu1 %1710, %v48_v8  }
 0x111   :  { %82 = vrot.lane.b32.xlu1 %v1917_v0, %s1876_s20 }
 0x115   :  { %55 = vrot.lane.b32.xlu1 %v1917_v0, %s1878_s21 }
 0x17f   :  { %v152_v23 = vpop.permute.xlu1 %151  ;;  %v162_v25 = vpop.permute.xlu0 %161 }
 0x180   :  { %v158_v27 = vmin.f32 %v152_v23, %v157_v22  ;;  %v168_v28 = vmax.f32 %v162_v25, %v167_v24 }
 0x182   :  { %v169_v34 = vsub.f32 %v158_v27, %v168_v28 }
 0x183   :  { %v60_v29 = vpop.permute.xlu0 %59 }
 0x184   :  { %v62_v30 = vmul.f32 %v60_v29, %v1917_v0  ;;  %v174_v31 = vpop.permute.xlu1 %173  ;;  %v170_v38 = vadd.f32 1.0, %v169_v34 }
 0x185   :  { %v180_v36 = vmin.f32 %v174_v31, %v179_v32 }
 0x186   :  { %64 = vrot.lane.b32.xlu1 %v62_v30, %s1871_s19  ;;  %v171_v44 = vmax.f32 %v170_v38, 0.0 }
 0x188   :  { %v183_v35 = vpop.permute.xlu1 %182 }
 0x189   :  { %v189_v37 = vmax.f32 %v183_v35, %v188_v33 }
 0x18a   :  { %78 = vrot.lane.b32.xlu1 %v1917_v0, %s1879_s22 }
 0x18b   :  { %v190_v39 = vsub.f32 %v180_v36, %v189_v37 }
 0x18c   :  { %v83_v40 = vpop.permute.xlu1 %82 }
 0x18d   :  { %v191_v41 = vadd.f32 1.0, %v190_v39  ;;  %v85_v42 = vmul.f32 %v83_v40, %v1917_v0 }
 0x18f   :  { %v192_v45 = vmax.f32 %v191_v41, 0.0  ;;  %87 = vrot.lane.b32.xlu1 %v85_v42, %s1880_s23 }
 0x190   :  { %v56_v49 = vpop.permute.xlu1 %55 }
 0x191   :  { %v198_v46 = vmul.f32 %v192_v45, %v171_v44  ;;  %v58_v50 = vmul.f32 %v56_v49, %v1917_v0 }
 0x193   :  { %100 = vrot.lane.b32.xlu1 %v1917_v0, %s1881_s24  ;;  %vm199_vm1 = vcmp.gt.f32.partialorder %v198_v46, 0.0 }
 0x194   :  { %vm1950_vm2 = vmand %vm135_vm0, %vm199_vm1 }
 0x195   :  { %v6095_v47 = vsel %vm1950_vm2, 4294967295, %v6094_v47  ;;  %v201_v48 = vsel %vm1950_vm2, 1.0, %v1877_v10 }
 0x196   :  { %6096 = vst [vmem:[#allocation13_spill] sm:$0xff] %v6095_v47  ;;  %202 = vmax.xlane.f32.xlu0 %v201_v48 }
 0x197   :  { %104 = vrot.lane.b32.xlu1 %v1917_v0, %s1882_s25 }
 0x1f8   :  { %v65_v51 = vpop.permute.xlu1 %64 }
 0x1f9   :  { %v67_v52 = vsub.f32 %v58_v50, %v65_v51 }
 0x1fb   :  { %70 = vrot.lane.b32.xlu1 %v67_v52, %s1871_s19 }
 0x1fc   :  { %v79_v53 = vpop.permute.xlu1 %78 }
 0x1fd   :  { %v81_v54 = vmul.f32 %v79_v53, %v1917_v0 }
 0x1ff   :  { %74 = vrot.lane.b32.xlu1 %v67_v52, %s1873_s0 }
 0x201   :  { %v88_v55 = vpop.permute.xlu1 %87 }
 0x202   :  { %v90_v56 = vsub.f32 %v81_v54, %v88_v55 }
 0x204   :  { %92 = vrot.lane.b32.xlu0 %v90_v56, %s1882_s25 }
 0x205   :  { %v101_v57 = vpop.permute.xlu1 %100 }
 0x206   :  { %v1962_v58 = vsub.f32 %v1917_v0, %v101_v57 }
 0x208   :  { %v108_v59 = vand.u32 2147483647, %v1962_v58 }
 0x209   :  { %v105_v60 = vpop.permute.xlu1 %104 }
 0x20a   :  { %v1966_v61 = vsub.f32 %v1917_v0, %v105_v60  ;;  %110 = vrot.lane.b32.xlu1 %v108_v59, %s1883_s26 }
 0x20c   :  { %v114_v62 = vand.u32 2147483647, %v1966_v61 }
 0x20e   :  { %116 = vrot.lane.b32.xlu1 %v114_v62, %s1883_s26 }
 0x21f   :  { %v203_v63 = vpop.xlane.xlu0 %202 }
 0x220   :  { %v204_v1 = vrot.slane %v203_v63, 4 }
 0x222   :  { %v205_v2 = vmax.f32 %v203_v63, %v204_v1 }
 0x224   :  { %v206_v3 = vrot.slane %v205_v2, 2 }
 0x226   :  { %v207_v4 = vmax.f32 %v205_v2, %v206_v3 }
 0x228   :  { %v208_v5 = vrot.slane %v207_v4, 1 }
 0x22a   :  { %v209_v6 = vmax.f32 %v207_v4, %v208_v5 }
 0x22c   :  { %1677 = vpush %v209_v6 }
 0x25d   :  { %s1678_s27 = spop %1677 }
 0x25e   :  { %p211_p10 = scmp.gt.f32.partialorder %s1678_s27, 0.0 }
 0x26d   :  { %v71_v7 = vpop.permute.xlu1 %70 }
 0x26e   :  { %v73_v9 = vadd.f32 %v71_v7, %v67_v52 }
 0x271   :  { %v75_v8 = vpop.permute.xlu1 %74 }
 0x272   :  { %v77_v10 = vadd.f32 %v75_v8, %v73_v9 }
 0x276   :  { %v93_v12 = vpop.permute.xlu0 %92 }
 0x277   :  { %v95_v13 = vadd.f32 %v93_v12, %v77_v10 }
 0x279   :  { %v1969_v14 = vmul.f32 0.5, %v95_v13 }
 0x27b   :  { %v97_v15 = vand.u32 2147483647, %v1969_v14  ;;  %vm98_vm3 = vcmp.ge.f32.partialorder %v1969_v14, 0.0 }
 0x27c   :  { %v99_v18 = vsel %vm98_vm3, 1.0, %v1884_v16  ;;  %v111_v19 = vpop.permute.xlu1 %110 }
 0x27d   :  { %v113_v21 = vadd.f32 %v111_v19, %v108_v59 }
 0x27f   :  { %v120_v22 = vmul.f32 1e-06, %v113_v21  ;;  %214 = sbr.rel (!%p211_p10) target bundleno = 1206 (0x4b6), region = 21 }
 0x280   :  { %v117_v23 = vpop.permute.xlu1 %116 }
 0x281   :  { %v119_v24 = vadd.f32 %v117_v23, %v114_v62 }
 0x283   :  { %v121_v25 = vmul.f32 1e-06, %v119_v24 }
 0x284   :  { %v1885_v27 = vmov 3   ;;  %v1886_v28 = vmov 1   ;;  %v1887_v29 = vmov 2   ;;  %v5598_v30 = vmov 0  }
 0x285   :  { %1714 = vset.pattern.permute.xlu1 %v1885_v27  ;;  %1712 = vset.pattern.permute.xlu0 %v1886_v28  ;;  %v1889_v31 = vmov 5   ;;  %v1890_v32 = vmov 4   ;;  %v1891_v33 = vmov 7   ;;  %v1892_v34 = vmov 6  }
 0x286   :  { %356 = vperm.xlu1 %1714, %v1917_v0   ;;  %260 = vperm.xlu0 %1712, %v1917_v0   ;;  %vm1606_vm4 = vcmp.gt.f32.partialorder %v97_v15, 0.0  ;;  %v218_v35 = vrot.slane %v1928_v11, 7  ;;  %v215_v36 = vrot.slane %v1928_v11, 3  ;;  %v250_v44 = vrot.slane %v1928_v11, 6 }
 0x287   :  { %v284_v56 = vsub.s32 3, %v1933_v17  ;;  %v306_v59 = vsub.s32 5, %v1933_v17  ;;  %v328_v60 = vsub.s32 7, %v1933_v17  ;;  %v270_v62 = vsub.s32 2, %v1933_v17 }
 0x288   :  { %v220_v37 = vmul.f32 %v218_v35, %v1928_v11  ;;  %v217_v38 = vmul.f32 %v215_v36, %v1928_v11  ;;  %v252_v48 = vsub.f32 %v1928_v11, %v250_v44  ;;  %v296_v63 = vsub.s32 4, %v1933_v17 }
 0x289   :  { %v318_v1 = vsub.s32 6, %v1933_v17  ;;  %v2026_v2 = vrot.slane %v1928_v11, %v1941_v26  ;;  %v2030_v3 = vrot.slane %v1928_v11, %v1936_v20  ;;  %v2033_v4 = vrot.slane %v1928_v11, %v284_v56 }
 0x28a   :  { %1715 = vset.pattern.permute.xlu1 %v1887_v29  ;;  %1713 = vset.pattern.permute.xlu0 %v5598_v30  ;;  %v222_v39 = vrot.slane %v220_v37, 2  ;;  %v253_v50 = vand.u32 2147483647, %v252_v48  ;;  %v2039_v7 = vrot.slane %v1928_v11, %v306_v59  ;;  %v2042_v17 = vrot.slane %v1928_v11, %v328_v60 }
 0x28b   :  { %362 = vperm.xlu1 %1715, %v1917_v0   ;;  %274 = vperm.xlu0 %1713, %v1917_v0   ;;  %6103 = vst [vmem:[#allocation20_spill] sm:$0xff] %v2026_v2  ;;  %6104 = vst [vmem:[#allocation21_spill] sm:$0xff] %v2030_v3  ;;  %v2045_v8 = vrot.slane %v1928_v11, %v270_v62  ;;  %v2048_v9 = vrot.slane %v1928_v11, %v296_v63  ;;  %v1893_v19 = vmov -1.0  }
 0x28c   :  { %v224_v41 = vsub.f32 %v217_v38, %v222_v39  ;;  %v255_v53 = vrot.slane %v253_v50, 1  ;;  %6105 = vst [vmem:[#allocation22_spill] sm:$0xff] %v2033_v4  ;;  %6107 = vst [vmem:[#allocation24_spill] sm:$0xff] %v2039_v7  ;;  %v2050_v10 = vrot.slane %v252_v48, %v284_v56  ;;  %v2052_v12 = vrot.slane %v252_v48, %v270_v62 }
 0x28d   :  { %6108 = vst [vmem:[#allocation25_spill] sm:$0xff] %v2042_v17  ;;  %6109 = vst [vmem:[#allocation26_spill] sm:$0xff] %v2045_v8  ;;  %v2054_v13 = vrot.slane %v252_v48, %v296_v63  ;;  %v2056_v14 = vrot.slane %v252_v48, %v318_v1  ;;  %v2096_v35 = vrot.slane %v252_v48, %v1941_v26 }
 0x28e   :  { %v227_v42 = vrot.slane %v224_v41, 2  ;;  %v230_v46 = vrot.slane %v224_v41, 4  ;;  %v233_v52 = vrot.slane %v224_v41, 6  ;;  %v257_v57 = vadd.f32 %v255_v53, %v253_v50  ;;  %6110 = vst [vmem:[#allocation27_spill] sm:$0xff] %v2048_v9  ;;  %6111 = vst [vmem:[#allocation28_spill] sm:$0xff] %v2050_v10 }
 0x28f   :  { %1716 = vset.pattern.permute.xlu1 %v1889_v31  ;;  %1717 = vset.pattern.permute.xlu0 %v1890_v32  ;;  %6112 = vst [vmem:[#allocation29_spill] sm:$0xff] %v2052_v12  ;;  %6113 = vst [vmem:[#allocation30_spill] sm:$0xff] %v2054_v13 }
 0x290   :  { %388 = vperm.xlu1 %1716, %v1917_v0   ;;  %394 = vperm.xlu0 %1717, %v1917_v0   ;;  %v229_v45 = vadd.f32 %v227_v42, %v224_v41  ;;  %v258_v6 = vmul.f32 1e-06, %v257_v57  ;;  %6114 = vst [vmem:[#allocation31_spill] sm:$0xff] %v2056_v14  ;;  %v2061_v16 = vrot.slane %v257_v57, %v270_v62  ;;  %6128 = vst [vmem:[#allocation45_spill] sm:$0xff] %v2096_v35 }
 0x291   :  { %v2067_v23 = vrot.slane %v257_v57, %v318_v1 }
 0x292   :  { %v232_v51 = vadd.f32 %v230_v46, %v229_v45 }
 0x293   :  { %6117 = vst [vmem:[#allocation34_spill] sm:$0xff] %v2067_v23 }
 0x294   :  { %1718 = vset.pattern.permute.xlu1 %v1891_v33  ;;  %1722 = vset.pattern.permute.xlu0 %v1889_v31  ;;  %v235_v54 = vadd.f32 %v233_v52, %v232_v51  ;;  %v2084_v31 = vrot.slane %v252_v48, %v1936_v20 }
 0x295   :  { %420 = vperm.xlu1 %1718, %v1917_v0   ;;  %674 = vperm.xlu0 %1722, %v1962_v58  }
 0x296   :  { %6124 = vst [vmem:[#allocation41_spill] sm:$0xff] %v2084_v31 }
 0x299   :  { %1719 = vset.pattern.permute.xlu1 %v1892_v34  ;;  %1725 = vset.pattern.permute.xlu0 %v1891_v33 }
 0x29a   :  { %426 = vperm.xlu1 %1719, %v1917_v0   ;;  %785 = vperm.xlu0 %1725, %v1962_v58   ;;  %v1608_v0 = vsel %vm1606_vm4, 1, %v5598_v30 }
 0x29e   :  { %1720 = vset.pattern.permute.xlu1 %v1885_v27  ;;  %1726 = vset.pattern.permute.xlu0 %v1887_v29  ;;  %v2074_v27 = vrot.slane %v258_v6, %v296_v63 }
 0x29f   :  { %563 = vperm.xlu1 %1720, %v1962_v58   ;;  %557 = vperm.xlu0 %1726, %v1962_v58  }
 0x2a0   :  { %6120 = vst [vmem:[#allocation37_spill] sm:$0xff] %v2074_v27 }
 0x2a3   :  { %1721 = vset.pattern.permute.xlu1 %v1890_v32  ;;  %1014 = vperm.xlu0 %1726, %v120_v22  }
 0x2a4   :  { %668 = vperm.xlu1 %1721, %v1962_v58  }
 0x2a7   :  { %1731 = vset.pattern.permute.xlu0 %v1892_v34 }
 0x2a8   :  { %1723 = vset.pattern.permute.xlu1 %v5598_v30  ;;  %693 = vperm.xlu0 %1731, %v113_v21  }
 0x2a9   :  { %242 = vperm.xlu1 %1723, %v99_v18   ;;  %v2063_v18 = vrot.slane %v257_v57, %v296_v63 }
 0x2ac   :  { %1087 = vperm.xlu0 %1731, %v120_v22  }
 0x2ad   :  { %1724 = vset.pattern.permute.xlu1 %v1892_v34 }
 0x2ae   :  { %779 = vperm.xlu1 %1724, %v1962_v58   ;;  %v2015_v58 = vmul.f32 0.5, %v235_v54 }
 0x2b0   :  { %1734 = vset.pattern.permute.xlu0 %v5598_v30  ;;  %6101 = vst [vmem:[#allocation18_spill] sm:$0xff] %v2015_v58  ;;  %vm238_vm5 = vcmp.ge.f32.partialorder %v2015_v58, 0.0 }
 0x2b1   :  { %1610 = vperm.xlu0 %1734, %v1608_v0   ;;  %v2093_v0 = vrot.slane %v252_v48, %v328_v60 }
 0x2b2   :  { %1727 = vset.pattern.permute.xlu1 %v1887_v29  ;;  %v2081_v29 = vrot.slane %v252_v48, %v306_v59 }
 0x2b3   :  { %458 = vperm.xlu1 %1727, %v113_v21   ;;  %6127 = vst [vmem:[#allocation44_spill] sm:$0xff] %v2093_v0 }
 0x2b4   :  { %6123 = vst [vmem:[#allocation40_spill] sm:$0xff] %v2081_v29 }
 0x2b7   :  { %1728 = vset.pattern.permute.xlu1 %v1890_v32 }
 0x2b8   :  { %582 = vperm.xlu1 %1728, %v113_v21   ;;  %v239_v21 = vsel %vm238_vm5, 1.0, %v1893_v19  ;;  %vm5737_vm5 = vmmov 1  }
 0x2b9   :  { %v2091_v34 = vrot.slane %v239_v21, %v1936_v20 }
 0x2bb   :  { %6126 = vst [vmem:[#allocation43_spill] sm:$0xff] %v2091_v34 }
 0x2bc   :  { %1729 = vset.pattern.permute.xlu1 %v5598_v30 }
 0x2bd   :  { %892 = vperm.xlu1 %1729, %v1966_v61  }
 0x2c1   :  { %1730 = vset.pattern.permute.xlu1 %v1886_v28  ;;  %v2076_v28 = vrot.slane %v258_v6, %v318_v1 }
 0x2c2   :  { %898 = vperm.xlu1 %1730, %v1966_v61  }
 0x2c3   :  { %6121 = vst [vmem:[#allocation38_spill] sm:$0xff] %v2076_v28 }
 0x2c6   :  { %1732 = vset.pattern.permute.xlu1 %v1890_v32 }
 0x2c7   :  { %1052 = vperm.xlu1 %1732, %v120_v22  }
 0x2cb   :  { %1733 = vset.pattern.permute.xlu1 %v5598_v30 }
 0x2cc   :  { %805 = vperm.xlu1 %1733, %v119_v24   ;;  %v2070_v24 = vrot.slane %v257_v57, %v1936_v20 }
 0x2ce   :  { %6118 = vst [vmem:[#allocation35_spill] sm:$0xff] %v2070_v24 }
 0x2d0   :  { %1123 = vperm.xlu1 %1733, %v121_v25   ;;  %v2072_v25 = vrot.slane %v258_v6, %v270_v62 }
 0x2d2   :  { %6119 = vst [vmem:[#allocation36_spill] sm:$0xff] %v2072_v25 }
 0x2d4   :  { %1623 = vperm.xlu1 %1733, %v97_v15   ;;  %v2059_v15 = vrot.slane %v1928_v11, %v318_v1  ;;  %v2079_v11 = vrot.slane %v258_v6, %v1936_v20 }
 0x2d6   :  { %6115 = vst [vmem:[#allocation32_spill] sm:$0xff] %v2059_v15  ;;  %6122 = vst [vmem:[#allocation39_spill] sm:$0xff] %v2079_v11 }
 0x301   :  { %v2004_v40 = vpop.permute.xlu1 %356  ;;  %v2019_v61 = vpop.permute.xlu0 %260 }
 0x302   :  { %6097 = vst [vmem:[#allocation14_spill] sm:$0xff] %v2004_v40  ;;  %6102 = vst [vmem:[#allocation19_spill] sm:$0xff] %v2019_v61  ;;  %v359_v32 = vsub.f32 %v2004_v40, %v2026_v2  ;;  %v369_v36 = vsub.f32 %v2004_v40, %v2033_v4  ;;  %v267_v37 = vsub.f32 %v2019_v61, %v2026_v2 }
 0x303   :  { %v293_v38 = vsub.f32 %v2019_v61, %v2033_v4  ;;  %v375_v41 = vsub.f32 %v2004_v40, %v2039_v7  ;;  %v315_v44 = vsub.f32 %v2019_v61, %v2039_v7  ;;  %v337_v51 = vsub.f32 %v2019_v61, %v2042_v17 }
 0x304   :  { %v2138_v60 = vmul.f32 %v2052_v12, %v267_v37  ;;  %v2179_v48 = vmul.f32 %v359_v32, %v2052_v12 }
 0x305   :  { %v2141_v62 = vmul.f32 %v2054_v13, %v293_v38  ;;  %v2152_v21 = vmul.f32 %v2056_v14, %v315_v44  ;;  %v2174_v26 = vmul.f32 %v2084_v31, %v337_v51  ;;  %v2190_v51 = vmul.f32 %v369_v36, %v2054_v13 }
 0x306   :  { %v2006_v43 = vpop.permute.xlu1 %362  ;;  %v2065_v22 = vpop.permute.xlu0 %274  ;;  %6131 = vst [vmem:[#allocation48_spill] sm:$0xff] %v2138_v60  ;;  %6137 = vst [vmem:[#allocation54_spill] sm:$0xff] %v2179_v48  ;;  %v2230_v11 = vmul.f32 %v375_v41, %v2056_v14 }
 0x307   :  { %6098 = vst [vmem:[#allocation15_spill] sm:$0xff] %v2006_v43  ;;  %6116 = vst [vmem:[#allocation33_spill] sm:$0xff] %v2065_v22  ;;  %v281_v39 = vsub.f32 %v2065_v22, %v2030_v3  ;;  %v365_v50 = vsub.f32 %v2006_v43, %v2030_v3  ;;  %v923_v63 = vsub.f32 %v2030_v3, %v2006_v43 }
 0x308   :  { %6132 = vst [vmem:[#allocation49_spill] sm:$0xff] %v2141_v62  ;;  %v947_v19 = vsub.f32 %v2045_v8, %v2006_v43  ;;  %6134 = vst [vmem:[#allocation51_spill] sm:$0xff] %v2152_v21  ;;  %v971_v38 = vsub.f32 %v2048_v9, %v2006_v43  ;;  %v303_v44 = vsub.f32 %v2065_v22, %v2045_v8 }
 0x309   :  { %v2135_v59 = vmul.f32 %v2050_v10, %v281_v39  ;;  %v2155_v37 = vmul.f32 %v365_v50, %v2050_v10  ;;  %v995_v39 = vsub.f32 %v2059_v15, %v2006_v43  ;;  %v325_v50 = vsub.f32 %v2065_v22, %v2048_v9  ;;  %6136 = vst [vmem:[#allocation53_spill] sm:$0xff] %v2174_v26 }
 0x30a   :  { %v347_v30 = vsub.f32 %v2065_v22, %v2059_v15  ;;  %6139 = vst [vmem:[#allocation56_spill] sm:$0xff] %v2190_v51  ;;  %v2215_v45 = vmul.f32 %v2081_v29, %v303_v44  ;;  %v371_v34 = vsub.f32 %v2006_v43, %v2045_v8  ;;  %6145 = vst [vmem:[#allocation62_spill] sm:$0xff] %v2230_v11 }
 0x30b   :  { %v2010_v49 = vpop.permute.xlu1 %388  ;;  %v2130_v56 = vpop.permute.xlu0 %394  ;;  %6130 = vst [vmem:[#allocation47_spill] sm:$0xff] %v2135_v59  ;;  %6135 = vst [vmem:[#allocation52_spill] sm:$0xff] %v2155_v37  ;;  %v2218_v42 = vmul.f32 %v2093_v0, %v325_v50  ;;  %v383_v60 = vsub.f32 %v2006_v43, %v2059_v15  ;;  %v6149_v37 = vsub.f32 %v2004_v40, %v2042_v17 }
 0x30c   :  { %6099 = vst [vmem:[#allocation16_spill] sm:$0xff] %v2010_v49  ;;  %6129 = vst [vmem:[#allocation46_spill] sm:$0xff] %v2130_v56  ;;  %v391_v46 = vsub.f32 %v2010_v49, %v2026_v2  ;;  %v401_v57 = vsub.f32 %v2010_v49, %v2033_v4  ;;  %v407_v54 = vsub.f32 %v2010_v49, %v2039_v7 }
 0x30d   :  { %v397_v47 = vsub.f32 %v2130_v56, %v2030_v3  ;;  %v929_v36 = vsub.f32 %v2030_v3, %v2130_v56  ;;  %v953_v32 = vsub.f32 %v2045_v8, %v2130_v56  ;;  %v977_v52 = vsub.f32 %v2048_v9, %v2130_v56  ;;  %6141 = vst [vmem:[#allocation58_spill] sm:$0xff] %v2215_v45 }
 0x30e   :  { %v1001_v1 = vsub.f32 %v2059_v15, %v2130_v56  ;;  %6142 = vst [vmem:[#allocation59_spill] sm:$0xff] %v2218_v42  ;;  %v2223_v59 = vmul.f32 %v2096_v35, %v347_v30  ;;  %v377_v30 = vsub.f32 %v2006_v43, %v2048_v9  ;;  %v2278_v43 = vmul.f32 %v6149_v37, %v2084_v31 }
 0x30f   :  { %v2281_v41 = vmul.f32 %v391_v46, %v2052_v12  ;;  %v2294_v26 = vmul.f32 %v401_v57, %v2054_v13  ;;  %v2302_v42 = vmul.f32 %v383_v60, %v2096_v35  ;;  %v403_v60 = vsub.f32 %v2130_v56, %v2045_v8 }
 0x310   :  { %v2012_v55 = vpop.permute.xlu1 %420  ;;  %v2187_v53 = vpop.permute.xlu0 %674  ;;  %6144 = vst [vmem:[#allocation61_spill] sm:$0xff] %v2223_v59  ;;  %6150 = vst [vmem:[#allocation66_spill] sm:$0xff] %v2278_v43  ;;  %v6157_v21 = vsub.f32 %v2030_v3, %v2065_v22  ;;  %v6169_v62 = vsub.f32 %v2048_v9, %v2065_v22 }
 0x311   :  { %6100 = vst [vmem:[#allocation17_spill] sm:$0xff] %v2012_v55  ;;  %6138 = vst [vmem:[#allocation55_spill] sm:$0xff] %v2187_v53  ;;  %v423_v44 = vsub.f32 %v2012_v55, %v2026_v2  ;;  %v2247_v48 = vmul.f32 %v923_v63, %v2187_v53  ;;  %v2250_v50 = vmul.f32 %v947_v19, %v2187_v53 }
 0x312   :  { %v2253_v28 = vmul.f32 %v971_v38, %v2187_v53  ;;  %v2256_v27 = vmul.f32 %v995_v39, %v2187_v53  ;;  %v2269_v38 = vmul.f32 %v371_v34, %v2081_v29  ;;  %v2272_v39 = vmul.f32 %v377_v30, %v2093_v0  ;;  %6151 = vst [vmem:[#allocation67_spill] sm:$0xff] %v2281_v41 }
 0x313   :  { %v2284_v63 = vmul.f32 %v397_v47, %v2050_v10  ;;  %6154 = vst [vmem:[#allocation70_spill] sm:$0xff] %v2294_v26  ;;  %6155 = vst [vmem:[#allocation71_spill] sm:$0xff] %v2302_v42  ;;  %v2348_v41 = vmul.f32 %v423_v44, %v2052_v12  ;;  %v6166_v44 = vsub.f32 %v2033_v4, %v2010_v49 }
 0x314   :  { %6147 = vst [vmem:[#allocation64_spill] sm:$0xff] %v2269_v38  ;;  %6148 = vst [vmem:[#allocation65_spill] sm:$0xff] %v2272_v39  ;;  %v415_v39 = vsub.f32 %v2130_v56, %v2059_v15  ;;  %v2385_v53 = vmul.f32 %v403_v60, %v2081_v29 }
 0x315   :  { %v2035_v5 = vpop.permute.xlu1 %426  ;;  %v2220_v58 = vpop.permute.xlu0 %785  ;;  %6152 = vst [vmem:[#allocation68_spill] sm:$0xff] %v2284_v63  ;;  %6162 = vst [vmem:[#allocation74_spill] sm:$0xff] %v2348_v41  ;;  %v6217_v41 = vmov 0 }
 0x316   :  { %6106 = vst [vmem:[#allocation23_spill] sm:$0xff] %v2035_v5  ;;  %6143 = vst [vmem:[#allocation60_spill] sm:$0xff] %v2220_v58  ;;  %v429_v19 = vsub.f32 %v2035_v5, %v2030_v3  ;;  %v930_v59 = vmul.f32 %v929_v36, %v2220_v58  ;;  %v954_v37 = vmul.f32 %v953_v32, %v2220_v58 }
 0x317   :  { %v978_v46 = vmul.f32 %v977_v52, %v2220_v58  ;;  %v2299_v47 = vmul.f32 %v1001_v1, %v2220_v58  ;;  %v2319_v36 = vmul.f32 %v407_v54, %v2056_v14  ;;  %v6158_v32 = vsub.f32 %v2026_v2, %v2019_v61  ;;  %6171 = vst [vmem:[#allocation75_spill] sm:$0xff] %v2385_v53 }
 0x318   :  { %v409_v1 = vsub.f32 %v2130_v56, %v2048_v9  ;;  %v6159_v54 = vsub.f32 %v2033_v4, %v2019_v61  ;;  %v6163_v56 = vsub.f32 %v2039_v7, %v2019_v61  ;;  %v6170_v58 = vsub.f32 %v2059_v15, %v2065_v22 }
 0x319   :  { %6156 = vst [vmem:[#allocation72_spill] sm:$0xff] %v2319_v36  ;;  %v6223_v53 = vmov 0 }
 0x31a   :  { %v2088_v33 = vpop.permute.xlu1 %563  ;;  %v2290_v30 = vpop.permute.xlu0 %557 }
 0x31b   :  { %6125 = vst [vmem:[#allocation42_spill] sm:$0xff] %v2088_v33  ;;  %6153 = vst [vmem:[#allocation69_spill] sm:$0xff] %v2290_v30  ;;  %v918_v57 = vmul.f32 %v6157_v21, %v2088_v33  ;;  %v916_v34 = vmul.f32 %v6158_v32, %v2290_v30  ;;  %v940_v11 = vmul.f32 %v6159_v54, %v2290_v30 }
 0x31c   :  { %v6160_v32 = vsub.f32 %v2010_v49, %v2042_v17  ;;  %v964_v38 = vmul.f32 %v6163_v56, %v2290_v30  ;;  %v6164_v54 = vsub.f32 %v2042_v17, %v2019_v61  ;;  %v6167_v56 = vsub.f32 %v2039_v7, %v2010_v49 }
 0x31e   :  { %v2345_v63 = vmul.f32 %v6160_v32, %v2084_v31  ;;  %v2358_v51 = vmul.f32 %v6164_v54, %v2290_v30  ;;  %v1015_v21 = vpop.permute.xlu0 %1014  ;;  %v6165_v32 = vsub.f32 %v2026_v2, %v2010_v49  ;;  %v6168_v54 = vsub.f32 %v2045_v8, %v2065_v22 }
 0x31f   :  { %v2147_v6 = vpop.permute.xlu1 %668  ;;  %v919_v31 = vsub.f32 %v916_v34, %v918_v57  ;;  %v2391_v30 = vmul.f32 %v415_v39, %v2096_v35  ;;  %v2400_v12 = vmul.f32 %v2067_v23, %v1015_v21  ;;  %v2407_v57 = vmul.f32 %v2070_v24, %v1015_v21 }
 0x320   :  { %6133 = vst [vmem:[#allocation50_spill] sm:$0xff] %v2147_v6  ;;  %6161 = vst [vmem:[#allocation73_spill] sm:$0xff] %v2345_v63  ;;  %v942_v61 = vmul.f32 %v6168_v54, %v2088_v33  ;;  %v2394_v54 = vmul.f32 %v2061_v16, %v1015_v21  ;;  %v6179_v22 = vsub.f32 %v2026_v2, %v2004_v40 }
 0x321   :  { %6173 = vst [vmem:[#allocation77_spill] sm:$0xff] %v2391_v30  ;;  %6176 = vst [vmem:[#allocation80_spill] sm:$0xff] %v2400_v12 }
 0x322   :  { %6174 = vst [vmem:[#allocation78_spill] sm:$0xff] %v2394_v54  ;;  %6178 = vst [vmem:[#allocation81_spill] sm:$0xff] %v2407_v57 }
 0x324   :  { %v2206_v20 = vpop.permute.xlu1 %242 }
 0x325   :  { %6140 = vst [vmem:[#allocation57_spill] sm:$0xff] %v2206_v20 }
 0x329   :  { %v2260_v25 = vpop.permute.xlu1 %779 }
 0x32a   :  { %6146 = vst [vmem:[#allocation63_spill] sm:$0xff] %v2260_v25  ;;  %v928_v42 = vmul.f32 %v6165_v32, %v2260_v25  ;;  %v952_v43 = vmul.f32 %v6166_v44, %v2260_v25  ;;  %v976_v45 = vmul.f32 %v6167_v56, %v2260_v25  ;;  %v966_v32 = vmul.f32 %v6169_v62, %v2088_v33 }
 0x32b   :  { %v990_v44 = vmul.f32 %v6170_v58, %v2088_v33  ;;  %v2388_v56 = vmul.f32 %v409_v1, %v2093_v0  ;;  %v2397_v62 = vmul.f32 %v2063_v18, %v1015_v21  ;;  %v6177_v58 = vsub.f32 %v2042_v17, %v2010_v49 }
 0x32c   :  { %v931_v1 = vsub.f32 %v928_v42, %v930_v59  ;;  %v955_v39 = vsub.f32 %v952_v43, %v954_v37  ;;  %v922_v33 = vmul.f32 %v6179_v22, %v2147_v6  ;;  %v979_v35 = vsub.f32 %v976_v45, %v978_v46  ;;  %v694_v43 = vpop.permute.xlu0 %693 }
 0x32d   :  { %6172 = vst [vmem:[#allocation76_spill] sm:$0xff] %v2388_v56  ;;  %6175 = vst [vmem:[#allocation79_spill] sm:$0xff] %v2397_v62  ;;  %v1000_v34 = vmul.f32 %v6177_v58, %v2260_v25  ;;  %v6180_v0 = vsub.f32 %v2033_v4, %v2004_v40  ;;  %v6181_v21 = vsub.f32 %v2039_v7, %v2004_v40 }
 0x32e   :  { %v2329_v52 = vpop.permute.xlu1 %458  ;;  %v943_v42 = vsub.f32 %v940_v11, %v942_v61  ;;  %v6182_v59 = vsub.f32 %v2042_v17, %v2004_v40  ;;  %v967_v49 = vsub.f32 %v964_v38, %v966_v32  ;;  %v991_v22 = vsub.f32 %v2358_v51, %v990_v44 }
 0x32f   :  { %v946_v14 = vmul.f32 %v6180_v0, %v2147_v6  ;;  %v970_v58 = vmul.f32 %v6181_v21, %v2147_v6  ;;  %v2429_v45 = vmul.f32 %v429_v19, %v2050_v10  ;;  %v1003_v61 = vsub.f32 %v1000_v34, %v2299_v47  ;;  %v6186_v19 = vld [vmem:[#allocation36_spill] sm:$0xff]  ;;  %v6189_v34 = vld [vmem:[#allocation37_spill] sm:$0xff] }
 0x330   :  { %v994_v37 = vmul.f32 %v6182_v59, %v2147_v6  ;;  %v2437_v21 = vmul.f32 %v931_v1, %v2206_v20  ;;  %v2440_v38 = vmul.f32 %v955_v39, %v2206_v20  ;;  %v925_v51 = vsub.f32 %v922_v33, %v2247_v48  ;;  %v6191_v1 = vld [vmem:[#allocation38_spill] sm:$0xff] }
 0x331   :  { %6183 = vst [vmem:[#allocation82_spill] sm:$0xff] %v2429_v45  ;;  %v2444_v32 = vmul.f32 %v694_v43, %v6186_v19  ;;  %v2447_v44 = vmul.f32 %v979_v35, %v2206_v20  ;;  %v949_v59 = vsub.f32 %v946_v14, %v2250_v50  ;;  %v973_v47 = vsub.f32 %v970_v58, %v2253_v28  ;;  %v6196_v35 = vld [vmem:[#allocation39_spill] sm:$0xff] }
 0x332   :  { %6184 = vst [vmem:[#allocation83_spill] sm:$0xff] %v2437_v21  ;;  %6185 = vst [vmem:[#allocation84_spill] sm:$0xff] %v2440_v38  ;;  %v2452_v11 = vmul.f32 %v694_v43, %v6189_v34  ;;  %v2455_v25 = vmul.f32 %v694_v43, %v6191_v1  ;;  %v2460_v33 = vmul.f32 %v919_v31, %v2206_v20  ;;  %v1088_v31 = vpop.permute.xlu0 %1087 }
 0x333   :  { %v2409_v60 = vpop.permute.xlu1 %582  ;;  %6187 = vst [vmem:[#allocation85_spill] sm:$0xff] %v2444_v32  ;;  %6188 = vst [vmem:[#allocation86_spill] sm:$0xff] %v2447_v44  ;;  %v2463_v48 = vmul.f32 %v943_v42, %v2206_v20  ;;  %v2466_v46 = vmul.f32 %v694_v43, %v6196_v35  ;;  %v2469_v14 = vmul.f32 %v1003_v61, %v2206_v20 }
 0x334   :  { %6190 = vst [vmem:[#allocation37_spill] sm:$0xff] %v2452_v11  ;;  %6192 = vst [vmem:[#allocation87_spill] sm:$0xff] %v2455_v25  ;;  %v997_v28 = vsub.f32 %v994_v37, %v2256_v27  ;;  %v2476_v58 = vsub.f32 %v2440_v38, %v2437_v21  ;;  %v2486_v27 = vsub.f32 %v2447_v44, %v2440_v38 }
 0x335   :  { %6194 = vst [vmem:[#allocation89_spill] sm:$0xff] %v2460_v33  ;;  %6195 = vst [vmem:[#allocation90_spill] sm:$0xff] %v2463_v48  ;;  %v2489_v37 = vmul.f32 %v925_v51, %v2206_v20  ;;  %v2492_v0 = vmul.f32 %v949_v59, %v2206_v20  ;;  %v2495_v50 = vmul.f32 %v967_v49, %v2206_v20 }
 0x336   :  { %6197 = vst [vmem:[#allocation91_spill] sm:$0xff] %v2466_v46  ;;  %6198 = vst [vmem:[#allocation92_spill] sm:$0xff] %v2469_v14  ;;  %v2502_v61 = vsub.f32 %v2463_v48, %v2460_v33  ;;  %v2507_v51 = vsub.f32 %v2469_v14, %v2447_v44  ;;  %v2510_v59 = vmul.f32 %v1088_v31, %v2061_v16  ;;  %v1091_v43 = vand.u32 2147483647, %v2476_v58 }
 0x337   :  { %6199 = vst [vmem:[#allocation93_spill] sm:$0xff] %v2476_v58  ;;  %6200 = vst [vmem:[#allocation94_spill] sm:$0xff] %v2486_v27  ;;  %v2513_v49 = vmul.f32 %v991_v22, %v2206_v20  ;;  %v2518_v40 = vsub.f32 %v2437_v21, %v2469_v14  ;;  %v2521_v42 = vmul.f32 %v2063_v18, %v1088_v31  ;;  %v1239_v25 = vand.u32 2147483647, %v2486_v27 }
 0x338   :  { %v2457_v39 = vpop.permute.xlu1 %892  ;;  %6201 = vst [vmem:[#allocation95_spill] sm:$0xff] %v2489_v37  ;;  %6202 = vst [vmem:[#allocation96_spill] sm:$0xff] %v2492_v0  ;;  %v2524_v30 = vmul.f32 %v2067_v23, %v1088_v31  ;;  %v2530_v11 = vmul.f32 %v2070_v24, %v1088_v31  ;;  %v2534_v22 = vsub.f32 %v2492_v0, %v2489_v37  ;;  %v1022_v36 = vand.u32 2147483647, %v2502_v61 }
 0x339   :  { %6193 = vst [vmem:[#allocation88_spill] sm:$0xff] %v2457_v39  ;;  %6203 = vst [vmem:[#allocation97_spill] sm:$0xff] %v2495_v50  ;;  %v2538_v32 = vsub.f32 %v2495_v50, %v2463_v48  ;;  %v2541_v63 = vmul.f32 %v973_v47, %v2206_v20  ;;  %v2544_v56 = vmul.f32 %v997_v28, %v2206_v20  ;;  %v1382_v31 = vand.u32 2147483647, %v2507_v51 }
 0x33a   :  { %6204 = vst [vmem:[#allocation98_spill] sm:$0xff] %v2507_v51  ;;  %6205 = vst [vmem:[#allocation99_spill] sm:$0xff] %v2510_v59  ;;  %v2553_v26 = vsub.f32 %v2513_v49, %v2495_v50  ;;  %v1525_v47 = vand.u32 2147483647, %v2518_v40  ;;  %vm2557_vm6 = vcmp.le.f32.partialorder %v1091_v43, %v2510_v59  ;;  %v6214_v28 = vmov 0 }
 0x33b   :  { %6206 = vst [vmem:[#allocation100_spill] sm:$0xff] %v2513_v49  ;;  %6207 = vst [vmem:[#allocation101_spill] sm:$0xff] %v2518_v40  ;;  %v6215_v28 = vsel %vm2557_vm6, 4294967295, %v6214_v28  ;;  %vm2564_vm7 = vcmp.le.f32.partialorder %v1239_v25, %v2521_v42  ;;  %v1056_v10 = vand.u32 2147483647, %v2534_v22  ;;  %v2573_v43 = vmul.f32 %v2329_v52, %v6186_v19 }
 0x33c   :  { %6208 = vst [vmem:[#allocation102_spill] sm:$0xff] %v2521_v42  ;;  %6209 = vst [vmem:[#allocation103_spill] sm:$0xff] %v2524_v30  ;;  %v6218_v41 = vsel %vm2564_vm7, 4294967295, %v6217_v41  ;;  %v1178_v29 = vand.u32 2147483647, %v2538_v32  ;;  %v2577_v6 = vmul.f32 %v6189_v34, %v2329_v52  ;;  %v2581_v25 = vmul.f32 %v6191_v1, %v2329_v52 }
 0x33d   :  { %v2526_v46 = vpop.permute.xlu1 %898  ;;  %6211 = vst [vmem:[#allocation105_spill] sm:$0xff] %v2530_v11  ;;  %6212 = vst [vmem:[#allocation106_spill] sm:$0xff] %v2541_v63  ;;  %vm2584_vm8 = vcmp.le.f32.partialorder %v1022_v36, %v2394_v54  ;;  %v1094_v42 = vsel %vm2557_vm6, 1.0, %v2476_v58  ;;  %vm2592_vm9 = vcmp.le.f32.partialorder %v1382_v31, %v2524_v30  ;;  %v6226_v59 = vmov 0 }
 0x33e   :  { %6210 = vst [vmem:[#allocation104_spill] sm:$0xff] %v2526_v46  ;;  %6213 = vst [vmem:[#allocation107_spill] sm:$0xff] %v2544_v56  ;;  %v6224_v53 = vsel %vm2584_vm8, 4294967295, %v6223_v53  ;;  %v6227_v59 = vsel %vm2592_vm9, 4294967295, %v6226_v59  ;;  %v2598_v13 = vmul.f32 %v6196_v35, %v2329_v52  ;;  %v1321_v17 = vand.u32 2147483647, %v2553_v26 }
 0x33f   :  { %6216 = vst [vmem:[#allocation108_spill] sm:$0xff] %v6215_v28  ;;  %6219 = vst [vmem:[#allocation109_spill] sm:$0xff] %v6218_v41  ;;  %v1242_v36 = vsel %vm2564_vm7, 1.0, %v2486_v27  ;;  %vm2605_vm10 = vcmp.le.f32.partialorder %v1525_v47, %v2530_v11  ;;  %v6230_v54 = vmov 0  ;;  %v2611_v31 = vsub.f32 %v2541_v63, %v2492_v0 }
 0x340   :  { %6220 = vst [vmem:[#allocation110_spill] sm:$0xff] %v2573_v43  ;;  %6221 = vst [vmem:[#allocation111_spill] sm:$0xff] %v2577_v6  ;;  %v6231_v54 = vsel %vm2605_vm10, 4294967295, %v6230_v54  ;;  %v2615_v30 = vsub.f32 %v2460_v33, %v2513_v49  ;;  %v1025_v52 = vsel %vm2584_vm8, 1.0, %v2502_v61  ;;  %vm2624_vm11 = vcmp.le.f32.partialorder %v1178_v29, %v2397_v62 }
 0x341   :  { %6222 = vst [vmem:[#allocation112_spill] sm:$0xff] %v2581_v25  ;;  %6225 = vst [vmem:[#allocation113_spill] sm:$0xff] %v6224_v53  ;;  %v6234_v47 = vmov 0  ;;  %v2630_v11 = vsub.f32 %v2544_v56, %v2541_v63  ;;  %1735 = vrcp.f32 %v1094_v42  ;;  %v1385_v58 = vsel %vm2592_vm9, 1.0, %v2507_v51 }
 0x342   :  { %v1053_v45 = vpop.permute.xlu1 %1052  ;;  %6228 = vst [vmem:[#allocation114_spill] sm:$0xff] %v6227_v59  ;;  %6229 = vst [vmem:[#allocation115_spill] sm:$0xff] %v2598_v13  ;;  %v6235_v47 = vsel %vm2624_vm11, 4294967295, %v6234_v47  ;;  %1737 = vrcp.f32 %v1242_v36  ;;  %v1528_v29 = vsel %vm2605_vm10, 1.0, %v2518_v40  ;;  %vm2643_vm12 = vcmp.le.f32.partialorder %v1321_v17, %v2400_v12 }
 0x343   :  { %6232 = vst [vmem:[#allocation116_spill] sm:$0xff] %v6231_v54  ;;  %v2621_v41 = vmul.f32 %v1053_v45, %v2061_v16  ;;  %6236 = vst [vmem:[#allocation118_spill] sm:$0xff] %v6235_v47  ;;  %v2637_v28 = vmul.f32 %v2063_v18, %v1053_v45  ;;  %v6238_v62 = vmov 0  ;;  %v2648_v27 = vmul.f32 %v2067_v23, %v1053_v45 }
 0x344   :  { %v6239_v62 = vsel %vm2643_vm12, 4294967295, %v6238_v62  ;;  %1739 = vrcp.f32 %v1025_v52  ;;  %v1181_v42 = vsel %vm2624_vm11, 1.0, %v2538_v32  ;;  %v1208_v59 = vand.u32 2147483647, %v2611_v31  ;;  %vm2772_vm3 = vmxor %vm2584_vm8, %vm5737_vm5 }
 0x345   :  { %6233 = vst [vmem:[#allocation117_spill] sm:$0xff] %v2621_v41  ;;  %6237 = vst [vmem:[#allocation119_spill] sm:$0xff] %v2637_v28  ;;  %v1464_v36 = vand.u32 2147483647, %v2615_v30  ;;  %1741 = vrcp.f32 %v1385_v58  ;;  %vm2657_vm13 = vcmp.le.f32.partialorder %v1056_v10, %v2621_v41  ;;  %v6242_v17 = vmov 0 }
 0x346   :  { %6240 = vst [vmem:[#allocation120_spill] sm:$0xff] %v6239_v62  ;;  %6241 = vst [vmem:[#allocation121_spill] sm:$0xff] %v2648_v27  ;;  %v6243_v17 = vsel %vm2657_vm13, 4294967295, %v6242_v17  ;;  %v1351_v12 = vand.u32 2147483647, %v2630_v11  ;;  %1743 = vrcp.f32 %v1528_v29  ;;  %vm2664_vm14 = vcmp.le.f32.partialorder %v1208_v59, %v2637_v28 }
 0x347   :  { %6244 = vst [vmem:[#allocation122_spill] sm:$0xff] %v6243_v17  ;;  %v6245_v40 = vmov 0  ;;  %v1324_v54 = vsel %vm2643_vm12, 1.0, %v2553_v26  ;;  %v2673_v10 = vmul.f32 %v2409_v60, %v6186_v19  ;;  %1745 = vrcp.f32 %v1181_v42 }
 0x348   :  { %v6246_v40 = vsel %vm2664_vm14, 4294967295, %v6245_v40  ;;  %vm2676_vm15 = vcmp.le.f32.partialorder %v1351_v12, %v2648_v27  ;;  %v6249_v58 = vmov 0  ;;  %v2682_v59 = vsub.f32 %v2489_v37, %v2544_v56 }
 0x349   :  { %6247 = vst [vmem:[#allocation123_spill] sm:$0xff] %v6246_v40  ;;  %6248 = vst [vmem:[#allocation124_spill] sm:$0xff] %v2673_v10  ;;  %v6250_v58 = vsel %vm2676_vm15, 4294967295, %v6249_v58  ;;  %v1059_v29 = vsel %vm2657_vm13, 1.0, %v2534_v22  ;;  %vm2688_vm0 = vcmp.le.f32.partialorder %v1464_v36, %v2407_v57  ;;  %v6252_v52 = vmov 0 }
 0x34a   :  { %6251 = vst [vmem:[#allocation125_spill] sm:$0xff] %v6250_v58  ;;  %v6253_v52 = vsel %vm2688_vm0, 4294967295, %v6252_v52  ;;  %v6255_v12 = vsub.f32 %v2030_v3, %v2035_v5  ;;  %v6256_v51 = vsub.f32 %v2045_v8, %v2035_v5  ;;  %v1211_v19 = vsel %vm2664_vm14, 1.0, %v2611_v31 }
 0x34b   :  { %6254 = vst [vmem:[#allocation126_spill] sm:$0xff] %v6253_v52  ;;  %1747 = vrcp.f32 %v1324_v54  ;;  %v2704_v36 = vmul.f32 %v2070_v24, %v1053_v45  ;;  %v6258_v57 = vsub.f32 %v2048_v9, %v2035_v5  ;;  %v6260_v54 = vsub.f32 %v2026_v2, %v2012_v55 }
 0x34c   :  { %v936_v42 = vmul.f32 %v6255_v12, %v2526_v46  ;;  %v960_v23 = vmul.f32 %v6256_v51, %v2526_v46  ;;  %v2712_v12 = vmul.f32 %v2409_v60, %v6189_v34  ;;  %v1354_v51 = vsel %vm2676_vm15, 1.0, %v2630_v11 }
 0x34d   :  { %6257 = vst [vmem:[#allocation127_spill] sm:$0xff] %v2704_v36  ;;  %v984_v62 = vmul.f32 %v6258_v57, %v2526_v46  ;;  %v934_v3 = vmul.f32 %v6260_v54, %v2457_v39  ;;  %v6261_v45 = vsub.f32 %v2033_v4, %v2012_v55  ;;  %1749 = vrcp.f32 %v1059_v29 }
 0x34e   :  { %6259 = vst [vmem:[#allocation128_spill] sm:$0xff] %v2712_v12  ;;  %v1467_v57 = vsel %vm2688_vm0, 1.0, %v2615_v30  ;;  %v1494_v9 = vand.u32 2147483647, %v2682_v59  ;;  %v6262_v24 = vsub.f32 %v2039_v7, %v2012_v55  ;;  %v2736_v54 = vmul.f32 %v2409_v60, %v6191_v1 }
 0x34f   :  { %v958_v8 = vmul.f32 %v6261_v45, %v2457_v39  ;;  %1751 = vrcp.f32 %v1211_v19  ;;  %v937_v45 = vsub.f32 %v934_v3, %v936_v42  ;;  %v2740_v29 = vmul.f32 %v2409_v60, %v6196_v35 }
 0x350   :  { %v982_v2 = vmul.f32 %v6262_v24, %v2457_v39  ;;  %6263 = vst [vmem:[#allocation129_spill] sm:$0xff] %v2736_v54  ;;  %1753 = vrcp.f32 %v1354_v51  ;;  %vm2744_vm4 = vcmp.le.f32.partialorder %v1494_v9, %v2704_v36  ;;  %v6265_v52 = vmov 0  ;;  %v2748_v24 = vpop.permute.xlu1 %805 }
 0x351   :  { %v961_v4 = vsub.f32 %v958_v8, %v960_v23  ;;  %6264 = vst [vmem:[#allocation130_spill] sm:$0xff] %v2740_v29  ;;  %v6266_v52 = vsel %vm2744_vm4, 4294967295, %v6265_v52  ;;  %1755 = vrcp.f32 %v1467_v57  ;;  %v1736_v23 = vpop.eup %1735  ;;  %v1093_v42 = vsub.f32 0.0, %v2437_v21 }
 0x352   :  { %6267 = vst [vmem:[#allocation131_spill] sm:$0xff] %v6266_v52  ;;  %v985_v7 = vsub.f32 %v982_v2, %v984_v62  ;;  %v1738_v51 = vpop.eup %1737  ;;  %v1497_v2 = vsel %vm2744_vm4, 1.0, %v2682_v59  ;;  %v2762_v62 = vmul.f32 %v937_v45, %v2206_v20  ;;  %v1180_v60 = vsub.f32 0.0, %v2463_v48 }
 0x353   :  { %v2765_v57 = vmul.f32 %v961_v4, %v2206_v20  ;;  %v1740_v1 = vpop.eup %1739  ;;  %1757 = vrcp.f32 %v1497_v2  ;;  %v6273_v9 = vsub.f32 0.0, %v2460_v33  ;;  %vm6274_vm1 = vcmp.gt.f32.partialorder %v2502_v61, 0.0 }
 0x354   :  { %6268 = vst [vmem:[#allocation132_spill] sm:$0xff] %v2762_v62  ;;  %v2778_v45 = vmul.f32 %v985_v7, %v2206_v20  ;;  %v1742_v4 = vpop.eup %1741  ;;  %v1241_v7 = vsub.f32 0.0, %v2440_v38  ;;  %v2791_v3 = vpop.permute.xlu1 %1123  ;;  %vm2799_vm5 = vmand %vm2772_vm3, %vm6274_vm1  ;;  %v1323_v29 = vsub.f32 0.0, %v2495_v50  ;;  %vm6277_vm10 = vmmov 1  }
 0x355   :  { %6269 = vst [vmem:[#allocation133_spill] sm:$0xff] %v2765_v57  ;;  %v2784_v8 = vpop.eup %1743  ;;  %v1027_v21 = vmul.f32 %v1740_v1, %v6273_v9  ;;  %v2807_v2 = vsub.f32 %v2765_v57, %v2762_v62  ;;  %vm2813_vm8 = vmxor %vm2624_vm11, %vm6277_vm10  ;;  %v1353_v9 = vsub.f32 0.0, %v2541_v63  ;;  %vm6280_vm2 = vcmp.lt.f32.partialorder %v2502_v61, 0.0 }
 0x356   :  { %6272 = vst [vmem:[#allocation134_spill] sm:$0xff] %v2778_v45  ;;  %v1746_v53 = vpop.eup %1745  ;;  %v2821_v54 = vsub.f32 %v2778_v45, %v2765_v57  ;;  %vm2827_vm9 = vmand %vm2772_vm3, %vm6280_vm2  ;;  %v2831_v47 = vmul.f32 %v1736_v23, %v1093_v42  ;;  %v2834_v13 = vmul.f32 %v1738_v51, %v1241_v7  ;;  %v2838_v25 = vmul.f32 %v2791_v3, %v2061_v16 }
 0x357   :  { %vm2843_vm1 = vmxor %vm2657_vm13, %vm6277_vm10  ;;  %v1183_v35 = vmul.f32 %v1746_v53, %v1180_v60  ;;  %v2852_v51 = vmul.f32 %v2063_v18, %v2791_v3  ;;  %v1031_v7 = vmax.f32 %v1027_v21, 0.0  ;;  %v1035_v41 = vmin.f32 %v1027_v21, 1.0 }
 0x358   :  { %v1748_v12 = vpop.eup %1747  ;;  %6283 = vst [vmem:[#allocation135_spill] sm:$0xff] %v2838_v25  ;;  %vm6287_vm3 = vcmp.gt.f32.partialorder %v2538_v32, 0.0  ;;  %v1384_v53 = vsub.f32 0.0, %v2447_v44  ;;  %v1127_v60 = vand.u32 2147483647, %v2807_v2  ;;  %vm2867_vm2 = vmxor %vm2664_vm14, %vm6277_vm10  ;;  %v1466_v23 = vsub.f32 0.0, %v2513_v49 }
 0x359   :  { %6286 = vst [vmem:[#allocation136_spill] sm:$0xff] %v2852_v51  ;;  %vm2858_vm11 = vmand %vm2813_vm8, %vm6287_vm3  ;;  %v1326_v21 = vmul.f32 %v1748_v12, %v1323_v29  ;;  %v6292_v63 = vsub.f32 %v2059_v15, %v2035_v5  ;;  %v1270_v27 = vand.u32 2147483647, %v2821_v54  ;;  %vm6293_vm3 = vcmp.lt.f32.partialorder %v2538_v32, 0.0 }
 0x35a   :  { %v1750_v16 = vpop.eup %1749  ;;  %vm2882_vm14 = vmand %vm2813_vm8, %vm6293_vm3  ;;  %v2887_v12 = vmul.f32 %v1742_v4, %v1384_v53  ;;  %v1496_v29 = vsub.f32 0.0, %v2544_v56  ;;  %vm2892_vm7 = vcmp.le.f32.partialorder %v1127_v60, %v2838_v25  ;;  %v1187_v6 = vmax.f32 %v1183_v35, 0.0  ;;  %v6302_v4 = vld [vmem:[#allocation25_spill] sm:$0xff] }
 0x35b   :  { %v1008_v44 = vmul.f32 %v6292_v63, %v2526_v46  ;;  %v6296_v63 = vmov 0  ;;  %v1191_v1 = vmin.f32 %v1183_v35, 1.0  ;;  %vm2899_vm8 = vmxor %vm2643_vm12, %vm6277_vm10  ;;  %v6303_v53 = vsub.f32 %v6302_v4, %v2012_v55 }
 0x35c   :  { %v1752_v42 = vpop.eup %1751  ;;  %v6297_v63 = vsel %vm2892_vm7, 4294967295, %v6296_v63  ;;  %vm2909_vm13 = vcmp.le.f32.partialorder %v1270_v27, %v2852_v51  ;;  %v6304_v10 = vmov 0  ;;  %v1032_v35 = vsel %vm2799_vm5, %v1031_v7, 0.0 }
 0x35d   :  { %v1754_v17 = vpop.eup %1753  ;;  %6298 = vst [vmem:[#allocation137_spill] sm:$0xff] %v6297_v63  ;;  %v1006_v60 = vmul.f32 %v6303_v53, %v2457_v39  ;;  %v6305_v10 = vsel %vm2909_vm13, 4294967295, %v6304_v10  ;;  %v1036_v36 = vsel %vm2827_vm9, %v1035_v41, 1.0  ;;  %v6307_v49 = vsub.f32 0.0, %v2489_v37  ;;  %v6402_v63 = vld [vmem:[#allocation41_spill] sm:$0xff] }
 0x35e   :  { %v1756_v32 = vpop.eup %1755  ;;  %6306 = vst [vmem:[#allocation138_spill] sm:$0xff] %v6305_v10  ;;  %vm6308_vm3 = vcmp.gt.f32.partialorder %v2534_v22, 0.0  ;;  %vm6311_vm4 = vcmp.lt.f32.partialorder %v2534_v22, 0.0  ;;  %v6312_v27 = vmov 0  ;;  %v6314_v41 = vsub.f32 0.0, %v2492_v0 }
 0x35f   :  { %v1061_v50 = vmul.f32 %v1750_v16, %v6307_v49  ;;  %vm2923_vm12 = vmand %vm2843_vm1, %vm6308_vm3  ;;  %vm6315_vm9 = vcmp.gt.f32.partialorder %v2611_v31, 0.0  ;;  %v1527_v16 = vsub.f32 0.0, %v2469_v14  ;;  %v1009_v7 = vsub.f32 %v1006_v60, %v1008_v44  ;;  %v6327_v44 = vld [vmem:[#allocation93_spill] sm:$0xff] }
 0x360   :  { %vm2931_vm0 = vmand %vm2843_vm1, %vm6311_vm4  ;;  %v1213_v38 = vmul.f32 %v1752_v42, %v6314_v41  ;;  %vm6321_vm1 = vcmp.lt.f32.partialorder %v2611_v31, 0.0  ;;  %v1330_v42 = vmax.f32 %v1326_v21, 0.0  ;;  %v1130_v41 = vsel %vm2892_vm7, 1.0, %v2807_v2  ;;  %v1758_v28 = vpop.eup %1757 }
 0x361   :  { %v6313_v27 = vsel %vm2931_vm0, 4294967295, %v6312_v27  ;;  %vm2941_vm5 = vmand %vm2867_vm2, %vm6315_vm9  ;;  %vm6324_vm9 = vcmp.gt.f32.partialorder %v2553_v26, 0.0  ;;  %v1334_v18 = vmin.f32 %v1326_v21, 1.0  ;;  %v1356_v22 = vmul.f32 %v1754_v17, %v1353_v9  ;;  %v6330_v17 = vld [vmem:[#allocation36_spill] sm:$0xff] }
 0x362   :  { %vm2949_vm4 = vmxor %vm2557_vm6, %vm6277_vm10  ;;  %v1469_v0 = vmul.f32 %v1756_v32, %v1466_v23  ;;  %v1273_v14 = vsel %vm2909_vm13, 1.0, %v2821_v54  ;;  %v1188_v60 = vsel %vm2858_vm11, %v1187_v6, 0.0  ;;  %v1192_v37 = vsel %vm2882_vm14, %v1191_v1, 1.0 }
 0x363   :  { %vm2957_vm0 = vmand %vm2867_vm2, %vm6321_vm1  ;;  %v2990_v9 = vmul.f32 %v2748_v24, %v6330_v17  ;;  %v2994_v23 = vmul.f32 %v2748_v24, %v6189_v34  ;;  %v1065_v6 = vmax.f32 %v1032_v35, %v1061_v50  ;;  %v1069_v21 = vmin.f32 %v1036_v36, %v1061_v50  ;;  %v6334_v17 = vld [vmem:[#allocation126_spill] sm:$0xff] }
 0x364   :  { %vm2969_vm3 = vmand %vm2899_vm8, %vm6324_vm9  ;;  %v1217_v40 = vmax.f32 %v1188_v60, %v1213_v38  ;;  %vm6333_vm11 = vcmp.lt.f32.partialorder %v2553_v26, 0.0  ;;  %1759 = vrcp.f32 %v1130_v41  ;;  %v1221_v32 = vmin.f32 %v1192_v37, %v1213_v38 }
 0x365   :  { %vm2984_vm1 = vmxor %vm2676_vm15, %vm6277_vm10  ;;  %6331 = vst [vmem:[#allocation93_spill] sm:$0xff] %v2990_v9  ;;  %v1331_v1 = vsel %vm2969_vm3, %v1330_v42, 0.0  ;;  %vm6335_vm2 = vnez %v6334_v17  ;;  %v3012_v26 = vmul.f32 %v1009_v7, %v2206_v20  ;;  %1761 = vrcp.f32 %v1273_v14  ;;  %v6345_v17 = vld [vmem:[#allocation38_spill] sm:$0xff] }
 0x366   :  { %6332 = vst [vmem:[#allocation36_spill] sm:$0xff] %v2994_v23  ;;  %vm1333_vm14 = vmand %vm2899_vm8, %vm6333_vm11  ;;  %vm6339_vm11 = vcmp.gt.f32.partialorder %v2630_v11, 0.0  ;;  %v1360_v38 = vmax.f32 %v1331_v1, %v1356_v22  ;;  %v1473_v42 = vmax.f32 %v1469_v0, 0.0  ;;  %v1477_v41 = vmin.f32 %v1469_v0, 1.0 }
 0x367   :  { %vm3006_vm15 = vmxor %vm6335_vm2, %vm6277_vm10  ;;  %6338 = vst [vmem:[#allocation139_spill] sm:$0xff] %v3012_v26  ;;  %v1335_v50 = vsel %vm1333_vm14, %v1334_v18, 1.0  ;;  %vm6342_vm6 = vcmp.lt.f32.partialorder %v2630_v11, 0.0  ;;  %v1499_v31 = vmul.f32 %v1758_v28, %v1496_v29  ;;  %v3034_v58 = vmul.f32 %v2748_v24, %v6345_v17 }
 0x368   :  { %vm3019_vm3 = vmand %vm2984_vm1, %vm6339_vm11  ;;  %v1364_v7 = vmin.f32 %v1335_v50, %v1356_v22  ;;  %vm6347_vm14 = vcmp.gt.f32.partialorder %v2615_v30, 0.0  ;;  %v3041_v0 = vmul.f32 %v2784_v8, %v1527_v16  ;;  %v6348_v22 = vld [vmem:[#allocation39_spill] sm:$0xff]  ;;  %v1066_v28 = vsel %vm2923_vm12, %v1065_v6, %v1032_v35  ;;  %v6356_v16 = vld [vmem:[#allocation34_spill] sm:$0xff] }
 0x369   :  { %vm3027_vm9 = vmand %vm2984_vm1, %vm6342_vm6  ;;  %6346 = vst [vmem:[#allocation38_spill] sm:$0xff] %v3034_v58  ;;  %v3047_v29 = vmul.f32 %v2748_v24, %v6348_v22  ;;  %vm6350_vm6 = vnez %v6313_v27  ;;  %v1218_v18 = vsel %vm2941_vm5, %v1217_v40, %v1188_v60  ;;  %vm6351_vm1 = vcmp.lt.f32.partialorder %v2615_v30, 0.0  ;;  %v6352_v24 = vld [vmem:[#allocation94_spill] sm:$0xff]  ;;  %v6370_v30 = vld [vmem:[#allocation109_spill] sm:$0xff] }
 0x36a   :  { %vm1472_vm11 = vmand %vm3006_vm15, %vm6347_vm14  ;;  %v1070_v17 = vsel %vm6350_vm6, %v1069_v21, %v1036_v36  ;;  %v3061_v8 = vsub.f32 %v3012_v26, %v2778_v45  ;;  %vm1246_vm8 = vcmp.gt.f32.partialorder %v6352_v24, 0.0  ;;  %v1222_v35 = vsel %vm2957_vm0, %v1221_v32, %v1192_v37  ;;  %v6377_v6 = vld [vmem:[#allocation26_spill] sm:$0xff]  ;;  %v6404_v58 = vld [vmem:[#allocation63_spill] sm:$0xff] }
 0x36b   :  { %6349 = vst [vmem:[#allocation39_spill] sm:$0xff] %v3047_v29  ;;  %vm1476_vm14 = vmand %vm3006_vm15, %vm6351_vm1  ;;  %v3068_v36 = vsel %vm3019_vm3, %v1360_v38, %v1331_v1  ;;  %v1474_v53 = vsel %vm1472_vm11, %v1473_v42, 0.0  ;;  %vm6353_vm12 = vnez %v6266_v52  ;;  %vm1250_vm15 = vcmp.lt.f32.partialorder %v6352_v24, 0.0 }
 0x36c   :  { %v1478_v27 = vsel %vm1476_vm14, %v1477_v41, 1.0  ;;  %vm3073_vm5 = vmxor %vm6353_vm12, %vm6277_vm10  ;;  %v3080_v49 = vsel %vm3027_vm9, %v1364_v7, %v1335_v50  ;;  %v1503_v37 = vmax.f32 %v1474_v53, %v1499_v31  ;;  %v3084_v60 = vmul.f32 %v6356_v16, %v2791_v3 }
 0x36d   :  { %v1507_v61 = vmin.f32 %v1478_v27, %v1499_v31  ;;  %vm6358_vm0 = vcmp.gt.f32.partialorder %v6327_v44, 0.0  ;;  %v1100_v21 = vmax.f32 %v1066_v28, %v2831_v47  ;;  %v1104_v40 = vmin.f32 %v1070_v17, %v2831_v47 }
 0x36e   :  { %6357 = vst [vmem:[#allocation94_spill] sm:$0xff] %v3084_v60  ;;  %vm3090_vm3 = vmand %vm2949_vm4, %vm6358_vm0  ;;  %v1248_v34 = vmax.f32 %v1218_v18, %v2834_v13  ;;  %v1252_v50 = vmin.f32 %v1222_v35, %v2834_v13  ;;  %vm6361_vm9 = vcmp.gt.f32.partialorder %v2682_v59, 0.0  ;;  %v1413_v43 = vand.u32 2147483647, %v3061_v8 }
 0x36f   :  { %vm1502_vm11 = vmand %vm3073_vm5, %vm6361_vm9  ;;  %v3107_v38 = vsub.f32 %v2762_v62, %v3012_v26  ;;  %vm6363_vm6 = vcmp.lt.f32.partialorder %v2682_v59, 0.0  ;;  %v1129_v13 = vsub.f32 0.0, %v2762_v62  ;;  %vm6364_vm14 = vcmp.lt.f32.partialorder %v6327_v44, 0.0  ;;  %v6368_v59 = vld [vmem:[#allocation35_spill] sm:$0xff] }
 0x370   :  { %vm1506_vm1 = vmand %vm3073_vm5, %vm6363_vm6  ;;  %v3123_v14 = vsel %vm1502_vm11, %v1503_v37, %v1474_v53  ;;  %vm3128_vm9 = vcmp.le.f32.partialorder %v1413_v43, %v3084_v60  ;;  %v6365_v31 = vmov 0  ;;  %v3134_v22 = vmul.f32 %v6368_v59, %v2791_v3  ;;  %v6379_v3 = vld [vmem:[#allocation27_spill] sm:$0xff] }
 0x371   :  { %6362 = vst [vmem:[#allocation34_spill] sm:$0xff] %v3107_v38  ;;  %vm1103_vm0 = vmand %vm2949_vm4, %vm6364_vm14  ;;  %v3125_v7 = vsel %vm1506_vm1, %v1507_v61, %v1478_v27  ;;  %v6366_v31 = vsel %vm3128_vm9, 4294967295, %v6365_v31  ;;  %vm6371_vm5 = vnez %v6370_v30  ;;  %vm1134_vm4 = vcmp.gt.f32.partialorder %v2807_v2, 0.0  ;;  %v1760_v37 = vpop.eup %1759  ;;  %v6400_v30 = vld [vmem:[#allocation50_spill] sm:$0xff] }
 0x372   :  { %6367 = vst [vmem:[#allocation140_spill] sm:$0xff] %v6366_v31  ;;  %6369 = vst [vmem:[#allocation35_spill] sm:$0xff] %v3134_v22  ;;  %v1272_v19 = vsub.f32 0.0, %v2765_v57  ;;  %v1101_v27 = vsel %vm3090_vm3, %v1100_v21, %v1066_v28  ;;  %vm1138_vm11 = vcmp.lt.f32.partialorder %v2807_v2, 0.0  ;;  %v1556_v61 = vand.u32 2147483647, %v3107_v38  ;;  %v1762_v59 = vpop.eup %1761 }
 0x373   :  { %vm3139_vm6 = vmxor %vm6371_vm5, %vm6277_vm10  ;;  %v1105_v43 = vsel %vm1103_vm0, %v1104_v40, %v1070_v17  ;;  %vm1277_vm1 = vcmp.gt.f32.partialorder %v2821_v54, 0.0  ;;  %v1416_v28 = vsel %vm3128_vm9, 1.0, %v3061_v8  ;;  %v6374_v17 = vmov 0  ;;  %v6378_v40 = vld [vmem:[#allocation24_spill] sm:$0xff]  ;;  %v6401_v57 = vld [vmem:[#allocation55_spill] sm:$0xff] }
 0x374   :  { %vm1247_vm3 = vmand %vm3139_vm6, %vm1246_vm8  ;;  %vm3166_vm0 = vcmp.le.f32.partialorder %v1556_v61, %v3134_v22  ;;  %v435_v21 = vsub.f32 %v2035_v5, %v6377_v6  ;;  %v439_v16 = vsub.f32 %v2012_v55, %v6378_v40  ;;  %v441_v53 = vsub.f32 %v2035_v5, %v6379_v3  ;;  %v6392_v61 = vld [vmem:[#allocation29_spill] sm:$0xff] }
 0x375   :  { %v6375_v17 = vsel %vm3166_vm0, 4294967295, %v6374_v17  ;;  %vm1251_vm8 = vmand %vm3139_vm6, %vm1250_vm15  ;;  %v1132_v48 = vmul.f32 %v1760_v37, %v1129_v13  ;;  %v1249_v11 = vsel %vm1247_vm3, %v1248_v34, %v1218_v18  ;;  %v447_v41 = vsub.f32 %v2035_v5, %v2059_v15  ;;  %v6382_v34 = vld [vmem:[#allocation30_spill] sm:$0xff]  ;;  %v6393_v15 = vld [vmem:[#allocation69_spill] sm:$0xff] }
 0x376   :  { %6376 = vst [vmem:[#allocation141_spill] sm:$0xff] %v6375_v17  ;;  %v1253_v32 = vsel %vm1251_vm8, %v1252_v50, %v1222_v35  ;;  %v1275_v1 = vmul.f32 %v1762_v59, %v1272_v19  ;;  %vm3188_vm14 = vmxor %vm2892_vm7, %vm6277_vm10  ;;  %1763 = vrcp.f32 %v1416_v28  ;;  %v1559_v18 = vsel %vm3166_vm0, 1.0, %v3107_v38  ;;  %v6383_v35 = vld [vmem:[#allocation22_spill] sm:$0xff]  ;;  %v6386_v19 = vld [vmem:[#allocation40_spill] sm:$0xff] }
 0x377   :  { %v6384_v50 = vsub.f32 %v2012_v55, %v6383_v35  ;;  %v445_v44 = vsub.f32 %v2012_v55, %v6302_v4  ;;  %v3204_v37 = vmul.f32 %v435_v21, %v6386_v19  ;;  %v6388_v59 = vld [vmem:[#allocation31_spill] sm:$0xff]  ;;  %v6390_v28 = vld [vmem:[#allocation44_spill] sm:$0xff]  ;;  %v1043_v5 = vmul.f32 %v6393_v15, %v6392_v61  ;;  %vm3217_vm15 = vmxor %vm2909_vm13, %vm6277_vm10 }
 0x378   :  { %v3207_v47 = vmul.f32 %v439_v16, %v6388_v59  ;;  %v3210_v42 = vmul.f32 %v441_v53, %v6390_v28  ;;  %v1136_v52 = vmax.f32 %v1101_v27, %v1132_v48  ;;  %v1140_v56 = vmin.f32 %v1105_v43, %v1132_v48  ;;  %v6396_v21 = vld [vmem:[#allocation45_spill] sm:$0xff]  ;;  %v6398_v16 = vld [vmem:[#allocation28_spill] sm:$0xff]  ;;  %v6399_v55 = vld [vmem:[#allocation42_spill] sm:$0xff] }
 0x379   :  { %v3199_v13 = vmul.f32 %v6384_v50, %v6382_v34  ;;  %6387 = vst [vmem:[#allocation30_spill] sm:$0xff] %v3204_v37  ;;  %v3222_v4 = vmul.f32 %v447_v41, %v6396_v21  ;;  %v1044_v60 = vmul.f32 %v6399_v55, %v6398_v16  ;;  %vm1135_vm6 = vmand %vm3188_vm14, %vm1134_vm4  ;;  %v1279_v53 = vmax.f32 %v1249_v11, %v1275_v1  ;;  %v6470_v31 = vld [vmem:[#allocation65_spill] sm:$0xff] }
 0x37a   :  { %6389 = vst [vmem:[#allocation22_spill] sm:$0xff] %v3207_v47  ;;  %6391 = vst [vmem:[#allocation40_spill] sm:$0xff] %v3210_v42  ;;  %v1283_v48 = vmin.f32 %v1253_v32, %v1275_v1  ;;  %v1078_v10 = vmul.f32 %v6400_v30, %v6392_v61  ;;  %v1079_v51 = vmul.f32 %v6401_v57, %v6398_v16  ;;  %v6405_v1 = vld [vmem:[#allocation60_spill] sm:$0xff]  ;;  %1765 = vrcp.f32 %v1559_v18 }
 0x37b   :  { %6385 = vst [vmem:[#allocation26_spill] sm:$0xff] %v3199_v13  ;;  %6397 = vst [vmem:[#allocation31_spill] sm:$0xff] %v3222_v4  ;;  %v3240_v29 = vmul.f32 %v445_v44, %v6402_v63  ;;  %v1113_v62 = vmul.f32 %v6404_v58, %v6392_v61  ;;  %v1114_v25 = vmul.f32 %v6405_v1, %v6398_v16  ;;  %v6424_v47 = vld [vmem:[#allocation20_spill] sm:$0xff]  ;;  %vm6488_vm12 = vcmp.lt.f32.partialorder %v3061_v8, 0.0 }
 0x37c   :  { %vm1139_vm3 = vmand %vm3188_vm14, %vm1138_vm11  ;;  %v3255_v41 = vsel %vm1135_vm6, %v1136_v52, %v1101_v27  ;;  %vm6408_vm11 = vcmp.lt.f32.partialorder %v2821_v54, 0.0  ;;  %v3265_v23 = vadd.f32 %v1044_v60, %v1043_v5  ;;  %v3271_v24 = vadd.f32 %v1079_v51, %v1078_v10 }
 0x37d   :  { %6403 = vst [vmem:[#allocation44_spill] sm:$0xff] %v3240_v29  ;;  %vm1278_vm4 = vmand %vm3217_vm15, %vm1277_vm1  ;;  %v3257_v22 = vsel %vm1139_vm3, %v1140_v56, %v1105_v43  ;;  %v1149_v56 = vmul.f32 %v2457_v39, %v6392_v61  ;;  %v3275_v52 = vadd.f32 %v1114_v25, %v1113_v62  ;;  %v1150_v54 = vmul.f32 %v2526_v46, %v6398_v16  ;;  %v6423_v29 = vld [vmem:[#allocation21_spill] sm:$0xff] }
 0x37e   :  { %6406 = vst [vmem:[#allocation29_spill] sm:$0xff] %v3255_v41  ;;  %6407 = vst [vmem:[#allocation28_spill] sm:$0xff] %v3257_v22  ;;  %v3267_v2 = vsel %vm1278_vm4, %v1279_v53, %v1249_v11  ;;  %v1199_v5 = vmul.f32 %v6393_v15, %v6382_v34  ;;  %v1156_v11 = vmul.f32 %v3255_v41, %v6392_v61  ;;  %v6415_v53 = vld [vmem:[#allocation98_spill] sm:$0xff] }
 0x37f   :  { %vm1282_vm14 = vmand %vm3217_vm15, %vm6408_vm11  ;;  %6409 = vst [vmem:[#allocation142_spill] sm:$0xff] %v3265_v23  ;;  %v1158_v10 = vmul.f32 %v3255_v41, %v6398_v16  ;;  %v1160_v51 = vmul.f32 %v3257_v22, %v6392_v61  ;;  %v1162_v25 = vmul.f32 %v3257_v22, %v6398_v16  ;;  %v1299_v62 = vmul.f32 %v3267_v2, %v6382_v34  ;;  %v6416_v22 = vld [vmem:[#allocation43_spill] sm:$0xff]  ;;  %v6417_v41 = vld [vmem:[#allocation48_spill] sm:$0xff] }
 0x380   :  { %6410 = vst [vmem:[#allocation143_spill] sm:$0xff] %v3267_v2  ;;  %v3269_v9 = vsel %vm1282_vm14, %v1283_v48, %v1253_v32  ;;  %6412 = vst [vmem:[#allocation145_spill] sm:$0xff] %v3271_v24  ;;  %v1200_v32 = vmul.f32 %v6399_v55, %v6386_v19  ;;  %v1230_v50 = vmul.f32 %v6400_v30, %v6382_v34  ;;  %vm1389_vm1 = vcmp.gt.f32.partialorder %v6415_v53, 0.0  ;;  %v6421_v23 = vld [vmem:[#allocation52_spill] sm:$0xff] }
 0x381   :  { %6411 = vst [vmem:[#allocation144_spill] sm:$0xff] %v3269_v9  ;;  %6413 = vst [vmem:[#allocation146_spill] sm:$0xff] %v3275_v52  ;;  %v1305_v60 = vmul.f32 %v3269_v9, %v6386_v19  ;;  %v1301_v61 = vmul.f32 %v3267_v2, %v6386_v19  ;;  %v1303_v16 = vmul.f32 %v3269_v9, %v6382_v34  ;;  %vm1393_vm8 = vcmp.lt.f32.partialorder %v6415_v53, 0.0  ;;  %v6418_v2 = vld [vmem:[#allocation47_spill] sm:$0xff]  ;;  %v6420_v9 = vld [vmem:[#allocation54_spill] sm:$0xff] }
 0x382   :  { %v1231_v48 = vmul.f32 %v6401_v57, %v6386_v19  ;;  %v1261_v43 = vmul.f32 %v6404_v58, %v6382_v34  ;;  %v1262_v44 = vmul.f32 %v6405_v1, %v6386_v19  ;;  %v1293_v18 = vmul.f32 %v2526_v46, %v6386_v19  ;;  %v6451_v53 = vld [vmem:[#allocation116_spill] sm:$0xff] }
 0x383   :  { %v6419_v52 = vsub.f32 %v6417_v41, %v6418_v2  ;;  %v6422_v27 = vsub.f32 %v6420_v9, %v6421_v23  ;;  %v1764_v4 = vpop.eup %1763  ;;  %v1157_v42 = vadd.f32 %v1156_v11, %v6423_v29  ;;  %v1159_v37 = vadd.f32 %v1158_v10, %v6424_v47 }
 0x384   :  { %v1161_v13 = vadd.f32 %v1160_v51, %v6423_v29  ;;  %v1163_v19 = vadd.f32 %v1162_v25, %v6424_v47  ;;  %v3328_v20 = vadd.f32 %v1150_v54, %v1149_v56  ;;  %v1292_v41 = vmul.f32 %v2457_v39, %v6382_v34  ;;  %v6428_v29 = vld [vmem:[#allocation101_spill] sm:$0xff] }
 0x385   :  { %v3316_v24 = vmul.f32 %v6419_v52, %v6416_v22  ;;  %v3322_v33 = vmul.f32 %v6422_v27, %v6416_v22  ;;  %v1300_v2 = vadd.f32 %v1299_v62, %v6377_v6  ;;  %v1306_v9 = vadd.f32 %v1305_v60, %v6383_v35 }
 0x386   :  { %6425 = vst [vmem:[#allocation98_spill] sm:$0xff] %v3328_v20  ;;  %v3334_v23 = vadd.f32 %v1200_v32, %v1199_v5  ;;  %v3336_v52 = vadd.f32 %v1231_v48, %v1230_v50  ;;  %v1302_v27 = vadd.f32 %v1301_v61, %v6383_v35  ;;  %v1304_v11 = vadd.f32 %v1303_v16, %v6377_v6  ;;  %v6432_v5 = vld [vmem:[#allocation114_spill] sm:$0xff]  ;;  %v6440_v16 = vld [vmem:[#allocation49_spill] sm:$0xff] }
 0x387   :  { %vm1532_vm15 = vcmp.gt.f32.partialorder %v6428_v29, 0.0  ;;  %v3341_v47 = vadd.f32 %v1262_v44, %v1261_v43  ;;  %v3343_v56 = vadd.f32 %v1293_v18, %v1292_v41  ;;  %v3348_v10 = vsub.f32 %v3322_v33, %v3316_v24  ;;  %v3365_v43 = vpop.eup %1765  ;;  %v6441_v48 = vld [vmem:[#allocation58_spill] sm:$0xff] }
 0x388   :  { %6426 = vst [vmem:[#allocation48_spill] sm:$0xff] %v3334_v23  ;;  %6427 = vst [vmem:[#allocation47_spill] sm:$0xff] %v3336_v52  ;;  %vm6433_vm6 = vnez %v6432_v5  ;;  %v3357_v6 = vmul.f32 %v1163_v19, %v1157_v42  ;;  %v3359_v35 = vmul.f32 %v1161_v13, %v1159_v37  ;;  %v1342_v44 = vmul.f32 %v6393_v15, %v6388_v59 }
 0x389   :  { %6429 = vst [vmem:[#allocation54_spill] sm:$0xff] %v3341_v47  ;;  %6430 = vst [vmem:[#allocation52_spill] sm:$0xff] %v3343_v56  ;;  %v1343_v18 = vmul.f32 %v6399_v55, %v6390_v28  ;;  %v3368_v25 = vmul.f32 %v1306_v9, %v1300_v2  ;;  %v1373_v62 = vmul.f32 %v6400_v30, %v6388_v59  ;;  %v1415_v13 = vsub.f32 0.0, %v2778_v45  ;;  %v6443_v2 = vld [vmem:[#allocation56_spill] sm:$0xff]  ;;  %v6644_v45 = vld [vmem:[#allocation99_spill] sm:$0xff] }
 0x38a   :  { %vm3353_vm3 = vmxor %vm6433_vm6, %vm6277_vm10  ;;  %6436 = vst [vmem:[#allocation21_spill] sm:$0xff] %v3357_v6  ;;  %v1374_v42 = vmul.f32 %v6401_v57, %v6390_v28  ;;  %v3376_v37 = vmul.f32 %v1304_v11, %v1302_v27  ;;  %v1404_v60 = vmul.f32 %v6404_v58, %v6388_v59  ;;  %v1405_v32 = vmul.f32 %v6405_v1, %v6390_v28  ;;  %v6444_v9 = vld [vmem:[#allocation64_spill] sm:$0xff]  ;;  %v6466_v6 = vld [vmem:[#allocation51_spill] sm:$0xff] }
 0x38b   :  { %6437 = vst [vmem:[#allocation20_spill] sm:$0xff] %v3359_v35  ;;  %6438 = vst [vmem:[#allocation101_spill] sm:$0xff] %v3368_v25  ;;  %v1436_v50 = vmul.f32 %v2526_v46, %v6390_v28  ;;  %v1418_v61 = vmul.f32 %v1764_v4, %v1415_v13  ;;  %v6442_v19 = vsub.f32 %v6440_v16, %v6441_v48  ;;  %v462_v34 = vand.u32 2147483647, %v3348_v10 }
 0x38c   :  { %6439 = vst [vmem:[#allocation147_spill] sm:$0xff] %v3376_v37  ;;  %vm1390_vm14 = vmand %vm3353_vm3, %vm1389_vm1  ;;  %v6445_v27 = vsub.f32 %v6443_v2, %v6444_v9  ;;  %v3408_v13 = vadd.f32 %v1343_v18, %v1342_v44  ;;  %v6447_v16 = vmax.f32 %v3068_v36, %v2887_v12  ;;  %v6449_v2 = vld [vmem:[#allocation68_spill] sm:$0xff]  ;;  %vm6452_vm4 = vnez %v6451_v53  ;;  %v6467_v53 = vld [vmem:[#allocation59_spill] sm:$0xff] }
 0x38d   :  { %v3393_v41 = vmul.f32 %v6442_v19, %v6416_v22  ;;  %vm1394_vm1 = vmand %vm3353_vm3, %vm1393_vm8  ;;  %v6448_v19 = vld [vmem:[#allocation67_spill] sm:$0xff]  ;;  %v3427_v44 = vadd.f32 %v1374_v42, %v1373_v62  ;;  %v6456_v18 = vmin.f32 %v3080_v49, %v2887_v12  ;;  %v3442_v4 = vadd.f32 %v1405_v32, %v1404_v60 }
 0x38e   :  { %v3399_v11 = vmul.f32 %v6445_v27, %v6416_v22  ;;  %6446 = vst [vmem:[#allocation49_spill] sm:$0xff] %v3408_v13  ;;  %v1392_v48 = vsel %vm1390_vm14, %v6447_v16, %v3068_v36  ;;  %v6450_v9 = vsub.f32 %v6448_v19, %v6449_v2  ;;  %vm3423_vm8 = vmxor %vm6452_vm4, %vm6277_vm10  ;;  %v1435_v16 = vmul.f32 %v2457_v39, %v6388_v59  ;;  %v6457_v19 = vld [vmem:[#allocation110_spill] sm:$0xff] }
 0x38f   :  { %6455 = vst [vmem:[#allocation58_spill] sm:$0xff] %v3427_v44  ;;  %v1396_v36 = vsel %vm1394_vm1, %v6456_v18, %v3080_v49  ;;  %vm3436_vm3 = vcmp.le.f32.partialorder %v462_v34, %v6457_v19  ;;  %v6458_v2 = vmov 0  ;;  %6460 = vst [vmem:[#allocation56_spill] sm:$0xff] %v3442_v4  ;;  %v1485_v62 = vmul.f32 %v6393_v15, %v6402_v63  ;;  %v6469_v44 = vld [vmem:[#allocation62_spill] sm:$0xff]  ;;  %v6579_v18 = vld [vmem:[#allocation95_spill] sm:$0xff] }
 0x390   :  { %v3418_v27 = vmul.f32 %v6450_v9, %v6416_v22  ;;  %v6459_v2 = vsel %vm3436_vm3, 4294967295, %v6458_v2  ;;  %v1486_v12 = vmul.f32 %v6399_v55, %v6396_v21  ;;  %vm3451_vm14 = vmxor %vm3128_vm9, %vm6277_vm10  ;;  %v1422_v34 = vmax.f32 %v1392_v48, %v1418_v61  ;;  %v6478_v13 = vld [vmem:[#allocation66_spill] sm:$0xff] }
 0x391   :  { %v3455_v42 = vadd.f32 %v1436_v50, %v1435_v16  ;;  %v3460_v60 = vsub.f32 %v3399_v11, %v3393_v41  ;;  %vm1533_vm1 = vmand %vm3423_vm8, %vm1532_vm15  ;;  %v1516_v32 = vmul.f32 %v6400_v30, %v6402_v63  ;;  %v1517_v37 = vmul.f32 %v6401_v57, %v6396_v21  ;;  %v6582_v15 = vld [vmem:[#allocation78_spill] sm:$0xff] }
 0x392   :  { %v465_v50 = vsel %vm3436_vm3, 1.0, %v3348_v10  ;;  %v3475_v16 = vsub.f32 %v3418_v27, %v3322_v33  ;;  %v1426_v9 = vmin.f32 %v1396_v36, %v1418_v61  ;;  %v6465_v25 = vmax.f32 %v3123_v14, %v3041_v0  ;;  %vm1425_vm2 = vmand %vm3451_vm14, %vm6488_vm12 }
 0x393   :  { %6463 = vst [vmem:[#allocation64_spill] sm:$0xff] %v3455_v42  ;;  %v6468_v42 = vsub.f32 %v6466_v6, %v6467_v53  ;;  %v6471_v57 = vsub.f32 %v6469_v44, %v6470_v31  ;;  %vm6473_vm15 = vcmp.gt.f32.partialorder %v3061_v8, 0.0  ;;  %v3497_v61 = vadd.f32 %v1486_v12, %v1485_v62  ;;  %v6476_v6 = vld [vmem:[#allocation61_spill] sm:$0xff]  ;;  %v6479_v31 = vld [vmem:[#allocation71_spill] sm:$0xff]  ;;  %v6484_v12 = vld [vmem:[#allocation70_spill] sm:$0xff] }
 0x394   :  { %v1535_v35 = vsel %vm1533_vm1, %v6465_v25, %v3123_v14  ;;  %vm1421_vm11 = vmand %vm3451_vm14, %vm6473_vm15  ;;  %v1558_v14 = vsub.f32 0.0, %v3012_v26  ;;  %v6475_v25 = vld [vmem:[#allocation53_spill] sm:$0xff]  ;;  %vm6482_vm1 = vcmp.lt.f32.partialorder %v6428_v29, 0.0  ;;  %vm1563_vm4 = vcmp.gt.f32.partialorder %v3107_v38, 0.0 }
 0x395   :  { %v3485_v4 = vmul.f32 %v6468_v42, %v6416_v22  ;;  %v3491_v30 = vmul.f32 %v6471_v57, %v6416_v22  ;;  %6474 = vst [vmem:[#allocation68_spill] sm:$0xff] %v3497_v61  ;;  %v6477_v53 = vsub.f32 %v6475_v25, %v6476_v6  ;;  %v6480_v57 = vsub.f32 %v6478_v13, %v6479_v31  ;;  %vm1537_vm15 = vmand %vm3423_vm8, %vm6482_vm1  ;;  %v6485_v25 = vld [vmem:[#allocation75_spill] sm:$0xff]  ;;  %v6493_v31 = vld [vmem:[#allocation82_spill] sm:$0xff] }
 0x396   :  { %v3517_v62 = vsel %vm1421_vm11, %v1422_v34, %v1392_v48  ;;  %v6486_v6 = vsub.f32 %v6484_v12, %v6485_v25  ;;  %1767 = vrcp.f32 %v465_v50  ;;  %v486_v13 = vand.u32 2147483647, %v3460_v60  ;;  %v6492_v34 = vld [vmem:[#allocation74_spill] sm:$0xff]  ;;  %vm3606_vm11 = vmxor %vm3166_vm0, %vm6277_vm10 }
 0x397   :  { %6472 = vst [vmem:[#allocation67_spill] sm:$0xff] %v3491_v30  ;;  %v3504_v42 = vmul.f32 %v6477_v53, %v6416_v22  ;;  %v3510_v44 = vmul.f32 %v6480_v57, %v6416_v22  ;;  %6483 = vst [vmem:[#allocation51_spill] sm:$0xff] %v3517_v62  ;;  %v3530_v29 = vadd.f32 %v1517_v37, %v1516_v32  ;;  %v586_v12 = vand.u32 2147483647, %v3475_v16  ;;  %v6498_v37 = vld [vmem:[#allocation111_spill] sm:$0xff] }
 0x398   :  { %v3523_v53 = vmul.f32 %v6486_v6, %v6416_v22  ;;  %v6490_v48 = vmin.f32 %v3125_v7, %v3041_v0  ;;  %v6494_v57 = vsub.f32 %v6492_v34, %v6493_v31  ;;  %v3545_v8 = vsel %vm1425_vm2, %v1426_v9, %v1396_v36  ;;  %vm1564_vm14 = vmand %vm3606_vm11, %vm1563_vm4 }
 0x399   :  { %6481 = vst [vmem:[#allocation110_spill] sm:$0xff] %v3510_v44  ;;  %6489 = vst [vmem:[#allocation62_spill] sm:$0xff] %v3530_v29  ;;  %v3548_v49 = vmul.f32 %v3365_v43, %v1558_v14  ;;  %vm3551_vm12 = vcmp.le.f32.partialorder %v486_v13, %v6498_v37  ;;  %v3557_v0 = vsub.f32 %v3491_v30, %v3485_v4  ;;  %v6502_v43 = vld [vmem:[#allocation124_spill] sm:$0xff]  ;;  %v6510_v29 = vmov 0 }
 0x39a   :  { %6487 = vst [vmem:[#allocation59_spill] sm:$0xff] %v3523_v53  ;;  %v3536_v51 = vsel %vm1537_vm15, %v6490_v48, %v3125_v7  ;;  %v3542_v50 = vmul.f32 %v6494_v57, %v6416_v22  ;;  %6496 = vst [vmem:[#allocation61_spill] sm:$0xff] %v3545_v8  ;;  %v1442_v7 = vmul.f32 %v3517_v62, %v6388_v59  ;;  %v489_v57 = vsel %vm3551_vm12, 1.0, %v3460_v60 }
 0x39b   :  { %6491 = vst [vmem:[#allocation65_spill] sm:$0xff] %v3536_v51  ;;  %6497 = vst [vmem:[#allocation66_spill] sm:$0xff] %v3548_v49  ;;  %v1444_v25 = vmul.f32 %v3517_v62, %v6390_v28  ;;  %v3565_v36 = vsub.f32 %v3510_v44, %v3504_v42  ;;  %vm3568_vm2 = vcmp.le.f32.partialorder %v586_v12, %v6502_v43  ;;  %v6511_v29 = vsel %vm3606_vm11, 4294967295, %v6510_v29 }
 0x39c   :  { %6495 = vst [vmem:[#allocation53_spill] sm:$0xff] %v3542_v50  ;;  %v3574_v14 = vmul.f32 %v6404_v58, %v6402_v63  ;;  %v3578_v6 = vmul.f32 %v6405_v1, %v6396_v21  ;;  %v3582_v13 = vmul.f32 %v2457_v39, %v6402_v63  ;;  %v3586_v48 = vsub.f32 %v3523_v53, %v3399_v11  ;;  %v6516_v63 = vld [vmem:[#allocation72_spill] sm:$0xff]  ;;  %v6537_v1 = vld [vmem:[#allocation26_spill] sm:$0xff]  ;;  %vm3720_vm0 = vmxor %vm3436_vm3, %vm6277_vm10 }
 0x39d   :  { %6501 = vst [vmem:[#allocation71_spill] sm:$0xff] %v3565_v36  ;;  %v3590_v34 = vmul.f32 %v3545_v8, %v6388_v59  ;;  %v3594_v31 = vmul.f32 %v2526_v46, %v6396_v21  ;;  %v3601_v12 = vsub.f32 %v3542_v50, %v3418_v27  ;;  %6512 = vst [vmem:[#allocation124_spill] sm:$0xff] %v6511_v29  ;;  %1769 = vrcp.f32 %v489_v57  ;;  %v6520_v46 = vld [vmem:[#allocation112_spill] sm:$0xff]  ;;  %v6528_v57 = vld [vmem:[#allocation57_spill] sm:$0xff] }
 0x39e   :  { %6505 = vst [vmem:[#allocation70_spill] sm:$0xff] %v3574_v14  ;;  %6506 = vst [vmem:[#allocation75_spill] sm:$0xff] %v3578_v6  ;;  %v3612_v59 = vmul.f32 %v3545_v8, %v6390_v28  ;;  %v589_v6 = vsel %vm3568_vm2, 1.0, %v3475_v16  ;;  %v3620_v14 = vadd.f32 %v1442_v7, %v6379_v3  ;;  %v3623_v17 = vadd.f32 %v1444_v25, %v6378_v40  ;;  %v6523_v25 = vld [vmem:[#allocation115_spill] sm:$0xff]  ;;  %v6534_v3 = vld [vmem:[#allocation128_spill] sm:$0xff] }
 0x39f   :  { %6507 = vst [vmem:[#allocation74_spill] sm:$0xff] %v3582_v13  ;;  %6508 = vst [vmem:[#allocation82_spill] sm:$0xff] %v3590_v34  ;;  %v511_v13 = vand.u32 2147483647, %v3557_v0  ;;  %v536_v28 = vand.u32 2147483647, %v3565_v36  ;;  %1771 = vrcp.f32 %v589_v6 }
 0x3a0   :  { %6509 = vst [vmem:[#allocation111_spill] sm:$0xff] %v3594_v31  ;;  %6513 = vst [vmem:[#allocation148_spill] sm:$0xff] %v3612_v59  ;;  %v1565_v31 = vmax.f32 %v1535_v35, %v3548_v49  ;;  %v6517_v59 = vld [vmem:[#allocation76_spill] sm:$0xff]  ;;  %v6521_v39 = vmov 0  ;;  %v606_v7 = vand.u32 2147483647, %v3586_v48 }
 0x3a1   :  { %6514 = vst [vmem:[#allocation149_spill] sm:$0xff] %v3620_v14  ;;  %6515 = vst [vmem:[#allocation150_spill] sm:$0xff] %v3623_v17  ;;  %v6518_v34 = vsub.f32 %v6516_v63, %v6517_v59  ;;  %vm3635_vm8 = vcmp.le.f32.partialorder %v511_v13, %v6520_v46  ;;  %vm3645_vm1 = vcmp.le.f32.partialorder %v536_v28, %v6523_v25  ;;  %v6524_v21 = vmov 0  ;;  %v6530_v17 = vld [vmem:[#allocation73_spill] sm:$0xff]  ;;  %v6538_v58 = vld [vmem:[#allocation30_spill] sm:$0xff] }
 0x3a2   :  { %v6522_v39 = vsel %vm3635_vm8, 4294967295, %v6521_v39  ;;  %v6525_v21 = vsel %vm3645_vm1, 4294967295, %v6524_v21  ;;  %v697_v63 = vand.u32 2147483647, %v3601_v12  ;;  %v3652_v13 = vsub.f32 %v3316_v24, %v3542_v50  ;;  %v6531_v14 = vld [vmem:[#allocation77_spill] sm:$0xff]  ;;  %vm3805_vm7 = vmxor %vm3551_vm12, %vm6277_vm10 }
 0x3a3   :  { %v3632_v61 = vmul.f32 %v6518_v34, %v6416_v22  ;;  %v3654_v34 = vsel %vm1564_vm14, %v1565_v31, %v1535_v35  ;;  %v3658_v59 = vmul.f32 %v6416_v22, %v6528_v57  ;;  %v6532_v28 = vsub.f32 %v6530_v17, %v6531_v14  ;;  %v6541_v57 = vld [vmem:[#allocation22_spill] sm:$0xff]  ;;  %v6545_v14 = vld [vmem:[#allocation85_spill] sm:$0xff] }
 0x3a4   :  { %6526 = vst [vmem:[#allocation76_spill] sm:$0xff] %v3652_v13  ;;  %6527 = vst [vmem:[#allocation112_spill] sm:$0xff] %v3654_v34  ;;  %vm3667_vm4 = vcmp.le.f32.partialorder %v606_v7, %v6534_v3  ;;  %v6535_v6 = vmov 0  ;;  %v6539_v35 = vsub.f32 %v6537_v1, %v6538_v58  ;;  %v6542_v34 = vld [vmem:[#allocation40_spill] sm:$0xff]  ;;  %v514_v17 = vsel %vm3635_vm8, 1.0, %v3557_v0  ;;  %v6549_v58 = vld [vmem:[#allocation31_spill] sm:$0xff] }
 0x3a5   :  { %6519 = vst [vmem:[#allocation72_spill] sm:$0xff] %v3632_v61  ;;  %6529 = vst [vmem:[#allocation115_spill] sm:$0xff] %v3658_v59  ;;  %v3664_v40 = vmul.f32 %v6532_v28, %v6416_v22  ;;  %v6536_v6 = vsel %vm3667_vm4, 4294967295, %v6535_v6  ;;  %v6543_v8 = vsub.f32 %v6541_v57, %v6542_v34  ;;  %vm3687_vm15 = vcmp.le.f32.partialorder %v697_v63, %v6545_v14  ;;  %v6548_v28 = vld [vmem:[#allocation44_spill] sm:$0xff]  ;;  %v1768_v63 = vpop.eup %1767 }
 0x3a6   :  { %v3675_v31 = vmul.f32 %v6539_v35, %v6416_v22  ;;  %v6546_v7 = vmov 0  ;;  %v6550_v1 = vsub.f32 %v6548_v28, %v6549_v58  ;;  %v464_v26 = vsub.f32 0.0, %v3316_v24 }
 0x3a7   :  { %6533 = vst [vmem:[#allocation73_spill] sm:$0xff] %v3664_v40  ;;  %v3681_v62 = vmul.f32 %v6543_v8, %v6416_v22  ;;  %v6547_v7 = vsel %vm3687_vm15, 4294967295, %v6546_v7  ;;  %v539_v8 = vsel %vm3645_vm1, 1.0, %v3565_v36  ;;  %v3703_v34 = vsub.f32 %v3632_v61, %v3491_v30 }
 0x3a8   :  { %6540 = vst [vmem:[#allocation77_spill] sm:$0xff] %v3675_v31  ;;  %v3695_v35 = vmul.f32 %v6550_v1, %v6416_v22  ;;  %v6552_v57 = vsub.f32 0.0, %v6457_v19  ;;  %v6553_v49 = vmov 0  ;;  %v609_v58 = vsel %vm3667_vm4, 1.0, %v3586_v48 }
 0x3a9   :  { %6544 = vst [vmem:[#allocation128_spill] sm:$0xff] %v3681_v62  ;;  %v809_v1 = vand.u32 2147483647, %v3652_v13  ;;  %vm469_vm9 = vcmp.gt.f32.partialorder %v3348_v10, 0.0  ;;  %1773 = vrcp.f32 %v514_v17  ;;  %v3732_v19 = vsub.f32 %v3675_v31, %v3523_v53 }
 0x3aa   :  { %6551 = vst [vmem:[#allocation26_spill] sm:$0xff] %v3695_v35  ;;  %vm3708_vm14 = vcmp.lt.f32.partialorder %v3316_v24, %v6552_v57  ;;  %v700_v24 = vsel %vm3687_vm15, 1.0, %v3601_v12  ;;  %1775 = vrcp.f32 %v539_v8  ;;  %v6557_v57 = vld [vmem:[#allocation93_spill] sm:$0xff]  ;;  %v6558_v28 = vmov 0  ;;  %vm3746_vm11 = vmand %vm3720_vm0, %vm469_vm9 }
 0x3ab   :  { %v6554_v49 = vsel %vm3708_vm14, 4294967295, %v6553_v49  ;;  %vm3735_vm13 = vcmp.le.f32.partialorder %v809_v1, %v6557_v57  ;;  %v467_v51 = vmul.f32 %v1768_v63, %v464_v26  ;;  %1777 = vrcp.f32 %v609_v58 }
 0x3ac   :  { %v6559_v28 = vsel %vm3735_vm13, 4294967295, %v6558_v28  ;;  %v627_v17 = vand.u32 2147483647, %v3703_v34  ;;  %v3742_v5 = vsub.f32 %v3664_v40, %v3510_v44  ;;  %v6564_v56 = vsub.f32 0.0, %v6498_v37 }
 0x3ad   :  { %6560 = vst [vmem:[#allocation30_spill] sm:$0xff] %v6559_v28  ;;  %v6565_v1 = vmov 0  ;;  %1779 = vrcp.f32 %v700_v24  ;;  %vm6567_vm5 = vcmp.lt.f32.partialorder %v3348_v10, 0.0  ;;  %v6568_v58 = vmov 0  ;;  %v6573_v24 = vld [vmem:[#allocation129_spill] sm:$0xff]  ;;  %v6656_v28 = vld [vmem:[#allocation132_spill] sm:$0xff] }
 0x3ae   :  { %6561 = vst [vmem:[#allocation22_spill] sm:$0xff] %v3742_v5  ;;  %vm3753_vm6 = vcmp.lt.f32.partialorder %v3393_v41, %v6564_v56  ;;  %vm3763_vm9 = vmand %vm3720_vm0, %vm6567_vm5  ;;  %v6570_v56 = vsub.f32 0.0, %v6520_v46  ;;  %v6571_v37 = vmov 0  ;;  %v588_v63 = vsub.f32 0.0, %v3322_v33  ;;  %v6577_v46 = vld [vmem:[#allocation117_spill] sm:$0xff] }
 0x3af   :  { %v6566_v1 = vsel %vm3753_vm6, 4294967295, %v6565_v1  ;;  %v6569_v58 = vsel %vm3763_vm9, 4294967295, %v6568_v58  ;;  %vm3777_vm15 = vcmp.le.f32.partialorder %v627_v17, %v6573_v24  ;;  %v6574_v10 = vmov 0  ;;  %v6583_v17 = vld [vmem:[#allocation89_spill] sm:$0xff] }
 0x3b0   :  { %vm3771_vm1 = vcmp.lt.f32.partialorder %v3485_v4, %v6570_v56  ;;  %v6575_v10 = vsel %vm3777_vm15, 4294967295, %v6574_v10  ;;  %v812_v22 = vsel %vm3735_vm13, 1.0, %v3652_v13  ;;  %v3786_v26 = vsub.f32 %v3393_v41, %v3675_v31 }
 0x3b1   :  { %v6572_v37 = vsel %vm3771_vm1, 4294967295, %v6571_v37  ;;  %v6578_v56 = vsub.f32 0.0, %v6577_v46  ;;  %v6580_v55 = vmov 0  ;;  %v6584_v47 = vand.u32 2147483647, %v6583_v17 }
 0x3b2   :  { %6576 = vst [vmem:[#allocation40_spill] sm:$0xff] %v3786_v26  ;;  %v6585_v29 = vmov 0  ;;  %v6592_v23 = vand.u32 2147483647, %v6579_v18  ;;  %v6593_v20 = vmov 0  ;;  %v6596_v54 = vsub.f32 0.0, %v6582_v15 }
 0x3b3   :  { %vm3791_vm5 = vcmp.lt.f32.partialorder %v6579_v18, %v6578_v56  ;;  %vm3798_vm0 = vcmp.le.f32.partialorder %v6584_v47, %v6582_v15  ;;  %v6589_v56 = vsub.f32 0.0, %v6502_v43  ;;  %v717_v47 = vand.u32 2147483647, %v3732_v19 }
 0x3b4   :  { %v6581_v55 = vsel %vm3791_vm5, 4294967295, %v6580_v55  ;;  %v6586_v29 = vsel %vm3798_vm0, 4294967295, %v6585_v29  ;;  %vm3822_vm0 = vcmp.le.f32.partialorder %v6592_v23, %v6577_v46  ;;  %vm3829_vm1 = vcmp.lt.f32.partialorder %v6583_v17, %v6596_v54  ;;  %v1770_v54 = vpop.eup %1769  ;;  %v6611_v17 = vld [vmem:[#allocation130_spill] sm:$0xff] }
 0x3b5   :  { %vm3814_vm5 = vcmp.lt.f32.partialorder %v3322_v33, %v6589_v56  ;;  %v6594_v20 = vsel %vm3822_vm0, 4294967295, %v6593_v20  ;;  %v6597_v38 = vmov 0  ;;  %v471_v33 = vmax.f32 %v467_v51, 0.0  ;;  %vm3849_vm0 = vmxor %vm3568_vm2, %vm6277_vm10  ;;  %v6605_v56 = vld [vmem:[#allocation37_spill] sm:$0xff]  ;;  %v1772_v43 = vpop.eup %1771 }
 0x3b6   :  { %6595 = vst [vmem:[#allocation85_spill] sm:$0xff] %v6594_v20  ;;  %v6598_v38 = vsel %vm3829_vm1, 4294967295, %v6597_v38  ;;  %v6600_v23 = vsub.f32 0.0, %v6534_v3  ;;  %v6601_v18 = vmov 0  ;;  %v648_v15 = vand.u32 2147483647, %v3742_v5 }
 0x3b7   :  { %6599 = vst [vmem:[#allocation44_spill] sm:$0xff] %v6598_v38  ;;  %v630_v3 = vsel %vm3777_vm15, 1.0, %v3703_v34  ;;  %vm3858_vm13 = vcmp.le.f32.partialorder %v717_v47, %v6605_v56  ;;  %1781 = vrcp.f32 %v812_v22  ;;  %v475_v13 = vmin.f32 %v467_v51, 1.0 }
 0x3b8   :  { %vm3841_vm9 = vcmp.lt.f32.partialorder %v3399_v11, %v6600_v23  ;;  %v6606_v23 = vmov 0  ;;  %vm6608_vm14 = vcmp.gt.f32.partialorder %v3460_v60, 0.0  ;;  %v6609_v59 = vmov 0 }
 0x3b9   :  { %v6602_v18 = vsel %vm3841_vm9, 4294967295, %v6601_v18  ;;  %v6607_v23 = vsel %vm3858_vm13, 4294967295, %v6606_v23  ;;  %vm3866_vm3 = vmand %vm3805_vm7, %vm6608_vm14  ;;  %vm3872_vm15 = vcmp.le.f32.partialorder %v648_v15, %v6611_v17  ;;  %v6612_v31 = vmov 0 }
 0x3ba   :  { %v6610_v59 = vsel %vm3866_vm3, 4294967295, %v6609_v59  ;;  %v6613_v31 = vsel %vm3872_vm15, 4294967295, %v6612_v31  ;;  %v829_v47 = vand.u32 2147483647, %v3786_v26  ;;  %v6615_v51 = vsub.f32 0.0, %v6573_v24  ;;  %vm3899_vm9 = vmxor %vm3635_vm8, %vm6277_vm10 }
 0x3bb   :  { %6614 = vst [vmem:[#allocation31_spill] sm:$0xff] %v6613_v31  ;;  %v6616_v22 = vmov 0  ;;  %v3892_v36 = vsub.f32 %v3681_v62, %v3632_v61  ;;  %v472_v50 = vsel %vm3746_vm11, %v471_v33, 0.0  ;;  %v6618_v57 = vmov 0  ;;  %v6624_v33 = vld [vmem:[#allocation36_spill] sm:$0xff] }
 0x3bc   :  { %vm3885_vm14 = vcmp.lt.f32.partialorder %v3491_v30, %v6615_v51  ;;  %v6619_v57 = vsel %vm3899_vm9, 4294967295, %v6618_v57  ;;  %vm6621_vm1 = vcmp.gt.f32.partialorder %v3475_v16, 0.0  ;;  %v6622_v24 = vmov 0 }
 0x3bd   :  { %v6617_v22 = vsel %vm3885_vm14, 4294967295, %v6616_v22  ;;  %6620 = vst [vmem:[#allocation129_spill] sm:$0xff] %v6619_v57  ;;  %vm3907_vm4 = vmand %vm3849_vm0, %vm6621_vm1  ;;  %1783 = vrcp.f32 %v630_v3  ;;  %v720_v8 = vsel %vm3858_vm13, 1.0, %v3732_v19  ;;  %vm3919_vm9 = vcmp.le.f32.partialorder %v829_v47, %v6624_v33 }
 0x3be   :  { %v6623_v24 = vsel %vm3907_vm4, 4294967295, %v6622_v24  ;;  %v6625_v51 = vmov 0  ;;  %v6627_v15 = vsub.f32 0.0, %v3393_v41  ;;  %v3927_v57 = vmul.f32 %v1772_v43, %v588_v63 }
 0x3bf   :  { %v6626_v51 = vsel %vm3919_vm9, 4294967295, %v6625_v51  ;;  %vm6628_vm1 = vnez %v6602_v18  ;;  %vm6629_vm11 = vnez %v6536_v6  ;;  %v651_v3 = vsel %vm3872_vm15, 1.0, %v3742_v5 }
 0x3c0   :  { %v3925_v30 = vmul.f32 %v1770_v54, %v6627_v15  ;;  %v3938_v47 = vsub.f32 %v3485_v4, %v3681_v62  ;;  %vm6631_vm13 = vnez %v6569_v58  ;;  %vm6632_vm8 = vcmp.lt.f32.partialorder %v3475_v16, 0.0  ;;  %v1774_v58 = vpop.eup %1773  ;;  %v6646_v62 = vld [vmem:[#allocation83_spill] sm:$0xff] }
 0x3c1   :  { %v3942_v41 = vsel %vm6631_vm13, %v475_v13, 1.0  ;;  %vm3949_vm6 = vmand %vm3849_vm0, %vm6632_vm8  ;;  %v6633_v63 = vmov 0  ;;  %v6635_v54 = vsub.f32 0.0, %v6545_v14  ;;  %vm6638_vm13 = vcmp.lt.f32.partialorder %v3460_v60, 0.0  ;;  %v6783_v13 = vld [vmem:[#allocation115_spill] sm:$0xff] }
 0x3c2   :  { %6630 = vst [vmem:[#allocation117_spill] sm:$0xff] %v3938_v47  ;;  %v6634_v63 = vsel %vm3949_vm6, 4294967295, %v6633_v63  ;;  %v495_v16 = vmax.f32 %v472_v50, %v3925_v30  ;;  %vm3967_vm8 = vmand %vm3805_vm7, %vm6638_vm13  ;;  %v6639_v46 = vmov 0  ;;  %v6642_v14 = vmov 0 }
 0x3c3   :  { %vm3958_vm15 = vcmp.lt.f32.partialorder %v3418_v27, %v6635_v54  ;;  %v6640_v46 = vsel %vm3967_vm8, 4294967295, %v6639_v46  ;;  %vm3974_vm0 = vmxor %vm6629_vm11, %vm6277_vm10  ;;  %1785 = vrcp.f32 %v720_v8  ;;  %v738_v15 = vand.u32 2147483647, %v3892_v36  ;;  %v1776_v54 = vpop.eup %1775  ;;  %v6654_v8 = vld [vmem:[#allocation135_spill] sm:$0xff] }
 0x3c4   :  { %6641 = vst [vmem:[#allocation95_spill] sm:$0xff] %v6640_v46  ;;  %v6643_v14 = vsel %vm3974_vm0, 4294967295, %v6642_v14  ;;  %v832_v60 = vsel %vm3919_vm9, 1.0, %v3786_v26  ;;  %v6645_v43 = vsub.f32 0.0, %v6644_v45  ;;  %v6647_v5 = vmov 0  ;;  %v1778_v18 = vpop.eup %1777 }
 0x3c5   :  { %v6650_v31 = vand.u32 2147483647, %v6646_v62  ;;  %v6651_v46 = vmov 0  ;;  %v6655_v33 = vsub.f32 0.0, %v6654_v8  ;;  %v6657_v26 = vmov 0 }
 0x3c6   :  { %vm3985_vm7 = vcmp.lt.f32.partialorder %v6646_v62, %v6645_v43  ;;  %v6660_v43 = vld [vmem:[#allocation113_spill] sm:$0xff]  ;;  %v6664_v62 = vmov 0  ;;  %1787 = vrcp.f32 %v651_v3  ;;  %v6669_v52 = vsub.f32 0.0, %v6605_v56 }
 0x3c7   :  { %v6648_v5 = vsel %vm3985_vm7, 4294967295, %v6647_v5  ;;  %vm3992_vm13 = vcmp.le.f32.partialorder %v6650_v31, %v6644_v45  ;;  %vm3999_vm3 = vcmp.lt.f32.partialorder %v6656_v28, %v6655_v33  ;;  %vm6662_vm7 = vmand %vm6629_vm11, %vm6628_vm1  ;;  %v6667_v31 = vmov 0 }
 0x3c8   :  { %6649 = vst [vmem:[#allocation78_spill] sm:$0xff] %v6648_v5  ;;  %v6652_v46 = vsel %vm3992_vm13, 4294967295, %v6651_v46  ;;  %v6658_v26 = vsel %vm3999_vm3, 4294967295, %v6657_v26  ;;  %vm6663_vm13 = vmand %vm3568_vm2, %vm3814_vm5  ;;  %vm6666_vm3 = vnez %v6575_v10  ;;  %vm4036_vm2 = vcmp.lt.f32.partialorder %v3523_v53, %v6669_v52  ;;  %v6694_v52 = vld [vmem:[#allocation122_spill] sm:$0xff] }
 0x3c9   :  { %6653 = vst [vmem:[#allocation89_spill] sm:$0xff] %v6652_v46  ;;  %vm4017_vm6 = vmor %vm6663_vm13, %vm6662_vm7  ;;  %v4042_v6 = vsub.f32 %v3695_v35, %v3664_v40  ;;  %v6673_v33 = vand.u32 2147483647, %v6656_v28  ;;  %v6674_v45 = vmov 0  ;;  %vm6678_vm8 = vnez %v6566_v1 }
 0x3ca   :  { %v6665_v62 = vsel %vm4017_vm6, 4294967295, %v6664_v62  ;;  %vm4024_vm0 = vmxor %vm6666_vm3, %vm6277_vm10  ;;  %vm6680_vm1 = vnez %v6459_v2  ;;  %vm6681_vm4 = vnez %v6554_v49  ;;  %v6683_v28 = vmov 0  ;;  %v6690_v49 = vld [vmem:[#allocation87_spill] sm:$0xff] }
 0x3cb   :  { %v6668_v31 = vsel %vm4024_vm0, 4294967295, %v6667_v31  ;;  %6672 = vst [vmem:[#allocation37_spill] sm:$0xff] %v4042_v6  ;;  %vm4047_vm5 = vcmp.le.f32.partialorder %v6673_v33, %v6654_v8  ;;  %vm6679_vm11 = vmand %vm3551_vm12, %vm6678_vm8  ;;  %v595_v32 = vmax.f32 %v3927_v57, 0.0  ;;  %v599_v1 = vmin.f32 %v3927_v57, 1.0  ;;  %v1780_v8 = vpop.eup %1779 }
 0x3cc   :  { %v6675_v45 = vsel %vm4047_vm5, 4294967295, %v6674_v45  ;;  %vm6682_vm6 = vmand %vm6680_vm1, %vm6681_vm4  ;;  %vm6687_vm12 = vnez %v6547_v7  ;;  %v6691_v56 = vmov 0  ;;  %v850_v3 = vand.u32 2147483647, %v3938_v47 }
 0x3cd   :  { %6676 = vst [vmem:[#allocation130_spill] sm:$0xff] %v6675_v45  ;;  %vm4065_vm14 = vmor %vm6682_vm6, %vm6679_vm11  ;;  %vm4084_vm6 = vcmp.le.f32.partialorder %v738_v15, %v6690_v49  ;;  %v499_v57 = vmin.f32 %v3942_v41, %v3925_v30  ;;  %v6696_v33 = vsub.f32 0.0, %v3485_v4  ;;  %v6697_v15 = vsub.f32 0.0, %v6611_v17  ;;  %v6729_v30 = vld [vmem:[#allocation79_spill] sm:$0xff] }
 0x3ce   :  { %v6684_v28 = vsel %vm4065_vm14, 4294967295, %v6683_v28  ;;  %vm4079_vm8 = vmxor %vm6687_vm12, %vm6277_vm10  ;;  %v6692_v56 = vsel %vm4084_vm6, 4294967295, %v6691_v56  ;;  %v6698_v38 = vmov 0  ;;  %1789 = vrcp.f32 %v832_v60 }
 0x3cf   :  { %v4097_v40 = vmul.f32 %v1774_v58, %v6696_v33  ;;  %vm4103_vm5 = vcmp.lt.f32.partialorder %v3510_v44, %v6697_v15  ;;  %vm6701_vm14 = vnez %v6610_v59  ;;  %v6702_v17 = vsub.f32 0.0, %v3504_v42  ;;  %v6719_v59 = vld [vmem:[#allocation38_spill] sm:$0xff] }
 0x3d0   :  { %v6699_v38 = vsel %vm4103_vm5, 4294967295, %v6698_v38  ;;  %v4118_v4 = vsel %vm6701_vm14, %v495_v16, %v472_v50  ;;  %v6704_v33 = vsub.f32 0.0, %v6523_v25  ;;  %v6705_v15 = vmov 0  ;;  %v6730_v44 = vld [vmem:[#allocation90_spill] sm:$0xff] }
 0x3d1   :  { %v4122_v58 = vmul.f32 %v1776_v54, %v6702_v17  ;;  %vm6707_vm5 = vcmp.gt.f32.partialorder %v3586_v48, 0.0  ;;  %vm6708_vm3 = vnez %v6643_v14  ;;  %v6709_v60 = vmov 0  ;;  %v6723_v14 = vld [vmem:[#allocation119_spill] sm:$0xff]  ;;  %v6725_v17 = vld [vmem:[#allocation96_spill] sm:$0xff] }
 0x3d2   :  { %vm4127_vm1 = vcmp.lt.f32.partialorder %v3504_v42, %v6704_v33  ;;  %vm4135_vm7 = vmand %vm6708_vm3, %vm6707_vm5  ;;  %vm6711_vm14 = vcmp.lt.f32.partialorder %v3586_v48, 0.0  ;;  %v6712_v50 = vmov 0  ;;  %vm6714_vm13 = vnez %v6607_v23  ;;  %v6780_v23 = vld [vmem:[#allocation77_spill] sm:$0xff] }
 0x3d3   :  { %6703 = vst [vmem:[#allocation99_spill] sm:$0xff] %v4122_v58  ;;  %v6706_v15 = vsel %vm4127_vm1, 4294967295, %v6705_v15  ;;  %v6710_v60 = vsel %vm4135_vm7, 4294967295, %v6709_v60  ;;  %vm4143_vm4 = vmand %vm6708_vm3, %vm6711_vm14  ;;  %v6715_v25 = vsub.f32 0.0, %v6690_v49  ;;  %v6716_v48 = vmov 0 }
 0x3d4   :  { %v6713_v50 = vsel %vm4143_vm4, 4294967295, %v6712_v50  ;;  %vm4161_vm3 = vcmp.le.f32.partialorder %v850_v3, %v6719_v59  ;;  %v6720_v16 = vmov 0  ;;  %v6724_v54 = vsub.f32 0.0, %v6723_v14  ;;  %vm6770_vm0 = vmand %vm6714_vm13, %vm4036_vm2 }
 0x3d5   :  { %vm4156_vm7 = vcmp.lt.f32.partialorder %v3632_v61, %v6715_v25  ;;  %v6721_v16 = vsel %vm4161_vm3, 4294967295, %v6720_v16  ;;  %v6726_v33 = vmov 0  ;;  %v6731_v49 = vand.u32 2147483647, %v6730_v44 }
 0x3d6   :  { %v6717_v48 = vsel %vm4156_vm7, 4294967295, %v6716_v48  ;;  %6722 = vst [vmem:[#allocation135_spill] sm:$0xff] %v6721_v16  ;;  %vm4168_vm14 = vcmp.lt.f32.partialorder %v6725_v17, %v6724_v54  ;;  %v6732_v25 = vmov 0  ;;  %vm6735_vm11 = vnez %v6525_v21 }
 0x3d7   :  { %6718 = vst [vmem:[#allocation83_spill] sm:$0xff] %v6717_v48  ;;  %v6727_v33 = vsel %vm4168_vm14, 4294967295, %v6726_v33  ;;  %vm4175_vm1 = vcmp.le.f32.partialorder %v6731_v49, %v6729_v30  ;;  %vm4182_vm5 = vmxor %vm6735_vm11, %vm6277_vm10  ;;  %v6736_v3 = vmov 0  ;;  %v6739_v58 = vsub.f32 0.0, %v3399_v11 }
 0x3d8   :  { %6728 = vst [vmem:[#allocation132_spill] sm:$0xff] %v6727_v33  ;;  %v6733_v25 = vsel %vm4175_vm1, 4294967295, %v6732_v25  ;;  %v6737_v3 = vsel %vm4182_vm5, 4294967295, %v6736_v3  ;;  %vm4193_vm14 = vmxor %vm6714_vm13, %vm6277_vm10  ;;  %v6740_v53 = vmov 0  ;;  %v741_v49 = vsel %vm4084_vm6, 1.0, %v3892_v36 }
 0x3d9   :  { %6734 = vst [vmem:[#allocation113_spill] sm:$0xff] %v6733_v25  ;;  %6738 = vst [vmem:[#allocation87_spill] sm:$0xff] %v6737_v3  ;;  %v4188_v54 = vmul.f32 %v1778_v18, %v6739_v58  ;;  %v6741_v53 = vsel %vm4193_vm14, 4294967295, %v6740_v53  ;;  %v759_v33 = vand.u32 2147483647, %v4042_v6  ;;  %v4204_v11 = vsub.f32 %v3504_v42, %v3695_v35 }
 0x3da   :  { %v6743_v18 = vand.u32 2147483647, %v6725_v17  ;;  %v6744_v58 = vmov 0  ;;  %v6747_v3 = vsub.f32 0.0, %v6729_v30  ;;  %v6748_v20 = vmov 0 }
 0x3db   :  { %6742 = vst [vmem:[#allocation122_spill] sm:$0xff] %v4204_v11  ;;  %vm6751_vm11 = vnez %v6623_v24  ;;  %vm6752_vm14 = vnez %v6634_v63  ;;  %v6753_v35 = vsub.f32 0.0, %v3418_v27  ;;  %vm6754_vm4 = vcmp.gt.f32.partialorder %v3601_v12, 0.0  ;;  %v6761_v63 = vld [vmem:[#allocation93_spill] sm:$0xff]  ;;  %v6805_v24 = vld [vmem:[#allocation31_spill] sm:$0xff] }
 0x3dc   :  { %vm4209_vm5 = vcmp.le.f32.partialorder %v6743_v18, %v6723_v14  ;;  %vm4216_vm1 = vcmp.lt.f32.partialorder %v6730_v44, %v6747_v3  ;;  %v596_v59 = vsel %vm6751_vm11, %v595_v32, 0.0  ;;  %v600_v42 = vsel %vm6752_vm14, %v599_v1, 1.0  ;;  %v6757_v44 = vld [vmem:[#allocation30_spill] sm:$0xff]  ;;  %v6763_v27 = vld [vmem:[#allocation53_spill] sm:$0xff]  ;;  %v1782_v1 = vpop.eup %1781  ;;  %v6778_v18 = vld [vmem:[#allocation36_spill] sm:$0xff] }
 0x3dd   :  { %v6745_v58 = vsel %vm4209_vm5, 4294967295, %v6744_v58  ;;  %v6749_v20 = vsel %vm4216_vm1, 4294967295, %v6748_v20  ;;  %v4226_v17 = vmul.f32 %v1780_v8, %v6753_v35  ;;  %vm4232_vm5 = vmand %vm4079_vm8, %vm6754_vm4  ;;  %v6755_v30 = vmov 0  ;;  %v6766_v8 = vld [vmem:[#allocation71_spill] sm:$0xff] }
 0x3de   :  { %6746 = vst [vmem:[#allocation119_spill] sm:$0xff] %v6745_v58  ;;  %6750 = vst [vmem:[#allocation96_spill] sm:$0xff] %v6749_v20  ;;  %v6756_v30 = vsel %vm4232_vm5, 4294967295, %v6755_v30  ;;  %vm6758_vm1 = vnez %v6757_v44  ;;  %v6762_v32 = vsub.f32 0.0, %v6761_v63  ;;  %v6764_v35 = vmov 0 }
 0x3df   :  { %vm4239_vm9 = vmxor %vm6758_vm1, %vm6277_vm10  ;;  %vm6767_vm14 = vcmp.lt.f32.partialorder %v3601_v12, 0.0  ;;  %v6768_v14 = vmov 0  ;;  %v6772_v3 = vmov 0  ;;  %v6775_v12 = vld [vmem:[#allocation91_spill] sm:$0xff]  ;;  %v6776_v2 = vmov 0 }
 0x3e0   :  { %vm4246_vm11 = vcmp.lt.f32.partialorder %v6763_v27, %v6762_v32  ;;  %vm4255_vm5 = vmand %vm4079_vm8, %vm6767_vm14  ;;  %vm4274_vm4 = vcmp.le.f32.partialorder %v759_v33, %v6775_v12  ;;  %v6779_v63 = vsub.f32 0.0, %v6778_v18  ;;  %v853_v7 = vsel %vm4161_vm3, 1.0, %v3938_v47  ;;  %v6784_v32 = vld [vmem:[#allocation142_spill] sm:$0xff]  ;;  %v6786_v33 = vld [vmem:[#allocation129_spill] sm:$0xff] }
 0x3e1   :  { %v6765_v35 = vsel %vm4246_vm11, 4294967295, %v6764_v35  ;;  %v6769_v14 = vsel %vm4255_vm5, 4294967295, %v6768_v14  ;;  %vm6771_vm10 = vmand %vm6687_vm12, %vm3958_vm15  ;;  %v6777_v2 = vsel %vm4274_vm4, 4294967295, %v6776_v2  ;;  %v1046_v58 = vmul.f32 %v6784_v32, %v6783_v13  ;;  %v6791_v32 = vld [vmem:[#allocation95_spill] sm:$0xff] }
 0x3e2   :  { %vm4269_vm1 = vmor %vm6771_vm10, %vm6770_vm0  ;;  %vm4281_vm8 = vcmp.lt.f32.partialorder %v6780_v23, %v6779_v63  ;;  %vm6785_vm10 = vcmp.gt.f32.partialorder %v3557_v0, 0.0  ;;  %vm6787_vm15 = vnez %v6786_v33  ;;  %1791 = vrcp.f32 %v741_v49  ;;  %v6790_v63 = vld [vmem:[#allocation76_spill] sm:$0xff]  ;;  %v6824_v33 = vld [vmem:[#allocation102_spill] sm:$0xff] }
 0x3e3   :  { %v6773_v3 = vsel %vm4269_vm1, 4294967295, %v6772_v3  ;;  %vm4294_vm0 = vmand %vm6787_vm15, %vm6785_vm10  ;;  %v811_v18 = vsub.f32 0.0, %v6763_v27  ;;  %vm816_vm13 = vcmp.gt.f32.partialorder %v6790_v63, 0.0  ;;  %vm820_vm12 = vcmp.lt.f32.partialorder %v6790_v63, 0.0 }
 0x3e4   :  { %6774 = vst [vmem:[#allocation79_spill] sm:$0xff] %v6773_v3  ;;  %v6788_v3 = vmov 0  ;;  %vm6792_vm14 = vnez %v6791_v32  ;;  %v615_v16 = vmax.f32 %v596_v59, %v4188_v54  ;;  %v619_v49 = vmin.f32 %v600_v42, %v4188_v54  ;;  %vm4314_vm10 = vmand %vm4239_vm9, %vm816_vm13 }
 0x3e5   :  { %v6789_v3 = vsel %vm4294_vm0, 4294967295, %v6788_v3  ;;  %v4308_v47 = vsel %vm6792_vm14, %v499_v57, %v3942_v41  ;;  %v6793_v48 = vmov 0  ;;  %vm4320_vm2 = vmand %vm4239_vm9, %vm820_vm12  ;;  %v6796_v27 = vmov 0  ;;  %v1784_v57 = vpop.eup %1783 }
 0x3e6   :  { %v6794_v48 = vsel %vm4314_vm10, 4294967295, %v6793_v48  ;;  %v6797_v27 = vsel %vm4320_vm2, 4294967295, %v6796_v27  ;;  %v871_v41 = vand.u32 2147483647, %v4204_v11  ;;  %vm6804_vm2 = vmmov 1  }
 0x3e7   :  { %6795 = vst [vmem:[#allocation90_spill] sm:$0xff] %v6794_v48  ;;  %6798 = vst [vmem:[#allocation30_spill] sm:$0xff] %v6797_v27  ;;  %vm6806_vm0 = vnez %v6805_v24  ;;  %v6807_v63 = vmov 0  ;;  %v6810_v32 = vmov 0  ;;  %v762_v46 = vsel %vm4274_vm4, 1.0, %v4042_v6  ;;  %v6838_v48 = vld [vmem:[#allocation133_spill] sm:$0xff] }
 0x3e8   :  { %vm4341_vm5 = vmxor %vm6806_vm0, %vm6804_vm2  ;;  %v4355_v5 = vmul.f32 %v1782_v1, %v811_v18  ;;  %vm6813_vm9 = vnez %v6626_v51  ;;  %1793 = vrcp.f32 %v853_v7  ;;  %vm6815_vm12 = vcmp.lt.f32.partialorder %v3557_v0, 0.0 }
 0x3e9   :  { %v6808_v63 = vsel %vm4341_vm5, 4294967295, %v6807_v63  ;;  %vm4348_vm1 = vmxor %vm4084_vm6, %vm6804_vm2  ;;  %v706_v1 = vmax.f32 %v4226_v17, 0.0  ;;  %v6819_v7 = vmov 0  ;;  %v6822_v0 = vmov 0 }
 0x3ea   :  { %6809 = vst [vmem:[#allocation93_spill] sm:$0xff] %v6808_v63  ;;  %v6811_v32 = vsel %vm4348_vm1, 4294967295, %v6810_v32  ;;  %v6814_v63 = vld [vmem:[#allocation145_spill] sm:$0xff]  ;;  %vm4367_vm10 = vmand %vm6787_vm15, %vm6815_vm12  ;;  %vm1047_vm15 = vcmp.gt.f32.partialorder %v1046_v58, 0.0  ;;  %v6825_v6 = vsub.f32 0.0, %v6824_v33  ;;  %v6827_v27 = vmov 0 }
 0x3eb   :  { %6812 = vst [vmem:[#allocation53_spill] sm:$0xff] %v6811_v32  ;;  %v1081_v54 = vmul.f32 %v6814_v63, %v6783_v13  ;;  %v6816_v32 = vmov 0  ;;  %vm4376_vm3 = vmxor %vm6813_vm9, %vm6804_vm2  ;;  %v6821_v63 = vld [vmem:[#allocation39_spill] sm:$0xff]  ;;  %v6831_v61 = vmov 0  ;;  %v6836_v58 = vld [vmem:[#allocation136_spill] sm:$0xff]  ;;  %vm6846_vm13 = vnez %v6575_v10  ;;  %v1786_v10 = vpop.eup %1785 }
 0x3ec   :  { %v6817_v32 = vsel %vm4367_vm10, 4294967295, %v6816_v32  ;;  %v6820_v7 = vsel %vm4376_vm3, 4294967295, %v6819_v7  ;;  %vm4381_vm1 = vcmp.le.f32.partialorder %v871_v41, %v6821_v63  ;;  %v6834_v41 = vld [vmem:[#allocation137_spill] sm:$0xff]  ;;  %v6837_v63 = vsub.f32 0.0, %v6836_v58 }
 0x3ed   :  { %6818 = vst [vmem:[#allocation71_spill] sm:$0xff] %v6817_v32  ;;  %v6823_v0 = vsel %vm4381_vm1, 4294967295, %v6822_v0  ;;  %v6826_v32 = vld [vmem:[#allocation84_spill] sm:$0xff]  ;;  %vm6847_vm10 = vnez %v6617_v22  ;;  %vm6854_vm11 = vnez %v6586_v29  ;;  %vm6858_vm0 = vnez %v6572_v37 }
 0x3ee   :  { %vm4388_vm12 = vcmp.lt.f32.partialorder %v6826_v32, %v6825_v6  ;;  %v6830_v18 = vand.u32 2147483647, %v6826_v32  ;;  %vm4406_vm6 = vcmp.lt.f32.partialorder %v6838_v48, %v6837_v63  ;;  %v6839_v6 = vmov 0  ;;  %vm6848_vm2 = vmand %vm6846_vm13, %vm6847_vm10  ;;  %v6970_v25 = vld [vmem:[#allocation90_spill] sm:$0xff] }
 0x3ef   :  { %v6828_v27 = vsel %vm4388_vm12, 4294967295, %v6827_v27  ;;  %v6840_v6 = vsel %vm4406_vm6, 4294967295, %v6839_v6  ;;  %vm6843_vm12 = vnez %v6668_v31  ;;  %vm6849_vm6 = vnez %v6665_v62  ;;  %v6880_v31 = vld [vmem:[#allocation44_spill] sm:$0xff] }
 0x3f0   :  { %6829 = vst [vmem:[#allocation91_spill] sm:$0xff] %v6828_v27  ;;  %vm4395_vm5 = vcmp.le.f32.partialorder %v6830_v18, %v6824_v33  ;;  %6841 = vst [vmem:[#allocation36_spill] sm:$0xff] %v6840_v6  ;;  %v520_v27 = vmax.f32 %v4118_v4, %v4097_v40  ;;  %v6844_v18 = vmov 0  ;;  %v6850_v63 = vmov 0  ;;  %v6852_v33 = vld [vmem:[#allocation22_spill] sm:$0xff] }
 0x3f1   :  { %v6832_v61 = vsel %vm4395_vm5, 4294967295, %v6831_v61  ;;  %vm6842_vm5 = vcmp.gt.f32.partialorder %v3703_v34, 0.0  ;;  %vm4429_vm3 = vmor %vm6849_vm6, %vm6848_vm2  ;;  %v710_v32 = vmin.f32 %v4226_v17, 1.0  ;;  %vm6857_vm13 = vnez %v6522_v39  ;;  %v6865_v17 = vld [vmem:[#allocation67_spill] sm:$0xff] }
 0x3f2   :  { %vm4418_vm4 = vmand %vm6843_vm12, %vm6842_vm5  ;;  %v6851_v63 = vsel %vm4429_vm3, 4294967295, %v6850_v63  ;;  %vm6860_vm3 = vnez %v6684_v28  ;;  %v6861_v22 = vmov 0  ;;  %v6866_v45 = vsub.f32 0.0, %v6865_v17  ;;  %v6926_v17 = vld [vmem:[#allocation59_spill] sm:$0xff] }
 0x3f3   :  { %v6845_v18 = vsel %vm4418_vm4, 4294967295, %v6844_v18  ;;  %vm6853_vm4 = vnez %v6660_v43  ;;  %vm6859_vm1 = vmand %vm6857_vm13, %vm6858_vm0  ;;  %vm6867_vm0 = vcmp.lt.f32.partialorder %v3703_v34, 0.0  ;;  %v6868_v37 = vmov 0 }
 0x3f4   :  { %vm6855_vm14 = vmand %vm6853_vm4, %vm6854_vm11  ;;  %vm6863_vm11 = vnez %v6710_v60  ;;  %v4467_v39 = vmul.f32 %v1784_v57, %v6866_v45  ;;  %v6872_v28 = vmov 0  ;;  %1795 = vrcp.f32 %v762_v46  ;;  %v1788_v46 = vpop.eup %1787  ;;  %v6972_v60 = vld [vmem:[#allocation30_spill] sm:$0xff] }
 0x3f5   :  { %vm1048_vm10 = vmand %vm6855_vm14, %vm1047_vm15  ;;  %v4459_v29 = vsel %vm6863_vm11, %v615_v16, %v596_v59  ;;  %vm6864_vm14 = vnez %v6713_v50  ;;  %vm6871_vm15 = vnez %v6741_v53  ;;  %v6878_v34 = vmov 0  ;;  %v6905_v53 = vld [vmem:[#allocation38_spill] sm:$0xff] }
 0x3f6   :  { %vm4453_vm5 = vmor %vm6860_vm3, %vm6859_vm1  ;;  %v4463_v62 = vsel %vm6864_vm14, %v619_v49, %v600_v42  ;;  %vm6870_vm3 = vcmp.gt.f32.partialorder %v3732_v19, 0.0  ;;  %vm6875_vm14 = vnez %v6757_v44  ;;  %v6883_v51 = vand.u32 2147483647, %v6838_v48  ;;  %v6907_v42 = vld [vmem:[#allocation128_spill] sm:$0xff]  ;;  %v6957_v49 = vld [vmem:[#allocation97_spill] sm:$0xff] }
 0x3f7   :  { %v6862_v22 = vsel %vm4453_vm5, 4294967295, %v6861_v22  ;;  %vm4473_vm1 = vmand %vm6843_vm12, %vm6867_vm0  ;;  %vm6876_vm12 = vnez %v6765_v35  ;;  %v6884_v45 = vmov 0  ;;  %v6892_v43 = vmov 0  ;;  %v6910_v35 = vld [vmem:[#allocation85_spill] sm:$0xff]  ;;  %v7092_v44 = vld [vmem:[#allocation124_spill] sm:$0xff] }
 0x3f8   :  { %v6869_v37 = vsel %vm4473_vm1, 4294967295, %v6868_v37  ;;  %vm4481_vm13 = vmand %vm6871_vm15, %vm6870_vm3  ;;  %vm6881_vm3 = vnez %v6880_v31  ;;  %v818_v50 = vmax.f32 %v4355_v5, 0.0  ;;  %v822_v48 = vmin.f32 %v4355_v5, 1.0 }
 0x3f9   :  { %v6873_v28 = vsel %vm4481_vm13, 4294967295, %v6872_v28  ;;  %vm6874_vm11 = vmand %vm6813_vm9, %vm4281_vm8  ;;  %vm4507_vm8 = vcmp.le.f32.partialorder %v6883_v51, %v6836_v58  ;;  %v6906_v16 = vsub.f32 0.0, %v6905_v53  ;;  %vm6920_vm13 = vcmp.gt.f32.partialorder %v6766_v8, 0.0  ;;  %v6929_v53 = vld [vmem:[#allocation73_spill] sm:$0xff] }
 0x3fa   :  { %vm6877_vm0 = vmand %vm6875_vm14, %vm6876_vm12  ;;  %v6885_v45 = vsel %vm4507_vm8, 4294967295, %v6884_v45  ;;  %vm6896_vm14 = vnez %v6581_v55  ;;  %v6904_v55 = vld [vmem:[#allocation40_spill] sm:$0xff]  ;;  %vm6911_vm8 = vnez %v6910_v35  ;;  %v6927_v31 = vsub.f32 0.0, %v6926_v17 }
 0x3fb   :  { %vm4495_vm2 = vmor %vm6877_vm0, %vm6874_vm11  ;;  %vm6903_vm0 = vnez %v6756_v30  ;;  %v1790_v30 = vpop.eup %1789  ;;  %v6933_v35 = vmov 0  ;;  %v636_v17 = vmax.f32 %v4459_v29, %v4467_v39  ;;  %v640_v57 = vmin.f32 %v4463_v62, %v4467_v39 }
 0x3fc   :  { %v6879_v34 = vsel %vm4495_vm2, 4294967295, %v6878_v34  ;;  %vm6882_vm6 = vmand %vm6853_vm4, %vm6881_vm3  ;;  %vm6891_vm4 = vcmp.lt.f32.partialorder %v3732_v19, 0.0  ;;  %vm6895_vm3 = vnez %v6694_v52  ;;  %v707_v5 = vsel %vm6903_vm0, %v706_v1, 0.0  ;;  %v6921_v1 = vld [vmem:[#allocation87_spill] sm:$0xff] }
 0x3fd   :  { %vm1049_vm5 = vmor %vm6882_vm6, %vm1048_vm10  ;;  %vm6894_vm6 = vnez %v6823_v0  ;;  %vm6922_vm1 = vnez %v6921_v1  ;;  %v6923_v52 = vmov 0  ;;  %v722_v51 = vmul.f32 %v1786_v10, %v6927_v31 }
 0x3fe   :  { %vm4523_vm10 = vmand %vm6871_vm15, %vm6891_vm4  ;;  %v874_v59 = vsel %vm6894_vm6, 1.0, %v4204_v11  ;;  %vm1082_vm15 = vcmp.gt.f32.partialorder %v1081_v54, 0.0  ;;  %v6919_v54 = vld [vmem:[#allocation34_spill] sm:$0xff]  ;;  %v6943_v31 = vmov 0  ;;  %v6948_v11 = vmov 0 }
 0x3ff   :  { %v6893_v43 = vsel %vm4523_vm10, 4294967295, %v6892_v43  ;;  %vm6897_vm2 = vmand %vm6895_vm3, %vm6896_vm14  ;;  %vm836_vm14 = vcmp.gt.f32.partialorder %v6904_v55, 0.0  ;;  %vm6940_vm10 = vnez %v6789_v3  ;;  %1797 = vrcp.f32 %v874_v59  ;;  %v6963_v59 = vld [vmem:[#allocation83_spill] sm:$0xff] }
 0x400   :  { %vm4537_vm9 = vmor %vm1049_vm5, %vm6897_vm2  ;;  %vm840_vm5 = vcmp.lt.f32.partialorder %v6904_v55, 0.0  ;;  %vm4556_vm2 = vcmp.lt.f32.partialorder %v6907_v42, %v6906_v16  ;;  %v6928_v55 = vsub.f32 0.0, %v6775_v12  ;;  %v6930_v16 = vmov 0  ;;  %v6937_v12 = vld [vmem:[#allocation146_spill] sm:$0xff] }
 0x401   :  { %vm6912_vm4 = vmand %vm6895_vm3, %vm6911_vm8  ;;  %vm6925_vm8 = vnez %v6769_v14  ;;  %v6935_v14 = vmov 0  ;;  %v6953_v10 = vmov 0  ;;  %v726_v20 = vmax.f32 %v707_v5, %v722_v51 }
 0x402   :  { %vm4565_vm12 = vmand %vm6912_vm4, %vm1082_vm15  ;;  %v711_v58 = vsel %vm6925_vm8, %v710_v32, 1.0  ;;  %vm4589_vm3 = vcmp.lt.f32.partialorder %v6929_v53, %v6928_v55  ;;  %vm6932_vm15 = vnez %v6820_v7  ;;  %v1116_v32 = vmul.f32 %v6937_v12, %v6783_v13  ;;  %v6946_v12 = vld [vmem:[#allocation135_spill] sm:$0xff]  ;;  %v6956_v53 = vld [vmem:[#allocation80_spill] sm:$0xff] }
 0x403   :  { %vm4578_vm6 = vmand %vm6922_vm1, %vm6920_vm13  ;;  %v6931_v16 = vsel %vm4589_vm3, 4294967295, %v6930_v16  ;;  %v4618_v7 = vsel %vm6940_vm10, %v520_v27, %v4118_v4  ;;  %v831_v55 = vsub.f32 0.0, %v6780_v23  ;;  %v6950_v4 = vld [vmem:[#allocation121_spill] sm:$0xff]  ;;  %v6952_v27 = vld [vmem:[#allocation106_spill] sm:$0xff]  ;;  %v6959_v23 = vmov 0 }
 0x404   :  { %v6924_v52 = vsel %vm4578_vm6, 4294967295, %v6923_v52  ;;  %vm4595_vm4 = vmand %vm6932_vm15, %vm836_vm14  ;;  %vm6947_vm14 = vnez %v6946_v12  ;;  %v6951_v3 = vsub.f32 0.0, %v6950_v4  ;;  %vm6962_vm0 = vnez %v6692_v56 }
 0x405   :  { %v6934_v35 = vsel %vm4595_vm4, 4294967295, %v6933_v35  ;;  %vm4601_vm13 = vmand %vm6932_vm15, %vm840_vm5  ;;  %vm6941_vm5 = vmmov 1   ;;  %vm6942_vm15 = vnez %v6777_v2  ;;  %vm6964_vm11 = vnez %v6963_v59 }
 0x406   :  { %v6936_v14 = vsel %vm4601_vm13, 4294967295, %v6935_v14  ;;  %vm4625_vm8 = vmxor %vm6942_vm15, %vm6941_vm5  ;;  %vm4640_vm10 = vcmp.lt.f32.partialorder %v6952_v27, %v6951_v3  ;;  %v6966_v3 = vld [vmem:[#allocation79_spill] sm:$0xff]  ;;  %v6974_v56 = vand.u32 2147483647, %v6952_v27  ;;  %v6975_v39 = vmov 0 }
 0x407   :  { %v6944_v31 = vsel %vm4625_vm8, 4294967295, %v6943_v31  ;;  %vm4633_vm7 = vmxor %vm6947_vm14, %vm6941_vm5  ;;  %v6954_v10 = vsel %vm4640_vm10, 4294967295, %v6953_v10  ;;  %vm6967_vm4 = vnez %v6966_v3  ;;  %vm6971_vm10 = vnez %v6970_v25  ;;  %v6995_v27 = vld [vmem:[#allocation99_spill] sm:$0xff]  ;;  %v1792_v3 = vpop.eup %1791 }
 0x408   :  { %6945 = vst [vmem:[#allocation77_spill] sm:$0xff] %v6944_v31  ;;  %v6949_v11 = vsel %vm4633_vm7, 4294967295, %v6948_v11  ;;  %6955 = vst [vmem:[#allocation115_spill] sm:$0xff] %v6954_v10  ;;  %v6958_v31 = vand.u32 2147483647, %v6957_v49  ;;  %v6968_v10 = vmov 0  ;;  %v545_v19 = vmax.f32 %v4618_v7, %v6995_v27 }
 0x409   :  { %vm6965_vm13 = vmand %vm6962_vm0, %vm6964_vm11  ;;  %vm4675_vm11 = vcmp.le.f32.partialorder %v6974_v56, %v6950_v4  ;;  %v6977_v59 = vsub.f32 0.0, %v6956_v53  ;;  %v6978_v25 = vmov 0  ;;  %v6983_v4 = vld [vmem:[#allocation108_spill] sm:$0xff]  ;;  %v6997_v9 = vmov 0  ;;  %v7000_v56 = vld [vmem:[#allocation91_spill] sm:$0xff] }
 0x40a   :  { %vm4647_vm8 = vcmp.le.f32.partialorder %v6958_v31, %v6956_v53  ;;  %vm4660_vm6 = vmor %vm6967_vm4, %vm6965_vm13  ;;  %v819_v31 = vsel %vm6971_vm10, %v818_v50, 0.0  ;;  %v6976_v39 = vsel %vm4675_vm11, 4294967295, %v6975_v39  ;;  %vm6980_vm4 = vcmp.lt.f32.partialorder %v6766_v8, 0.0  ;;  %v6985_v53 = vld [vmem:[#allocation78_spill] sm:$0xff] }
 0x40b   :  { %v6960_v23 = vsel %vm4647_vm8, 4294967295, %v6959_v23  ;;  %v6969_v10 = vsel %vm4660_vm6, 4294967295, %v6968_v10  ;;  %vm6973_vm8 = vnez %v6972_v60  ;;  %vm4682_vm0 = vcmp.lt.f32.partialorder %v6957_v49, %v6977_v59  ;;  %vm4690_vm13 = vmand %vm6922_vm1, %vm6980_vm4  ;;  %v6991_v49 = vld [vmem:[#allocation98_spill] sm:$0xff]  ;;  %v7002_v59 = vld [vmem:[#allocation109_spill] sm:$0xff] }
 0x40c   :  { %6961 = vst [vmem:[#allocation142_spill] sm:$0xff] %v6960_v23  ;;  %v823_v23 = vsel %vm6973_vm8, %v822_v48, 1.0  ;;  %v6979_v25 = vsel %vm4682_vm0, 4294967295, %v6978_v25  ;;  %v6981_v60 = vmov 0  ;;  %v730_v50 = vmin.f32 %v711_v58, %v722_v51  ;;  %vm6988_vm6 = vmor %vm4537_vm9, %vm4565_vm12  ;;  %v6993_v51 = vld [vmem:[#allocation71_spill] sm:$0xff] }
 0x40d   :  { %v6982_v60 = vsel %vm4690_vm13, 4294967295, %v6981_v60  ;;  %v834_v48 = vmul.f32 %v1790_v30, %v831_v55  ;;  %vm6984_vm10 = vnez %v6983_v4  ;;  %vm6986_vm7 = vnez %v6985_v53  ;;  %v7031_v4 = vld [vmem:[#allocation138_spill] sm:$0xff] }
 0x40e   :  { %vm6987_vm11 = vmand %vm6984_vm10, %vm6986_vm7  ;;  %v1152_v1 = vmul.f32 %v6991_v49, %v6783_v13  ;;  %v6992_v30 = vmin.f32 %v4308_v47, %v4097_v40  ;;  %vm6994_vm1 = vnez %v6993_v51  ;;  %vm6996_vm9 = vnez %v6823_v0  ;;  %v6999_v40 = vld [vmem:[#allocation48_spill] sm:$0xff]  ;;  %v7009_v51 = vld [vmem:[#allocation93_spill] sm:$0xff] }
 0x40f   :  { %vm4705_vm0 = vmor %vm6988_vm6, %vm6987_vm11  ;;  %vm1117_vm6 = vcmp.gt.f32.partialorder %v1116_v32, 0.0  ;;  %v7006_v32 = vld [vmem:[#allocation110_spill] sm:$0xff]  ;;  %vm7010_vm3 = vnez %v7009_v51  ;;  %v7094_v12 = vmov 0 }
 0x410   :  { %v4717_v55 = vsel %vm6994_vm1, %v6992_v30, %v4308_v47  ;;  %vm4728_vm12 = vmxor %vm6996_vm9, %vm6941_vm5  ;;  %v1202_v47 = vmul.f32 %v6999_v40, %v6783_v13  ;;  %vm7005_vm5 = vnez %v6845_v18  ;;  %v7007_v49 = vsub.f32 0.0, %v7006_v32 }
 0x411   :  { %v6998_v9 = vsel %vm4728_vm12, 4294967295, %v6997_v9  ;;  %v4745_v53 = vsel %vm7005_vm5, %v636_v17, %v4459_v29  ;;  %vm7008_vm12 = vcmp.gt.f32.partialorder %v6852_v33, 0.0  ;;  %v7011_v40 = vmov 0  ;;  %v7017_v29 = vld [vmem:[#allocation53_spill] sm:$0xff] }
 0x412   :  { %v4749_v30 = vmul.f32 %v1788_v46, %v7007_v49  ;;  %vm4755_vm15 = vmand %vm7010_vm3, %vm7008_vm12  ;;  %vm7013_vm1 = vcmp.lt.f32.partialorder %v6852_v33, 0.0  ;;  %v7014_v18 = vmov 0  ;;  %vm7016_vm5 = vcmp.gt.f32.partialorder %v3892_v36, 0.0  ;;  %v7024_v49 = vld [vmem:[#allocation89_spill] sm:$0xff] }
 0x413   :  { %v7012_v40 = vsel %vm4755_vm15, 4294967295, %v7011_v40  ;;  %vm4763_vm7 = vmand %vm7010_vm3, %vm7013_vm1  ;;  %vm7018_vm8 = vnez %v7017_v29  ;;  %v7019_v46 = vmov 0  ;;  %vm7021_vm12 = vcmp.lt.f32.partialorder %v3892_v36, 0.0  ;;  %v7029_v29 = vld [vmem:[#allocation117_spill] sm:$0xff] }
 0x414   :  { %v7015_v18 = vsel %vm4763_vm7, 4294967295, %v7014_v18  ;;  %vm4771_vm11 = vmand %vm7018_vm8, %vm7016_vm5  ;;  %v7022_v33 = vmov 0  ;;  %v838_v17 = vmax.f32 %v819_v31, %v834_v48  ;;  %v842_v32 = vmin.f32 %v823_v23, %v834_v48  ;;  %v1794_v48 = vpop.eup %1793 }
 0x415   :  { %v7020_v46 = vsel %vm4771_vm11, 4294967295, %v7019_v46  ;;  %vm4779_vm4 = vmand %vm7018_vm8, %vm7021_vm12  ;;  %vm7025_vm3 = vnez %v7024_v49  ;;  %vm7027_vm5 = vnez %v6869_v37  ;;  %vm7028_vm11 = vnez %v6873_v28  ;;  %v7048_v28 = vld [vmem:[#allocation26_spill] sm:$0xff] }
 0x416   :  { %v7023_v33 = vsel %vm4779_vm4, 4294967295, %v7022_v33  ;;  %vm7026_vm1 = vmand %vm6984_vm10, %vm7025_vm3  ;;  %v4791_v51 = vsel %vm7027_vm5, %v640_v57, %v4463_v62  ;;  %v4795_v36 = vsel %vm7028_vm11, %v726_v20, %v707_v5  ;;  %vm857_vm8 = vcmp.gt.f32.partialorder %v7029_v29, 0.0 }
 0x417   :  { %vm1118_vm7 = vmand %vm7026_vm1, %vm1117_vm6  ;;  %vm861_vm12 = vcmp.lt.f32.partialorder %v7029_v29, 0.0  ;;  %vm7033_vm1 = vnez %v6805_v24  ;;  %vm7034_vm5 = vnez %v6699_v38  ;;  %vm7036_vm11 = vnez %v6851_v63  ;;  %v7046_v24 = vld [vmem:[#allocation39_spill] sm:$0xff]  ;;  %v7062_v29 = vld [vmem:[#allocation94_spill] sm:$0xff] }
 0x418   :  { %vm1119_vm4 = vmor %vm4705_vm0, %vm1118_vm7  ;;  %v7037_v20 = vmov 0  ;;  %vm7040_vm9 = vnez %v6893_v43  ;;  %vm7041_vm0 = vnez %v6949_v11  ;;  %v7042_v37 = vmov 0  ;;  %v7056_v11 = vld [vmem:[#allocation47_spill] sm:$0xff] }
 0x419   :  { %vm7035_vm15 = vmand %vm7033_vm1, %vm7034_vm5  ;;  %v731_v62 = vsel %vm7040_vm9, %v730_v50, %v711_v58  ;;  %v7044_v38 = vmov 0  ;;  %v7047_v63 = vsub.f32 0.0, %v7046_v24  ;;  %v7049_v5 = vmov 0  ;;  %v7057_v58 = vld [vmem:[#allocation103_spill] sm:$0xff]  ;;  %v7058_v50 = vld [vmem:[#allocation86_spill] sm:$0xff] }
 0x41a   :  { %vm4812_vm13 = vmor %vm7036_vm11, %vm7035_vm15  ;;  %vm7051_vm9 = vnez %v6834_v41  ;;  %v7054_v43 = vmov 0  ;;  %v1233_v57 = vmul.f32 %v7056_v11, %v6783_v13  ;;  %v7059_v8 = vand.u32 2147483647, %v7058_v50 }
 0x41b   :  { %v7038_v20 = vsel %vm4812_vm13, 4294967295, %v7037_v20  ;;  %vm4820_vm7 = vmand %vm7041_vm0, %vm857_vm8  ;;  %vm4833_vm15 = vcmp.lt.f32.partialorder %v7048_v28, %v7047_v63  ;;  %vm7052_vm8 = vnez %v6658_v26  ;;  %v7060_v49 = vmov 0  ;;  %v7064_v63 = vld [vmem:[#allocation134_spill] sm:$0xff] }
 0x41c   :  { %7039 = vst [vmem:[#allocation129_spill] sm:$0xff] %v7038_v20  ;;  %v7043_v37 = vsel %vm4820_vm7, 4294967295, %v7042_v37  ;;  %vm4826_vm3 = vmand %vm7041_vm0, %vm861_vm12  ;;  %v7050_v5 = vsel %vm4833_vm15, 4294967295, %v7049_v5  ;;  %vm1153_vm12 = vcmp.gt.f32.partialorder %v1152_v1, 0.0  ;;  %vm4851_vm11 = vcmp.le.f32.partialorder %v7059_v8, %v7057_v58  ;;  %v7073_v8 = vld [vmem:[#allocation72_spill] sm:$0xff] }
 0x41d   :  { %v7045_v38 = vsel %vm4826_vm3, 4294967295, %v7044_v38  ;;  %vm7053_vm1 = vmand %vm7051_vm9, %vm7052_vm8  ;;  %v7061_v49 = vsel %vm4851_vm11, 4294967295, %v7060_v49  ;;  %v7063_v24 = vsub.f32 0.0, %v7062_v29  ;;  %v7065_v26 = vmov 0 }
 0x41e   :  { %vm4842_vm5 = vmor %vm1119_vm4, %vm7053_vm1  ;;  %v549_v1 = vmin.f32 %v4717_v55, %v6995_v27  ;;  %vm7067_vm4 = vnez %v6525_v21  ;;  %vm7068_vm8 = vnez %v6706_v15  ;;  %vm7070_vm10 = vnez %v6862_v22  ;;  %v7079_v15 = vld [vmem:[#allocation130_spill] sm:$0xff] }
 0x41f   :  { %v7055_v43 = vsel %vm4842_vm5, 4294967295, %v7054_v43  ;;  %vm4858_vm0 = vcmp.lt.f32.partialorder %v7064_v63, %v7063_v24  ;;  %vm7069_vm1 = vmand %vm7067_vm4, %vm7068_vm8  ;;  %v7071_v11 = vmov 0  ;;  %v7074_v6 = vsub.f32 0.0, %v7073_v8 }
 0x420   :  { %v7066_v26 = vsel %vm4858_vm0, 4294967295, %v7065_v26  ;;  %vm4871_vm13 = vmor %vm7070_vm10, %vm7069_vm1  ;;  %v852_v20 = vsub.f32 0.0, %v6907_v42  ;;  %vm7076_vm11 = vnez %v6879_v34  ;;  %v7077_v21 = vmov 0 }
 0x421   :  { %v7072_v11 = vsel %vm4871_vm13, 4294967295, %v7071_v11  ;;  %v743_v24 = vmul.f32 %v1792_v3, %v7074_v6  ;;  %vm7075_vm0 = vmand %vm6947_vm14, %vm4556_vm2  ;;  %vm7080_vm10 = vnez %v7079_v15  ;;  %vm1203_vm1 = vcmp.gt.f32.partialorder %v1202_v47, 0.0 }
 0x422   :  { %vm4885_vm3 = vmor %vm7076_vm11, %vm7075_vm0  ;;  %v7084_v22 = vsub.f32 0.0, %v7057_v58  ;;  %v7085_v42 = vmov 0  ;;  %v7088_v41 = vand.u32 2147483647, %v7064_v63  ;;  %v7089_v34 = vmov 0  ;;  %v7099_v58 = vld [vmem:[#allocation118_spill] sm:$0xff] }
 0x423   :  { %v7078_v21 = vsel %vm4885_vm3, 4294967295, %v7077_v21  ;;  %vm7081_vm4 = vmand %vm7051_vm9, %vm7080_vm10  ;;  %vm7093_vm0 = vnez %v7092_v44  ;;  %v657_v47 = vmax.f32 %v4745_v53, %v4749_v30  ;;  %vm7097_vm11 = vnez %v6934_v35  ;;  %v7105_v35 = vld [vmem:[#allocation96_spill] sm:$0xff] }
 0x424   :  { %vm4894_vm8 = vmand %vm7081_vm4, %vm1153_vm12  ;;  %vm4901_vm2 = vcmp.lt.f32.partialorder %v7058_v50, %v7084_v22  ;;  %vm4912_vm9 = vcmp.le.f32.partialorder %v7088_v41, %v7062_v29  ;;  %vm7091_vm12 = vcmp.lt.f32.partialorder %v6919_v54, 0.0  ;;  %vm7096_vm4 = vnez %v6924_v52  ;;  %v7101_v50 = vld [vmem:[#allocation113_spill] sm:$0xff]  ;;  %v1796_v29 = vpop.eup %1795 }
 0x425   :  { %v7086_v42 = vsel %vm4901_vm2, 4294967295, %v7085_v42  ;;  %v7090_v34 = vsel %vm4912_vm9, 4294967295, %v7089_v34  ;;  %vm4920_vm10 = vmand %vm7093_vm0, %vm7091_vm12  ;;  %v4927_v27 = vsel %vm7096_vm4, %v545_v19, %v4618_v7  ;;  %v839_v3 = vsel %vm7097_vm11, %v838_v17, %v819_v31  ;;  %v7112_v31 = vld [vmem:[#allocation37_spill] sm:$0xff]  ;;  %v7115_v17 = vld [vmem:[#allocation132_spill] sm:$0xff] }
 0x426   :  { %v7095_v12 = vsel %vm4920_vm10, 4294967295, %v7094_v12  ;;  %vm7098_vm14 = vnez %v6936_v14  ;;  %vm7100_vm9 = vnez %v7099_v58  ;;  %vm7102_vm12 = vnez %v7101_v50  ;;  %v7108_v14 = vld [vmem:[#allocation142_spill] sm:$0xff]  ;;  %v7124_v22 = vld [vmem:[#allocation77_spill] sm:$0xff] }
 0x427   :  { %v843_v54 = vsel %vm7098_vm14, %v842_v32, %v823_v23  ;;  %vm7103_vm0 = vmand %vm7100_vm9, %vm7102_vm12  ;;  %v661_v52 = vmin.f32 %v4791_v51, %v4749_v30  ;;  %v747_v7 = vmax.f32 %v4795_v36, %v743_v24  ;;  %v751_v19 = vmin.f32 %v731_v62, %v743_v24  ;;  %v7110_v23 = vld [vmem:[#allocation120_spill] sm:$0xff]  ;;  %v7113_v30 = vld [vmem:[#allocation123_spill] sm:$0xff] }
 0x428   :  { %vm1204_vm3 = vmand %vm7103_vm0, %vm1203_vm1  ;;  %v855_v63 = vmul.f32 %v1794_v48, %v852_v20  ;;  %vm7104_vm11 = vnez %v6823_v0  ;;  %vm7106_vm14 = vnez %v7105_v35  ;;  %vm766_vm10 = vcmp.gt.f32.partialorder %v7112_v31, 0.0  ;;  %v7120_v48 = vld [vmem:[#allocation54_spill] sm:$0xff]  ;;  %v7123_v24 = vld [vmem:[#allocation73_spill] sm:$0xff] }
 0x429   :  { %vm7107_vm13 = vmand %vm7100_vm9, %vm7106_vm14  ;;  %vm770_vm2 = vcmp.lt.f32.partialorder %v7112_v31, 0.0  ;;  %vm7114_vm7 = vnez %v7113_v30  ;;  %vm7116_vm5 = vnez %v7115_v17  ;;  %vm1234_vm9 = vcmp.gt.f32.partialorder %v1233_v57, 0.0  ;;  %v7137_v50 = vld [vmem:[#allocation125_spill] sm:$0xff]  ;;  %v7140_v17 = vld [vmem:[#allocation42_spill] sm:$0xff] }
 0x42a   :  { %vm1205_vm12 = vmor %vm7107_vm13, %vm1204_vm3  ;;  %v1264_v20 = vmul.f32 %v7120_v48, %v6783_v13  ;;  %vm7122_vm14 = vnez %v6982_v60  ;;  %v761_v15 = vsub.f32 0.0, %v7123_v24  ;;  %v7128_v57 = vmov 0  ;;  %v7130_v60 = vld [vmem:[#allocation119_spill] sm:$0xff]  ;;  %v7139_v35 = vld [vmem:[#allocation69_spill] sm:$0xff]  ;;  %v1798_v24 = vpop.eup %1797 }
 0x42b   :  { %vm7117_vm4 = vmand %vm7114_vm7, %vm7116_vm5  ;;  %v4976_v8 = vsel %vm7122_vm14, %v549_v1, %v4717_v55  ;;  %vm7125_vm5 = vnez %v7124_v22  ;;  %v859_v44 = vmax.f32 %v839_v3, %v855_v63  ;;  %v863_v58 = vmin.f32 %v843_v54, %v855_v63  ;;  %v7135_v1 = vld [vmem:[#allocation115_spill] sm:$0xff]  ;;  %v7147_v48 = vld [vmem:[#allocation122_spill] sm:$0xff] }
 0x42c   :  { %vm4963_vm15 = vmor %vm1205_vm12, %vm7117_vm4  ;;  %vm7131_vm14 = vnez %v7130_v60  ;;  %v560_v31 = vmul.f32 %v7139_v35, %v4927_v27  ;;  %v566_v63 = vmul.f32 %v7140_v17, %v4927_v27  ;;  %v7145_v30 = vmov 0 }
 0x42d   :  { %vm4981_vm4 = vmand %vm7125_vm5, %vm766_vm10  ;;  %vm882_vm1 = vcmp.lt.f32.partialorder %v7147_v48, 0.0  ;;  %v7154_v22 = vmov 0  ;;  %vm7159_vm0 = vnez %v7000_v56  ;;  %v764_v56 = vmul.f32 %v1796_v29, %v761_v15 }
 0x42e   :  { %vm4987_vm12 = vmand %vm7125_vm5, %vm770_vm2  ;;  %vm7141_vm2 = vnez %v6777_v2  ;;  %vm7142_vm5 = vnez %v6931_v16  ;;  %v7176_v55 = vmov 0  ;;  %v570_v15 = vmul.f32 %v7140_v17, %v4976_v8 }
 0x42f   :  { %v7129_v57 = vsel %vm4987_vm12, 4294967295, %v7128_v57  ;;  %vm7132_vm3 = vmand %vm7114_vm7, %vm7131_vm14  ;;  %vm878_vm14 = vcmp.gt.f32.partialorder %v7147_v48, 0.0 }
 0x430   :  { %vm4996_vm6 = vmand %vm7132_vm3, %vm1234_vm9  ;;  %vm7144_vm9 = vnez %v6969_v10 }
 0x431   :  { %vm7143_vm7 = vmand %vm7141_vm2, %vm7142_vm5  ;;  %vm7149_vm5 = vnez %v7012_v40  ;;  %v7199_v40 = vld [vmem:[#allocation50_spill] sm:$0xff] }
 0x432   :  { %vm5015_vm3 = vmor %vm7144_vm9, %vm7143_vm7  ;;  %v5032_v2 = vsel %vm7149_vm5, %v657_v47, %v4745_v53  ;;  %vm7150_vm7 = vnez %v7015_v18  ;;  %vm7151_vm9 = vnez %v7020_v46  ;;  %v7156_v53 = vmov 0  ;;  %v7163_v18 = vld [vmem:[#allocation127_spill] sm:$0xff] }
 0x433   :  { %v7146_v30 = vsel %vm5015_vm3, 4294967295, %v7145_v30  ;;  %vm1236_vm10 = vmor %vm4963_vm15, %vm4996_vm6  ;;  %v5037_v16 = vsel %vm7150_vm7, %v661_v52, %v4791_v51  ;;  %v748_v10 = vsel %vm7151_vm9, %v747_v7, %v4795_v36  ;;  %vm7152_vm6 = vnez %v7023_v33  ;;  %v7165_v33 = vld [vmem:[#allocation107_spill] sm:$0xff]  ;;  %v7169_v36 = vld [vmem:[#allocation100_spill] sm:$0xff] }
 0x434   :  { %v752_v32 = vsel %vm7152_vm6, %v751_v19, %v731_v62  ;;  %vm7153_vm15 = vnez %v6998_v9  ;;  %vm7158_vm7 = vnez %v7002_v59  ;;  %v7164_v46 = vsub.f32 0.0, %v7163_v18  ;;  %v7168_v9 = vld [vmem:[#allocation81_spill] sm:$0xff]  ;;  %v7174_v7 = vld [vmem:[#allocation52_spill] sm:$0xff] }
 0x435   :  { %vm5046_vm2 = vmand %vm7153_vm15, %vm878_vm14  ;;  %v7166_v51 = vmov 0  ;;  %v7170_v62 = vand.u32 2147483647, %v7169_v36  ;;  %v7171_v47 = vmov 0  ;;  %v873_v52 = vsub.f32 0.0, %v7048_v28 }
 0x436   :  { %v7155_v22 = vsel %vm5046_vm2, 4294967295, %v7154_v22  ;;  %vm5052_vm5 = vmand %vm7153_vm15, %vm882_vm1  ;;  %vm5068_vm14 = vcmp.lt.f32.partialorder %v7165_v33, %v7164_v46  ;;  %vm1265_vm6 = vcmp.gt.f32.partialorder %v1264_v20, 0.0  ;;  %v1295_v19 = vmul.f32 %v7174_v7, %v6783_v13 }
 0x437   :  { %v7157_v53 = vsel %vm5052_vm5, 4294967295, %v7156_v53  ;;  %vm7160_vm9 = vmand %vm7158_vm7, %vm7159_vm0  ;;  %v7167_v51 = vsel %vm5068_vm14, 4294967295, %v7166_v51  ;;  %vm5075_vm1 = vcmp.le.f32.partialorder %v7170_v62, %v7168_v9  ;;  %vm7173_vm0 = vnez %v7055_v43  ;;  %v7234_v43 = vld [vmem:[#allocation105_spill] sm:$0xff] }
 0x438   :  { %vm5061_vm13 = vmor %vm1236_vm10, %vm7160_vm9  ;;  %v7172_v47 = vsel %vm5075_vm1, 4294967295, %v7171_v47  ;;  %v7175_v60 = vand.u32 2147483647, %v7165_v33  ;;  %v7178_v29 = vsub.f32 0.0, %v7168_v9  ;;  %v7179_v28 = vmov 0 }
 0x439   :  { %v568_v20 = vmul.f32 %v7139_v35, %v4976_v8  ;;  %vm7181_vm10 = vnez %v7043_v37  ;;  %vm7182_vm14 = vnez %v7045_v38  ;;  %v7188_v35 = vld [vmem:[#allocation114_spill] sm:$0xff]  ;;  %v768_v17 = vmax.f32 %v748_v10, %v764_v56  ;;  %v7192_v38 = vld [vmem:[#allocation29_spill] sm:$0xff] }
 0x43a   :  { %vm5089_vm15 = vcmp.le.f32.partialorder %v7175_v60, %v7163_v18  ;;  %vm5096_vm9 = vcmp.lt.f32.partialorder %v7169_v36, %v7178_v29  ;;  %v860_v48 = vsel %vm7181_vm10, %v859_v44, %v839_v3  ;;  %v864_v18 = vsel %vm7182_vm14, %v863_v58, %v843_v54  ;;  %v7193_v54 = vld [vmem:[#allocation28_spill] sm:$0xff]  ;;  %v7194_v44 = vld [vmem:[#allocation65_spill] sm:$0xff]  ;;  %v7195_v58 = vld [vmem:[#allocation66_spill] sm:$0xff] }
 0x43b   :  { %v7177_v55 = vsel %vm5089_vm15, 4294967295, %v7176_v55  ;;  %v7180_v28 = vsel %vm5096_vm9, 4294967295, %v7179_v28  ;;  %vm7183_vm15 = vnez %v6832_v61  ;;  %v772_v37 = vmin.f32 %v752_v32, %v764_v56  ;;  %v7190_v61 = vld [vmem:[#allocation49_spill] sm:$0xff]  ;;  %v7200_v36 = vld [vmem:[#allocation55_spill] sm:$0xff]  ;;  %v7213_v29 = vld [vmem:[#allocation140_spill] sm:$0xff] }
 0x43c   :  { %vm7184_vm3 = vmand %vm7158_vm7, %vm7183_vm15  ;;  %v876_v3 = vmul.f32 %v1798_v24, %v873_v52  ;;  %v1345_v59 = vmul.f32 %v7190_v61, %v6783_v13  ;;  %v7196_v24 = vmin.f32 %v7194_v44, %v7195_v58  ;;  %v671_v9 = vmul.f32 %v7199_v40, %v5032_v2  ;;  %v7202_v52 = vld [vmem:[#allocation129_spill] sm:$0xff] }
 0x43d   :  { %vm5113_vm1 = vmand %vm7184_vm3, %vm1265_vm6  ;;  %vm7197_vm6 = vnez %v7095_v12  ;;  %v677_v62 = vmul.f32 %v7200_v36, %v5032_v2  ;;  %v679_v56 = vmul.f32 %v7199_v40, %v5037_v16  ;;  %vm7206_vm10 = vnez %v7031_v4  ;;  %v7207_v12 = vld [vmem:[#allocation36_spill] sm:$0xff]  ;;  %v7241_v4 = vld [vmem:[#allocation139_spill] sm:$0xff] }
 0x43e   :  { %vm1267_vm14 = vmor %vm5061_vm13, %vm5113_vm1  ;;  %v5139_v33 = vsel %vm7197_vm6, %v7196_v24, %v7194_v44  ;;  %vm7201_vm13 = vmmov 1   ;;  %vm7203_vm1 = vnez %v7202_v52  ;;  %vm7208_vm6 = vnez %v7207_v12  ;;  %v7239_v52 = vld [vmem:[#allocation35_spill] sm:$0xff] }
 0x43f   :  { %7198 = vst [vmem:[#allocation76_spill] sm:$0xff] %v5139_v33  ;;  %vm5150_vm15 = vmxor %vm7203_vm1, %vm7201_vm13  ;;  %vm7215_vm1 = vnez %v7072_v11  ;;  %v7216_v46 = vmov 0  ;;  %v681_v61 = vmul.f32 %v7200_v36, %v5037_v16  ;;  %v880_v44 = vmax.f32 %v860_v48, %v876_v3  ;;  %v7224_v11 = vld [vmem:[#allocation33_spill] sm:$0xff] }
 0x440   :  { %vm7209_vm2 = vmand %vm7206_vm10, %vm7208_vm6  ;;  %v884_v58 = vmin.f32 %v864_v18, %v876_v3  ;;  %vm7220_vm6 = vnez %v7078_v21  ;;  %v561_v40 = vadd.f32 %v560_v31, %v7224_v11  ;;  %v7225_v3 = vld [vmem:[#allocation19_spill] sm:$0xff]  ;;  %v569_v0 = vadd.f32 %v568_v20, %v7224_v11  ;;  %v7233_v31 = vld [vmem:[#allocation58_spill] sm:$0xff] }
 0x441   :  { %vm5159_vm7 = vmor %vm1267_vm14, %vm7209_vm2  ;;  %vm7218_vm2 = vnez %v7050_v5  ;;  %v567_v36 = vadd.f32 %v566_v63, %v7225_v3  ;;  %v1376_v63 = vmul.f32 %v7233_v31, %v6783_v13  ;;  %v7237_v20 = vmov 0 }
 0x442   :  { %vm5170_vm12 = vmxor %vm7215_vm1, %vm7201_vm13  ;;  %vm1296_vm1 = vcmp.gt.f32.partialorder %v1295_v19, 0.0  ;;  %v7235_v19 = vld [vmem:[#allocation92_spill] sm:$0xff]  ;;  %v7240_v12 = vsub.f32 0.0, %v7239_v52  ;;  %v571_v11 = vadd.f32 %v570_v15, %v7225_v3  ;;  %v5232_v33 = vsel %vm4981_vm4, %v768_v17, %v748_v10  ;;  %v7251_v10 = vld [vmem:[#allocation143_spill] sm:$0xff] }
 0x443   :  { %v7217_v46 = vsel %vm5170_vm12, 4294967295, %v7216_v46  ;;  %vm7219_vm14 = vmand %vm7104_vm11, %vm7218_vm2  ;;  %v7236_v6 = vand.u32 2147483647, %v7235_v19  ;;  %v7248_v41 = vand.u32 2147483647, %v7241_v4  ;;  %v7253_v15 = vld [vmem:[#allocation15_spill] sm:$0xff] }
 0x444   :  { %vm5183_vm5 = vmor %vm7220_vm6, %vm7219_vm14  ;;  %vm7229_vm14 = vnez %v6885_v45  ;;  %v7242_v45 = vmov 0  ;;  %v672_v17 = vadd.f32 %v671_v9, %v7253_v15  ;;  %v680_v3 = vadd.f32 %v679_v56, %v7253_v15  ;;  %v7263_v56 = vld [vmem:[#allocation51_spill] sm:$0xff] }
 0x445   :  { %vm7226_vm11 = vmor %vm7173_vm0, %vm4894_vm8  ;;  %vm5218_vm8 = vcmp.le.f32.partialorder %v7236_v6, %v7234_v43  ;;  %vm5225_vm0 = vcmp.lt.f32.partialorder %v7241_v4, %v7240_v12  ;;  %v7245_v6 = vsub.f32 0.0, %v7234_v43  ;;  %v7246_v12 = vmov 0 }
 0x446   :  { %vm5200_vm2 = vmxor %vm7226_vm11, %vm7201_vm13  ;;  %v7238_v20 = vsel %vm5218_vm8, 4294967295, %v7237_v20  ;;  %v7243_v45 = vsel %vm5225_vm0, 4294967295, %v7242_v45  ;;  %vm1346_vm11 = vcmp.gt.f32.partialorder %v1345_v59, 0.0  ;;  %vm5252_vm4 = vcmp.le.f32.partialorder %v7248_v41, %v7239_v52  ;;  %v7264_v52 = vld [vmem:[#allocation61_spill] sm:$0xff] }
 0x447   :  { %vm7230_vm6 = vmand %vm7206_vm10, %vm7229_vm14  ;;  %vm7244_vm10 = vnez %v7129_v57  ;;  %vm5245_vm14 = vcmp.lt.f32.partialorder %v7235_v19, %v7245_v6  ;;  %v7249_v57 = vmov 0  ;;  %vm7256_vm0 = vnez %v7108_v14  ;;  %v7262_v14 = vld [vmem:[#allocation56_spill] sm:$0xff] }
 0x448   :  { %vm5209_vm12 = vmand %vm7230_vm6, %vm1296_vm1  ;;  %v5236_v31 = vsel %vm7244_vm10, %v772_v37, %v752_v32  ;;  %v7247_v12 = vsel %vm5245_vm14, 4294967295, %v7246_v12  ;;  %v7250_v57 = vsel %vm5252_vm4, 4294967295, %v7249_v57  ;;  %v7252_v32 = vld [vmem:[#allocation144_spill] sm:$0xff]  ;;  %v7254_v37 = vld [vmem:[#allocation14_spill] sm:$0xff]  ;;  %vm7255_vm1 = vnez %v7110_v23 }
 0x449   :  { %v678_v59 = vadd.f32 %v677_v62, %v7254_v37  ;;  %vm7257_vm9 = vmand %vm7255_vm1, %vm7256_vm0  ;;  %v682_v43 = vadd.f32 %v681_v61, %v7254_v37  ;;  %vm7258_vm4 = vnez %v7155_v22  ;;  %vm7259_vm6 = vnez %v7157_v53  ;;  %v7266_v22 = vld [vmem:[#allocation126_spill] sm:$0xff]  ;;  %v7268_v53 = vld [vmem:[#allocation63_spill] sm:$0xff] }
 0x44a   :  { %vm1347_vm14 = vmand %vm7257_vm9, %vm1346_vm11  ;;  %v5271_v19 = vsel %vm7258_vm4, %v880_v44, %v860_v48  ;;  %v5275_v9 = vsel %vm7259_vm6, %v884_v58, %v864_v18  ;;  %vm7260_vm10 = vnez %v6979_v25  ;;  %v1407_v62 = vmul.f32 %v7262_v14, %v6783_v13  ;;  %v7269_v23 = vld [vmem:[#allocation60_spill] sm:$0xff]  ;;  %v7359_v58 = vld [vmem:[#allocation25_spill] sm:$0xff] }
 0x44b   :  { %vm7261_vm3 = vmand %vm7255_vm1, %vm7260_vm10  ;;  %vm7267_vm11 = vnez %v7266_v22  ;;  %v782_v48 = vmul.f32 %v7268_v53, %v5232_v33  ;;  %v788_v18 = vmul.f32 %v7269_v23, %v5232_v33  ;;  %v790_v25 = vmul.f32 %v7268_v53, %v5236_v31  ;;  %v7340_v53 = vld [vmem:[#allocation76_spill] sm:$0xff] }
 0x44c   :  { %vm1348_vm8 = vmor %vm7261_vm3, %vm1347_vm14  ;;  %vm7270_vm3 = vnez %v7146_v30  ;;  %v7271_v61 = vmov 0  ;;  %v7273_v44 = vmov 0  ;;  %vm7279_vm4 = vnez %v7135_v1  ;;  %v7286_v1 = vld [vmem:[#allocation64_spill] sm:$0xff] }
 0x44d   :  { %vm5299_vm1 = vmxor %vm7270_vm3, %vm7201_vm13  ;;  %vm7278_vm3 = vnez %v7137_v50  ;;  %v5335_v60 = vmul.f32 %v571_v11, %v561_v40  ;;  %v792_v24 = vmul.f32 %v7269_v23, %v5236_v31  ;;  %v1438_v21 = vmul.f32 %v7286_v1, %v6783_v13  ;;  %v7290_v40 = vld [vmem:[#allocation88_spill] sm:$0xff] }
 0x44e   :  { %v7272_v61 = vsel %vm5299_vm1, 4294967295, %v7271_v61  ;;  %vm5306_vm14 = vmxor %vm5183_vm5, %vm7201_vm13  ;;  %vm1377_vm5 = vcmp.gt.f32.partialorder %v1376_v63, 0.0  ;;  %v7288_v63 = vld [vmem:[#allocation131_spill] sm:$0xff]  ;;  %v895_v4 = vmul.f32 %v7290_v40, %v5271_v19  ;;  %v7291_v11 = vld [vmem:[#allocation104_spill] sm:$0xff]  ;;  %v903_v50 = vmul.f32 %v7290_v40, %v5275_v9 }
 0x44f   :  { %v7274_v44 = vsel %vm5306_vm14, 4294967295, %v7273_v44  ;;  %vm7275_vm6 = vmor %vm5159_vm7, %vm5209_vm12  ;;  %vm7284_vm7 = vnez %v6976_v39  ;;  %v901_v6 = vmul.f32 %v7291_v11, %v5271_v19  ;;  %v905_v39 = vmul.f32 %v7291_v11, %v5275_v9  ;;  %v7329_v1 = vld [vmem:[#allocation112_spill] sm:$0xff]  ;;  %v7336_v11 = vld [vmem:[#allocation141_spill] sm:$0xff] }
 0x450   :  { %vm5316_vm10 = vmxor %vm7275_vm6, %vm7201_vm13  ;;  %v576_v41 = vmul.f32 %v569_v0, %v567_v36  ;;  %v686_v37 = vmul.f32 %v682_v43, %v672_v17  ;;  %v687_v14 = vmul.f32 %v680_v3, %v678_v59  ;;  %vm7296_vm12 = vnez %v7188_v35  ;;  %v7306_v36 = vld [vmem:[#allocation16_spill] sm:$0xff]  ;;  %v7316_v17 = vld [vmem:[#allocation23_spill] sm:$0xff] }
 0x451   :  { %vm7280_vm9 = vmand %vm7278_vm3, %vm7279_vm4  ;;  %v789_v0 = vadd.f32 %v788_v18, %v7306_v36  ;;  %vm1439_vm14 = vcmp.gt.f32.partialorder %v1438_v21, 0.0  ;;  %v904_v59 = vadd.f32 %v903_v50, %v7316_v17  ;;  %v7326_v18 = vld [vmem:[#allocation24_spill] sm:$0xff]  ;;  %v7339_v50 = vld [vmem:[#allocation75_spill] sm:$0xff]  ;;  %v7350_v43 = vmov 0 }
 0x452   :  { %vm5325_vm0 = vmor %vm1348_vm8, %vm7280_vm9  ;;  %v7372_v22 = vld [vmem:[#allocation20_spill] sm:$0xff] }
 0x453   :  { %vm7285_vm8 = vmand %vm7278_vm3, %vm7284_vm7  ;;  %vm1408_vm7 = vcmp.gt.f32.partialorder %v1407_v62, 0.0  ;;  %v7324_v62 = vld [vmem:[#allocation27_spill] sm:$0xff] }
 0x454   :  { %vm1378_vm9 = vmand %vm7285_vm8, %vm1377_vm5  ;;  %vm7293_vm8 = vcmp.gt.f32.partialorder %v5037_v16, %v5032_v2  ;;  %vm7301_vm5 = vcmp.gt.f32.partialorder %v4976_v8, %v4927_v27  ;;  %v7303_v2 = vmov 0  ;;  %v7305_v16 = vld [vmem:[#allocation46_spill] sm:$0xff]  ;;  %v793_v27 = vadd.f32 %v792_v24, %v7306_v36  ;;  %v7328_v24 = vld [vmem:[#allocation41_spill] sm:$0xff] }
 0x455   :  { %vm1379_vm3 = vmor %vm5325_vm0, %vm1378_vm9  ;;  %vm7297_vm0 = vnez %v7086_v42  ;;  %v783_v7 = vadd.f32 %v782_v48, %v7305_v16  ;;  %v791_v42 = vadd.f32 %v790_v25, %v7305_v16  ;;  %v7325_v48 = vld [vmem:[#allocation82_spill] sm:$0xff]  ;;  %v7327_v25 = vld [vmem:[#allocation148_spill] sm:$0xff]  ;;  %v1585_v21 = vmul.f32 %v7329_v1, %v7328_v24 }
 0x456   :  { %vm5369_vm1 = vmand %vm5150_vm15, %vm7293_vm8  ;;  %vm7302_vm15 = vnez %v7217_v46  ;;  %v7314_v46 = vld [vmem:[#allocation116_spill] sm:$0xff]  ;;  %v1447_v23 = vadd.f32 %v7325_v48, %v7324_v62  ;;  %v1449_v30 = vadd.f32 %v7327_v25, %v7326_v18  ;;  %v1589_v16 = vmul.f32 %v7340_v53, %v7328_v24  ;;  %v7342_v36 = vld [vmem:[#allocation74_spill] sm:$0xff] }
 0x457   :  { %vm7298_vm9 = vmand %vm7296_vm12, %vm7297_vm0  ;;  %vm7307_vm0 = vnez %v7061_v49  ;;  %v7312_v49 = vld [vmem:[#allocation68_spill] sm:$0xff]  ;;  %v7361_v48 = vmov 0  ;;  %v7380_v24 = vld [vmem:[#allocation18_spill] sm:$0xff] }
 0x458   :  { %vm5378_vm4 = vmor %vm1379_vm3, %vm7298_vm9  ;;  %v1488_v35 = vmul.f32 %v7312_v49, %v6783_v13  ;;  %v7343_v49 = vld [vmem:[#allocation111_spill] sm:$0xff] }
 0x459   :  { %vm5387_vm8 = vmand %vm7302_vm15, %vm7301_vm5  ;;  %vm7309_vm15 = vcmp.gt.f32.partialorder %v7193_v54, %v7192_v38  ;;  %v896_v38 = vadd.f32 %v895_v4, %v7316_v17  ;;  %v7317_v54 = vld [vmem:[#allocation17_spill] sm:$0xff]  ;;  %v1580_v17 = vadd.f32 %v7343_v49, %v7342_v36  ;;  %v1624_v49 = vpop.permute.xlu1 %1623 }
 0x45a   :  { %v7304_v2 = vsel %vm5387_vm8, 4294967295, %v7303_v2  ;;  %vm7308_vm9 = vmand %vm7296_vm12, %vm7307_vm0  ;;  %v902_v5 = vadd.f32 %v901_v6, %v7317_v54  ;;  %v906_v3 = vadd.f32 %v905_v39, %v7317_v54  ;;  %v7338_v6 = vld [vmem:[#allocation70_spill] sm:$0xff]  ;;  %v577_v54 = vsub.f32 %v5335_v60, %v576_v41 }
 0x45b   :  { %vm1409_vm6 = vmand %vm7308_vm9, %vm1408_vm7  ;;  %vm7315_vm7 = vnez %v7314_v46  ;;  %v1549_v39 = vadd.f32 %v7339_v50, %v7338_v6  ;;  %vm7345_vm12 = vnez %v7272_v61  ;;  %v798_v60 = vmul.f32 %v791_v42, %v789_v0  ;;  %v7393_v50 = vld [vmem:[#allocation57_spill] sm:$0xff] }
 0x45c   :  { %vm5409_vm8 = vmand %vm5200_vm2, %vm7309_vm15  ;;  %vm7318_vm2 = vnez %v7213_v29  ;;  %vm7323_vm15 = vnez %v7247_v12  ;;  %v1581_v18 = vmul.f32 %v1580_v17, %v6783_v13 }
 0x45d   :  { %vm1410_vm3 = vmor %vm5378_vm4, %vm1409_vm6  ;;  %vm7319_vm4 = vnez %v7066_v26  ;;  %v7330_v26 = vld [vmem:[#allocation45_spill] sm:$0xff] }
 0x45e   :  { %vm7320_vm6 = vmand %vm7318_vm2, %vm7319_vm4  ;;  %v1587_v40 = vmul.f32 %v7329_v1, %v7330_v26  ;;  %v1591_v29 = vmul.f32 %v7340_v53, %v7330_v26 }
 0x45f   :  { %vm5430_vm9 = vmor %vm1410_vm3, %vm7320_vm6  ;;  %vm7331_vm3 = vnez %v7090_v34  ;;  %v688_v34 = vsub.f32 %v686_v37, %v687_v14  ;;  %v7346_v37 = vmov 0  ;;  %v797_v14 = vmul.f32 %v793_v27, %v783_v7  ;;  %v7357_v7 = vld [vmem:[#allocation150_spill] sm:$0xff] }
 0x460   :  { %vm7332_vm4 = vmand %vm7318_vm2, %vm7331_vm3  ;;  %vm7352_vm2 = vcmp.gt.f32.partialorder %v7252_v32, %v7251_v10  ;;  %v1454_v27 = vmul.f32 %v1447_v23, %v7357_v7  ;;  %v7358_v10 = vld [vmem:[#allocation32_spill] sm:$0xff]  ;;  %v1588_v62 = vadd.f32 %v1587_v40, %v7359_v58  ;;  %v1592_v42 = vadd.f32 %v1591_v29, %v7359_v58  ;;  %v1611_v29 = vpop.permute.xlu0 %1610 }
 0x461   :  { %vm5451_vm6 = vmand %vm7332_vm4, %vm1439_vm14  ;;  %vm7344_vm4 = vcmp.gt.f32.partialorder %v5236_v31, %v5232_v33  ;;  %v7355_v31 = vld [vmem:[#allocation62_spill] sm:$0xff]  ;;  %v1586_v32 = vadd.f32 %v1585_v21, %v7358_v10  ;;  %v1590_v0 = vadd.f32 %v1589_v16, %v7358_v10 }
 0x462   :  { %vm1441_vm14 = vmor %vm5430_vm9, %vm5451_vm6  ;;  %vm7348_vm9 = vcmp.gt.f32.partialorder %v5275_v9, %v5271_v19  ;;  %vm7349_vm6 = vnez %v7274_v44  ;;  %v1519_v61 = vmul.f32 %v7355_v31, %v6783_v13  ;;  %v910_v19 = vmul.f32 %v906_v3, %v896_v38  ;;  %v7356_v44 = vld [vmem:[#allocation149_spill] sm:$0xff]  ;;  %v7375_v3 = vld [vmem:[#allocation147_spill] sm:$0xff] }
 0x463   :  { %vm5481_vm0 = vmand %vm7345_vm12, %vm7344_vm4  ;;  %v911_v9 = vmul.f32 %v904_v59, %v902_v5  ;;  %vm1489_vm4 = vcmp.gt.f32.partialorder %v1488_v35, 0.0  ;;  %v1453_v41 = vmul.f32 %v1449_v30, %v7356_v44  ;;  %v689_v35 = vsel %vm5369_vm1, %v688_v34, 0.0  ;;  %v7371_v38 = vld [vmem:[#allocation21_spill] sm:$0xff] }
 0x464   :  { %v7347_v37 = vsel %vm5481_vm0, 4294967295, %v7346_v37  ;;  %vm5490_vm3 = vmand %vm7349_vm6, %vm7348_vm9  ;;  %vm1520_vm0 = vcmp.gt.f32.partialorder %v1519_v61, 0.0  ;;  %v7373_v5 = vsub.f32 %v7371_v38, %v7372_v22  ;;  %v7374_v59 = vld [vmem:[#allocation101_spill] sm:$0xff]  ;;  %v1596_v30 = vmul.f32 %v1592_v42, %v1586_v32 }
 0x465   :  { %v7351_v43 = vsel %vm5490_vm3, 4294967295, %v7350_v43  ;;  %vm5499_vm5 = vmand %vm5316_vm10, %vm7352_vm2  ;;  %vm7360_vm10 = vcmp.gt.f32.partialorder %v7264_v52, %v7263_v56  ;;  %v1550_v56 = vmul.f32 %v1549_v39, %v6783_v13  ;;  %v799_v52 = vsub.f32 %v797_v14, %v798_v60 }
 0x466   :  { %vm1450_vm12 = vmxor %vm1441_vm14, %vm7201_vm13  ;;  %vm7363_vm14 = vnez %v7172_v47  ;;  %v912_v15 = vsub.f32 %v910_v19, %v911_v9  ;;  %v7376_v23 = vsub.f32 %v7374_v59, %v7375_v3  ;;  %v1455_v25 = vsub.f32 %v1453_v41, %v1454_v27  ;;  %v1638_v41 = vld [vmem:[#allocation2] sm:$0xff] }
 0x467   :  { %vm5513_vm2 = vmand %vm1450_vm12, %vm7360_vm10  ;;  %vm7365_vm12 = vnez %v7180_v28  ;;  %v1170_v28 = vsel %vm5409_vm8, %v7373_v5, 0.0  ;;  %v1597_v8 = vmul.f32 %v1590_v0, %v1588_v62  ;;  %v7396_v27 = vld [vmem:[#allocation13_spill] sm:$0xff] }
 0x468   :  { %v7362_v48 = vsel %vm5513_vm2, 4294967295, %v7361_v48  ;;  %vm7364_vm9 = vmand %vm7267_vm11, %vm7363_vm14  ;;  %vm7367_vm2 = vnez %v7304_v2  ;;  %vm7369_vm14 = vnez %v7167_v51  ;;  %v1313_v2 = vsel %vm5499_vm5, %v7376_v23, 0.0 }
 0x469   :  { %vm1490_vm6 = vmand %vm7364_vm9, %vm1489_vm4  ;;  %v578_v47 = vsel %vm7367_vm2, %v577_v54, 0.0  ;;  %vm7368_vm4 = vnez %v7288_v63  ;;  %vm1551_vm5 = vcmp.gt.f32.partialorder %v1550_v56, 0.0  ;;  %v237_v63 = vand.u32 2147483647, %v7380_v24 }
 0x46a   :  { %vm7366_vm10 = vmand %vm7267_vm11, %vm7365_vm12  ;;  %vm7377_vm11 = vnez %v7177_v55  ;;  %v690_v51 = vadd.f32 %v689_v35, %v578_v47  ;;  %v1314_v21 = vadd.f32 %v1313_v2, %v1170_v28 }
 0x46b   :  { %vm1491_vm13 = vmor %vm7366_vm10, %vm1490_vm6  ;;  %vm7383_vm10 = vnez %v7347_v37 }
 0x46c   :  { %vm7370_vm9 = vmand %vm7368_vm4, %vm7369_vm14  ;;  %v800_v13 = vsel %vm7383_vm10, %v799_v52, 0.0 }
 0x46d   :  { %vm1512_vm3 = vmor %vm1491_vm13, %vm7370_vm9  ;;  %v801_v12 = vadd.f32 %v800_v13, %v690_v51  ;;  %vm7386_vm9 = vnez %v7243_v45  ;;  %v7392_v45 = vmov 0  }
 0x46e   :  { %vm7378_vm13 = vmand %vm7368_vm4, %vm7377_vm11  ;;  %vm7384_vm4 = vnez %v7351_v43 }
 0x46f   :  { %vm1521_vm1 = vmand %vm7378_vm13, %vm1520_vm0  ;;  %vm7381_vm0 = vnez %v7238_v20  ;;  %v913_v55 = vsel %vm7384_vm4, %v912_v15, 0.0  ;;  %v1598_v20 = vsub.f32 %v1596_v30, %v1597_v8 }
 0x470   :  { %vm1522_vm2 = vmor %vm1512_vm3, %vm1521_vm1  ;;  %vm1582_vm1 = vcmp.gt.f32.partialorder %v1581_v18, 0.0  ;;  %v914_v26 = vadd.f32 %v913_v55, %v801_v12 }
 0x471   :  { %vm7379_vm8 = vmand %vm7315_vm7, %vm7323_vm15  ;;  %vm7385_vm15 = vnez %v7336_v11  ;;  %v7395_v11 = vld [vmem:[#allocation43_spill] sm:$0xff] }
 0x472   :  { %vm1543_vm6 = vmor %vm1522_vm2, %vm7379_vm8  ;;  %vm1607_vm2 = vcmp.gt.f32.partialorder %v237_v63, 0.0  ;;  %vm7388_vm8 = vnez %v7362_v48  ;;  %v1601_v39 = vmul.f32 %v914_v26, %v7393_v50 }
 0x473   :  { %vm7382_vm3 = vmand %vm7315_vm7, %vm7381_vm0  ;;  %vm1594_vm7 = vcmp.gt.f32.partialorder %v7340_v53, %v7329_v1  ;;  %v1456_v46 = vsel %vm7388_vm8, %v1455_v25, 0.0  ;;  %v1613_v4 = vsel %vm1607_vm2, 1, %v7392_v45  ;;  %v7394_v53 = vld [vmem:[#allocation12_spill] sm:$0xff] }
 0x474   :  { %vm1552_vm12 = vmand %vm7382_vm3, %vm1551_vm5  ;;  %v1457_v40 = vadd.f32 %v1456_v46, %v1314_v21  ;;  %v1617_v16 = vrot.slane %v1613_v4, %v7394_v53  ;;  %v1629_v36 = vrot.slane %v237_v63, %v7394_v53 }
 0x475   :  { %vm1553_vm14 = vmor %vm1543_vm6, %vm1552_vm12  ;;  %vm7389_vm6 = vnez %v7250_v57  ;;  %vm7391_vm12 = vmmov 1  }
 0x476   :  { %vm7387_vm11 = vmand %vm7385_vm15, %vm7386_vm9  ;;  %v1630_v37 = vadd.f32 %v1629_v36, %v1624_v49 }
 0x477   :  { %vm1574_vm13 = vmor %vm1553_vm14, %vm7387_vm11  ;;  %vm1612_vm14 = vcmp.eq.s32.totalorder %v1611_v29, 1 }
 0x478   :  { %vm7390_vm5 = vmand %vm7385_vm15, %vm7389_vm6  ;;  %vm1618_vm15 = vcmp.eq.s32.totalorder %v1617_v16, 1 }
 0x479   :  { %vm1583_vm0 = vmand %vm7390_vm5, %vm1582_vm1 }
 0x47a   :  { %vm1584_vm3 = vmor %vm1574_vm13, %vm1583_vm0  ;;  %vm7397_vm13 = vnez %v7396_v27 }
 0x47b   :  { %vm1593_vm10 = vmxor %vm1584_vm3, %vm7391_vm12 }
 0x47c   :  { %vm1595_vm4 = vmand %vm1593_vm10, %vm1594_vm7 }
 0x47d   :  { %v1599_v6 = vsel %vm1595_vm4, %v1598_v20, 0.0  ;;  %vm1619_vm9 = vmand %vm1612_vm14, %vm1618_vm15 }
 0x47e   :  { %v1600_v1 = vadd.f32 %v1599_v6, %v1457_v40 }
 0x480   :  { %v1602_v34 = vmul.f32 %v1600_v1, %v7395_v11 }
 0x482   :  { %v1603_v57 = vadd.f32 %v1602_v34, %v1601_v39 }
 0x484   :  { %v1604_v17 = vmul.f32 0.5, %v1603_v57 }
 0x486   :  { %v1605_v54 = vmax.f32 %v1604_v17, 0.0 }
 0x488   :  { %v1620_v14 = vsel %vm1619_vm9, %v1605_v54, 0.0 }
 0x489   :  { %v1631_v43 = vsub.f32 %v1630_v37, %v1620_v14 }
 0x48b   :  { %vm1632_vm11 = vcmp.eq.f32.partialorder %v1631_v43, 0.0 }
 0x48c   :  { %v1633_v33 = vsel %vm1632_vm11, 1.0, %v1631_v43 }
 0x48d   :  { %1799 = vrcp.f32 %v1633_v33 }
 0x49a   :  { %v1800_v31 = vpop.eup %1799 }
 0x49b   :  { %v1635_v61 = vmul.f32 %v1800_v31, %v1620_v14 }
 0x49d   :  { %v1636_v60 = vsel %vm1632_vm11, 1.0, %v1635_v61 }
 0x49e   :  { %v1637_v19 = vmax.f32 %v1636_v60, 1e-06 }
 0x4a0   :  { %1801 = vlog2.f32 %v1637_v19 }
 0x4ad   :  { %v1802_v9 = vpop.eup %1801 }
 0x4ae   :  { %v1640_v44 = vmul.f32 0.6931472, %v1802_v9 }
 0x4b0   :  { %v1641_v7 = vsub.f32 0.0, %v1640_v44 }
 0x4b2   :  { %v1642_v10 = vsel %vm7397_vm13, %v1641_v7, 0.0 }
 0x4b3   :  { %v1643_v32 = vadd.f32 %v1642_v10, %v1638_v41 }
 0x4b5   :  { %1644 = vst [vmem:[#allocation2] sm:$0xff] %v1643_v32 }
 0x4b6 PF:  { %s1895_s28 = smov [#allocation8]   ;;  %vm1656_vm1 = vcmask 0  }
 0x4b7   :  { %s1667_s29 = sshll.u32 %s1895_s28, 4  ;;  %s1668_s29 = int_to_ptr.vmem [resolvable:$true] %s1667_s29 }
 0x4b8   :  { %s1843_s3 = scalar_lea.vmem %s1668_s29, 16  ;;  %s1847_s4 = scalar_lea.vmem %s1668_s29, 32 }
 0x4b9   :  { %p1844_p11 = scmp.ne.s32.totalorder %s1668_s29, %s1843_s3  ;;  %p1848_p12 = scmp.lt.s32.totalorder %s1668_s29, %s1668_s29 }
 0x4ba   :  { %p1849_p13 = scmp.lt.s32.totalorder %s1847_s4, %s1843_s3 }
 0x4bc   :  { %v1645_v58 = vld [vmem:[#allocation2] sm:$0xff]  ;;  %p1850_p0 = por %p1849_p13, %p1848_p12 }
 0x4bd   :  { %1646 = vadd.xlane.f32.xlu0 %v1645_v58 }
 0x4be   :  { %p1851_p1 = pnand %p1850_p0, %p1844_p11 }
 0x546   :  { %v1647_v62 = vpop.xlane.xlu0 %1646 }
 0x547   :  { %v1648_v48 = vrot.slane %v1647_v62, 4 }
 0x549   :  { %v1649_v0 = vadd.f32 %v1648_v48, %v1647_v62 }
 0x54b   :  { %v1650_v42 = vrot.slane %v1649_v0, 2 }
 0x54d   :  { %v1651_v35 = vadd.f32 %v1650_v42, %v1649_v0 }
 0x54f   :  { %v1652_v56 = vrot.slane %v1651_v35, 1 }
 0x551   :  { %v1653_v47 = vadd.f32 %v1652_v56, %v1651_v35 }
 0x553   :  { %1679 = vpush %v1653_v47 }
 0x584   :  { %s1680_s30 = spop %1679 }
 0x585   :  { %v1655_v52 = vstv %s1680_s30 }
 0x586   :  { %1657 = vst.msk [vmem:[#allocation8] sm:$0x1] %vm1656_vm1, %v1655_v52 }
 0x587   :  { %1854 = shalt.err (!%p1851_p1)
}
 0x588   :  { %1670 = dma.vmem_to_hbm [thread:$0]  %s1668_s29, 16, %s5597_s2, [#allocation5]  }
 0x589   :  { %1867 = dma.done.wait [#allocation5], 16  }
 0x58a   :  { %1868 = vsyncadd [#allocation5], 4294967280 }
 0x58b   :  { %1674 = vsyncpa [#allocation4], 1 }
 0x58c   :  { %1675 = vsyncpa [#allocation7], 1 }
 0x58d   :  { %1676 = vsyncpa [#allocation5], 1 }

</bundles_post_ra>
